<compile_context>
chip_gen: v7x
topology: tpu7x:2x2x1
jax: 0.10.0
libtpu: 0.0.40
codegen_flags: <defaults>
</compile_context>

<pallas_src>
import jax
import jax.numpy as jnp
import numpy as np
from jax.experimental import pallas as pl
from jax.experimental.pallas import tpu as pltpu

HIGHEST = jax.lax.Precision.HIGHEST


def _round_up(x, m):
    return (x + m - 1) // m * m


# ----------------------------------------------------------------------------
# Pallas kernels
# ----------------------------------------------------------------------------
def _conv_bias_relu_pool_kernel(x_ref, w_ref, b_ref, o_ref):
    """Fused conv (as matmul) + bias + ReLU + 2x2 max-pool.

    x_ref : (4, K, TM)  im2col patches, one slab per 2x2 pool phase,
                        pooled pixels (b, yy, xx) lane-dense on the last axis.
    w_ref : (O, K)      conv weights, (c, kh, kw) flattened on K.
    b_ref : (O, 1)
    o_ref : (O, TM)     pooled, ReLU'd output (lane-dense).
    """
    w = w_ref[...]
    m = None
    for p in range(4):  # static unroll over the 4 pool-window phases
        acc = jnp.dot(w, x_ref[p], preferred_element_type=jnp.float32,
                      precision=HIGHEST)
        m = acc if m is None else jnp.maximum(m, acc)
    # relu(max_p(conv_p) + b) == max_p(relu(conv_p + b)) since b is phase-const.
    o_ref[...] = jnp.maximum(m + b_ref[...], 0.0).astype(o_ref.dtype)


def conv_bias_relu_pool(patches, w_mat, b, tm):
    """patches: (4, K, Mp_pad), w_mat: (O, K), b: (O,) -> (O, Mp_pad)."""
    _, K, Mp_pad = patches.shape
    O = w_mat.shape[0]
    assert Mp_pad % tm == 0 and tm % 128 == 0
    return pl.pallas_call(
        _conv_bias_relu_pool_kernel,
        out_shape=jax.ShapeDtypeStruct((O, Mp_pad), jnp.float32),
        grid=(Mp_pad // tm,),
        in_specs=[
            pl.BlockSpec((4, K, tm), lambda m: (0, 0, m)),
            pl.BlockSpec((O, K), lambda m: (0, 0)),      # weights VMEM-resident
            pl.BlockSpec((O, 1), lambda m: (0, 0)),
        ],
        out_specs=pl.BlockSpec((O, tm), lambda m: (0, m)),
        compiler_params=pltpu.CompilerParams(
            dimension_semantics=("parallel",)),
    )(patches, w_mat, b.reshape(O, 1))


def _linear_t_kernel(x_ref, w_ref, b_ref, o_ref):
    # w: (N, K), x: (K, TB), b: (N, 1) -> o: (N, TB)   (batch lane-dense)
    acc = jnp.dot(w_ref[...], x_ref[...], preferred_element_type=jnp.float32,
                  precision=HIGHEST)
    o_ref[...] = (acc + b_ref[...]).astype(o_ref.dtype)


def linear_t(feats_t, w, b, tb):
    """feats_t: (K, B_pad), w: (N, K), b: (N,) -> (N, B_pad)."""
    K, B_pad = feats_t.shape
    N = w.shape[0]
    assert B_pad % tb == 0 and tb % 128 == 0
    return pl.pallas_call(
        _linear_t_kernel,
        out_shape=jax.ShapeDtypeStruct((N, B_pad), jnp.float32),
        grid=(B_pad // tb,),
        in_specs=[
            pl.BlockSpec((K, tb), lambda m: (0, m)),
            pl.BlockSpec((N, K), lambda m: (0, 0)),
            pl.BlockSpec((N, 1), lambda m: (0, 0)),
        ],
        out_specs=pl.BlockSpec((N, tb), lambda m: (0, m)),
        compiler_params=pltpu.CompilerParams(
            dimension_semantics=("parallel",)),
    )(feats_t, w, b.reshape(N, 1))


# ----------------------------------------------------------------------------
# Glue: pool-phase-major im2col (pure data movement, XLA)
# ----------------------------------------------------------------------------
def _pool_phase_patches(act, kh, kw):
    """act: (B, C, H, W) -> patches (4, K_pad, Mp_pad) for the fused kernel.

    phase = dy*2 + dx (the 2x2 pool window element),
    K     = c*kh*kw + i*kw + j  (zero-padded to a sublane multiple),
    M     = b*Hp*Wp + yy*Wp + xx (zero-padded to a multiple of the lane tile).
    """
    B, C, H, W = act.shape
    Ho, Wo = H - kh + 1, W - kw + 1
    assert Ho % 2 == 0 and Wo % 2 == 0
    Hp, Wp = Ho // 2, Wo // 2
    cols = []
    for i in range(kh):
        for j in range(kw):
            cols.append(act[:, :, i:i + Ho, j:j + Wo])      # (B, C, Ho, Wo)
    p = jnp.stack(cols, axis=2)                             # (B, C, KK, Ho, Wo)
    p = p.reshape(B, C, kh * kw, Hp, 2, Wp, 2)
    p = p.transpose(4, 6, 1, 2, 0, 3, 5)                    # (dy,dx,C,KK,B,yy,xx)
    K = C * kh * kw
    Mp = B * Hp * Wp
    p = p.reshape(4, K, Mp)

    K_pad = _round_up(K, 8)
    tm = min(512, _round_up(Mp, 128))
    Mp_pad = _round_up(Mp, tm)
    p = jnp.pad(p, ((0, 0), (0, K_pad - K), (0, Mp_pad - Mp)))
    return p, Hp, Wp, Mp, K_pad, tm


# ----------------------------------------------------------------------------
# Full forward pass (CNN_new.forward)
# ----------------------------------------------------------------------------
def cnn_new_forward(x, params):
    w1, b1, w2, b2, wf, bf = params
    B = x.shape[0]

    # x.expand(-1, 3, -1, -1): for a 1-channel input the 3 broadcast channels
    # are identical, so conv1 over them == conv1 of the single channel with the
    # channel-summed weights (avoids 3x im2col traffic).
    if x.shape[1] == 1:
        w1_eff = jnp.sum(w1, axis=1, keepdims=True)          # (16, 1, 5, 5)
    else:
        w1_eff = w1                                          # expand is a no-op

    def conv_block(act, w, b):
        O, C, kh, kw = w.shape
        patches, Hp, Wp, Mp, K_pad, tm = _pool_phase_patches(act, kh, kw)
        w_mat = w.reshape(O, C * kh * kw)
        w_mat = jnp.pad(w_mat, ((0, 0), (0, K_pad - C * kh * kw)))
        out = conv_bias_relu_pool(patches, w_mat, b, tm)     # (O, Mp_pad)
        out = out[:, :Mp].reshape(O, B, Hp, Wp).transpose(1, 0, 2, 3)
        return out                                           # (B, O, Hp, Wp)

    h = conv_block(x, w1_eff, b1)        # (B, 16, 12, 12)
    h = conv_block(h, w2, b2)            # (B, 32, 4, 4)
    feats = h.reshape(B, -1)             # (B, 512)  (C,H,W order == torch .view)

    # Classifier with batch lane-dense: (10, B_pad) = wf @ feats^T + b.
    feats_t = feats.T                    # (512, B)
    tb = min(512, _round_up(B, 128))
    B_pad = _round_up(B, tb)
    feats_t = jnp.pad(feats_t, ((0, 0), (0, B_pad - B)))
    logits_t = linear_t(feats_t, wf, bf, tb)                 # (10, B_pad)
    return logits_t[:, :B].T                                 # (B, 10)


# ----------------------------------------------------------------------------
# Pure-JAX reference for validation
# ----------------------------------------------------------------------------
def reference_forward(x, params):
    w1, b1, w2, b2, wf, bf = params
    B = x.shape[0]
    x = jnp.broadcast_to(x, (B, 3, x.shape[2], x.shape[3]))

    def conv(y, w, b):
        y = jax.lax.conv_general_dilated(
            y, w, (1, 1), "VALID",
            dimension_numbers=("NCHW", "OIHW", "NCHW"), precision=HIGHEST)
        return jnp.maximum(y + b[None, :, None, None], 0.0)

    def pool(y):
        return jax.lax.reduce_window(
            y, -jnp.inf, jax.lax.max, (1, 1, 2, 2), (1, 1, 2, 2), "VALID")

    x = pool(conv(x, w1, b1))
    x = pool(conv(x, w2, b2))
    x = x.reshape(B, -1)
    return jnp.dot(x, wf.T, precision=HIGHEST) + bf


# ----------------------------------------------------------------------------
if __name__ == "__main__":
    key = jax.random.PRNGKey(0)
    k1, k2, k3, k4, k5, k6, kx = jax.random.split(key, 7)

    # Parameter shapes from CNN_new.__init__.
    w1 = jax.random.normal(k1, (16, 3, 5, 5), jnp.float32) * 0.1
    b1 = jax.random.normal(k2, (16,), jnp.float32) * 0.1
    w2 = jax.random.normal(k3, (32, 16, 5, 5), jnp.float32) * 0.05
    b2 = jax.random.normal(k4, (32,), jnp.float32) * 0.05
    wf = jax.random.normal(k5, (10, 32 * 4 * 4), jnp.float32) * 0.05
    bf = jax.random.normal(k6, (10,), jnp.float32) * 0.05
    params = (w1, b1, w2, b2, wf, bf)

    # Small batch; 28x28 spatial is implied by the 32*4*4 classifier input.
    x = jax.random.normal(kx, (2, 1, 28, 28), jnp.float32)

    out = jax.block_until_ready(jax.jit(cnn_new_forward)(x, params))
    assert out.shape == (2, 10), out.shape

    ref = jax.block_until_ready(jax.jit(reference_forward)(x, params))
    np.testing.assert_allclose(np.asarray(out), np.asarray(ref),
                               rtol=5e-4, atol=5e-4)

    print("KERNEL_OK")
</pallas_src>

<mosaic_0001>
module attributes {stable_mosaic.version = 11 : i64} {
  func.func @_conv_bias_relu_pool_kernel(%arg0: i32, %arg1: memref<4x32x384xf32, #tpu.memory_space<vmem>>, %arg2: memref<16x32xf32, #tpu.memory_space<vmem>>, %arg3: memref<16x1xf32, #tpu.memory_space<vmem>>, %arg4: memref<16x384xf32, #tpu.memory_space<vmem>>) attributes {dimension_semantics = [#tpu.dimension_semantics<parallel>], iteration_bounds = array<i64: 1>, scalar_prefetch = 0 : i64, scratch_operands = 0 : i64, tpu.core_type = #tpu.core_type<tc>, window_params = [{transform_indices = @transform_0, window_bounds = array<i64: 4, 32, 384>}, {pipeline_mode = #tpu.pipeline_mode<synchronous>, transform_indices = @transform_1, window_bounds = array<i64: 16, 32>}, {pipeline_mode = #tpu.pipeline_mode<synchronous>, transform_indices = @transform_2, window_bounds = array<i64: 16, 1>}, {transform_indices = @transform_3, window_bounds = array<i64: 16, 384>}]} {
    %c0 = arith.constant 0 : index
    %c0_0 = arith.constant 0 : index
    %0 = vector.load %arg2[%c0, %c0_0] : memref<16x32xf32, #tpu.memory_space<vmem>>, vector<16x32xf32>
    %c0_1 = arith.constant 0 : index
    %c0_2 = arith.constant 0 : index
    %c0_3 = arith.constant 0 : index
    %1 = vector.load %arg1[%c0_1, %c0_2, %c0_3] : memref<4x32x384xf32, #tpu.memory_space<vmem>>, vector<1x32x384xf32>
    %2 = vector.shape_cast %1 : vector<1x32x384xf32> to vector<32x384xf32>
    %cst = arith.constant dense<0.000000e+00> : vector<16x384xf32>
    %3 = tpu.matmul %0, %2, %cst {dimension_numbers = #tpu.dot_dimension_numbers<[1], [0], [0], [1], [0, 0, 1, 1], [], []>, precision = #tpu.contract_precision<fp32>} : vector<16x32xf32>, vector<32x384xf32>, vector<16x384xf32> -> vector<16x384xf32>
    %c1 = arith.constant 1 : index
    %c0_4 = arith.constant 0 : index
    %c0_5 = arith.constant 0 : index
    %4 = vector.load %arg1[%c1, %c0_4, %c0_5] : memref<4x32x384xf32, #tpu.memory_space<vmem>>, vector<1x32x384xf32>
    %5 = vector.shape_cast %4 : vector<1x32x384xf32> to vector<32x384xf32>
    %cst_6 = arith.constant dense<0.000000e+00> : vector<16x384xf32>
    %6 = tpu.matmul %0, %5, %cst_6 {dimension_numbers = #tpu.dot_dimension_numbers<[1], [0], [0], [1], [0, 0, 1, 1], [], []>, precision = #tpu.contract_precision<fp32>} : vector<16x32xf32>, vector<32x384xf32>, vector<16x384xf32> -> vector<16x384xf32>
    %7 = arith.maximumf %3, %6 : vector<16x384xf32>
    %c2 = arith.constant 2 : index
    %c0_7 = arith.constant 0 : index
    %c0_8 = arith.constant 0 : index
    %8 = vector.load %arg1[%c2, %c0_7, %c0_8] : memref<4x32x384xf32, #tpu.memory_space<vmem>>, vector<1x32x384xf32>
    %9 = vector.shape_cast %8 : vector<1x32x384xf32> to vector<32x384xf32>
    %cst_9 = arith.constant dense<0.000000e+00> : vector<16x384xf32>
    %10 = tpu.matmul %0, %9, %cst_9 {dimension_numbers = #tpu.dot_dimension_numbers<[1], [0], [0], [1], [0, 0, 1, 1], [], []>, precision = #tpu.contract_precision<fp32>} : vector<16x32xf32>, vector<32x384xf32>, vector<16x384xf32> -> vector<16x384xf32>
    %11 = arith.maximumf %7, %10 : vector<16x384xf32>
    %c3 = arith.constant 3 : index
    %c0_10 = arith.constant 0 : index
    %c0_11 = arith.constant 0 : index
    %12 = vector.load %arg1[%c3, %c0_10, %c0_11] : memref<4x32x384xf32, #tpu.memory_space<vmem>>, vector<1x32x384xf32>
    %13 = vector.shape_cast %12 : vector<1x32x384xf32> to vector<32x384xf32>
    %cst_12 = arith.constant dense<0.000000e+00> : vector<16x384xf32>
    %14 = tpu.matmul %0, %13, %cst_12 {dimension_numbers = #tpu.dot_dimension_numbers<[1], [0], [0], [1], [0, 0, 1, 1], [], []>, precision = #tpu.contract_precision<fp32>} : vector<16x32xf32>, vector<32x384xf32>, vector<16x384xf32> -> vector<16x384xf32>
    %15 = arith.maximumf %11, %14 : vector<16x384xf32>
    %c0_13 = arith.constant 0 : index
    %c0_14 = arith.constant 0 : index
    %16 = vector.load %arg3[%c0_13, %c0_14] : memref<16x1xf32, #tpu.memory_space<vmem>>, vector<16x1xf32>
    %17 = vector.broadcast %16 : vector<16x1xf32> to vector<16x384xf32>
    %18 = arith.addf %15, %17 : vector<16x384xf32>
    %cst_15 = arith.constant 0.000000e+00 : f32
    %19 = vector.broadcast %cst_15 : f32 to vector<16x384xf32>
    %20 = arith.maximumf %18, %19 : vector<16x384xf32>
    %c0_16 = arith.constant 0 : index
    %c0_17 = arith.constant 0 : index
    %21 = vector.load %arg4[%c0_16, %c0_17] : memref<16x384xf32, #tpu.memory_space<vmem>>, vector<16x384xf32>
    tpu.vector_store %arg4[%c0_16, %c0_17], %20 {strides = array<i32>} : memref<16x384xf32, #tpu.memory_space<vmem>>, vector<16x384xf32>,
    return
  }
  func.func @transform_0(%arg0: i32) -> (i32, i32, i32) {
    %c0_i32 = arith.constant 0 : i32
    %c0_i32_0 = arith.constant 0 : i32
    %c0_i32_1 = arith.constant 0 : i32
    return %c0_i32, %c0_i32_0, %arg0 : i32, i32, i32
  }
  func.func @transform_1(%arg0: i32) -> (i32, i32) {
    %c0_i32 = arith.constant 0 : i32
    %c0_i32_0 = arith.constant 0 : i32
    %c0_i32_1 = arith.constant 0 : i32
    return %c0_i32, %c0_i32_0 : i32, i32
  }
  func.func @transform_2(%arg0: i32) -> (i32, i32) {
    %c0_i32 = arith.constant 0 : i32
    %c0_i32_0 = arith.constant 0 : i32
    %c0_i32_1 = arith.constant 0 : i32
    return %c0_i32, %c0_i32_0 : i32, i32
  }
  func.func @transform_3(%arg0: i32) -> (i32, i32) {
    %c0_i32 = arith.constant 0 : i32
    %c0_i32_0 = arith.constant 0 : i32
    return %c0_i32, %arg0 : i32, i32
  }
}

module attributes {stable_mosaic.version = 11 : i64} {
  func.func @_conv_bias_relu_pool_kernel(%arg0: i32, %arg1: memref<4x400x128xf32, #tpu.memory_space<vmem>>, %arg2: memref<32x400xf32, #tpu.memory_space<vmem>>, %arg3: memref<32x1xf32, #tpu.memory_space<vmem>>, %arg4: memref<32x128xf32, #tpu.memory_space<vmem>>) attributes {dimension_semantics = [#tpu.dimension_semantics<parallel>], iteration_bounds = array<i64: 1>, scalar_prefetch = 0 : i64, scratch_operands = 0 : i64, tpu.core_type = #tpu.core_type<tc>, window_params = [{transform_indices = @transform_0, window_bounds = array<i64: 4, 400, 128>}, {pipeline_mode = #tpu.pipeline_mode<synchronous>, transform_indices = @transform_1, window_bounds = array<i64: 32, 400>}, {pipeline_mode = #tpu.pipeline_mode<synchronous>, transform_indices = @transform_2, window_bounds = array<i64: 32, 1>}, {transform_indices = @transform_3, window_bounds = array<i64: 32, 128>}]} {
    %c0 = arith.constant 0 : index
    %c0_0 = arith.constant 0 : index
    %0 = vector.load %arg2[%c0, %c0_0] : memref<32x400xf32, #tpu.memory_space<vmem>>, vector<32x400xf32>
    %c0_1 = arith.constant 0 : index
    %c0_2 = arith.constant 0 : index
    %c0_3 = arith.constant 0 : index
    %1 = vector.load %arg1[%c0_1, %c0_2, %c0_3] : memref<4x400x128xf32, #tpu.memory_space<vmem>>, vector<1x400x128xf32>
    %2 = vector.shape_cast %1 : vector<1x400x128xf32> to vector<400x128xf32>
    %cst = arith.constant dense<0.000000e+00> : vector<32x128xf32>
    %3 = tpu.matmul %0, %2, %cst {dimension_numbers = #tpu.dot_dimension_numbers<[1], [0], [0], [1], [0, 0, 1, 1], [], []>, precision = #tpu.contract_precision<fp32>} : vector<32x400xf32>, vector<400x128xf32>, vector<32x128xf32> -> vector<32x128xf32>
    %c1 = arith.constant 1 : index
    %c0_4 = arith.constant 0 : index
    %c0_5 = arith.constant 0 : index
    %4 = vector.load %arg1[%c1, %c0_4, %c0_5] : memref<4x400x128xf32, #tpu.memory_space<vmem>>, vector<1x400x128xf32>
    %5 = vector.shape_cast %4 : vector<1x400x128xf32> to vector<400x128xf32>
    %cst_6 = arith.constant dense<0.000000e+00> : vector<32x128xf32>
    %6 = tpu.matmul %0, %5, %cst_6 {dimension_numbers = #tpu.dot_dimension_numbers<[1], [0], [0], [1], [0, 0, 1, 1], [], []>, precision = #tpu.contract_precision<fp32>} : vector<32x400xf32>, vector<400x128xf32>, vector<32x128xf32> -> vector<32x128xf32>
    %7 = arith.maximumf %3, %6 : vector<32x128xf32>
    %c2 = arith.constant 2 : index
    %c0_7 = arith.constant 0 : index
    %c0_8 = arith.constant 0 : index
    %8 = vector.load %arg1[%c2, %c0_7, %c0_8] : memref<4x400x128xf32, #tpu.memory_space<vmem>>, vector<1x400x128xf32>
    %9 = vector.shape_cast %8 : vector<1x400x128xf32> to vector<400x128xf32>
    %cst_9 = arith.constant dense<0.000000e+00> : vector<32x128xf32>
    %10 = tpu.matmul %0, %9, %cst_9 {dimension_numbers = #tpu.dot_dimension_numbers<[1], [0], [0], [1], [0, 0, 1, 1], [], []>, precision = #tpu.contract_precision<fp32>} : vector<32x400xf32>, vector<400x128xf32>, vector<32x128xf32> -> vector<32x128xf32>
    %11 = arith.maximumf %7, %10 : vector<32x128xf32>
    %c3 = arith.constant 3 : index
    %c0_10 = arith.constant 0 : index
    %c0_11 = arith.constant 0 : index
    %12 = vector.load %arg1[%c3, %c0_10, %c0_11] : memref<4x400x128xf32, #tpu.memory_space<vmem>>, vector<1x400x128xf32>
    %13 = vector.shape_cast %12 : vector<1x400x128xf32> to vector<400x128xf32>
    %cst_12 = arith.constant dense<0.000000e+00> : vector<32x128xf32>
    %14 = tpu.matmul %0, %13, %cst_12 {dimension_numbers = #tpu.dot_dimension_numbers<[1], [0], [0], [1], [0, 0, 1, 1], [], []>, precision = #tpu.contract_precision<fp32>} : vector<32x400xf32>, vector<400x128xf32>, vector<32x128xf32> -> vector<32x128xf32>
    %15 = arith.maximumf %11, %14 : vector<32x128xf32>
    %c0_13 = arith.constant 0 : index
    %c0_14 = arith.constant 0 : index
    %16 = vector.load %arg3[%c0_13, %c0_14] : memref<32x1xf32, #tpu.memory_space<vmem>>, vector<32x1xf32>
    %17 = vector.broadcast %16 : vector<32x1xf32> to vector<32x128xf32>
    %18 = arith.addf %15, %17 : vector<32x128xf32>
    %cst_15 = arith.constant 0.000000e+00 : f32
    %19 = vector.broadcast %cst_15 : f32 to vector<32x128xf32>
    %20 = arith.maximumf %18, %19 : vector<32x128xf32>
    %c0_16 = arith.constant 0 : index
    %c0_17 = arith.constant 0 : index
    %21 = vector.load %arg4[%c0_16, %c0_17] : memref<32x128xf32, #tpu.memory_space<vmem>>, vector<32x128xf32>
    tpu.vector_store %arg4[%c0_16, %c0_17], %20 {strides = array<i32>} : memref<32x128xf32, #tpu.memory_space<vmem>>, vector<32x128xf32>,
    return
  }
  func.func @transform_0(%arg0: i32) -> (i32, i32, i32) {
    %c0_i32 = arith.constant 0 : i32
    %c0_i32_0 = arith.constant 0 : i32
    %c0_i32_1 = arith.constant 0 : i32
    return %c0_i32, %c0_i32_0, %arg0 : i32, i32, i32
  }
  func.func @transform_1(%arg0: i32) -> (i32, i32) {
    %c0_i32 = arith.constant 0 : i32
    %c0_i32_0 = arith.constant 0 : i32
    %c0_i32_1 = arith.constant 0 : i32
    return %c0_i32, %c0_i32_0 : i32, i32
  }
  func.func @transform_2(%arg0: i32) -> (i32, i32) {
    %c0_i32 = arith.constant 0 : i32
    %c0_i32_0 = arith.constant 0 : i32
    %c0_i32_1 = arith.constant 0 : i32
    return %c0_i32, %c0_i32_0 : i32, i32
  }
  func.func @transform_3(%arg0: i32) -> (i32, i32) {
    %c0_i32 = arith.constant 0 : i32
    %c0_i32_0 = arith.constant 0 : i32
    return %c0_i32, %arg0 : i32, i32
  }
}

module attributes {stable_mosaic.version = 11 : i64} {
  func.func @_linear_t_kernel(%arg0: i32, %arg1: memref<512x128xf32, #tpu.memory_space<vmem>>, %arg2: memref<10x512xf32, #tpu.memory_space<vmem>>, %arg3: memref<10x1xf32, #tpu.memory_space<vmem>>, %arg4: memref<10x128xf32, #tpu.memory_space<vmem>>) attributes {dimension_semantics = [#tpu.dimension_semantics<parallel>], iteration_bounds = array<i64: 1>, scalar_prefetch = 0 : i64, scratch_operands = 0 : i64, tpu.core_type = #tpu.core_type<tc>, window_params = [{transform_indices = @transform_0, window_bounds = array<i64: 512, 128>}, {pipeline_mode = #tpu.pipeline_mode<synchronous>, transform_indices = @transform_1, window_bounds = array<i64: 10, 512>}, {pipeline_mode = #tpu.pipeline_mode<synchronous>, transform_indices = @transform_2, window_bounds = array<i64: 10, 1>}, {transform_indices = @transform_3, window_bounds = array<i64: 10, 128>}]} {
    %c0 = arith.constant 0 : index
    %c0_0 = arith.constant 0 : index
    %0 = vector.load %arg2[%c0, %c0_0] : memref<10x512xf32, #tpu.memory_space<vmem>>, vector<10x512xf32>
    %c0_1 = arith.constant 0 : index
    %c0_2 = arith.constant 0 : index
    %1 = vector.load %arg1[%c0_1, %c0_2] : memref<512x128xf32, #tpu.memory_space<vmem>>, vector<512x128xf32>
    %cst = arith.constant dense<0.000000e+00> : vector<10x128xf32>
    %2 = tpu.matmul %0, %1, %cst {dimension_numbers = #tpu.dot_dimension_numbers<[1], [0], [0], [1], [0, 0, 1, 1], [], []>, precision = #tpu.contract_precision<fp32>} : vector<10x512xf32>, vector<512x128xf32>, vector<10x128xf32> -> vector<10x128xf32>
    %c0_3 = arith.constant 0 : index
    %c0_4 = arith.constant 0 : index
    %3 = vector.load %arg3[%c0_3, %c0_4] : memref<10x1xf32, #tpu.memory_space<vmem>>, vector<10x1xf32>
    %4 = vector.broadcast %3 : vector<10x1xf32> to vector<10x128xf32>
    %5 = arith.addf %2, %4 : vector<10x128xf32>
    %c0_5 = arith.constant 0 : index
    %c0_6 = arith.constant 0 : index
    %6 = vector.load %arg4[%c0_5, %c0_6] : memref<10x128xf32, #tpu.memory_space<vmem>>, vector<10x128xf32>
    tpu.vector_store %arg4[%c0_5, %c0_6], %5 {strides = array<i32>} : memref<10x128xf32, #tpu.memory_space<vmem>>, vector<10x128xf32>,
    return
  }
  func.func @transform_0(%arg0: i32) -> (i32, i32) {
    %c0_i32 = arith.constant 0 : i32
    %c0_i32_0 = arith.constant 0 : i32
    return %c0_i32, %arg0 : i32, i32
  }
  func.func @transform_1(%arg0: i32) -> (i32, i32) {
    %c0_i32 = arith.constant 0 : i32
    %c0_i32_0 = arith.constant 0 : i32
    %c0_i32_1 = arith.constant 0 : i32
    return %c0_i32, %c0_i32_0 : i32, i32
  }
  func.func @transform_2(%arg0: i32) -> (i32, i32) {
    %c0_i32 = arith.constant 0 : i32
    %c0_i32_0 = arith.constant 0 : i32
    %c0_i32_1 = arith.constant 0 : i32
    return %c0_i32, %c0_i32_0 : i32, i32
  }
  func.func @transform_3(%arg0: i32) -> (i32, i32) {
    %c0_i32 = arith.constant 0 : i32
    %c0_i32_0 = arith.constant 0 : i32
    return %c0_i32, %arg0 : i32, i32
  }
}

</mosaic_0001>

<bundles_post_ra>
// kernel: cnn_new_forward.3
= control target key start
LH: loop header
LB: loop body
LE: loop exit
PB: predicated region body
PF: predicated region fallthrough
CT: control target
= control target key end

     0   :  { %v5557_v3 = vmov 0.0   ;;  %vm28_vm0 = vcmask 261120   ;;  %s6627_s0 = inlined_call_operand.vmem [shape: f32[4,32,384], index: 0, kind: input, shape index: {}]   ;;  %s6628_s1 = inlined_call_operand.vmem [shape: f32[16,32], index: 1, kind: input, shape index: {}]   ;;  %s6629_s2 = inlined_call_operand.vmem [shape: f32[16,1], index: 2, kind: input, shape index: {}]   ;;  %s6630_s3 = inlined_call_operand.vmem [shape: f32[16,384], index: 3, kind: output, shape index: {}]  }
   0x1   :  { %v17_v0 = vld [vmem:[%s6627_s0 + $0x8] sm:$0xff]  ;;  %v20_v1 = vld [vmem:[%s6627_s0 + $0x20] sm:$0xff]  ;;  %v18_v2 = vld [vmem:[%s6627_s0 + $0x10] sm:$0xff]  ;;  %107 = vmatprep.mubr.f32.mxu0 %v5557_v3 }
   0x2   :  { %v35_v4 = vand.u32 4294901760, %v17_v0  ;;  %v39_v5 = vand.u32 4294901760, %v20_v1  ;;  %v21_v6 = vld [vmem:[%s6627_s0 + $0x28] sm:$0xff]  ;;  %v628_v7 = vand.u32 4294901760, %v18_v2  ;;  %v16_v8 = vld [vmem:[%s6627_s0] sm:$0xff]  ;;  %v19_v9 = vld [vmem:[%s6627_s0 + $0x18] sm:$0xff] }
   0x3   :  { %v631_v10 = vand.u32 4294901760, %v21_v6  ;;  %v37_v11 = vand.u32 4294901760, %v16_v8  ;;  %v41_v12 = vand.u32 4294901760, %v19_v9  ;;  %v23_v13 = vld [vmem:[%s6627_s0 + $0x38] sm:$0xff]  ;;  %v26_v14 = vld [vmem:[%s6627_s0 + $0x50] sm:$0xff]  ;;  %v5607_v15 = vld [vmem:[%s6627_s0 + $0x40] sm:$0xff] }
   0x4   :  { %v5609_v16 = vpack.c.bf16 %v39_v5, %v35_v4  ;;  %v5611_v17 = vsub.f32 %v17_v0, %v35_v4  ;;  %v5613_v18 = vsub.f32 %v20_v1, %v39_v5  ;;  %v43_v19 = vand.u32 4294901760, %v23_v13  ;;  %v5618_v20 = vld [vmem:[%s6627_s0 + $0x58] sm:$0xff]  ;;  %v22_v21 = vld [vmem:[%s6627_s0 + $0x30] sm:$0xff]  ;;  %v25_v22 = vld [vmem:[%s6627_s0 + $0x48] sm:$0xff] }
   0x5   :  { %v5626_v23 = vpack.c.bf16 %v631_v10, %v628_v7  ;;  %v5628_v24 = vpack.c.bf16 %v41_v12, %v37_v11  ;;  %v5630_v25 = vsub.f32 %v16_v8, %v37_v11  ;;  %v5632_v26 = vsub.f32 %v19_v9, %v41_v12  ;;  %v14_v27 = vld [vmem:[%s6628_s1] sm:$0xff]  ;;  %v15_v36 = vld [vmem:[%s6628_s1 + $0x8] sm:$0xff] }
   0x6   :  { %5051 = vmatprep.subr.bf16.mxu0 %v5609_v16  ;;  %v47_v28 = vand.u32 4294901760, %v26_v14  ;;  %v5638_v29 = vsub.f32 %v23_v13, %v43_v19  ;;  %v634_v30 = vand.u32 4294901760, %v5607_v15  ;;  %v637_v31 = vand.u32 4294901760, %v5618_v20 }
   0x7   :  { %5099 = vmatprep.subr.bf16.mxu1 %v5626_v23  ;;  %5053 = vmatpush1.bf16.msra.mxu0 %v5628_v24  ;;  %v45_v32 = vand.u32 4294901760, %v22_v21  ;;  %v49_v33 = vand.u32 4294901760, %v25_v22  ;;  %v30_v34 = vsel %vm28_vm0, %v14_v27, 0  ;;  %v132_v35 = vand.u32 4294901760, %v5611_v17 }
   0x8   :  { %5101 = vmatpush3.bf16.msra.mxu1 %v5626_v23  ;;  %v5650_v37 = vpack.c.bf16 %v47_v28, %v43_v19  ;;  %v5652_v38 = vsub.f32 %v26_v14, %v47_v28  ;;  %v5654_v39 = vpack.c.bf16 %v637_v31, %v634_v30  ;;  %v5656_v40 = vand.u32 4294901760, %v30_v34 }
   0x9   :  { %v5658_v41 = vpack.c.bf16 %v49_v33, %v45_v32  ;;  %v5660_v42 = vsub.f32 %v22_v21, %v45_v32  ;;  %v5662_v43 = vsub.f32 %v25_v22, %v49_v33  ;;  %v133_v44 = vsub.f32 %v5611_v17, %v132_v35 }
   0xa   :  { %5055 = vmatprep.subr.bf16.mxu0 %v5650_v37  ;;  %5103 = vmatprep.subr.bf16.mxu1 %v5654_v39  ;;  %v5670_v45 = vsub.f32 %v30_v34, %v5656_v40  ;;  %v144_v46 = vand.u32 4294901760, %v5613_v18  ;;  %v33_v47 = vsel %vm28_vm0, %v15_v36, 0  ;;  %v5674_v48 = vsub.f32 %v18_v2, %v628_v7 }
   0xb   :  { %5057 = vmatpush1.bf16.msra.mxu0 %v5658_v41  ;;  %v134_v49 = vand.u32 4294901760, %v133_v44  ;;  %v5677_v50 = vand.u32 4294901760, %v33_v47  ;;  %v5679_v51 = vsub.f32 %v21_v6, %v631_v10  ;;  %v138_v52 = vand.u32 4294901760, %v5630_v25 }
   0xc   :  { %5105 = vmatpush3.bf16.msra.mxu1 %v5654_v39  ;;  %v5684_v53 = vand.u32 4294901760, %v5670_v45  ;;  %v145_v54 = vsub.f32 %v5613_v18, %v144_v46  ;;  %v719_v55 = vand.u32 4294901760, %v5674_v48  ;;  %v150_v56 = vand.u32 4294901760, %v5632_v26 }
   0xd   :  { %v5692_v57 = vsub.f32 %v33_v47, %v5677_v50  ;;  %v726_v58 = vand.u32 4294901760, %v5679_v51  ;;  %v139_v59 = vsub.f32 %v5630_v25, %v138_v52  ;;  %v156_v60 = vand.u32 4294901760, %v5638_v29 }
   0xe   :  { %v111_v61 = vsub.f32 %v5670_v45, %v5684_v53  ;;  %v146_v62 = vand.u32 4294901760, %v145_v54  ;;  %v720_v63 = vsub.f32 %v5674_v48, %v719_v55  ;;  %v151_v0 = vsub.f32 %v5632_v26, %v150_v56 }
   0xf   :  { %v5708_v1 = vand.u32 4294901760, %v5692_v57  ;;  %v727_v2 = vsub.f32 %v5679_v51, %v726_v58  ;;  %v140_v4 = vand.u32 4294901760, %v139_v59  ;;  %v157_v5 = vsub.f32 %v5638_v29, %v156_v60 }
  0x10   :  { %v5716_v6 = vand.u32 4294901760, %v111_v61  ;;  %v5058_v7 = vpack.c.bf16 %v146_v62, %v134_v49  ;;  %v721_v8 = vand.u32 4294901760, %v720_v63  ;;  %v152_v9 = vand.u32 4294901760, %v151_v0 }
  0x11   :  { %v122_v10 = vsub.f32 %v5692_v57, %v5708_v1  ;;  %v728_v11 = vand.u32 4294901760, %v727_v2  ;;  %v158_v12 = vand.u32 4294901760, %v157_v5  ;;  %v168_v13 = vand.u32 4294901760, %v5652_v38 }
  0x12   :  { %4794 = vmatprep.mubr.f32.mxu1 %v5716_v6  ;;  %113 = vmatmul.mubr.f32.vlgmr.msra.gmra.mrb[0].mxu0 %v5716_v6  ;;  %v5060_v14 = vpack.c.bf16 %v152_v9, %v140_v4  ;;  %v5724_v19 = vsub.f32 %v5607_v15, %v634_v30  ;;  %v5727_v21 = vsub.f32 %v5618_v20, %v637_v31  ;;  %v162_v22 = vand.u32 4294901760, %v5660_v42 }
  0x13   :  { %5059 = vmatprep.subr.bf16.mxu0 %v5058_v7  ;;  %v5730_v27 = vand.u32 4294901760, %v122_v10  ;;  %v5106_v28 = vpack.c.bf16 %v728_v11, %v721_v8  ;;  %118 = vmatprep.mubr.f32.mxu0 %v5557_v3  ;;  %v169_v32 = vsub.f32 %v5652_v38, %v168_v13  ;;  %v174_v33 = vand.u32 4294901760, %v5662_v43  ;;  %v4607_v10 = vld [vmem:[%s6627_s0 + $0x68] sm:$0xff]  ;;  %v4610_v11 = vld [vmem:[%s6627_s0 + $0x80] sm:$0xff] }
  0x14   :  { %5061 = vmatpush1.bf16.msra.mxu0 %v5060_v14  ;;  %v733_v15 = vand.u32 4294901760, %v5724_v19  ;;  %v740_v20 = vand.u32 4294901760, %v5727_v21  ;;  %v163_v30 = vsub.f32 %v5660_v42, %v162_v22  ;;  %v5066_v62 = vpack.c.bf16 %v5613_v18, %v5611_v17  ;;  %v5856_v14 = vld [vmem:[%s6627_s0 + $0xa0] sm:$0xff] }
  0x15   :  { %4795 = vmatmul.mubr.f32.vlgmr.msra.gmra.mrb[0].mxu1 %v5730_v27  ;;  %5107 = vmatprep.subr.bf16.mxu1 %v5106_v28  ;;  %v170_v31 = vand.u32 4294901760, %v169_v32  ;;  %v175_v34 = vsub.f32 %v5662_v43, %v174_v33  ;;  %v5114_v2 = vpack.c.bf16 %v5679_v51, %v5674_v48  ;;  %v5068_v4 = vpack.c.bf16 %v5632_v26, %v5630_v25  ;;  %v5821_v26 = vld [vmem:[%s6627_s0 + $0x60] sm:$0xff]  ;;  %v5878_v32 = vld [vmem:[%s6627_s0 + $0xa8] sm:$0xff] }
  0x16   :  { %5109 = vmatpush3.bf16.msra.mxu1 %v5106_v28  ;;  %124 = vmatmul.mubr.f32.gmra.mrb[2].mxu0 %v5730_v27  ;;  %v734_v36 = vsub.f32 %v5724_v19, %v733_v15  ;;  %v741_v44 = vsub.f32 %v5727_v21, %v740_v20  ;;  %v164_v47 = vand.u32 4294901760, %v163_v30  ;;  %v5070_v5 = vpack.c.bf16 %v5652_v38, %v5638_v29  ;;  %v5832_v29 = vld [vmem:[%s6627_s0 + $0x98] sm:$0xff]  ;;  %v5837_v38 = vld [vmem:[%s6627_s0 + $0xb0] sm:$0xff] }
  0x17   :  { %v5062_v49 = vpack.c.bf16 %v170_v31, %v158_v12  ;;  %v176_v54 = vand.u32 4294901760, %v175_v34  ;;  %234 = vmatprep.mubr.f32.mxu0 %v5557_v3  ;;  %4805 = vmatprep.mubr.f32.mxu1 %v5656_v40  ;;  %v5118_v7 = vpack.c.bf16 %v5727_v21, %v5724_v19  ;;  %v5072_v8 = vpack.c.bf16 %v5662_v43, %v5660_v42  ;;  %v5861_v19 = vld [vmem:[%s6627_s0 + $0xb8] sm:$0xff]  ;;  %v5873_v28 = vld [vmem:[%s6627_s0 + $0x90] sm:$0xff] }
  0x18   :  { %v735_v59 = vand.u32 4294901760, %v734_v36  ;;  %v742_v61 = vand.u32 4294901760, %v741_v44  ;;  %v5082_v9 = vpack.c.bf16 %v144_v46, %v132_v35  ;;  %v5130_v17 = vpack.c.bf16 %v726_v58, %v719_v55  ;;  %v5807_v35 = vld [vmem:[%s6627_s0 + $0x70] sm:$0xff]  ;;  %v5812_v46 = vld [vmem:[%s6627_s0 + $0x88] sm:$0xff] }
  0x19   :  { %5063 = vmatprep.subr.bf16.mxu0 %v5062_v49  ;;  %v5064_v63 = vpack.c.bf16 %v176_v54, %v164_v47  ;;  %v5084_v18 = vpack.c.bf16 %v150_v56, %v138_v52  ;;  %v5086_v48 = vpack.c.bf16 %v168_v13, %v156_v60  ;;  %v1168_v25 = vand.u32 4294901760, %v4607_v10  ;;  %v5826_v52 = vld [vmem:[%s6627_s0 + $0x78] sm:$0xff] }
  0x1a   :  { %v5110_v0 = vpack.c.bf16 %v742_v61, %v735_v59  ;;  %v1172_v51 = vand.u32 4294901760, %v4610_v11  ;;  %v5134_v55 = vpack.c.bf16 %v740_v20, %v733_v15  ;;  %v1761_v56 = vand.u32 4294901760, %v5807_v35 }
  0x1b   :  { %5065 = vmatpush1.bf16.msra.mxu0 %v5064_v63  ;;  %v1764_v58 = vand.u32 4294901760, %v5812_v46  ;;  %v5088_v60 = vpack.c.bf16 %v174_v33, %v162_v22  ;;  %v1170_v12 = vand.u32 4294901760, %v5821_v26  ;;  %v1174_v13 = vand.u32 4294901760, %v5826_v52 }
  0x1c   :  { %5111 = vmatprep.subr.bf16.mxu1 %v5110_v0  ;;  %5067 = vmatprep.subr.bf16.mxu0 %v5066_v62  ;;  %v5864_v42 = vsub.f32 %v4607_v10, %v1168_v25  ;;  %v5866_v43 = vsub.f32 %v4610_v11, %v1172_v51  ;;  %v1176_v21 = vand.u32 4294901760, %v5832_v29  ;;  %v1180_v22 = vand.u32 4294901760, %v5837_v38 }
  0x1d   :  { %5113 = vmatpush3.bf16.msra.mxu1 %v5110_v0  ;;  %v1767_v33 = vand.u32 4294901760, %v5856_v14  ;;  %v1770_v15 = vand.u32 4294901760, %v5861_v19  ;;  %v5885_v20 = vsub.f32 %v5807_v35, %v1761_v56  ;;  %v5888_v30 = vsub.f32 %v5812_v46, %v1764_v58 }
  0x1e   :  { %236 = vmatmul.mubr.f32.vlgmr.msra.gmra.mrb[0].mxu0 %v5656_v40  ;;  %5115 = vmatprep.subr.bf16.mxu1 %v5114_v2  ;;  %v5892_v31 = vsub.f32 %v5821_v26, %v1170_v12  ;;  %v5895_v34 = vsub.f32 %v5826_v52, %v1174_v13  ;;  %v1178_v36 = vand.u32 4294901760, %v5873_v28  ;;  %v1182_v44 = vand.u32 4294901760, %v5878_v32 }
  0x1f   :  { %5069 = vmatpush1.bf16.msra.mxu0 %v5068_v4  ;;  %241 = vmatprep.mubr.f32.mxu0 %v5557_v3  ;;  %v5901_v47 = vsub.f32 %v5832_v29, %v1176_v21  ;;  %v5904_v49 = vsub.f32 %v5837_v38, %v1180_v22  ;;  %v1265_v54 = vand.u32 4294901760, %v5864_v42  ;;  %v1277_v59 = vand.u32 4294901760, %v5866_v43 }
  0x20   :  { %4806 = vmatmul.mubr.f32.vlgmr.msra.gmra.mrb[0].mxu1 %v5677_v50  ;;  %5071 = vmatprep.subr.bf16.mxu0 %v5070_v5  ;;  %v5908_v61 = vpack.c.bf16 %v1172_v51, %v1168_v25  ;;  %v1852_v62 = vand.u32 4294901760, %v5885_v20  ;;  %v5915_v63 = vsub.f32 %v5856_v14, %v1767_v33  ;;  %v5918_v0 = vsub.f32 %v5861_v19, %v1770_v15 }
  0x21   :  { %5117 = vmatpush3.bf16.msra.mxu1 %v5114_v2  ;;  %4816 = vmatprep.mubr.f32.mxu1 %v5670_v45  ;;  %v5923_v2 = vsub.f32 %v5873_v28, %v1178_v36  ;;  %v5926_v4 = vsub.f32 %v5878_v32, %v1182_v44  ;;  %v1271_v5 = vand.u32 4294901760, %v5892_v31  ;;  %v1301_v10 = vand.u32 4294901760, %v5904_v49 }
  0x22   :  { %243 = vmatmul.mubr.f32.gmra.mrb[2].mxu0 %v5677_v50  ;;  %5119 = vmatprep.subr.bf16.mxu1 %v5118_v7  ;;  %v5942_v11 = vpack.c.bf16 %v1764_v58, %v1761_v56  ;;  %v1866_v35 = vand.u32 4294901760, %v5915_v63  ;;  %v1873_v46 = vand.u32 4294901760, %v5918_v0  ;;  %v5978_v56 = vpack.c.bf16 %v1182_v44, %v1178_v36 }
  0x23   :  { %5073 = vmatpush1.bf16.msra.mxu0 %v5072_v8  ;;  %329 = vmatprep.mubr.f32.mxu0 %v5557_v3  ;;  %v1278_v8 = vsub.f32 %v5866_v43, %v1277_v59  ;;  %v1295_v51 = vand.u32 4294901760, %v5923_v2  ;;  %v1307_v26 = vand.u32 4294901760, %v5926_v4  ;;  %v1302_v38 = vsub.f32 %v5904_v49, %v1301_v10 }
  0x24   :  { %5075 = vmatprep.subr.bf16.mxu0 %v5609_v16 }
  0x25   :  { %5121 = vmatpush3.bf16.msra.mxu1 %v5118_v7  ;;  %v1283_v7 = vand.u32 4294901760, %v5895_v34  ;;  %v1279_v29 = vand.u32 4294901760, %v1278_v8  ;;  %v1296_v19 = vsub.f32 %v5923_v2, %v1295_v51  ;;  %v1303_v32 = vand.u32 4294901760, %v1302_v38 }
  0x26   :  { %332 = vmatmul.mubr.f32.vlgmr.msra.gmra.mrb[0].mxu0 %v5670_v45  ;;  %5123 = vmatprep.subr.bf16.mxu1 %v5626_v23  ;;  %v5214_v38 = vpack.c.bf16 %v5918_v0, %v5915_v63 }
  0x27   :  { %5077 = vmatpush1.bf16.msra.mxu0 %v5628_v24  ;;  %337 = vmatprep.mubr.f32.mxu0 %v5557_v3  ;;  %v1284_v25 = vsub.f32 %v5895_v34, %v1283_v7 }
  0x28   :  { %4817 = vmatmul.mubr.f32.vlgmr.msra.gmra.mrb[0].mxu1 %v5692_v57  ;;  %5079 = vmatprep.subr.bf16.mxu0 %v5650_v37 }
  0x29   :  { %5125 = vmatpush3.bf16.msra.mxu1 %v5626_v23  ;;  %4827 = vmatprep.mubr.f32.mxu1 %v5684_v53  ;;  %v1285_v14 = vand.u32 4294901760, %v1284_v25  ;;  %v5162_v25 = vpack.c.bf16 %v5866_v43, %v5864_v42  ;;  %v5180_v43 = vpack.c.bf16 %v1283_v7, %v1271_v5 }
  0x2a   :  { %340 = vmatmul.mubr.f32.gmra.mrb[2].mxu0 %v5692_v57  ;;  %5127 = vmatprep.subr.bf16.mxu1 %v5654_v39 }
  0x2b   :  { %5081 = vmatpush1.bf16.msra.mxu0 %v5658_v41  ;;  %418 = vmatprep.mubr.f32.mxu0 %v5557_v3 }
  0x2c   :  { %5083 = vmatprep.subr.bf16.mxu0 %v5082_v9  ;;  %v1289_v9 = vand.u32 4294901760, %v5901_v47 }
  0x2d   :  { %5129 = vmatpush3.bf16.msra.mxu1 %v5654_v39 }
  0x2e   :  { %422 = vmatmul.mubr.f32.vlgmr.msra.gmra.mrb[0].mxu0 %v5684_v53  ;;  %5131 = vmatprep.subr.bf16.mxu1 %v5130_v17 }
  0x2f   :  { %5085 = vmatpush1.bf16.msra.mxu0 %v5084_v18  ;;  %427 = vmatprep.mubr.f32.mxu0 %v5557_v3  ;;  %v1853_v18 = vsub.f32 %v5885_v20, %v1852_v62 }
  0x30   :  { %4828 = vmatmul.mubr.f32.vlgmr.msra.gmra.mrb[0].mxu1 %v5708_v1  ;;  %5087 = vmatprep.subr.bf16.mxu0 %v5086_v48  ;;  %v1272_v48 = vsub.f32 %v5892_v31, %v1271_v5 }
  0x31   :  { %5133 = vmatpush3.bf16.msra.mxu1 %v5130_v17  ;;  %4838 = vmatprep.mubr.f32.mxu1 %v5656_v40  ;;  %v5944_v17 = vpack.c.bf16 %v1174_v13, %v1170_v12  ;;  %v1854_v58 = vand.u32 4294901760, %v1853_v18  ;;  %v1867_v12 = vsub.f32 %v5915_v63, %v1866_v35  ;;  %v1874_v13 = vsub.f32 %v5918_v0, %v1873_v46  ;;  %v6112_v63 = vld [vmem:[%s6627_s0 + $0x100] sm:$0xff]  ;;  %v6117_v0 = vld [vmem:[%s6627_s0 + $0x118] sm:$0xff] }
  0x32   :  { %431 = vmatmul.mubr.f32.gmra.mrb[2].mxu0 %v5708_v1  ;;  %5135 = vmatprep.subr.bf16.mxu1 %v5134_v55 }
  0x33   :  { %5089 = vmatpush1.bf16.msra.mxu0 %v5088_v60  ;;  %525 = vmatprep.mubr.f32.mxu0 %v5557_v3  ;;  %v1875_v36 = vand.u32 4294901760, %v1874_v13  ;;  %v4622_v13 = vld [vmem:[%s6627_s0 + $0xe0] sm:$0xff] }
  0x34   :  { %5091 = vmatprep.subr.bf16.mxu0 %v5609_v16  ;;  %v1859_v16 = vand.u32 4294901760, %v5888_v30 }
  0x35   :  { %5137 = vmatpush3.bf16.msra.mxu1 %v5134_v55  ;;  %v5976_v55 = vpack.c.bf16 %v1770_v15, %v1767_v33  ;;  %v1868_v15 = vand.u32 4294901760, %v1867_v12  ;;  %v4619_v12 = vld [vmem:[%s6627_s0 + $0xc8] sm:$0xff] }
  0x36   :  { %527 = vmatmul.mubr.f32.vlgmr.msra.gmra.mrb[0].mxu0 %v5656_v40  ;;  %5139 = vmatprep.subr.bf16.mxu1 %v5626_v23 }
  0x37   :  { %5093 = vmatpush1.bf16.msra.mxu0 %v5628_v24  ;;  %532 = vmatprep.mubr.f32.mxu0 %v5557_v3  ;;  %v1266_v24 = vsub.f32 %v5864_v42, %v1265_v54  ;;  %v5226_v42 = vpack.c.bf16 %v1859_v16, %v1852_v62  ;;  %v6082_v62 = vld [vmem:[%s6627_s0 + $0xd8] sm:$0xff] }
  0x38   :  { %4839 = vmatmul.mubr.f32.vlgmr.msra.gmra.mrb[0].mxu1 %v5677_v50  ;;  %5095 = vmatprep.subr.bf16.mxu0 %v5650_v37  ;;  %v5946_v37 = vpack.c.bf16 %v1180_v22, %v1176_v21  ;;  %v1308_v21 = vsub.f32 %v5926_v4, %v1307_v26 }
  0x39   :  { %5141 = vmatpush3.bf16.msra.mxu1 %v5626_v23  ;;  %4849 = vmatprep.mubr.f32.mxu1 %v5656_v40  ;;  %v1860_v23 = vsub.f32 %v5888_v30, %v1859_v16  ;;  %v1267_v52 = vand.u32 4294901760, %v1266_v24  ;;  %v1297_v24 = vand.u32 4294901760, %v1296_v19  ;;  %v5230_v16 = vpack.c.bf16 %v1873_v46, %v1866_v35 }
  0x3a   :  { %534 = vmatmul.mubr.f32.gmra.mrb[2].mxu0 %v5677_v50  ;;  %5143 = vmatprep.subr.bf16.mxu1 %v5654_v39  ;;  %v1309_v8 = vand.u32 4294901760, %v1308_v21  ;;  %v2909_v19 = vand.u32 4294901760, %v6117_v0 }
  0x3b   :  { %5097 = vmatpush1.bf16.msra.mxu0 %v5658_v41  ;;  %612 = vmatprep.mubr.f32.mxu0 %v5557_v3  ;;  %v1290_v41 = vsub.f32 %v5901_v47, %v1289_v9  ;;  %v1861_v60 = vand.u32 4294901760, %v1860_v23  ;;  %v5154_v22 = vpack.c.bf16 %v1279_v29, %v1267_v52  ;;  %v5206_v23 = vpack.c.bf16 %v1875_v36, %v1868_v15 }
  0x3c   :  { %5147 = vmatprep.subr.bf16.mxu0 %v5908_v61  ;;  %v5210_v52 = vpack.c.bf16 %v5888_v30, %v5885_v20  ;;  %v5164_v29 = vpack.c.bf16 %v5895_v34, %v5892_v31  ;;  %v6068_v20 = vld [vmem:[%s6627_s0 + $0xe8] sm:$0xff]  ;;  %v5182_v30 = vpack.c.bf16 %v1301_v10, %v1289_v9  ;;  %v2307_v31 = vand.u32 4294901760, %v4619_v12  ;;  %v6077_v34 = vld [vmem:[%s6627_s0 + $0xc0] sm:$0xff] }
  0x3d   :  { %5145 = vmatpush3.bf16.msra.mxu1 %v5654_v39  ;;  %v1273_v39 = vand.u32 4294901760, %v1272_v48  ;;  %v1291_v28 = vand.u32 4294901760, %v1290_v41  ;;  %v5202_v33 = vpack.c.bf16 %v1861_v60, %v1854_v58  ;;  %v5160_v48 = vpack.c.bf16 %v1309_v8, %v1297_v24 }
  0x3e   :  { %614 = vmatmul.mubr.f32.vlgmr.msra.gmra.mrb[0].mxu0 %v5656_v40  ;;  %5195 = vmatprep.subr.bf16.mxu1 %v5942_v11  ;;  %v5166_v41 = vpack.c.bf16 %v5904_v49, %v5901_v47  ;;  %v5168_v58 = vpack.c.bf16 %v5926_v4, %v5923_v2  ;;  %v5178_v60 = vpack.c.bf16 %v1277_v59, %v1265_v54  ;;  %v6063_v54 = vld [vmem:[%s6627_s0 + $0xd0] sm:$0xff]  ;;  %v2311_v59 = vand.u32 4294901760, %v4622_v13  ;;  %v6088_v47 = vld [vmem:[%s6627_s0 + $0xf8] sm:$0xff] }
  0x3f   :  { %5149 = vmatpush1.bf16.msra.mxu0 %v5944_v17  ;;  %619 = vmatprep.mubr.f32.mxu0 %v5557_v3  ;;  %v5156_v44 = vpack.c.bf16 %v1285_v14, %v1273_v39  ;;  %v5158_v18 = vpack.c.bf16 %v1303_v32, %v1291_v28  ;;  %v6093_v49 = vld [vmem:[%s6627_s0 + $0x110] sm:$0xff]  ;;  %v2900_v5 = vand.u32 4294901760, %v6063_v54  ;;  %v2903_v7 = vand.u32 4294901760, %v6068_v20 }
  0x40   :  { %4850 = vmatmul.mubr.f32.vlgmr.msra.gmra.mrb[0].mxu1 %v5677_v50  ;;  %5151 = vmatprep.subr.bf16.mxu0 %v5946_v37  ;;  %v5184_v9 = vpack.c.bf16 %v1307_v26, %v1295_v51  ;;  %v2309_v10 = vand.u32 4294901760, %v6077_v34  ;;  %v2313_v39 = vand.u32 4294901760, %v6082_v62  ;;  %v6120_v2 = vsub.f32 %v4619_v12, %v2307_v31  ;;  %v6129_v51 = vld [vmem:[%s6627_s0 + $0xf0] sm:$0xff]  ;;  %v6134_v26 = vld [vmem:[%s6627_s0 + $0x108] sm:$0xff] }
  0x41   :  { %5197 = vmatpush3.bf16.msra.mxu1 %v5942_v11  ;;  %4860 = vmatprep.mubr.f32.mxu1 %v5716_v6  ;;  %v6122_v4 = vsub.f32 %v4622_v13, %v2311_v59  ;;  %v2315_v35 = vand.u32 4294901760, %v6088_v47  ;;  %v2319_v46 = vand.u32 4294901760, %v6093_v49  ;;  %v2906_v14 = vand.u32 4294901760, %v6112_v63 }
  0x42   :  { %621 = vmatmul.mubr.f32.gmra.mrb[2].mxu0 %v5677_v50  ;;  %5199 = vmatprep.subr.bf16.mxu1 %v5976_v55  ;;  %v6141_v21 = vsub.f32 %v6063_v54, %v2900_v5  ;;  %v6148_v28 = vsub.f32 %v6077_v34, %v2309_v10  ;;  %v6151_v32 = vsub.f32 %v6082_v62, %v2313_v39  ;;  %v2321_v15 = vand.u32 4294901760, %v6134_v26 }
  0x43   :  { %5153 = vmatpush1.bf16.msra.mxu0 %v5978_v56  ;;  %1240 = vmatprep.mubr.f32.mxu0 %v5557_v3  ;;  %v6157_v36 = vsub.f32 %v6088_v47, %v2315_v35  ;;  %v2404_v24 = vand.u32 4294901760, %v6120_v2  ;;  %v2416_v8 = vand.u32 4294901760, %v6122_v4  ;;  %v6198_v13 = vpack.c.bf16 %v2903_v7, %v2900_v5 }
  0x44   :  { %5155 = vmatprep.subr.bf16.mxu0 %v5154_v22  ;;  %v6144_v22 = vsub.f32 %v6068_v20, %v2903_v7 }
  0x45   :  { %5201 = vmatpush3.bf16.msra.mxu1 %v5976_v55 }
  0x46   :  { %1246 = vmatmul.mubr.f32.vlgmr.msra.gmra.mrb[4].mxu0 %v5716_v6  ;;  %5203 = vmatprep.subr.bf16.mxu1 %v5202_v33 }
  0x47   :  { %5157 = vmatpush1.bf16.msra.mxu0 %v5156_v44  ;;  %1251 = vmatprep.mubr.f32.mxu0 %v5557_v3  ;;  %v6160_v44 = vsub.f32 %v6093_v49, %v2319_v46 }
  0x48   :  { %4861 = vmatmul.mubr.f32.vlgmr.msra.gmra.mrb[2].mxu1 %v5730_v27  ;;  %5159 = vmatprep.subr.bf16.mxu0 %v5158_v18  ;;  %v6164_v18 = vpack.c.bf16 %v2311_v59, %v2307_v31 }
  0x49   :  { %5205 = vmatpush3.bf16.msra.mxu1 %v5202_v33  ;;  %4871 = vmatprep.mubr.f32.mxu1 %v5656_v40  ;;  %v2317_v33 = vand.u32 4294901760, %v6129_v51  ;;  %v2440_v12 = vand.u32 4294901760, %v6160_v44 }
  0x4a   :  { %1257 = vmatmul.mubr.f32.gmra.mrb[6].mxu0 %v5730_v27  ;;  %5207 = vmatprep.subr.bf16.mxu1 %v5206_v23 }
  0x4b   :  { %5161 = vmatpush1.bf16.msra.mxu0 %v5160_v48  ;;  %1367 = vmatprep.mubr.f32.mxu0 %v5557_v3  ;;  %v6171_v48 = vsub.f32 %v6112_v63, %v2906_v14  ;;  %v2441_v49 = vsub.f32 %v6160_v44, %v2440_v12  ;;  %v6234_v5 = vpack.c.bf16 %v2321_v15, %v2317_v33 }
  0x4c   :  { %5163 = vmatprep.subr.bf16.mxu0 %v5162_v25  ;;  %v6174_v25 = vsub.f32 %v6117_v0, %v2909_v19 }
  0x4d   :  { %5209 = vmatpush3.bf16.msra.mxu1 %v5206_v23  ;;  %v2991_v23 = vand.u32 4294901760, %v6141_v21  ;;  %v3005_v54 = vand.u32 4294901760, %v6171_v48 }
  0x4e   :  { %1369 = vmatmul.mubr.f32.vlgmr.msra.gmra.mrb[4].mxu0 %v5656_v40  ;;  %5211 = vmatprep.subr.bf16.mxu1 %v5210_v52  ;;  %v3012_v20 = vand.u32 4294901760, %v6174_v25 }
  0x4f   :  { %5165 = vmatpush1.bf16.msra.mxu0 %v5164_v29  ;;  %1374 = vmatprep.mubr.f32.mxu0 %v5557_v3  ;;  %v6182_v29 = vsub.f32 %v6134_v26, %v2321_v15  ;;  %v2442_v26 = vand.u32 4294901760, %v2441_v49  ;;  %v5310_v49 = vpack.c.bf16 %v6174_v25, %v6171_v48 }
  0x50   :  { %4872 = vmatmul.mubr.f32.vlgmr.msra.gmra.mrb[2].mxu1 %v5677_v50  ;;  %5167 = vmatprep.subr.bf16.mxu0 %v5166_v41  ;;  %v2410_v41 = vand.u32 4294901760, %v6148_v28 }
  0x51   :  { %5213 = vmatpush3.bf16.msra.mxu1 %v5210_v52  ;;  %4882 = vmatprep.mubr.f32.mxu1 %v5670_v45  ;;  %v6179_v52 = vsub.f32 %v6129_v51, %v2317_v33  ;;  %v2446_v34 = vand.u32 4294901760, %v6182_v29 }
  0x52   :  { %1376 = vmatmul.mubr.f32.gmra.mrb[6].mxu0 %v5677_v50  ;;  %5215 = vmatprep.subr.bf16.mxu1 %v5214_v38 }
  0x53   :  { %5169 = vmatpush1.bf16.msra.mxu0 %v5168_v58  ;;  %1462 = vmatprep.mubr.f32.mxu0 %v5557_v3  ;;  %v2417_v58 = vsub.f32 %v6122_v4, %v2416_v8  ;;  %v2434_v59 = vand.u32 4294901760, %v6179_v52 }
  0x54   :  { %5171 = vmatprep.subr.bf16.mxu0 %v5908_v61 }
  0x55   :  { %5217 = vmatpush3.bf16.msra.mxu1 %v5214_v38  ;;  %v2422_v38 = vand.u32 4294901760, %v6151_v32  ;;  %v2418_v47 = vand.u32 4294901760, %v2417_v58  ;;  %v2435_v0 = vsub.f32 %v6179_v52, %v2434_v59 }
  0x56   :  { %1465 = vmatmul.mubr.f32.vlgmr.msra.gmra.mrb[4].mxu0 %v5670_v45  ;;  %5219 = vmatprep.subr.bf16.mxu1 %v5942_v11 }
  0x57   :  { %5173 = vmatpush1.bf16.msra.mxu0 %v5944_v17  ;;  %1470 = vmatprep.mubr.f32.mxu0 %v5557_v3  ;;  %v2423_v31 = vsub.f32 %v6151_v32, %v2422_v38 }
  0x58   :  { %4883 = vmatmul.mubr.f32.vlgmr.msra.gmra.mrb[2].mxu1 %v5692_v57  ;;  %5175 = vmatprep.subr.bf16.mxu0 %v5946_v37 }
  0x59   :  { %5221 = vmatpush3.bf16.msra.mxu1 %v5942_v11  ;;  %4893 = vmatprep.mubr.f32.mxu1 %v5684_v53  ;;  %v2424_v63 = vand.u32 4294901760, %v2423_v31  ;;  %v5258_v31 = vpack.c.bf16 %v6122_v4, %v6120_v2  ;;  %v5276_v4 = vpack.c.bf16 %v2422_v38, %v2410_v41 }
  0x5a   :  { %1473 = vmatmul.mubr.f32.gmra.mrb[6].mxu0 %v5692_v57  ;;  %5223 = vmatprep.subr.bf16.mxu1 %v5976_v55 }
  0x5b   :  { %5177 = vmatpush1.bf16.msra.mxu0 %v5978_v56  ;;  %1551 = vmatprep.mubr.f32.mxu0 %v5557_v3 }
  0x5c   :  { %5179 = vmatprep.subr.bf16.mxu0 %v5178_v60  ;;  %v2428_v60 = vand.u32 4294901760, %v6157_v36 }
  0x5d   :  { %5225 = vmatpush3.bf16.msra.mxu1 %v5976_v55 }
  0x5e   :  { %1555 = vmatmul.mubr.f32.vlgmr.msra.gmra.mrb[4].mxu0 %v5684_v53  ;;  %5227 = vmatprep.subr.bf16.mxu1 %v5226_v42 }
  0x5f   :  { %5181 = vmatpush1.bf16.msra.mxu0 %v5180_v43  ;;  %1560 = vmatprep.mubr.f32.mxu0 %v5557_v3  ;;  %v2992_v43 = vsub.f32 %v6141_v21, %v2991_v23 }
  0x60   :  { %4894 = vmatmul.mubr.f32.vlgmr.msra.gmra.mrb[2].mxu1 %v5708_v1  ;;  %5183 = vmatprep.subr.bf16.mxu0 %v5182_v30  ;;  %v2411_v30 = vsub.f32 %v6148_v28, %v2410_v41 }
  0x61   :  { %5229 = vmatpush3.bf16.msra.mxu1 %v5226_v42  ;;  %4904 = vmatprep.mubr.f32.mxu1 %v5656_v40  ;;  %v6200_v42 = vpack.c.bf16 %v2313_v39, %v2309_v10  ;;  %v2993_v7 = vand.u32 4294901760, %v2992_v43  ;;  %v3006_v10 = vsub.f32 %v6171_v48, %v3005_v54  ;;  %v3013_v39 = vsub.f32 %v6174_v25, %v3012_v20  ;;  %v6368_v48 = vld [vmem:[%s6627_s0 + $0x160] sm:$0xff]  ;;  %v6373_v25 = vld [vmem:[%s6627_s0 + $0x178] sm:$0xff] }
  0x62   :  { %1564 = vmatmul.mubr.f32.gmra.mrb[6].mxu0 %v5708_v1  ;;  %5231 = vmatprep.subr.bf16.mxu1 %v5230_v16 }
  0x63   :  { %5185 = vmatpush1.bf16.msra.mxu0 %v5184_v9  ;;  %1658 = vmatprep.mubr.f32.mxu0 %v5557_v3  ;;  %v3014_v33 = vand.u32 4294901760, %v3013_v39  ;;  %v4634_v39 = vld [vmem:[%s6627_s0 + $0x140] sm:$0xff] }
  0x64   :  { %5187 = vmatprep.subr.bf16.mxu0 %v5908_v61  ;;  %v2998_v61 = vand.u32 4294901760, %v6144_v22 }
  0x65   :  { %5233 = vmatpush3.bf16.msra.mxu1 %v5230_v16  ;;  %v6232_v16 = vpack.c.bf16 %v2909_v19, %v2906_v14  ;;  %v3007_v19 = vand.u32 4294901760, %v3006_v10  ;;  %v4631_v10 = vld [vmem:[%s6627_s0 + $0x128] sm:$0xff] }
  0x66   :  { %1660 = vmatmul.mubr.f32.vlgmr.msra.gmra.mrb[4].mxu0 %v5656_v40  ;;  %5235 = vmatprep.subr.bf16.mxu1 %v5942_v11 }
  0x67   :  { %5189 = vmatpush1.bf16.msra.mxu0 %v5944_v17  ;;  %1665 = vmatprep.mubr.f32.mxu0 %v5557_v3  ;;  %v2405_v17 = vsub.f32 %v6120_v2, %v2404_v24  ;;  %v5322_v2 = vpack.c.bf16 %v2998_v61, %v2991_v23  ;;  %v6338_v23 = vld [vmem:[%s6627_s0 + $0x138] sm:$0xff] }
  0x68   :  { %4905 = vmatmul.mubr.f32.vlgmr.msra.gmra.mrb[2].mxu1 %v5677_v50  ;;  %5191 = vmatprep.subr.bf16.mxu0 %v5946_v37  ;;  %v6202_v37 = vpack.c.bf16 %v2319_v46, %v2315_v35  ;;  %v2447_v35 = vsub.f32 %v6182_v29, %v2446_v34 }
  0x69   :  { %5237 = vmatpush3.bf16.msra.mxu1 %v5942_v11  ;;  %4915 = vmatprep.mubr.f32.mxu1 %v5656_v40  ;;  %v2999_v11 = vsub.f32 %v6144_v22, %v2998_v61  ;;  %v2406_v62 = vand.u32 4294901760, %v2405_v17  ;;  %v2436_v17 = vand.u32 4294901760, %v2435_v0  ;;  %v5326_v61 = vpack.c.bf16 %v3012_v20, %v3005_v54 }
  0x6a   :  { %1667 = vmatmul.mubr.f32.gmra.mrb[6].mxu0 %v5677_v50  ;;  %5239 = vmatprep.subr.bf16.mxu1 %v5976_v55  ;;  %v2448_v58 = vand.u32 4294901760, %v2447_v35  ;;  %v4048_v0 = vand.u32 4294901760, %v6373_v25 }
  0x6b   :  { %5193 = vmatpush1.bf16.msra.mxu0 %v5978_v56  ;;  %1745 = vmatprep.mubr.f32.mxu0 %v5557_v3  ;;  %v2429_v56 = vsub.f32 %v6157_v36, %v2428_v60  ;;  %v3000_v9 = vand.u32 4294901760, %v2999_v11  ;;  %v5250_v46 = vpack.c.bf16 %v2418_v47, %v2406_v62  ;;  %v5302_v11 = vpack.c.bf16 %v3014_v33, %v3007_v19 }
  0x6c   :  { %5243 = vmatprep.subr.bf16.mxu0 %v6164_v18  ;;  %v5306_v62 = vpack.c.bf16 %v6144_v22, %v6141_v21  ;;  %v5260_v47 = vpack.c.bf16 %v6151_v32, %v6148_v28  ;;  %v6324_v21 = vld [vmem:[%s6627_s0 + $0x148] sm:$0xff]  ;;  %v5278_v22 = vpack.c.bf16 %v2440_v12, %v2428_v60  ;;  %v3446_v28 = vand.u32 4294901760, %v4631_v10  ;;  %v6333_v32 = vld [vmem:[%s6627_s0 + $0x120] sm:$0xff] }
  0x6d   :  { %5241 = vmatpush3.bf16.msra.mxu1 %v5976_v55  ;;  %v2412_v55 = vand.u32 4294901760, %v2411_v30  ;;  %v2430_v51 = vand.u32 4294901760, %v2429_v56  ;;  %v5298_v14 = vpack.c.bf16 %v3000_v9, %v2993_v7  ;;  %v5256_v30 = vpack.c.bf16 %v2448_v58, %v2436_v17 }
  0x6e   :  { %1747 = vmatmul.mubr.f32.vlgmr.msra.gmra.mrb[4].mxu0 %v5656_v40  ;;  %5291 = vmatprep.subr.bf16.mxu1 %v6198_v13  ;;  %v5262_v56 = vpack.c.bf16 %v6160_v44, %v6157_v36  ;;  %v5264_v7 = vpack.c.bf16 %v6182_v29, %v6179_v52  ;;  %v5274_v9 = vpack.c.bf16 %v2416_v8, %v2404_v24  ;;  %v6319_v24 = vld [vmem:[%s6627_s0 + $0x130] sm:$0xff]  ;;  %v3450_v8 = vand.u32 4294901760, %v4634_v39  ;;  %v6344_v36 = vld [vmem:[%s6627_s0 + $0x158] sm:$0xff] }
  0x6f   :  { %5245 = vmatpush1.bf16.msra.mxu0 %v6200_v42  ;;  %1752 = vmatprep.mubr.f32.mxu0 %v5557_v3  ;;  %v5252_v15 = vpack.c.bf16 %v2424_v63, %v2412_v55  ;;  %v5254_v43 = vpack.c.bf16 %v2442_v26, %v2430_v51  ;;  %v6349_v44 = vld [vmem:[%s6627_s0 + $0x170] sm:$0xff]  ;;  %v4039_v41 = vand.u32 4294901760, %v6319_v24  ;;  %v4042_v38 = vand.u32 4294901760, %v6324_v21 }
  0x70   :  { %4916 = vmatmul.mubr.f32.vlgmr.msra.gmra.mrb[2].mxu1 %v5677_v50  ;;  %5247 = vmatprep.subr.bf16.mxu0 %v6202_v37  ;;  %v5280_v60 = vpack.c.bf16 %v2446_v34, %v2434_v59  ;;  %v3448_v12 = vand.u32 4294901760, %v6333_v32  ;;  %v3452_v55 = vand.u32 4294901760, %v6338_v23  ;;  %v6376_v52 = vsub.f32 %v4631_v10, %v3446_v28  ;;  %v6385_v59 = vld [vmem:[%s6627_s0 + $0x150] sm:$0xff]  ;;  %v6390_v34 = vld [vmem:[%s6627_s0 + $0x168] sm:$0xff] }
  0x71   :  { %5293 = vmatpush3.bf16.msra.mxu1 %v6198_v13  ;;  %4926 = vmatprep.mubr.f32.mxu1 %v5716_v6  ;;  %v6378_v29 = vsub.f32 %v4634_v39, %v3450_v8  ;;  %v3454_v54 = vand.u32 4294901760, %v6344_v36  ;;  %v3458_v20 = vand.u32 4294901760, %v6349_v44  ;;  %v4045_v63 = vand.u32 4294901760, %v6368_v48 }
  0x72   :  { %1754 = vmatmul.mubr.f32.gmra.mrb[6].mxu0 %v5677_v50  ;;  %5295 = vmatprep.subr.bf16.mxu1 %v6232_v16  ;;  %v6397_v35 = vsub.f32 %v6319_v24, %v4039_v41  ;;  %v6404_v51 = vsub.f32 %v6333_v32, %v3448_v12  ;;  %v6407_v26 = vsub.f32 %v6338_v23, %v3452_v55  ;;  %v3460_v19 = vand.u32 4294901760, %v6390_v34 }
  0x73   :  { %5249 = vmatpush1.bf16.msra.mxu0 %v6234_v5  ;;  %2379 = vmatprep.mubr.f32.mxu0 %v5557_v3  ;;  %v6413_v33 = vsub.f32 %v6344_v36, %v3454_v54  ;;  %v3543_v17 = vand.u32 4294901760, %v6376_v52  ;;  %v3555_v58 = vand.u32 4294901760, %v6378_v29  ;;  %v6454_v39 = vpack.c.bf16 %v4042_v38, %v4039_v41 }
  0x74   :  { %5251 = vmatprep.subr.bf16.mxu0 %v5250_v46  ;;  %v6400_v46 = vsub.f32 %v6324_v21, %v4042_v38  ;;  %v5558_v41 = vmov 0   ;;  %v6491_v38 = vpack.c.bf16 %v4048_v0, %v4045_v63 }
  0x75   :  { %5297 = vmatpush3.bf16.msra.mxu1 %v6232_v16  ;;  %5556 = vset.pattern.permute.xlu0 %v5558_v41 }
  0x76   :  { %2385 = vmatmul.mubr.f32.vlgmr.msra.gmra.mrb[8].mxu0 %v5716_v6  ;;  %5299 = vmatprep.subr.bf16.mxu1 %v5298_v14 }
  0x77   :  { %5253 = vmatpush1.bf16.msra.mxu0 %v5252_v15  ;;  %2390 = vmatprep.mubr.f32.mxu0 %v5557_v3  ;;  %v6416_v15 = vsub.f32 %v6349_v44, %v3458_v20 }
  0x78   :  { %4927 = vmatmul.mubr.f32.vlgmr.msra.gmra.mrb[4].mxu1 %v5730_v27  ;;  %5255 = vmatprep.subr.bf16.mxu0 %v5254_v43  ;;  %v6420_v43 = vpack.c.bf16 %v3450_v8, %v3446_v28 }
  0x79   :  { %5301 = vmatpush3.bf16.msra.mxu1 %v5298_v14  ;;  %4937 = vmatprep.mubr.f32.mxu1 %v5656_v40  ;;  %v3456_v14 = vand.u32 4294901760, %v6385_v59  ;;  %v3579_v10 = vand.u32 4294901760, %v6416_v15 }
  0x7a   :  { %2396 = vmatmul.mubr.f32.gmra.mrb[10].mxu0 %v5730_v27  ;;  %5303 = vmatprep.subr.bf16.mxu1 %v5302_v11 }
  0x7b   :  { %5257 = vmatpush1.bf16.msra.mxu0 %v5256_v30  ;;  %2506 = vmatprep.mubr.f32.mxu0 %v5557_v3  ;;  %v6427_v30 = vsub.f32 %v6368_v48, %v4045_v63 }
  0x7c   :  { %5259 = vmatprep.subr.bf16.mxu0 %v5258_v31  ;;  %v6430_v31 = vsub.f32 %v6373_v25, %v4048_v0 }
  0x7d   :  { %5305 = vmatpush3.bf16.msra.mxu1 %v5302_v11  ;;  %v4130_v11 = vand.u32 4294901760, %v6397_v35  ;;  %v4144_v24 = vand.u32 4294901760, %v6427_v30 }
  0x7e   :  { %2508 = vmatmul.mubr.f32.vlgmr.msra.gmra.mrb[8].mxu0 %v5656_v40  ;;  %5307 = vmatprep.subr.bf16.mxu1 %v5306_v62  ;;  %v4151_v21 = vand.u32 4294901760, %v6430_v31 }
  0x7f   :  { %5261 = vmatpush1.bf16.msra.mxu0 %v5260_v47  ;;  %2513 = vmatprep.mubr.f32.mxu0 %v5557_v3  ;;  %v6438_v47 = vsub.f32 %v6390_v34, %v3460_v19  ;;  %v4145_v48 = vsub.f32 %v6427_v30, %v4144_v24 }
  0x80   :  { %4938 = vmatmul.mubr.f32.vlgmr.msra.gmra.mrb[4].mxu1 %v5677_v50  ;;  %5263 = vmatprep.subr.bf16.mxu0 %v5262_v56  ;;  %v3549_v56 = vand.u32 4294901760, %v6404_v51  ;;  %v4152_v25 = vsub.f32 %v6430_v31, %v4151_v21 }
  0x81   :  { %5309 = vmatpush3.bf16.msra.mxu1 %v5306_v62  ;;  %4948 = vmatprep.mubr.f32.mxu1 %v5670_v45  ;;  %v6435_v62 = vsub.f32 %v6385_v59, %v3456_v14  ;;  %v3585_v23 = vand.u32 4294901760, %v6438_v47 }
  0x82   :  { %2515 = vmatmul.mubr.f32.gmra.mrb[10].mxu0 %v5677_v50  ;;  %5311 = vmatprep.subr.bf16.mxu1 %v5310_v49  ;;  %v3550_v28 = vsub.f32 %v6404_v51, %v3549_v56 }
  0x83   :  { %5265 = vmatpush1.bf16.msra.mxu0 %v5264_v7  ;;  %2601 = vmatprep.mubr.f32.mxu0 %v5557_v3  ;;  %v3556_v7 = vsub.f32 %v6378_v29, %v3555_v58  ;;  %v3573_v32 = vand.u32 4294901760, %v6435_v62  ;;  %v3586_v59 = vsub.f32 %v6438_v47, %v3585_v23  ;;  %v5360_v41 = vpack.c.bf16 %v6438_v47, %v6435_v62 }
  0x84   :  { %5267 = vmatprep.subr.bf16.mxu0 %v6164_v18 }
  0x85   :  { %5313 = vmatpush3.bf16.msra.mxu1 %v5310_v49  ;;  %v3561_v49 = vand.u32 4294901760, %v6407_v26  ;;  %v3557_v44 = vand.u32 4294901760, %v3556_v7  ;;  %v4153_v7 = vand.u32 4294901760, %v4152_v25 }
  0x86   :  { %2604 = vmatmul.mubr.f32.vlgmr.msra.gmra.mrb[8].mxu0 %v5670_v45  ;;  %5315 = vmatprep.subr.bf16.mxu1 %v6198_v13 }
  0x87   :  { %5269 = vmatpush1.bf16.msra.mxu0 %v6200_v42  ;;  %2609 = vmatprep.mubr.f32.mxu0 %v5557_v3  ;;  %v3562_v8 = vsub.f32 %v6407_v26, %v3561_v49 }
  0x88   :  { %4949 = vmatmul.mubr.f32.vlgmr.msra.gmra.mrb[4].mxu1 %v5692_v57  ;;  %5271 = vmatprep.subr.bf16.mxu0 %v6202_v37 }
  0x89   :  { %5317 = vmatpush3.bf16.msra.mxu1 %v6198_v13  ;;  %4959 = vmatprep.mubr.f32.mxu1 %v5684_v53 }
  0x8a   :  { %2612 = vmatmul.mubr.f32.gmra.mrb[10].mxu0 %v5692_v57  ;;  %5319 = vmatprep.subr.bf16.mxu1 %v6232_v16 }
  0x8b   :  { %5273 = vmatpush1.bf16.msra.mxu0 %v6234_v5  ;;  %2690 = vmatprep.mubr.f32.mxu0 %v5557_v3 }
  0x8c   :  { %5275 = vmatprep.subr.bf16.mxu0 %v5274_v9  ;;  %v3567_v9 = vand.u32 4294901760, %v6413_v33 }
  0x8d   :  { %5321 = vmatpush3.bf16.msra.mxu1 %v6232_v16 }
  0x8e   :  { %2694 = vmatmul.mubr.f32.vlgmr.msra.gmra.mrb[8].mxu0 %v5684_v53  ;;  %5323 = vmatprep.subr.bf16.mxu1 %v5322_v2 }
  0x8f   :  { %5277 = vmatpush1.bf16.msra.mxu0 %v5276_v4  ;;  %2699 = vmatprep.mubr.f32.mxu0 %v5557_v3  ;;  %v4131_v4 = vsub.f32 %v6397_v35, %v4130_v11 }
  0x90   :  { %4960 = vmatmul.mubr.f32.vlgmr.msra.gmra.mrb[4].mxu1 %v5708_v1  ;;  %5279 = vmatprep.subr.bf16.mxu0 %v5278_v22  ;;  %v4572_v22 = vld [vmem:[%s6629_s2] sm:$0xff] }
  0x91   :  { %5325 = vmatpush3.bf16.msra.mxu1 %v5322_v2  ;;  %4970 = vmatprep.mubr.f32.mxu1 %v5656_v40  ;;  %v6456_v2 = vpack.c.bf16 %v3452_v55, %v3448_v12  ;;  %v4132_v12 = vand.u32 4294901760, %v4131_v4 }
  0x92   :  { %2703 = vmatmul.mubr.f32.gmra.mrb[10].mxu0 %v5708_v1  ;;  %5327 = vmatprep.subr.bf16.mxu1 %v5326_v61 }
  0x93   :  { %5281 = vmatpush1.bf16.msra.mxu0 %v5280_v60  ;;  %2797 = vmatprep.mubr.f32.mxu0 %v5557_v3  ;;  %v6493_v60 = vpack.c.bf16 %v3460_v19, %v3456_v14  ;;  %v4573_v14 = vld [vmem:[%s6629_s2 + $0x8] sm:$0xff] }
  0x94   :  { %5283 = vmatprep.subr.bf16.mxu0 %v6164_v18  ;;  %v4137_v18 = vand.u32 4294901760, %v6400_v46  ;;  %4576 = vperm.xlu0 %5556, %v4572_v22   ;;  %v3587_v22 = vand.u32 4294901760, %v3586_v59 }
  0x95   :  { %5329 = vmatpush3.bf16.msra.mxu1 %v5326_v61  ;;  %v3580_v61 = vsub.f32 %v6416_v15, %v3579_v10 }
  0x96   :  { %2799 = vmatmul.mubr.f32.vlgmr.msra.gmra.mrb[8].mxu0 %v5656_v40  ;;  %5331 = vmatprep.subr.bf16.mxu1 %v6198_v13 }
  0x97   :  { %5285 = vmatpush1.bf16.msra.mxu0 %v6200_v42  ;;  %2804 = vmatprep.mubr.f32.mxu0 %v5557_v3  ;;  %v3544_v42 = vsub.f32 %v6376_v52, %v3543_v17  ;;  %v3581_v0 = vand.u32 4294901760, %v3580_v61  ;;  %v5358_v61 = vpack.c.bf16 %v6416_v15, %v6413_v33 }
  0x98   :  { %4971 = vmatmul.mubr.f32.vlgmr.msra.gmra.mrb[4].mxu1 %v5677_v50  ;;  %5287 = vmatprep.subr.bf16.mxu0 %v6202_v37  ;;  %v6458_v37 = vpack.c.bf16 %v3458_v20, %v3454_v54  ;;  %v3563_v54 = vand.u32 4294901760, %v3562_v8  ;;  %v3574_v20 = vsub.f32 %v6435_v62, %v3573_v32 }
  0x99   :  { %5333 = vmatpush3.bf16.msra.mxu1 %v6198_v13  ;;  %4981 = vmatprep.mubr.f32.mxu1 %v5656_v40  ;;  %v4138_v13 = vsub.f32 %v6400_v46, %v4137_v18  ;;  %v3545_v36 = vand.u32 4294901760, %v3544_v42  ;;  %v4146_v42 = vand.u32 4294901760, %v4145_v48 }
  0x9a   :  { %2806 = vmatmul.mubr.f32.gmra.mrb[10].mxu0 %v5677_v50  ;;  %5335 = vmatprep.subr.bf16.mxu1 %v6232_v16 }
  0x9b   :  { %5289 = vmatpush1.bf16.msra.mxu0 %v6234_v5  ;;  %2884 = vmatprep.mubr.f32.mxu0 %v5557_v3  ;;  %v3568_v5 = vsub.f32 %v6413_v33, %v3567_v9  ;;  %v4139_v55 = vand.u32 4294901760, %v4138_v13  ;;  %v5346_v34 = vpack.c.bf16 %v3557_v44, %v3545_v36  ;;  %v3575_v13 = vand.u32 4294901760, %v3574_v20 }
  0x9c   :  { %5339 = vmatprep.subr.bf16.mxu0 %v6420_v43  ;;  %4581 = vperm.xlu0 %5556, %v4573_v14   ;;  %v5398_v8 = vpack.c.bf16 %v4153_v7, %v4146_v42  ;;  %v5354_v44 = vpack.c.bf16 %v6378_v29, %v6376_v52  ;;  %v5372_v52 = vpack.c.bf16 %v3561_v49, %v3549_v56 }
  0x9d   :  { %5337 = vmatpush3.bf16.msra.mxu1 %v6232_v16  ;;  %v3551_v16 = vand.u32 4294901760, %v3550_v28  ;;  %v3569_v63 = vand.u32 4294901760, %v3568_v5  ;;  %v5394_v19 = vpack.c.bf16 %v4139_v55, %v4132_v12  ;;  %v5352_v36 = vpack.c.bf16 %v3587_v22, %v3575_v13 }
  0x9e   :  { %2886 = vmatmul.mubr.f32.vlgmr.msra.gmra.mrb[8].mxu0 %v5656_v40  ;;  %5387 = vmatprep.subr.bf16.mxu1 %v6454_v39  ;;  %v5356_v5 = vpack.c.bf16 %v6407_v26, %v6404_v51  ;;  %v5370_v12 = vpack.c.bf16 %v3555_v58, %v3543_v17  ;;  %v5422_v29 = vpack.c.bf16 %v4151_v21, %v4144_v24 }
  0x9f   :  { %5341 = vmatpush1.bf16.msra.mxu0 %v6456_v2  ;;  %2891 = vmatprep.mubr.f32.mxu0 %v5557_v3  ;;  %v5348_v4 = vpack.c.bf16 %v3563_v54, %v3551_v16  ;;  %v5350_v28 = vpack.c.bf16 %v3581_v0, %v3569_v63 }
  0xa0   :  { %4982 = vmatmul.mubr.f32.vlgmr.msra.gmra.mrb[4].mxu1 %v5677_v50  ;;  %5343 = vmatprep.subr.bf16.mxu0 %v6458_v37 }
  0xa1   :  { %5389 = vmatpush3.bf16.msra.mxu1 %v6454_v39  ;;  %4992 = vmatprep.mubr.f32.mxu1 %v5716_v6 }
  0xa2   :  { %2893 = vmatmul.mubr.f32.gmra.mrb[10].mxu0 %v5677_v50  ;;  %5391 = vmatprep.subr.bf16.mxu1 %v6491_v38 }
  0xa3   :  { %5345 = vmatpush1.bf16.msra.mxu0 %v6493_v60  ;;  %3518 = vmatprep.mubr.f32.mxu0 %v5557_v3 }
  0xa4   :  { %5347 = vmatprep.subr.bf16.mxu0 %v5346_v34 }
  0xa5   :  { %5393 = vmatpush3.bf16.msra.mxu1 %v6491_v38 }
  0xa6   :  { %3524 = vmatmul.mubr.f32.vlgmr.msra.gmra.mrb[12].mxu0 %v5716_v6  ;;  %5395 = vmatprep.subr.bf16.mxu1 %v5394_v19  ;;  %v5402_v6 = vpack.c.bf16 %v6400_v46, %v6397_v35  ;;  %v5376_v35 = vpack.c.bf16 %v3585_v23, %v3573_v32 }
  0xa7   :  { %5349 = vmatpush1.bf16.msra.mxu0 %v5348_v4  ;;  %3529 = vmatprep.mubr.f32.mxu0 %v5557_v3 }
  0xa8   :  { %4993 = vmatmul.mubr.f32.vlgmr.msra.gmra.mrb[6].mxu1 %v5730_v27  ;;  %5351 = vmatprep.subr.bf16.mxu0 %v5350_v28 }
  0xa9   :  { %5397 = vmatpush3.bf16.msra.mxu1 %v5394_v19  ;;  %5003 = vmatprep.mubr.f32.mxu1 %v5656_v40 }
  0xaa   :  { %3535 = vmatmul.mubr.f32.gmra.mrb[14].mxu0 %v5730_v27  ;;  %5399 = vmatprep.subr.bf16.mxu1 %v5398_v8  ;;  %v5406_v27 = vpack.c.bf16 %v6430_v31, %v6427_v30 }
  0xab   :  { %5353 = vmatpush1.bf16.msra.mxu0 %v5352_v36  ;;  %3645 = vmatprep.mubr.f32.mxu0 %v5557_v3 }
  0xac   :  { %5355 = vmatprep.subr.bf16.mxu0 %v5354_v44 }
  0xad   :  { %5401 = vmatpush3.bf16.msra.mxu1 %v5398_v8 }
  0xae   :  { %3647 = vmatmul.mubr.f32.vlgmr.msra.gmra.mrb[12].mxu0 %v5656_v40  ;;  %5403 = vmatprep.subr.bf16.mxu1 %v5402_v6 }
  0xaf   :  { %5357 = vmatpush1.bf16.msra.mxu0 %v5356_v5  ;;  %3652 = vmatprep.mubr.f32.mxu0 %v5557_v3 }
  0xb0   :  { %5004 = vmatmul.mubr.f32.vlgmr.msra.gmra.mrb[6].mxu1 %v5677_v50  ;;  %5359 = vmatprep.subr.bf16.mxu0 %v5358_v61 }
  0xb1   :  { %5405 = vmatpush3.bf16.msra.mxu1 %v5402_v6  ;;  %5014 = vmatprep.mubr.f32.mxu1 %v5670_v45 }
  0xb2   :  { %3654 = vmatmul.mubr.f32.gmra.mrb[14].mxu0 %v5677_v50  ;;  %5407 = vmatprep.subr.bf16.mxu1 %v5406_v27 }
  0xb3   :  { %5361 = vmatpush1.bf16.msra.mxu0 %v5360_v41  ;;  %3740 = vmatprep.mubr.f32.mxu0 %v5557_v3 }
  0xb4   :  { %5363 = vmatprep.subr.bf16.mxu0 %v6420_v43 }
  0xb5   :  { %5409 = vmatpush3.bf16.msra.mxu1 %v5406_v27 }
  0xb6   :  { %3743 = vmatmul.mubr.f32.vlgmr.msra.gmra.mrb[12].mxu0 %v5670_v45  ;;  %5411 = vmatprep.subr.bf16.mxu1 %v6454_v39  ;;  %v5418_v45 = vpack.c.bf16 %v4137_v18, %v4130_v11 }
  0xb7   :  { %5365 = vmatpush1.bf16.msra.mxu0 %v6456_v2  ;;  %3748 = vmatprep.mubr.f32.mxu0 %v5557_v3 }
  0xb8   :  { %5015 = vmatmul.mubr.f32.vlgmr.msra.gmra.mrb[6].mxu1 %v5692_v57  ;;  %5367 = vmatprep.subr.bf16.mxu0 %v6458_v37 }
  0xb9   :  { %5413 = vmatpush3.bf16.msra.mxu1 %v6454_v39  ;;  %5025 = vmatprep.mubr.f32.mxu1 %v5684_v53 }
  0xba   :  { %3751 = vmatmul.mubr.f32.gmra.mrb[14].mxu0 %v5692_v57  ;;  %5415 = vmatprep.subr.bf16.mxu1 %v6491_v38  ;;  %v5374_v57 = vpack.c.bf16 %v3579_v10, %v3567_v9 }
  0xbb   :  { %5369 = vmatpush1.bf16.msra.mxu0 %v6493_v60  ;;  %3829 = vmatprep.mubr.f32.mxu0 %v5557_v3 }
  0xbc   :  { %5371 = vmatprep.subr.bf16.mxu0 %v5370_v12 }
  0xbd   :  { %5417 = vmatpush3.bf16.msra.mxu1 %v6491_v38 }
  0xbe   :  { %3833 = vmatmul.mubr.f32.vlgmr.msra.gmra.mrb[12].mxu0 %v5684_v53  ;;  %5419 = vmatprep.subr.bf16.mxu1 %v5418_v45 }
  0xbf   :  { %5373 = vmatpush1.bf16.msra.mxu0 %v5372_v52  ;;  %3838 = vmatprep.mubr.f32.mxu0 %v5557_v3 }
  0xc0   :  { %5026 = vmatmul.mubr.f32.vlgmr.msra.gmra.mrb[6].mxu1 %v5708_v1  ;;  %5375 = vmatprep.subr.bf16.mxu0 %v5374_v57 }
  0xc1   :  { %5421 = vmatpush3.bf16.msra.mxu1 %v5418_v45  ;;  %5036 = vmatprep.mubr.f32.mxu1 %v5656_v40 }
  0xc2   :  { %3842 = vmatmul.mubr.f32.gmra.mrb[14].mxu0 %v5708_v1  ;;  %5423 = vmatprep.subr.bf16.mxu1 %v5422_v29 }
  0xc3   :  { %5377 = vmatpush1.bf16.msra.mxu0 %v5376_v35  ;;  %3936 = vmatprep.mubr.f32.mxu0 %v5557_v3 }
  0xc4   :  { %5379 = vmatprep.subr.bf16.mxu0 %v6420_v43 }
  0xc5   :  { %5425 = vmatpush3.bf16.msra.mxu1 %v5422_v29 }
  0xc6   :  { %3938 = vmatmul.mubr.f32.vlgmr.msra.gmra.mrb[12].mxu0 %v5656_v40  ;;  %5427 = vmatprep.subr.bf16.mxu1 %v6454_v39 }
  0xc7   :  { %5381 = vmatpush1.bf16.msra.mxu0 %v6456_v2  ;;  %3943 = vmatprep.mubr.f32.mxu0 %v5557_v3 }
  0xc8   :  { %5037 = vmatmul.mubr.f32.vlgmr.msra.gmra.mrb[6].mxu1 %v5677_v50  ;;  %5383 = vmatprep.subr.bf16.mxu0 %v6458_v37 }
  0xc9   :  { %5429 = vmatpush3.bf16.msra.mxu1 %v6454_v39  ;;  %5047 = vmatprep.mubr.f32.mxu1 %v5656_v40 }
  0xca   :  { %3945 = vmatmul.mubr.f32.gmra.mrb[14].mxu0 %v5677_v50  ;;  %5431 = vmatprep.subr.bf16.mxu1 %v6491_v38 }
  0xcb   :  { %5385 = vmatpush1.bf16.msra.mxu0 %v6493_v60  ;;  %4023 = vmatprep.mubr.f32.mxu0 %v5557_v3 }
  0xcd   :  { %5433 = vmatpush3.bf16.msra.mxu1 %v6491_v38 }
  0xce   :  { %4025 = vmatmul.mubr.f32.vlgmr.msra.gmra.mrb[12].mxu0 %v5656_v40 }
  0xcf   :  { %4030 = vmatprep.mubr.f32.mxu0 %v5557_v3 }
  0xd0   :  { %5048 = vmatmul.mubr.f32.vlgmr.msra.gmra.mrb[6].mxu1 %v5677_v50 }
  0xd2   :  { %4032 = vmatmul.mubr.f32.gmra.mrb[14].mxu0 %v5677_v50 }
 0x111   :  { %v615_v53 = vpop.f32.mrb[0].mxu0 }
 0x112   :  { %v617_v1 = vpop.f32.mrb[1].mxu0 }
 0x113   :  { %v4851_v46 = vpop.f32.mrb[0].mxu1  ;;  %v4577_v38 = vpop.permute.xlu0 %4576 }
 0x114   :  { %v1145_v51 = vpop.f32.mrb[1].mxu1 }
 0x115   :  { %v622_v26 = vpop.f32.mrb[2].mxu0 }
 0x116   :  { %v624_v33 = vpop.f32.mrb[3].mxu0 }
 0x11b   :  { %v4582_v54 = vpop.permute.xlu0 %4581 }
 0x141   :  { %v1748_v15 = vpop.f32.mrb[4].mxu0 }
 0x142   :  { %v2288_v17 = vmax.f32 %v615_v53, %v1748_v15  ;;  %v1750_v58 = vpop.f32.mrb[5].mxu0 }
 0x143   :  { %v4917_v43 = vpop.f32.mrb[2].mxu1  ;;  %v2289_v11 = vmax.f32 %v617_v1, %v1750_v58 }
 0x144   :  { %v2293_v18 = vmax.f32 %v4851_v46, %v4917_v43  ;;  %v2278_v30 = vpop.f32.mrb[3].mxu1 }
 0x145   :  { %v2290_v40 = vmax.f32 %v1145_v51, %v2278_v30  ;;  %v1755_v31 = vpop.f32.mrb[6].mxu0 }
 0x146   :  { %v2291_v3 = vmax.f32 %v622_v26, %v1755_v31  ;;  %v1757_v62 = vpop.f32.mrb[7].mxu0 }
 0x147   :  { %v2292_v47 = vmax.f32 %v624_v33, %v1757_v62 }
 0x171   :  { %v2887_v56 = vpop.f32.mrb[8].mxu0 }
 0x172   :  { %v3427_v50 = vmax.f32 %v2288_v17, %v2887_v56  ;;  %v2889_v49 = vpop.f32.mrb[9].mxu0 }
 0x173   :  { %v4983_v9 = vpop.f32.mrb[4].mxu1  ;;  %v3428_v10 = vmax.f32 %v2289_v11, %v2889_v49 }
 0x174   :  { %v3432_v39 = vmax.f32 %v2293_v18, %v4983_v9  ;;  %v3417_v2 = vpop.f32.mrb[5].mxu1 }
 0x175   :  { %v3429_v37 = vmax.f32 %v2290_v40, %v3417_v2  ;;  %v2894_v24 = vpop.f32.mrb[10].mxu0 }
 0x176   :  { %v3430_v21 = vmax.f32 %v2291_v3, %v2894_v24  ;;  %v2896_v32 = vpop.f32.mrb[11].mxu0 }
 0x177   :  { %v3431_v23 = vmax.f32 %v2292_v47, %v2896_v32 }
 0x1a1   :  { %v4026_v60 = vpop.f32.mrb[12].mxu0 }
 0x1a2   :  { %v4566_v55 = vmax.f32 %v3427_v50, %v4026_v60  ;;  %v4028_v48 = vpop.f32.mrb[13].mxu0 }
 0x1a3   :  { %v5049_v25 = vpop.f32.mrb[6].mxu1  ;;  %v4567_v16 = vmax.f32 %v3428_v10, %v4028_v48 }
 0x1a4   :  { %v4584_v20 = vadd.f32 %v4577_v38, %v4566_v55  ;;  %v4571_v59 = vmax.f32 %v3432_v39, %v5049_v25  ;;  %v4556_v34 = vpop.f32.mrb[7].mxu1 }
 0x1a5   :  { %v4585_v63 = vadd.f32 %v4577_v38, %v4567_v16  ;;  %v4568_v0 = vmax.f32 %v3429_v37, %v4556_v34  ;;  %v4033_v14 = vpop.f32.mrb[14].mxu0 }
 0x1a6   :  { %v4590_v19 = vmax.f32 %v4584_v20, 0.0  ;;  %v4589_v42 = vadd.f32 %v4582_v54, %v4571_v59  ;;  %v4569_v7 = vmax.f32 %v3430_v21, %v4033_v14  ;;  %v4035_v4 = vpop.f32.mrb[15].mxu0 }
 0x1a7   :  { %v4591_v13 = vmax.f32 %v4585_v63, 0.0  ;;  %v4586_v22 = vadd.f32 %v4577_v38, %v4568_v0  ;;  %v4570_v28 = vmax.f32 %v3431_v23, %v4035_v4 }
 0x1a8   :  { %4596 = vst [vmem:[%s6630_s3] sm:$0xff] %v4590_v19  ;;  %v4595_v8 = vmax.f32 %v4589_v42, 0.0  ;;  %v4587_v36 = vadd.f32 %v4582_v54, %v4569_v7 }
 0x1a9   :  { %4597 = vst [vmem:[%s6630_s3 + $0x8] sm:$0xff] %v4591_v13  ;;  %v4592_v44 = vmax.f32 %v4586_v22, 0.0  ;;  %v4588_v6 = vadd.f32 %v4582_v54, %v4570_v28 }
 0x1aa   :  { %4601 = vst [vmem:[%s6630_s3 + $0x28] sm:$0xff] %v4595_v8  ;;  %v4593_v5 = vmax.f32 %v4587_v36, 0.0 }
 0x1ab   :  { %4598 = vst [vmem:[%s6630_s3 + $0x10] sm:$0xff] %v4592_v44  ;;  %v4594_v61 = vmax.f32 %v4588_v6, 0.0 }
 0x1ac   :  { %4599 = vst [vmem:[%s6630_s3 + $0x18] sm:$0xff] %v4593_v5 }
 0x1ad   :  { %4600 = vst [vmem:[%s6630_s3 + $0x20] sm:$0xff] %v4594_v61 }

// kernel: cnn_new_forward.5
= control target key start
LH: loop header
LB: loop body
LE: loop exit
PB: predicated region body
PF: predicated region fallthrough
CT: control target
= control target key end

     0   :  { %s3969_s0 = inlined_call_operand.vmem [shape: f32[512,128], index: 0, kind: input, shape index: {}]   ;;  %s3970_s1 = inlined_call_operand.vmem [shape: f32[10,512], index: 1, kind: input, shape index: {}]   ;;  %s3971_s2 = inlined_call_operand.vmem [shape: f32[10,1], index: 2, kind: input, shape index: {}]   ;;  %s3972_s3 = inlined_call_operand.vmem [shape: f32[10,128], index: 3, kind: output, shape index: {}]  }
   0x1   :  { %v38_v0 = vld [vmem:[%s3969_s0 + $0x80] sm:$0xff]  ;;  %v39_v1 = vld [vmem:[%s3969_s0 + $0x88] sm:$0xff]  ;;  %v40_v7 = vld [vmem:[%s3969_s0 + $0x90] sm:$0xff] }
   0x2   :  { %v22_v2 = vld [vmem:[%s3969_s0] sm:$0xff]  ;;  %v147_v3 = vand.u32 4294901760, %v38_v0  ;;  %v150_v4 = vand.u32 4294901760, %v39_v1  ;;  %v23_v5 = vld [vmem:[%s3969_s0 + $0x8] sm:$0xff]  ;;  %v41_v8 = vld [vmem:[%s3969_s0 + $0x98] sm:$0xff]  ;;  %v153_v10 = vand.u32 4294901760, %v40_v7 }
   0x3   :  { %v99_v6 = vand.u32 4294901760, %v22_v2  ;;  %v102_v9 = vand.u32 4294901760, %v23_v5  ;;  %v156_v11 = vand.u32 4294901760, %v41_v8  ;;  %v24_v12 = vld [vmem:[%s3969_s0 + $0x10] sm:$0xff]  ;;  %v25_v13 = vld [vmem:[%s3969_s0 + $0x18] sm:$0xff]  ;;  %v42_v18 = vld [vmem:[%s3969_s0 + $0xa0] sm:$0xff] }
   0x4   :  { %v2827_v14 = vpack.c.bf16 %v150_v4, %v147_v3  ;;  %v105_v16 = vand.u32 4294901760, %v24_v12  ;;  %v108_v17 = vand.u32 4294901760, %v25_v13  ;;  %v43_v19 = vld [vmem:[%s3969_s0 + $0xa8] sm:$0xff]  ;;  %v26_v23 = vld [vmem:[%s3969_s0 + $0x20] sm:$0xff]  ;;  %v2850_v25 = vsub.f32 %v40_v7, %v153_v10  ;;  %v44_v37 = vld [vmem:[%s3969_s0 + $0xb0] sm:$0xff] }
   0x5   :  { %v2829_v15 = vsub.f32 %v22_v2, %v99_v6  ;;  %v2837_v20 = vpack.c.bf16 %v102_v9, %v99_v6  ;;  %v2839_v21 = vsub.f32 %v23_v5, %v102_v9  ;;  %v2841_v22 = vpack.c.bf16 %v156_v11, %v153_v10  ;;  %v27_v24 = vld [vmem:[%s3969_s0 + $0x28] sm:$0xff]  ;;  %v45_v42 = vld [vmem:[%s3969_s0 + $0xb8] sm:$0xff]  ;;  %v28_v55 = vld [vmem:[%s3969_s0 + $0x30] sm:$0xff] }
   0x6   :  { %2397 = vmatprep.subr.bf16.mxu0 %v2827_v14  ;;  %v2852_v26 = vsub.f32 %v41_v8, %v156_v11  ;;  %v2854_v27 = vpack.c.bf16 %v108_v17, %v105_v16  ;;  %v2856_v28 = vsub.f32 %v24_v12, %v105_v16  ;;  %v159_v29 = vand.u32 4294901760, %v42_v18  ;;  %v29_v56 = vld [vmem:[%s3969_s0 + $0x38] sm:$0xff]  ;;  %v46_v5 = vld [vmem:[%s3969_s0 + $0xc0] sm:$0xff]  ;;  %v47_v6 = vld [vmem:[%s3969_s0 + $0xc8] sm:$0xff] }
   0x7   :  { %2399 = vmatpush3.bf16.msra.mxu0 %v2837_v20  ;;  %v162_v30 = vand.u32 4294901760, %v43_v19  ;;  %v2859_v31 = vsub.f32 %v38_v0, %v147_v3  ;;  %v2861_v32 = vsub.f32 %v39_v1, %v150_v4  ;;  %v111_v33 = vand.u32 4294901760, %v26_v23  ;;  %v30_v11 = vld [vmem:[%s3969_s0 + $0x40] sm:$0xff] }
   0x8   :  { %2401 = vmatprep.subr.bf16.mxu0 %v2841_v22  ;;  %v114_v34 = vand.u32 4294901760, %v27_v24  ;;  %v3989_v35 = vand.u32 4294901760, %v2829_v15  ;;  %v3988_v36 = vand.u32 4294901760, %v2839_v21  ;;  %v2869_v38 = vsub.f32 %v25_v13, %v108_v17 }
   0x9   :  { %v2871_v39 = vpack.c.bf16 %v162_v30, %v159_v29  ;;  %v2873_v40 = vsub.f32 %v42_v18, %v159_v29  ;;  %v3994_v41 = vand.u32 4294901760, %v2859_v31  ;;  %v2879_v43 = vsub.f32 %v43_v19, %v162_v30  ;;  %v31_v29 = vld [vmem:[%s3969_s0 + $0x48] sm:$0xff] }
   0xa   :  { %v3991_v44 = vand.u32 4294901760, %v2861_v32  ;;  %v2882_v45 = vpack.c.bf16 %v114_v34, %v111_v33  ;;  %v2884_v46 = vsub.f32 %v26_v23, %v111_v33  ;;  %v229_v48 = vsub.f32 %v2829_v15, %v3989_v35 }
   0xb   :  { %2403 = vmatpush3.bf16.msra.mxu0 %v2854_v27  ;;  %v341_v47 = vsub.f32 %v2859_v31, %v3994_v41  ;;  %v236_v49 = vsub.f32 %v2839_v21, %v3988_v36  ;;  %v165_v50 = vand.u32 4294901760, %v44_v37  ;;  %v168_v52 = vand.u32 4294901760, %v45_v42 }
   0xc   :  { %2405 = vmatprep.subr.bf16.mxu0 %v2871_v39  ;;  %v348_v51 = vsub.f32 %v2861_v32, %v3991_v44  ;;  %v3986_v53 = vand.u32 4294901760, %v2850_v25  ;;  %v3985_v54 = vand.u32 4294901760, %v2852_v26  ;;  %v2908_v58 = vsub.f32 %v27_v24, %v114_v34 }
   0xd   :  { %v342_v57 = vand.u32 4294901760, %v341_v47  ;;  %v230_v59 = vand.u32 4294901760, %v229_v48  ;;  %v237_v60 = vand.u32 4294901760, %v236_v49  ;;  %v2910_v62 = vpack.c.bf16 %v168_v52, %v165_v50 }
   0xe   :  { %v349_v61 = vand.u32 4294901760, %v348_v51  ;;  %v2912_v63 = vsub.f32 %v44_v37, %v165_v50  ;;  %v355_v0 = vsub.f32 %v2850_v25, %v3986_v53  ;;  %v362_v2 = vsub.f32 %v2852_v26, %v3985_v54 }
   0xf   :  { %2407 = vmatpush3.bf16.msra.mxu0 %v2882_v45  ;;  %v2430_v1 = vpack.c.bf16 %v237_v60, %v230_v59  ;;  %v117_v3 = vand.u32 4294901760, %v28_v55  ;;  %v120_v4 = vand.u32 4294901760, %v29_v56  ;;  %v3984_v9 = vand.u32 4294901760, %v2856_v28 }
  0x10   :  { %v2428_v7 = vpack.c.bf16 %v349_v61, %v342_v57  ;;  %2409 = vmatprep.subr.bf16.mxu0 %v2910_v62  ;;  %v356_v8 = vand.u32 4294901760, %v355_v0  ;;  %v3981_v10 = vand.u32 4294901760, %v2869_v38  ;;  %v2933_v12 = vsub.f32 %v45_v42, %v168_v52  ;;  %v49_v57 = vld [vmem:[%s3969_s0 + $0xd8] sm:$0xff] }
  0x11   :  { %v363_v13 = vand.u32 4294901760, %v362_v2  ;;  %v2935_v16 = vpack.c.bf16 %v120_v4, %v117_v3  ;;  %v2937_v17 = vsub.f32 %v28_v55, %v117_v3  ;;  %v243_v18 = vsub.f32 %v2856_v28, %v3984_v9 }
  0x12   :  { %2429 = vmatprep.subr.bf16.mxu1 %v2428_v7  ;;  %v250_v19 = vsub.f32 %v2869_v38, %v3981_v10  ;;  %v171_v23 = vand.u32 4294901760, %v46_v5  ;;  %v174_v24 = vand.u32 4294901760, %v47_v6  ;;  %v3979_v33 = vand.u32 4294901760, %v2873_v40 }
  0x13   :  { %2431 = vmatpush3.bf16.msra.mxu1 %v2430_v1  ;;  %v2432_v30 = vpack.c.bf16 %v363_v13, %v356_v8  ;;  %2411 = vmatpush3.bf16.msra.mxu0 %v2935_v16  ;;  %v3978_v34 = vand.u32 4294901760, %v2879_v43  ;;  %v123_v37 = vand.u32 4294901760, %v30_v11  ;;  %v2951_v42 = vsub.f32 %v29_v56, %v120_v4  ;;  %v48_v56 = vld [vmem:[%s3969_s0 + $0xd0] sm:$0xff] }
  0x14   :  { %v244_v47 = vand.u32 4294901760, %v243_v18  ;;  %v251_v48 = vand.u32 4294901760, %v250_v19  ;;  %v2953_v49 = vpack.c.bf16 %v174_v24, %v171_v23  ;;  %v2955_v50 = vsub.f32 %v46_v5, %v171_v23  ;;  %v32_v1 = vld [vmem:[%s3969_s0 + $0x50] sm:$0xff]  ;;  %v33_v18 = vld [vmem:[%s3969_s0 + $0x58] sm:$0xff] }
  0x15   :  { %2433 = vmatprep.subr.bf16.mxu1 %v2432_v30  ;;  %v369_v51 = vsub.f32 %v2873_v40, %v3979_v33  ;;  %v376_v52 = vsub.f32 %v2879_v43, %v3978_v34  ;;  %v126_v55 = vand.u32 4294901760, %v31_v29  ;;  %v2970_v60 = vsub.f32 %v47_v6, %v174_v24 }
  0x16   :  { %v2434_v59 = vpack.c.bf16 %v251_v48, %v244_v47  ;;  %2413 = vmatprep.subr.bf16.mxu0 %v2953_v49  ;;  %v3976_v61 = vand.u32 4294901760, %v2884_v46  ;;  %v3975_v0 = vand.u32 4294901760, %v2908_v58  ;;  %v2979_v5 = vsub.f32 %v30_v11, %v123_v37 }
  0x17   :  { %v370_v2 = vand.u32 4294901760, %v369_v51  ;;  %v377_v3 = vand.u32 4294901760, %v376_v52  ;;  %v2977_v4 = vpack.c.bf16 %v126_v55, %v123_v37  ;;  %v177_v8 = vand.u32 4294901760, %v48_v56 }
  0x18   :  { %2435 = vmatpush3.bf16.msra.mxu1 %v2434_v59  ;;  %v257_v6 = vsub.f32 %v2884_v46, %v3976_v61  ;;  %v264_v7 = vsub.f32 %v2908_v58, %v3975_v0  ;;  %v180_v13 = vand.u32 4294901760, %v49_v57  ;;  %v3974_v11 = vand.u32 4294901760, %v2912_v63 }
  0x19   :  { %v2436_v19 = vpack.c.bf16 %v377_v3, %v370_v2  ;;  %2415 = vmatpush3.bf16.msra.mxu0 %v2977_v4  ;;  %v3973_v23 = vand.u32 4294901760, %v2933_v12  ;;  %v129_v24 = vand.u32 4294901760, %v32_v1  ;;  %v2993_v30 = vsub.f32 %v31_v29, %v126_v55  ;;  %v50_v29 = vld [vmem:[%s3969_s0 + $0xe0] sm:$0xff]  ;;  %v51_v55 = vld [vmem:[%s3969_s0 + $0xe8] sm:$0xff] }
  0x1a   :  { %v258_v37 = vand.u32 4294901760, %v257_v6  ;;  %v265_v47 = vand.u32 4294901760, %v264_v7  ;;  %v2995_v48 = vpack.c.bf16 %v180_v13, %v177_v8  ;;  %v2997_v51 = vsub.f32 %v48_v56, %v177_v8  ;;  %v34_v8 = vld [vmem:[%s3969_s0 + $0x60] sm:$0xff] }
  0x1b   :  { %2437 = vmatprep.subr.bf16.mxu1 %v2436_v19  ;;  %v383_v52 = vsub.f32 %v2912_v63, %v3974_v11  ;;  %v390_v59 = vsub.f32 %v2933_v12, %v3973_v23  ;;  %v132_v2 = vand.u32 4294901760, %v33_v18  ;;  %v3012_v56 = vsub.f32 %v49_v57, %v180_v13 }
  0x1c   :  { %4077 = vst [vmem:[#allocation2_spill] sm:$0xff] %v2995_v48  ;;  %v2438_v3 = vpack.c.bf16 %v265_v47, %v258_v37  ;;  %2417 = vmatprep.subr.bf16.mxu0 %v2995_v48  ;;  %v3977_v6 = vand.u32 4294901760, %v2937_v17  ;;  %v3980_v7 = vand.u32 4294901760, %v2951_v42  ;;  %v3021_v0 = vsub.f32 %v32_v1, %v129_v24 }
  0x1d   :  { %v384_v19 = vand.u32 4294901760, %v383_v52  ;;  %v391_v23 = vand.u32 4294901760, %v390_v59  ;;  %v3019_v11 = vpack.c.bf16 %v132_v2, %v129_v24  ;;  %v183_v37 = vand.u32 4294901760, %v50_v29  ;;  %v35_v52 = vld [vmem:[%s3969_s0 + $0x68] sm:$0xff] }
  0x1e   :  { %2439 = vmatpush3.bf16.msra.mxu1 %v2438_v3  ;;  %v271_v57 = vsub.f32 %v2937_v17, %v3977_v6  ;;  %v278_v13 = vsub.f32 %v2951_v42, %v3980_v7  ;;  %v186_v47 = vand.u32 4294901760, %v51_v55  ;;  %v3983_v1 = vand.u32 4294901760, %v2955_v50 }
  0x1f   :  { %4078 = vst [vmem:[#allocation3_spill] sm:$0xff] %v3019_v11  ;;  %v2440_v59 = vpack.c.bf16 %v391_v23, %v384_v19  ;;  %2419 = vmatpush3.bf16.msra.mxu0 %v3019_v11  ;;  %v3982_v24 = vand.u32 4294901760, %v2970_v60  ;;  %v135_v3 = vand.u32 4294901760, %v34_v8  ;;  %v3035_v61 = vsub.f32 %v33_v18, %v132_v2  ;;  %v52_v18 = vld [vmem:[%s3969_s0 + $0xf0] sm:$0xff]  ;;  %v53_v2 = vld [vmem:[%s3969_s0 + $0xf8] sm:$0xff] }
  0x20   :  { %v272_v6 = vand.u32 4294901760, %v271_v57  ;;  %v279_v34 = vand.u32 4294901760, %v278_v13  ;;  %v3037_v33 = vpack.c.bf16 %v186_v47, %v183_v37  ;;  %v3039_v7 = vsub.f32 %v50_v29, %v183_v37 }
  0x21   :  { %2441 = vmatprep.subr.bf16.mxu1 %v2440_v59  ;;  %v397_v23 = vsub.f32 %v2955_v50, %v3983_v1  ;;  %v404_v19 = vsub.f32 %v2970_v60, %v3982_v24  ;;  %v138_v10 = vand.u32 4294901760, %v35_v52  ;;  %v3054_v29 = vsub.f32 %v51_v55, %v186_v47  ;;  %v36_v59 = vld [vmem:[%s3969_s0 + $0x70] sm:$0xff] }
  0x22   :  { %4079 = vst [vmem:[#allocation4_spill] sm:$0xff] %v3037_v33  ;;  %v2442_v57 = vpack.c.bf16 %v279_v34, %v272_v6  ;;  %2421 = vmatprep.subr.bf16.mxu0 %v3037_v33  ;;  %v3987_v13 = vand.u32 4294901760, %v2979_v5  ;;  %v3990_v37 = vand.u32 4294901760, %v2993_v30  ;;  %v3063_v54 = vsub.f32 %v34_v8, %v135_v3 }
  0x23   :  { %v398_v24 = vand.u32 4294901760, %v397_v23  ;;  %v405_v1 = vand.u32 4294901760, %v404_v19  ;;  %v3061_v9 = vpack.c.bf16 %v138_v10, %v135_v3  ;;  %v189_v6 = vand.u32 4294901760, %v52_v18  ;;  %v37_v23 = vld [vmem:[%s3969_s0 + $0x78] sm:$0xff] }
  0x24   :  { %2443 = vmatpush3.bf16.msra.mxu1 %v2442_v57  ;;  %v285_v34 = vsub.f32 %v2979_v5, %v3987_v13  ;;  %v292_v55 = vsub.f32 %v2993_v30, %v3990_v37  ;;  %v192_v47 = vand.u32 4294901760, %v53_v2  ;;  %v3993_v8 = vand.u32 4294901760, %v2997_v51 }
  0x25   :  { %4080 = vst [vmem:[#allocation5_spill] sm:$0xff] %v3061_v9  ;;  %v2444_v19 = vpack.c.bf16 %v405_v1, %v398_v24  ;;  %2423 = vmatpush3.bf16.msra.mxu0 %v3061_v9  ;;  %v3992_v3 = vand.u32 4294901760, %v3012_v56  ;;  %v141_v57 = vand.u32 4294901760, %v36_v59  ;;  %v3077_v53 = vsub.f32 %v35_v52, %v138_v10  ;;  %v15_v10 = vld [vmem:[%s3970_s1 + $0x8] sm:$0xff] }
  0x26   :  { %v286_v13 = vand.u32 4294901760, %v285_v34  ;;  %v293_v36 = vand.u32 4294901760, %v292_v55  ;;  %v3079_v35 = vpack.c.bf16 %v192_v47, %v189_v6  ;;  %v3081_v37 = vsub.f32 %v52_v18, %v189_v6  ;;  %v14_v6 = vld [vmem:[%s3970_s1] sm:$0xff] }
  0x27   :  { %2445 = vmatprep.subr.bf16.mxu1 %v2444_v19  ;;  %v411_v1 = vsub.f32 %v2997_v51, %v3993_v8  ;;  %v418_v24 = vsub.f32 %v3012_v56, %v3992_v3  ;;  %v144_v44 = vand.u32 4294901760, %v37_v23  ;;  %v3093_v34 = vsub.f32 %v53_v2, %v192_v47 }
  0x28   :  { %4081 = vst [vmem:[#allocation6_spill] sm:$0xff] %v3079_v35  ;;  %v2446_v52 = vpack.c.bf16 %v293_v36, %v286_v13  ;;  %2425 = vmatprep.subr.bf16.mxu0 %v3079_v35  ;;  %v3997_v18 = vand.u32 4294901760, %v3021_v0  ;;  %v3998_v55 = vand.u32 4294901760, %v3035_v61  ;;  %v3102_v41 = vsub.f32 %v36_v59, %v141_v57 }
  0x29   :  { %v412_v19 = vand.u32 4294901760, %v411_v1  ;;  %v419_v3 = vand.u32 4294901760, %v418_v24  ;;  %v3100_v8 = vpack.c.bf16 %v144_v44, %v141_v57  ;;  %v3110_v13 = vand.u32 4294901760, %v15_v10 }
  0x2a   :  { %2447 = vmatpush3.bf16.msra.mxu1 %v2446_v52  ;;  %v299_v36 = vsub.f32 %v3021_v0, %v3997_v18  ;;  %v306_v2 = vsub.f32 %v3035_v61, %v3998_v55  ;;  %v4001_v47 = vand.u32 4294901760, %v3039_v7  ;;  %v4007_v1 = vand.u32 4294901760, %v3054_v29 }
  0x2b   :  { %4082 = vst [vmem:[#allocation7_spill] sm:$0xff] %v3100_v8  ;;  %4083 = vst [vmem:[#allocation8_spill] sm:$0xff] %v3110_v13  ;;  %v2448_v35 = vpack.c.bf16 %v419_v3, %v412_v19  ;;  %2427 = vmatpush3.bf16.msra.mxu0 %v3100_v8  ;;  %v2460_v59 = vpack.c.bf16 %v2861_v32, %v2859_v31  ;;  %v3117_v57 = vand.u32 4294901760, %v14_v6  ;;  %450 = vmatprep.mubr.f32.mxu1 %v3110_v13 }
  0x2c   :  { %v300_v24 = vand.u32 4294901760, %v299_v36  ;;  %v307_v52 = vand.u32 4294901760, %v306_v2  ;;  %v3120_v18 = vsub.f32 %v15_v10, %v3110_v13  ;;  %v425_v55 = vsub.f32 %v3039_v7, %v4001_v47 }
  0x2d   :  { %2449 = vmatprep.subr.bf16.mxu1 %v2448_v35  ;;  %v432_v3 = vsub.f32 %v3054_v29, %v4007_v1  ;;  %2461 = vmatprep.subr.bf16.mxu0 %v2460_v59  ;;  %v3130_v19 = vsub.f32 %v14_v6, %v3117_v57  ;;  %v4006_v36 = vand.u32 4294901760, %v3063_v54  ;;  %v4008_v10 = vand.u32 4294901760, %v3077_v53 }
  0x2e   :  { %v3134_v2 = vsub.f32 %v37_v23, %v144_v44  ;;  %v2450_v8 = vpack.c.bf16 %v307_v52, %v300_v24  ;;  %v4009_v47 = vand.u32 4294901760, %v3120_v18  ;;  %v426_v9 = vand.u32 4294901760, %v425_v55 }
  0x2f   :  { %4084 = vst [vmem:[#allocation9_spill] sm:$0xff] %v3130_v19  ;;  %v433_v13 = vand.u32 4294901760, %v432_v3  ;;  %v4012_v35 = vand.u32 4294901760, %v3130_v19  ;;  %v313_v59 = vsub.f32 %v3063_v54, %v4006_v36  ;;  %v320_v6 = vsub.f32 %v3077_v53, %v4008_v10 }
  0x30   :  { %2451 = vmatpush3.bf16.msra.mxu1 %v2450_v8  ;;  %v197_v44 = vsub.f32 %v3120_v18, %v4009_v47  ;;  %v2462_v23 = vpack.c.bf16 %v2839_v21, %v2829_v15  ;;  %v4013_v55 = vand.u32 4294901760, %v3081_v37  ;;  %v4014_v24 = vand.u32 4294901760, %v3093_v34 }
  0x31   :  { %v2452_v52 = vpack.c.bf16 %v433_v13, %v426_v9  ;;  %v203_v3 = vsub.f32 %v3130_v19, %v4012_v35  ;;  %v314_v36 = vand.u32 4294901760, %v313_v59  ;;  %v321_v1 = vand.u32 4294901760, %v320_v6  ;;  %v19_v9 = vld [vmem:[%s3970_s1 + $0x28] sm:$0x3] }
  0x32   :  { %v198_v10 = vand.u32 4294901760, %v197_v44  ;;  %v439_v8 = vsub.f32 %v3081_v37, %v4013_v55  ;;  %v446_v47 = vsub.f32 %v3093_v34, %v4014_v24  ;;  %v4016_v33 = vand.u32 4294901760, %v3102_v41 }
  0x33   :  { %2453 = vmatprep.subr.bf16.mxu1 %v2452_v52  ;;  %v204_v13 = vand.u32 4294901760, %v203_v3  ;;  %v2454_v35 = vpack.c.bf16 %v321_v1, %v314_v36  ;;  %v2464_v59 = vpack.c.bf16 %v2852_v26, %v2850_v25  ;;  %v4015_v6 = vand.u32 4294901760, %v3134_v2  ;;  %v18_v1 = vld [vmem:[%s3970_s1 + $0x20] sm:$0x3] }
  0x34   :  { %199 = vmatprep.mubr.f32.mxu0 %v198_v10  ;;  %v440_v44 = vand.u32 4294901760, %v439_v8  ;;  %v447_v55 = vand.u32 4294901760, %v446_v47  ;;  %v327_v24 = vsub.f32 %v3102_v41, %v4016_v33  ;;  %v3173_v3 = vand.u32 4294901760, %v19_v9 }
  0x35   :  { %205 = vmatmul.mubr.f32.vlgmr.msra.gmra.mrb[0].mxu0 %v204_v13  ;;  %2455 = vmatpush3.bf16.msra.mxu1 %v2454_v35  ;;  %v334_v52 = vsub.f32 %v3134_v2, %v4015_v6  ;;  %v2466_v47 = vpack.c.bf16 %v2869_v38, %v2856_v28  ;;  %v2468_v35 = vpack.c.bf16 %v2879_v43, %v2873_v40  ;;  %v3185_v6 = vand.u32 4294901760, %v18_v1 }
  0x36   :  { %2463 = vmatpush3.bf16.msra.mxu0 %v2462_v23  ;;  %v2456_v36 = vpack.c.bf16 %v447_v55, %v440_v44  ;;  %v328_v10 = vand.u32 4294901760, %v327_v24  ;;  %v3183_v13 = vsub.f32 %v19_v9, %v3173_v3  ;;  %v2470_v23 = vpack.c.bf16 %v2908_v58, %v2884_v46 }
  0x37   :  { %2465 = vmatprep.subr.bf16.mxu0 %v2464_v59  ;;  %v335_v8 = vand.u32 4294901760, %v334_v52  ;;  %v2472_v55 = vpack.c.bf16 %v2933_v12, %v2912_v63  ;;  %v4085_v24 = vand.u32 4294901760, %v2859_v31  ;;  %v4086_v59 = vand.u32 4294901760, %v2861_v32 }
  0x38   :  { %2457 = vmatprep.subr.bf16.mxu1 %v2456_v36  ;;  %v211_v52 = vand.u32 4294901760, %v3183_v13  ;;  %v3197_v9 = vsub.f32 %v18_v1, %v3185_v6  ;;  %v4087_v36 = vand.u32 4294901760, %v2829_v15  ;;  %v4089_v19 = vand.u32 4294901760, %v2850_v25 }
  0x39   :  { %v2458_v33 = vpack.c.bf16 %v335_v8, %v328_v10  ;;  %v2524_v44 = vpack.c.bf16 %v4086_v59, %v4085_v24  ;;  %v4088_v10 = vand.u32 4294901760, %v2839_v21  ;;  %v4090_v11 = vand.u32 4294901760, %v2852_v26 }
  0x3a   :  { %2467 = vmatpush3.bf16.msra.mxu0 %v2466_v47  ;;  %v4091_v31 = vand.u32 4294901760, %v2856_v28  ;;  %v4092_v32 = vand.u32 4294901760, %v2869_v38  ;;  %v4093_v1 = vand.u32 4294901760, %v2873_v40  ;;  %v4094_v15 = vand.u32 4294901760, %v2879_v43 }
  0x3b   :  { %v2526_v8 = vpack.c.bf16 %v4088_v10, %v4087_v36  ;;  %v3207_v48 = vpack.c.bf16 %v4090_v11, %v4089_v19  ;;  %2459 = vmatpush3.bf16.msra.mxu1 %v2458_v33  ;;  %2469 = vmatprep.subr.bf16.mxu0 %v2468_v35  ;;  %v4095_v25 = vand.u32 4294901760, %v2884_v46  ;;  %v4096_v26 = vand.u32 4294901760, %v2908_v58 }
  0x3c   :  { %v3213_v47 = vpack.c.bf16 %v4092_v32, %v4091_v31  ;;  %v3219_v21 = vpack.c.bf16 %v4094_v15, %v4093_v1  ;;  %2493 = vmatprep.subr.bf16.mxu1 %v2827_v14  ;;  %v212_v28 = vsub.f32 %v3183_v13, %v211_v52  ;;  %v217_v38 = vand.u32 4294901760, %v3197_v9 }
  0x3d   :  { %v3225_v11 = vpack.c.bf16 %v4096_v26, %v4095_v25  ;;  %v4097_v40 = vand.u32 4294901760, %v2912_v63  ;;  %v4098_v43 = vand.u32 4294901760, %v2933_v12  ;;  %v4099_v46 = vand.u32 4294901760, %v2937_v17  ;;  %v4107_v25 = vld [vmem:[#allocation3_spill] sm:$0xff]  ;;  %v70_v26 = vld [vmem:[%s3969_s0 + $0x180] sm:$0xff] }
  0x3e   :  { %v4100_v58 = vand.u32 4294901760, %v2951_v42  ;;  %v4101_v35 = vand.u32 4294901760, %v2955_v50  ;;  %v4102_v24 = vand.u32 4294901760, %v2970_v60  ;;  %v4103_v36 = vand.u32 4294901760, %v2979_v5  ;;  %452 = vmatmul.mubr.f32.vlgmr.msra.gmra.mrb[0].mxu1 %v3117_v57  ;;  %2471 = vmatpush3.bf16.msra.mxu0 %v2470_v23 }
  0x3f   :  { %v3236_v33 = vpack.c.bf16 %v4098_v43, %v4097_v40  ;;  %v4104_v63 = vand.u32 4294901760, %v2993_v30  ;;  %v2474_v12 = vpack.c.bf16 %v2951_v42, %v2937_v17  ;;  %v213_v31 = vand.u32 4294901760, %v212_v28  ;;  %2495 = vmatpush3.bf16.msra.mxu1 %v2837_v20  ;;  %2473 = vmatprep.subr.bf16.mxu0 %v2472_v55  ;;  %v4106_v55 = vld [vmem:[#allocation2_spill] sm:$0xff]  ;;  %v71_v28 = vld [vmem:[%s3969_s0 + $0x188] sm:$0xff]  ;;  %v4108_v40 = vld [vmem:[#allocation4_spill] sm:$0xff] }
  0x40   :  { %v3242_v19 = vpack.c.bf16 %v4100_v58, %v4099_v46  ;;  %v3248_v59 = vpack.c.bf16 %v4102_v24, %v4101_v35  ;;  %v218_v32 = vsub.f32 %v3197_v9, %v217_v38  ;;  %v2476_v1 = vpack.c.bf16 %v2970_v60, %v2955_v50  ;;  %2497 = vmatprep.subr.bf16.mxu1 %v2841_v22  ;;  %v4109_v43 = vld [vmem:[#allocation9_spill] sm:$0xff]  ;;  %v54_v46 = vld [vmem:[%s3969_s0 + $0x100] sm:$0xff] }
  0x41   :  { %v3254_v10 = vpack.c.bf16 %v4104_v63, %v4103_v36  ;;  %214 = vmatprep.mubr.f32.mxu0 %v213_v31  ;;  %457 = vmatprep.mubr.f32.mxu1 %v3173_v3  ;;  %v2478_v17 = vpack.c.bf16 %v2993_v30, %v2979_v5  ;;  %v2480_v42 = vpack.c.bf16 %v3012_v56, %v2997_v51  ;;  %v4105_v50 = vand.u32 4294901760, %v3120_v18  ;;  %v4110_v24 = vld [vmem:[#allocation5_spill] sm:$0xff]  ;;  %v4111_v36 = vld [vmem:[#allocation6_spill] sm:$0xff]  ;;  %v4112_v31 = vld [vmem:[#allocation8_spill] sm:$0xff] }
  0x42   :  { %v219_v15 = vand.u32 4294901760, %v218_v32  ;;  %2475 = vmatpush3.bf16.msra.mxu0 %v2474_v12  ;;  %459 = vmatmul.mubr.f32.gmra.mrb[2].mxu1 %v3185_v6  ;;  %v2482_v60 = vpack.c.bf16 %v3035_v61, %v3021_v0  ;;  %v2484_v5 = vpack.c.bf16 %v3054_v29, %v3039_v7  ;;  %v2486_v30 = vpack.c.bf16 %v3077_v53, %v3063_v54 }
  0x43   :  { %2499 = vmatpush3.bf16.msra.mxu1 %v2854_v27  ;;  %2477 = vmatprep.subr.bf16.mxu0 %v2476_v1  ;;  %v2490_v23 = vpack.c.bf16 %v3134_v2, %v3102_v41  ;;  %v1065_v58 = vand.u32 4294901760, %v70_v26  ;;  %v1068_v35 = vand.u32 4294901760, %v71_v28  ;;  %v1017_v63 = vand.u32 4294901760, %v54_v46  ;;  %v72_v1 = vld [vmem:[%s3969_s0 + $0x190] sm:$0xff] }
  0x44   :  { %2501 = vmatprep.subr.bf16.mxu1 %v2871_v39  ;;  %220 = vmatmul.mubr.f32.gmra.mrb[2].mxu0 %v219_v15  ;;  %v4113_v15 = vld [vmem:[#allocation7_spill] sm:$0xff] }
  0x45   :  { %594 = vmatprep.mubr.f32.mxu0 %v3120_v18  ;;  %710 = vmatprep.mubr.f32.mxu1 %v4105_v50  ;;  %v2488_v18 = vpack.c.bf16 %v3093_v34, %v3081_v37  ;;  %v3315_v32 = vsub.f32 %v70_v26, %v1065_v58  ;;  %v3334_v50 = vsub.f32 %v54_v46, %v1017_v63  ;;  %v1071_v26 = vand.u32 4294901760, %v72_v1 }
  0x46   :  { %2479 = vmatpush3.bf16.msra.mxu0 %v2478_v17  ;;  %v4115_v17 = vand.u32 4294901760, %v3012_v56  ;;  %v4118_v56 = vand.u32 4294901760, %v3039_v7  ;;  %v4120_v46 = vand.u32 4294901760, %v4109_v43  ;;  %v4124_v7 = vand.u32 4294901760, %v3093_v34 }
  0x47   :  { %2503 = vmatpush3.bf16.msra.mxu1 %v2882_v45  ;;  %2481 = vmatprep.subr.bf16.mxu0 %v2480_v42  ;;  %v4126_v34 = vand.u32 4294901760, %v3134_v2 }
  0x48   :  { %2505 = vmatprep.subr.bf16.mxu1 %v2910_v62 }
  0x4a   :  { %2483 = vmatpush3.bf16.msra.mxu0 %v2482_v60 }
  0x4b   :  { %2507 = vmatpush3.bf16.msra.mxu1 %v2935_v16  ;;  %2485 = vmatprep.subr.bf16.mxu0 %v2484_v5  ;;  %v56_v5 = vld [vmem:[%s3969_s0 + $0x110] sm:$0xff] }
  0x4c   :  { %2509 = vmatprep.subr.bf16.mxu1 %v2953_v49 }
  0x4e   :  { %2487 = vmatpush3.bf16.msra.mxu0 %v2486_v30 }
  0x4f   :  { %2511 = vmatpush3.bf16.msra.mxu1 %v2977_v4  ;;  %2489 = vmatprep.subr.bf16.mxu0 %v2488_v18  ;;  %v4119_v18 = vand.u32 4294901760, %v3054_v29 }
  0x50   :  { %2513 = vmatprep.subr.bf16.mxu1 %v4106_v55 }
  0x52   :  { %2491 = vmatpush3.bf16.msra.mxu0 %v2490_v23  ;;  %v3354_v23 = vpack.c.bf16 %v4119_v18, %v4118_v56  ;;  %v3390_v56 = vpack.c.bf16 %v1068_v35, %v1065_v58  ;;  %v2782_v58 = vmov 0  }
  0x53   :  { %2515 = vmatpush3.bf16.msra.mxu1 %v4107_v25  ;;  %2525 = vmatprep.subr.bf16.mxu0 %v2524_v44  ;;  %v55_v44 = vld [vmem:[%s3969_s0 + $0x108] sm:$0xff] }
  0x54   :  { %2517 = vmatprep.subr.bf16.mxu1 %v4108_v40  ;;  %v1020_v12 = vand.u32 4294901760, %v55_v44  ;;  %2781 = vset.pattern.permute.xlu0 %v2782_v58 }
  0x55   :  { %597 = vmatmul.mubr.f32.vlgmr.msra.gmra.mrb[4].mxu0 %v4109_v43 }
  0x56   :  { %2527 = vmatpush3.bf16.msra.mxu0 %v2526_v8  ;;  %603 = vmatprep.mubr.f32.mxu0 %v3183_v13  ;;  %v3317_v8 = vsub.f32 %v71_v28, %v1068_v35  ;;  %v3336_v60 = vsub.f32 %v55_v44, %v1020_v12  ;;  %v4121_v44 = vand.u32 4294901760, %v3063_v54  ;;  %v4034_v54 = vand.u32 4294901760, %v3315_v32 }
  0x57   :  { %2519 = vmatpush3.bf16.msra.mxu1 %v4110_v24  ;;  %2529 = vmatprep.subr.bf16.mxu0 %v3207_v48  ;;  %v73_v48 = vld [vmem:[%s3969_s0 + $0x198] sm:$0xff]  ;;  %v3392_v18 = vpack.c.bf16 %v1020_v12, %v1017_v63 }
  0x58   :  { %2521 = vmatprep.subr.bf16.mxu1 %v4111_v36  ;;  %v1074_v28 = vand.u32 4294901760, %v73_v48  ;;  %v4023_v13 = vand.u32 4294901760, %v3336_v60  ;;  %v1259_v63 = vsub.f32 %v3315_v32, %v4034_v54 }
  0x59   :  { %606 = vmatmul.mubr.f32.gmra.mrb[6].mxu0 %v3197_v9  ;;  %4127 = vst [vmem:[#allocation2_spill] sm:$0xff] %v3392_v18 }
  0x5a   :  { %2531 = vmatpush3.bf16.msra.mxu0 %v3213_v47  ;;  %891 = vmatprep.mubr.f32.mxu0 %v4112_v31  ;;  %v4114_v47 = vand.u32 4294901760, %v2997_v51  ;;  %v4117_v51 = vand.u32 4294901760, %v3035_v61  ;;  %v3409_v35 = vpack.c.bf16 %v1074_v28, %v1071_v26 }
  0x5b   :  { %2523 = vmatpush3.bf16.msra.mxu1 %v4113_v15  ;;  %2533 = vmatprep.subr.bf16.mxu0 %v3219_v21  ;;  %v57_v21 = vld [vmem:[%s3969_s0 + $0x118] sm:$0xff] }
  0x5c   :  { %2557 = vmatprep.subr.bf16.mxu1 %v2827_v14  ;;  %v3332_v42 = vpack.c.bf16 %v4115_v17, %v4114_v47  ;;  %v4116_v14 = vand.u32 4294901760, %v3021_v0  ;;  %v4122_v0 = vand.u32 4294901760, %v3077_v53  ;;  %v4123_v47 = vand.u32 4294901760, %v3081_v37  ;;  %v74_v17 = vld [vmem:[%s3969_s0 + $0x1a0] sm:$0xff]  ;;  %4128 = vst [vmem:[#allocation3_spill] sm:$0xff] %v3409_v35 }
  0x5d   :  { %v4025_v53 = vand.u32 4294901760, %v3317_v8  ;;  %v4125_v37 = vand.u32 4294901760, %v3102_v41  ;;  %v3398_v41 = vsub.f32 %v73_v48, %v1074_v28  ;;  %v1077_v2 = vand.u32 4294901760, %v74_v17  ;;  %v76_v48 = vld [vmem:[%s3969_s0 + $0x1b0] sm:$0xff] }
  0x5e   :  { %v3348_v30 = vpack.c.bf16 %v4117_v51, %v4116_v14  ;;  %714 = vmatmul.mubr.f32.vlgmr.msra.gmra.mrb[4].mxu1 %v4120_v46  ;;  %2535 = vmatpush3.bf16.msra.mxu0 %v3225_v11  ;;  %v3363_v61 = vpack.c.bf16 %v4122_v0, %v4121_v44  ;;  %v3369_v29 = vpack.c.bf16 %v4124_v7, %v4123_v47  ;;  %v75_v11 = vld [vmem:[%s3969_s0 + $0x1a8] sm:$0xff]  ;;  %v1023_v14 = vand.u32 4294901760, %v56_v5  ;;  %v60_v47 = vld [vmem:[%s3969_s0 + $0x130] sm:$0xff] }
  0x5f   :  { %2559 = vmatpush3.bf16.msra.mxu1 %v2837_v20  ;;  %721 = vmatprep.mubr.f32.mxu1 %v211_v52  ;;  %v3386_v43 = vpack.c.bf16 %v4126_v34, %v4125_v37  ;;  %v1026_v51 = vand.u32 4294901760, %v57_v21  ;;  %v4024_v20 = vand.u32 4294901760, %v3334_v50  ;;  %v3396_v52 = vsub.f32 %v72_v1, %v1071_v26  ;;  %v86_v1 = vld [vmem:[%s3971_s2] sm:$0xff] }
  0x60   :  { %2537 = vmatprep.subr.bf16.mxu0 %v3236_v33  ;;  %2561 = vmatprep.subr.bf16.mxu1 %v2841_v22  ;;  %v1080_v46 = vand.u32 4294901760, %v75_v11  ;;  %v58_v33 = vld [vmem:[%s3969_s0 + $0x120] sm:$0xff]  ;;  %v59_v22 = vld [vmem:[%s3969_s0 + $0x128] sm:$0xff]  ;;  %v1266_v12 = vsub.f32 %v3317_v8, %v4025_v53  ;;  %v4028_v0 = vand.u32 4294901760, %v3398_v41  ;;  %v1260_v37 = vand.u32 4294901760, %v1259_v63 }
  0x61   :  { %v3422_v9 = vpack.c.bf16 %v1026_v51, %v1023_v14  ;;  %v1029_v26 = vand.u32 4294901760, %v58_v33  ;;  %v1032_v28 = vand.u32 4294901760, %v59_v22  ;;  %v4029_v44 = vand.u32 4294901760, %v3396_v52  ;;  %90 = vperm.xlu0 %2781, %v86_v1  }
  0x62   :  { %725 = vmatmul.mubr.f32.gmra.mrb[6].mxu1 %v217_v38  ;;  %2539 = vmatpush3.bf16.msra.mxu0 %v3242_v19  ;;  %v3424_v38 = vsub.f32 %v56_v5, %v1023_v14  ;;  %v3426_v19 = vsub.f32 %v57_v21, %v1026_v51  ;;  %v77_v5 = vld [vmem:[%s3969_s0 + $0x1b8] sm:$0xff]  ;;  %v3445_v21 = vpack.c.bf16 %v1080_v46, %v1077_v2  ;;  %v1267_v34 = vand.u32 4294901760, %v1266_v12  ;;  %v87_v51 = vld [vmem:[%s3971_s2 + $0x8] sm:$0x3] }
  0x63   :  { %2563 = vmatpush3.bf16.msra.mxu1 %v2854_v27  ;;  %2541 = vmatprep.subr.bf16.mxu0 %v3248_v59  ;;  %v1147_v27 = vsub.f32 %v3334_v50, %v4024_v20  ;;  %v1154_v59 = vsub.f32 %v3336_v60, %v4023_v13  ;;  %v3455_v7 = vsub.f32 %v75_v11, %v1080_v46  ;;  %v1083_v14 = vand.u32 4294901760, %v76_v48 }
  0x64   :  { %2565 = vmatprep.subr.bf16.mxu1 %v2871_v39  ;;  %1002 = vmatprep.mubr.f32.mxu1 %v4112_v31  ;;  %v17_v39 = vld [vmem:[%s3970_s1 + $0x18] sm:$0xff]  ;;  %4129 = vst [vmem:[#allocation4_spill] sm:$0xff] %v3445_v21  ;;  %v3447_v31 = vsub.f32 %v74_v17, %v1077_v2  ;;  %v1086_v2 = vand.u32 4294901760, %v77_v5  ;;  %v4026_v11 = vand.u32 4294901760, %v3426_v19  ;;  %v3470_v58 = vpack.c.bf16 %v1032_v28, %v1029_v26 }
  0x65   :  { %v61_v17 = vld [vmem:[%s3969_s0 + $0x138] sm:$0xff]  ;;  %v3467_v46 = vand.u32 4294901760, %v17_v39  ;;  %v3472_v63 = vsub.f32 %v58_v33, %v1029_v26  ;;  %v1148_v12 = vand.u32 4294901760, %v1147_v27  ;;  %v1155_v1 = vand.u32 4294901760, %v1154_v59  ;;  %95 = vperm.xlu0 %2781, %v87_v51   ;;  %v78_v26 = vld [vmem:[%s3969_s0 + $0x1c0] sm:$0xff] }
  0x66   :  { %2543 = vmatpush3.bf16.msra.mxu0 %v3254_v10  ;;  %v4027_v10 = vand.u32 4294901760, %v3424_v38  ;;  %4131 = vst [vmem:[#allocation5_spill] sm:$0xff] %v3470_v58  ;;  %v1035_v13 = vand.u32 4294901760, %v60_v47  ;;  %v1038_v20 = vand.u32 4294901760, %v61_v17  ;;  %v3483_v53 = vsub.f32 %v59_v22, %v1032_v28 }
  0x67   :  { %2567 = vmatpush3.bf16.msra.mxu1 %v2882_v45  ;;  %2545 = vmatprep.subr.bf16.mxu0 %v3332_v42  ;;  %4130 = vst [vmem:[#allocation9_spill] sm:$0xff] %v3467_v46  ;;  %v1273_v45 = vsub.f32 %v3396_v52, %v4029_v44  ;;  %v1280_v42 = vsub.f32 %v3398_v41, %v4028_v0  ;;  %v1089_v51 = vand.u32 4294901760, %v78_v26 }
  0x68   :  { %2569 = vmatprep.subr.bf16.mxu1 %v2910_v62  ;;  %v3481_v62 = vpack.c.bf16 %v1267_v34, %v1260_v37  ;;  %v3485_v33 = vsub.f32 %v76_v48, %v1083_v14  ;;  %v3491_v27 = vsub.f32 %v17_v39, %v3467_v46  ;;  %v3495_v59 = vpack.c.bf16 %v1086_v2, %v1083_v14 }
  0x69   :  { %v1168_v22 = vsub.f32 %v3426_v19, %v4026_v11  ;;  %v3504_v48 = vpack.c.bf16 %v1155_v1, %v1148_v12  ;;  %v3506_v28 = vsub.f32 %v77_v5, %v1086_v2  ;;  %v4031_v39 = vand.u32 4294901760, %v3455_v7  ;;  %v63_v5 = vld [vmem:[%s3969_s0 + $0x148] sm:$0xff] }
  0x6a   :  { %2547 = vmatpush3.bf16.msra.mxu0 %v3348_v30  ;;  %4132 = vst [vmem:[#allocation6_spill] sm:$0xff] %v3495_v59  ;;  %v1161_v30 = vsub.f32 %v3424_v38, %v4027_v10  ;;  %v1274_v37 = vand.u32 4294901760, %v1273_v45  ;;  %v1281_v34 = vand.u32 4294901760, %v1280_v42  ;;  %v3513_v14 = vpack.c.bf16 %v1038_v20, %v1035_v13 }
  0x6b   :  { %2571 = vmatpush3.bf16.msra.mxu1 %v2935_v16  ;;  %2549 = vmatprep.subr.bf16.mxu0 %v3354_v23  ;;  %v79_v16 = vld [vmem:[%s3969_s0 + $0x1c8] sm:$0xff]  ;;  %v4033_v23 = vand.u32 4294901760, %v3447_v31  ;;  %v3522_v2 = vsub.f32 %v60_v47, %v1035_v13  ;;  %v4030_v12 = vand.u32 4294901760, %v3472_v63  ;;  %v4032_v1 = vand.u32 4294901760, %v3483_v53 }
  0x6c   :  { %2573 = vmatprep.subr.bf16.mxu1 %v2953_v49  ;;  %4133 = vst [vmem:[#allocation8_spill] sm:$0xff] %v3513_v14  ;;  %v62_v49 = vld [vmem:[%s3969_s0 + $0x140] sm:$0xff]  ;;  %v4035_v45 = vand.u32 4294901760, %v3491_v27  ;;  %v3529_v42 = vsub.f32 %v61_v17, %v1038_v20  ;;  %v1162_v11 = vand.u32 4294901760, %v1161_v30  ;;  %v1169_v10 = vand.u32 4294901760, %v1168_v22  ;;  %v80_v20 = vld [vmem:[%s3969_s0 + $0x1d0] sm:$0xff] }
  0x6d   :  { %4134 = vst [vmem:[#allocation7_spill] sm:$0xff] %v3522_v2  ;;  %v1092_v0 = vand.u32 4294901760, %v79_v16  ;;  %v1294_v13 = vsub.f32 %v3455_v7, %v4031_v39  ;;  %v1041_v47 = vand.u32 4294901760, %v62_v49  ;;  %v1044_v44 = vand.u32 4294901760, %v63_v5 }
  0x6e   :  { %2551 = vmatpush3.bf16.msra.mxu0 %v3363_v61  ;;  %4135 = vst [vmem:[#allocation10_spill] sm:$0xff] %v3529_v42  ;;  %v1287_v61 = vsub.f32 %v3447_v31, %v4033_v23  ;;  %v1175_v30 = vsub.f32 %v3472_v63, %v4030_v12  ;;  %v1182_v22 = vsub.f32 %v3483_v53, %v4032_v1  ;;  %v4037_v1 = vand.u32 4294901760, %v3529_v42 }
  0x6f   :  { %2575 = vmatpush3.bf16.msra.mxu1 %v2977_v4  ;;  %2553 = vmatprep.subr.bf16.mxu0 %v3369_v29  ;;  %v3538_v4 = vpack.c.bf16 %v1281_v34, %v1274_v37  ;;  %v3540_v29 = vsub.f32 %v78_v26, %v1089_v51  ;;  %v81_v26 = vld [vmem:[%s3969_s0 + $0x1d8] sm:$0xff]  ;;  %v1115_v34 = vsub.f32 %v3491_v27, %v4035_v45  ;;  %v1295_v54 = vand.u32 4294901760, %v1294_v13 }
  0x70   :  { %2577 = vmatprep.subr.bf16.mxu1 %v4106_v55  ;;  %v4036_v55 = vand.u32 4294901760, %v3485_v33  ;;  %v3565_v12 = vpack.c.bf16 %v1092_v0, %v1089_v51  ;;  %v3567_v39 = vsub.f32 %v79_v16, %v1092_v0  ;;  %v1288_v23 = vand.u32 4294901760, %v1287_v61  ;;  %v65_v16 = vld [vmem:[%s3969_s0 + $0x158] sm:$0xff] }
  0x71   :  { %v3571_v37 = vpack.c.bf16 %v1044_v44, %v1041_v47  ;;  %v1095_v17 = vand.u32 4294901760, %v80_v20  ;;  %v1098_v45 = vand.u32 4294901760, %v81_v26  ;;  %v4138_v0 = vand.u32 4294901760, %v3506_v28 }
  0x72   :  { %2555 = vmatpush3.bf16.msra.mxu0 %v3386_v43  ;;  %v3563_v43 = vpack.c.bf16 %v1169_v10, %v1162_v11  ;;  %4136 = vst [vmem:[#allocation11_spill] sm:$0xff] %v3565_v12  ;;  %v1301_v10 = vsub.f32 %v3485_v33, %v4036_v55  ;;  %v1176_v51 = vand.u32 4294901760, %v1175_v30  ;;  %v4139_v61 = vand.u32 4294901760, %v3522_v2  ;;  %v82_v30 = vld [vmem:[%s3969_s0 + $0x1e0] sm:$0xff] }
  0x73   :  { %2579 = vmatpush3.bf16.msra.mxu1 %v4107_v25  ;;  %2589 = vmatprep.subr.bf16.mxu0 %v3390_v56  ;;  %4137 = vst [vmem:[#allocation12_spill] sm:$0xff] %v3571_v37  ;;  %v3574_v25 = vsub.f32 %v62_v49, %v1041_v47  ;;  %v1308_v11 = vsub.f32 %v3506_v28, %v4138_v0  ;;  %v1183_v49 = vand.u32 4294901760, %v1182_v22  ;;  %v1116_v47 = vand.u32 4294901760, %v1115_v34  ;;  %v83_v22 = vld [vmem:[%s3969_s0 + $0x1e8] sm:$0xff] }
  0x74   :  { %2581 = vmatprep.subr.bf16.mxu1 %v4108_v40  ;;  %v64_v40 = vld [vmem:[%s3969_s0 + $0x150] sm:$0xff]  ;;  %v1189_v13 = vsub.f32 %v3522_v2, %v4139_v61  ;;  %v3595_v0 = vsub.f32 %v63_v5, %v1044_v44  ;;  %v1196_v55 = vsub.f32 %v3529_v42, %v4037_v1  ;;  %v4048_v34 = vand.u32 4294901760, %v3540_v29 }
  0x75   :  { %893 = vmatmul.mubr.f32.vlgmr.msra.gmra.mrb[8].mxu0 %v3117_v57  ;;  %v3609_v44 = vpack.c.bf16 %v1295_v54, %v1288_v23  ;;  %v3611_v5 = vsub.f32 %v80_v20, %v1095_v17  ;;  %v1047_v61 = vand.u32 4294901760, %v64_v40  ;;  %v1050_v1 = vand.u32 4294901760, %v65_v16 }
  0x76   :  { %2591 = vmatpush3.bf16.msra.mxu0 %v3392_v18  ;;  %898 = vmatprep.mubr.f32.mxu0 %v3173_v3  ;;  %v3616_v18 = vsub.f32 %v81_v26, %v1098_v45  ;;  %v1302_v42 = vand.u32 4294901760, %v1301_v10  ;;  %v1309_v2 = vand.u32 4294901760, %v1308_v11  ;;  %v3625_v54 = vpack.c.bf16 %v1183_v49, %v1176_v51 }
  0x77   :  { %2583 = vmatpush3.bf16.msra.mxu1 %v4110_v24  ;;  %2593 = vmatprep.subr.bf16.mxu0 %v3409_v35  ;;  %v3614_v35 = vpack.c.bf16 %v1098_v45, %v1095_v17  ;;  %v66_v24 = vld [vmem:[%s3969_s0 + $0x160] sm:$0xff]  ;;  %v1190_v23 = vand.u32 4294901760, %v1189_v13  ;;  %v1101_v20 = vand.u32 4294901760, %v82_v30  ;;  %v1104_v17 = vand.u32 4294901760, %v83_v22 }
  0x78   :  { %2585 = vmatprep.subr.bf16.mxu1 %v4111_v36  ;;  %4141 = vst [vmem:[#allocation14_spill] sm:$0xff] %v3616_v18  ;;  %v67_v36 = vld [vmem:[%s3969_s0 + $0x168] sm:$0xff]  ;;  %v1197_v45 = vand.u32 4294901760, %v1196_v55  ;;  %v1315_v26 = vsub.f32 %v3540_v29, %v4048_v34  ;;  %v4142_v10 = vand.u32 4294901760, %v3567_v39  ;;  %v4049_v51 = vand.u32 4294901760, %v3574_v25 }
  0x79   :  { %900 = vmatmul.mubr.f32.gmra.mrb[10].mxu0 %v3185_v6  ;;  %4140 = vst [vmem:[#allocation13_spill] sm:$0xff] %v3614_v35  ;;  %v3637_v49 = vpack.c.bf16 %v1050_v1, %v1047_v61  ;;  %v3639_v13 = vsub.f32 %v64_v40, %v1047_v61  ;;  %v3643_v55 = vsub.f32 %v65_v16, %v1050_v1  ;;  %v4056_v16 = vand.u32 4294901760, %v3616_v18  ;;  %v16_v61 = vld [vmem:[%s3970_s1 + $0x10] sm:$0xff] }
  0x7a   :  { %2595 = vmatpush3.bf16.msra.mxu0 %v3422_v9  ;;  %1117 = vmatprep.mubr.f32.mxu0 %v1116_v47  ;;  %v1322_v11 = vsub.f32 %v3567_v39, %v4142_v10  ;;  %v1056_v47 = vand.u32 4294901760, %v67_v36  ;;  %v3649_v10 = vld [vmem:[%s3969_s0 + $0x1f0] sm:$0xff]  ;;  %v3661_v1 = vsub.f32 %v82_v30, %v1101_v20  ;;  %v3671_v40 = vpack.c.bf16 %v1197_v45, %v1190_v23  ;;  %v3695_v45 = vld [vmem:[%s3969_s0 + $0x178] sm:$0xff] }
  0x7b   :  { %2587 = vmatpush3.bf16.msra.mxu1 %v4113_v15  ;;  %2597 = vmatprep.subr.bf16.mxu0 %v3445_v21  ;;  %v1053_v15 = vand.u32 4294901760, %v66_v24  ;;  %v3641_v21 = vpack.c.bf16 %v1309_v2, %v1302_v42  ;;  %4143 = vst [vmem:[#allocation15_spill] sm:$0xff] %v3643_v55  ;;  %v3659_v2 = vpack.c.bf16 %v1104_v17, %v1101_v20 }
  0x7c   :  { %2621 = vmatprep.subr.bf16.mxu1 %v3481_v62  ;;  %v3654_v62 = vld [vmem:[%s3969_s0 + $0x1f8] sm:$0xff]  ;;  %4144 = vst [vmem:[#allocation16_spill] sm:$0xff] %v3661_v1  ;;  %v3663_v42 = vsub.f32 %v83_v22, %v1104_v17  ;;  %v1323_v34 = vand.u32 4294901760, %v1322_v11  ;;  %v1203_v30 = vsub.f32 %v3574_v25, %v4049_v51  ;;  %v3690_v17 = vld [vmem:[%s3969_s0 + $0x170] sm:$0xff]  ;;  %v4146_v11 = vand.u32 4294901760, %v3611_v5 }
  0x7d   :  { %v21_v22 = vld [vmem:[%s3970_s1 + $0x38] sm:$0x3]  ;;  %v3681_v20 = vpack.c.bf16 %v1056_v47, %v1053_v15  ;;  %v1110_v23 = vand.u32 4294901760, %v3654_v62  ;;  %v3705_v51 = vand.u32 4294901760, %v16_v61 }
  0x7e   :  { %1004 = vmatmul.mubr.f32.vlgmr.msra.gmra.mrb[8].mxu1 %v3117_v57  ;;  %2599 = vmatpush3.bf16.msra.mxu0 %v3470_v58  ;;  %v1316_v57 = vand.u32 4294901760, %v1315_v26  ;;  %v3697_v26 = vsub.f32 %v67_v36, %v1056_v47  ;;  %v3714_v58 = vand.u32 4294901760, %v21_v22 }
  0x7f   :  { %2623 = vmatpush3.bf16.msra.mxu1 %v3504_v48  ;;  %1009 = vmatprep.mubr.f32.mxu1 %v3173_v3  ;;  %v3683_v48 = vsub.f32 %v66_v24, %v1053_v15  ;;  %v1107_v3 = vand.u32 4294901760, %v3649_v10  ;;  %v1329_v15 = vsub.f32 %v3611_v5, %v4146_v11  ;;  %v1204_v11 = vand.u32 4294901760, %v1203_v30 }
  0x80   :  { %2601 = vmatprep.subr.bf16.mxu0 %v3495_v59  ;;  %2625 = vmatprep.subr.bf16.mxu1 %v3538_v4  ;;  %v4145_v4 = vand.u32 4294901760, %v3595_v0  ;;  %v1336_v59 = vsub.f32 %v3616_v18, %v4056_v16  ;;  %v1062_v16 = vand.u32 4294901760, %v3695_v45  ;;  %v3728_v36 = vsub.f32 %v3654_v62, %v1110_v23 }
  0x81   :  { %v3725_v47 = vsub.f32 %v3649_v10, %v1107_v3  ;;  %v3734_v30 = vsub.f32 %v16_v61, %v3705_v51  ;;  %v4147_v10 = vand.u32 4294901760, %v3639_v13  ;;  %v4148_v18 = vand.u32 4294901760, %v3643_v55 }
  0x82   :  { %v1210_v24 = vsub.f32 %v3595_v0, %v4145_v4  ;;  %1011 = vmatmul.mubr.f32.gmra.mrb[10].mxu1 %v3185_v6  ;;  %2603 = vmatpush3.bf16.msra.mxu0 %v3513_v14  ;;  %v20_v4 = vld [vmem:[%s3970_s1 + $0x30] sm:$0x3]  ;;  %v2636_v6 = vpack.c.bf16 %v1323_v34, %v1316_v57  ;;  %v1059_v14 = vand.u32 4294901760, %v3690_v17  ;;  %v1330_v57 = vand.u32 4294901760, %v1329_v15 }
  0x83   :  { %2627 = vmatpush3.bf16.msra.mxu1 %v3563_v43  ;;  %2605 = vmatprep.subr.bf16.mxu0 %v3565_v12  ;;  %v3736_v12 = vand.u32 4294901760, %v20_v4  ;;  %v1217_v62 = vsub.f32 %v3639_v13, %v4147_v10  ;;  %v1224_v43 = vsub.f32 %v3643_v55, %v4148_v18  ;;  %v4149_v18 = vand.u32 4294901760, %v3661_v1 }
  0x84   :  { %2629 = vmatprep.subr.bf16.mxu1 %v3609_v44  ;;  %1368 = vmatprep.mubr.f32.mxu1 %v3467_v46  ;;  %v1211_v34 = vand.u32 4294901760, %v1210_v24  ;;  %v1337_v44 = vand.u32 4294901760, %v1336_v59  ;;  %v3746_v46 = vsub.f32 %v21_v22, %v3714_v58  ;;  %v3751_v61 = vsub.f32 %v3690_v17, %v1059_v14 }
  0x85   :  { %v3754_v59 = vsub.f32 %v3695_v45, %v1062_v16  ;;  %v1343_v22 = vsub.f32 %v3661_v1, %v4149_v18  ;;  %v4072_v17 = vand.u32 4294901760, %v3725_v47  ;;  %v4073_v24 = vand.u32 4294901760, %v3734_v30 }
  0x86   :  { %2607 = vmatpush3.bf16.msra.mxu0 %v3571_v37  ;;  %v2638_v45 = vpack.c.bf16 %v1211_v34, %v1204_v11  ;;  %v3767_v37 = vpack.c.bf16 %v1110_v23, %v1107_v3  ;;  %v3771_v15 = vsub.f32 %v20_v4, %v3736_v12  ;;  %v1218_v18 = vand.u32 4294901760, %v1217_v62 }
  0x87   :  { %2631 = vmatpush3.bf16.msra.mxu1 %v3625_v54  ;;  %2609 = vmatprep.subr.bf16.mxu0 %v3614_v35  ;;  %v4150_v54 = vand.u32 4294901760, %v3663_v42  ;;  %v4071_v35 = vand.u32 4294901760, %v3728_v36  ;;  %v1225_v1 = vand.u32 4294901760, %v1224_v43  ;;  %v4074_v55 = vand.u32 4294901760, %v3746_v46 }
  0x88   :  { %2633 = vmatprep.subr.bf16.mxu1 %v3641_v21  ;;  %v2640_v21 = vpack.c.bf16 %v1337_v44, %v1330_v57  ;;  %v4151_v11 = vand.u32 4294901760, %v3683_v48  ;;  %v4152_v23 = vand.u32 4294901760, %v3697_v26  ;;  %v4075_v34 = vand.u32 4294901760, %v3751_v61 }
  0x89   :  { %v1350_v10 = vsub.f32 %v3663_v42, %v4150_v54  ;;  %v4076_v57 = vand.u32 4294901760, %v3754_v59  ;;  %v1344_v43 = vand.u32 4294901760, %v1343_v22  ;;  %v1364_v62 = vsub.f32 %v3728_v36, %v4071_v35 }
  0x8a   :  { %2611 = vmatpush3.bf16.msra.mxu0 %v3637_v49  ;;  %v1231_v3 = vsub.f32 %v3683_v48, %v4151_v11  ;;  %v1238_v4 = vsub.f32 %v3697_v26, %v4152_v23  ;;  %v1121_v54 = vsub.f32 %v3734_v30, %v4073_v24  ;;  %v3796_v23 = vpack.c.bf16 %v1062_v16, %v1059_v14 }
  0x8b   :  { %2635 = vmatpush3.bf16.msra.mxu1 %v3671_v40  ;;  %2613 = vmatprep.subr.bf16.mxu0 %v3659_v2  ;;  %v1351_v44 = vand.u32 4294901760, %v1350_v10  ;;  %v1357_v40 = vsub.f32 %v3725_v47, %v4072_v17  ;;  %v2652_v22 = vpack.c.bf16 %v3317_v8, %v3315_v32  ;;  %v1130_v10 = vsub.f32 %v3746_v46, %v4074_v55 }
  0x8c   :  { %2637 = vmatprep.subr.bf16.mxu1 %v2636_v6  ;;  %v2642_v6 = vpack.c.bf16 %v1225_v1, %v1218_v18  ;;  %v1232_v35 = vand.u32 4294901760, %v1231_v3  ;;  %v1239_v17 = vand.u32 4294901760, %v1238_v4  ;;  %v1245_v24 = vsub.f32 %v3751_v61, %v4075_v34 }
  0x8d   :  { %v1252_v14 = vsub.f32 %v3754_v59, %v4076_v57  ;;  %v2644_v1 = vpack.c.bf16 %v1351_v44, %v1344_v43  ;;  %v1358_v16 = vand.u32 4294901760, %v1357_v40  ;;  %v1365_v18 = vand.u32 4294901760, %v1364_v62 }
  0x8e   :  { %2615 = vmatpush3.bf16.msra.mxu0 %v3681_v20  ;;  %v1122_v11 = vand.u32 4294901760, %v1121_v54  ;;  %v4153_v55 = vand.u32 4294901760, %v3771_v15  ;;  %v2654_v3 = vpack.c.bf16 %v3336_v60, %v3334_v50  ;;  %v1131_v4 = vand.u32 4294901760, %v1130_v10 }
  0x8f   :  { %2639 = vmatpush3.bf16.msra.mxu1 %v2638_v45  ;;  %2617 = vmatprep.subr.bf16.mxu0 %v3767_v37  ;;  %v2646_v34 = vpack.c.bf16 %v1239_v17, %v1232_v35  ;;  %v1246_v43 = vand.u32 4294901760, %v1245_v24  ;;  %v1253_v44 = vand.u32 4294901760, %v1252_v14  ;;  %v2648_v40 = vpack.c.bf16 %v1365_v18, %v1358_v16  ;;  %v4157_v14 = vld [vmem:[#allocation3_spill] sm:$0xff]  ;;  %v4158_v16 = vld [vmem:[#allocation14_spill] sm:$0xff] }
  0x90   :  { %2641 = vmatprep.subr.bf16.mxu1 %v2640_v21  ;;  %v1136_v45 = vsub.f32 %v3771_v15, %v4153_v55  ;;  %v2656_v21 = vpack.c.bf16 %v3398_v41, %v3396_v52  ;;  %v2658_v55 = vpack.c.bf16 %v3426_v19, %v3424_v38  ;;  %v2660_v35 = vpack.c.bf16 %v3455_v7, %v3447_v31 }
  0x91   :  { %v2650_v54 = vpack.c.bf16 %v1253_v44, %v1246_v43  ;;  %v2662_v24 = vpack.c.bf16 %v3483_v53, %v3472_v63  ;;  %v2664_v17 = vpack.c.bf16 %v3506_v28, %v3485_v33  ;;  %v2668_v10 = vpack.c.bf16 %v3567_v39, %v3540_v29  ;;  %v4162_v43 = vld [vmem:[#allocation5_spill] sm:$0xff]  ;;  %v4163_v44 = vld [vmem:[#allocation16_spill] sm:$0xff] }
  0x92   :  { %2619 = vmatpush3.bf16.msra.mxu0 %v3796_v23  ;;  %v1137_v62 = vand.u32 4294901760, %v1136_v45  ;;  %v2672_v18 = vpack.c.bf16 %v4158_v16, %v3611_v5  ;;  %v4159_v45 = vld [vmem:[#allocation4_spill] sm:$0xff] }
  0x93   :  { %2643 = vmatpush3.bf16.msra.mxu1 %v2642_v6  ;;  %2653 = vmatprep.subr.bf16.mxu0 %v2652_v22  ;;  %v4156_v22 = vld [vmem:[#allocation2_spill] sm:$0xff] }
  0x94   :  { %2645 = vmatprep.subr.bf16.mxu1 %v2644_v1  ;;  %v2670_v1 = vpack.c.bf16 %v3595_v0, %v3574_v25 }
  0x95   :  { %1123 = vmatmul.mubr.f32.vlgmr.msra.gmra.mrb[12].mxu0 %v1122_v11  ;;  %v4155_v11 = vld [vmem:[#allocation10_spill] sm:$0xff] }
  0x96   :  { %2655 = vmatpush3.bf16.msra.mxu0 %v2654_v3  ;;  %1132 = vmatprep.mubr.f32.mxu0 %v1131_v4  ;;  %v4160_v3 = vand.u32 4294901760, %v3491_v27  ;;  %v4161_v4 = vld [vmem:[#allocation15_spill] sm:$0xff] }
  0x97   :  { %2647 = vmatpush3.bf16.msra.mxu1 %v2646_v34  ;;  %2657 = vmatprep.subr.bf16.mxu0 %v2656_v21  ;;  %v4154_v34 = vld [vmem:[#allocation7_spill] sm:$0xff]  ;;  %v2674_v21 = vpack.c.bf16 %v4161_v4, %v3639_v13 }
  0x98   :  { %2649 = vmatprep.subr.bf16.mxu1 %v2648_v40  ;;  %v2666_v6 = vpack.c.bf16 %v4155_v11, %v4154_v34  ;;  %v2676_v40 = vpack.c.bf16 %v3663_v42, %v4163_v44 }
  0x99   :  { %1138 = vmatmul.mubr.f32.gmra.mrb[14].mxu0 %v1137_v62  ;;  %v4164_v62 = vld [vmem:[#allocation6_spill] sm:$0xff] }
  0x9a   :  { %2659 = vmatpush3.bf16.msra.mxu0 %v2658_v55  ;;  %1512 = vmatprep.mubr.f32.mxu0 %v3491_v27  ;;  %v2678_v55 = vpack.c.bf16 %v3697_v26, %v3683_v48  ;;  %v2680_v27 = vpack.c.bf16 %v3728_v36, %v3725_v47 }
  0x9b   :  { %2651 = vmatpush3.bf16.msra.mxu1 %v2650_v54  ;;  %2661 = vmatprep.subr.bf16.mxu0 %v2660_v35  ;;  %v4165_v54 = vld [vmem:[#allocation8_spill] sm:$0xff]  ;;  %v4166_v35 = vld [vmem:[#allocation11_spill] sm:$0xff] }
  0x9c   :  { %2685 = vmatprep.subr.bf16.mxu1 %v3390_v56 }
  0x9e   :  { %1370 = vmatmul.mubr.f32.vlgmr.msra.gmra.mrb[12].mxu1 %v3705_v51  ;;  %2663 = vmatpush3.bf16.msra.mxu0 %v2662_v24  ;;  %v2682_v24 = vpack.c.bf16 %v3754_v59, %v3751_v61 }
  0x9f   :  { %2687 = vmatpush3.bf16.msra.mxu1 %v4156_v22  ;;  %1375 = vmatprep.mubr.f32.mxu1 %v3714_v58 }
  0xa0   :  { %2665 = vmatprep.subr.bf16.mxu0 %v2664_v17  ;;  %2689 = vmatprep.subr.bf16.mxu1 %v4157_v14  ;;  %v4167_v17 = vld [vmem:[#allocation12_spill] sm:$0xff] }
  0xa2   :  { %1377 = vmatmul.mubr.f32.gmra.mrb[14].mxu1 %v3736_v12  ;;  %2667 = vmatpush3.bf16.msra.mxu0 %v2666_v6  ;;  %v4168_v6 = vand.u32 4294901760, %v3315_v32  ;;  %v4175_v32 = vand.u32 4294901760, %v3424_v38  ;;  %v4180_v38 = vand.u32 4294901760, %v3483_v53  ;;  %v4186_v53 = vand.u32 4294901760, %v4155_v11 }
  0xa3   :  { %2691 = vmatpush3.bf16.msra.mxu1 %v3422_v9  ;;  %2669 = vmatprep.subr.bf16.mxu0 %v2668_v10  ;;  %v4169_v10 = vand.u32 4294901760, %v3317_v8  ;;  %v4176_v8 = vand.u32 4294901760, %v3426_v19  ;;  %v4181_v19 = vld [vmem:[#allocation9_spill] sm:$0xff]  ;;  %v4192_v11 = vand.u32 4294901760, %v3595_v0  ;;  %v4198_v0 = vand.u32 4294901760, %v3663_v42 }
  0xa4   :  { %2693 = vmatprep.subr.bf16.mxu1 %v4159_v45  ;;  %1628 = vmatprep.mubr.f32.mxu1 %v4160_v3  ;;  %v4171_v3 = vand.u32 4294901760, %v3334_v50  ;;  %v4203_v42 = vand.u32 4294901760, %v3751_v61 }
  0xa5   :  { %v2722_v50 = vpack.c.bf16 %v4176_v8, %v4175_v32 }
  0xa6   :  { %2671 = vmatpush3.bf16.msra.mxu0 %v2670_v1  ;;  %v2716_v1 = vpack.c.bf16 %v4169_v10, %v4168_v6  ;;  %v4184_v10 = vand.u32 4294901760, %v3734_v30 }
  0xa7   :  { %2695 = vmatpush3.bf16.msra.mxu1 %v4162_v43  ;;  %2673 = vmatprep.subr.bf16.mxu0 %v2672_v18  ;;  %v4170_v18 = vld [vmem:[#allocation13_spill] sm:$0xff] }
  0xa8   :  { %2697 = vmatprep.subr.bf16.mxu1 %v4164_v62 }
  0xaa   :  { %2675 = vmatpush3.bf16.msra.mxu0 %v2674_v21  ;;  %v4172_v21 = vand.u32 4294901760, %v3336_v60  ;;  %v4177_v60 = vand.u32 4294901760, %v3447_v31  ;;  %v4182_v31 = vand.u32 4294901760, %v3485_v33  ;;  %v4189_v33 = vand.u32 4294901760, %v3567_v39 }
  0xab   :  { %2699 = vmatpush3.bf16.msra.mxu1 %v4165_v54  ;;  %2677 = vmatprep.subr.bf16.mxu0 %v2676_v40  ;;  %v4194_v39 = vand.u32 4294901760, %v4158_v16  ;;  %v4199_v16 = vand.u32 4294901760, %v3683_v48 }
  0xac   :  { %2701 = vmatprep.subr.bf16.mxu1 %v4166_v35  ;;  %v2718_v40 = vpack.c.bf16 %v4172_v21, %v4171_v3  ;;  %v4187_v3 = vand.u32 4294901760, %v3746_v46 }
  0xae   :  { %2679 = vmatpush3.bf16.msra.mxu0 %v2678_v55  ;;  %v4173_v55 = vand.u32 4294901760, %v3396_v52  ;;  %v4178_v52 = vand.u32 4294901760, %v3455_v7  ;;  %v4183_v7 = vand.u32 4294901760, %v3506_v28 }
  0xaf   :  { %2703 = vmatpush3.bf16.msra.mxu1 %v4167_v17  ;;  %2681 = vmatprep.subr.bf16.mxu0 %v2680_v27  ;;  %v4174_v27 = vand.u32 4294901760, %v3398_v41 }
  0xb0   :  { %2705 = vmatprep.subr.bf16.mxu1 %v4170_v18  ;;  %v2724_v41 = vpack.c.bf16 %v4178_v52, %v4177_v60 }
  0xb1   :  { %v2720_v57 = vpack.c.bf16 %v4174_v27, %v4173_v55 }
  0xb2   :  { %2683 = vmatpush3.bf16.msra.mxu0 %v2682_v24  ;;  %v4179_v24 = vand.u32 4294901760, %v3472_v63  ;;  %v4185_v63 = vand.u32 4294901760, %v4154_v34  ;;  %v4191_v34 = vand.u32 4294901760, %v3574_v25  ;;  %v4196_v25 = vand.u32 4294901760, %v4161_v4 }
  0xb3   :  { %2707 = vmatpush3.bf16.msra.mxu1 %v3637_v49  ;;  %2717 = vmatprep.subr.bf16.mxu0 %v2716_v1  ;;  %v4202_v4 = vand.u32 4294901760, %v3728_v36 }
  0xb4   :  { %2709 = vmatprep.subr.bf16.mxu1 %v3659_v2  ;;  %v2726_v6 = vpack.c.bf16 %v4180_v38, %v4179_v24  ;;  %v2730_v1 = vpack.c.bf16 %v4186_v53, %v4185_v63 }
  0xb5   :  { %1515 = vmatmul.mubr.f32.vlgmr.msra.gmra.mrb[16].mxu0 %v3734_v30  ;;  %v4190_v30 = vand.u32 4294901760, %v3771_v15 }
  0xb6   :  { %2719 = vmatpush3.bf16.msra.mxu0 %v2718_v40  ;;  %1521 = vmatprep.mubr.f32.mxu0 %v3746_v46  ;;  %v4193_v46 = vand.u32 4294901760, %v3611_v5 }
  0xb7   :  { %2711 = vmatpush3.bf16.msra.mxu1 %v3681_v20  ;;  %2721 = vmatprep.subr.bf16.mxu0 %v2720_v57  ;;  %v2728_v57 = vpack.c.bf16 %v4183_v7, %v4182_v31 }
  0xb8   :  { %2713 = vmatprep.subr.bf16.mxu1 %v3767_v37 }
  0xb9   :  { %1524 = vmatmul.mubr.f32.gmra.mrb[18].mxu0 %v3771_v15  ;;  %v4195_v15 = vand.u32 4294901760, %v3639_v13  ;;  %v4201_v13 = vand.u32 4294901760, %v3725_v47 }
  0xba   :  { %2723 = vmatpush3.bf16.msra.mxu0 %v2722_v50  ;;  %1809 = vmatprep.mubr.f32.mxu0 %v4181_v19 }
  0xbb   :  { %2715 = vmatpush3.bf16.msra.mxu1 %v3796_v23  ;;  %2725 = vmatprep.subr.bf16.mxu0 %v2724_v41 }
  0xbc   :  { %2749 = vmatprep.subr.bf16.mxu1 %v3390_v56  ;;  %v4188_v56 = vand.u32 4294901760, %v3540_v29  ;;  %v2736_v29 = vpack.c.bf16 %v4194_v39, %v4193_v46 }
  0xbe   :  { %1632 = vmatmul.mubr.f32.vlgmr.msra.gmra.mrb[16].mxu1 %v4184_v10  ;;  %2727 = vmatpush3.bf16.msra.mxu0 %v2726_v6  ;;  %v2732_v28 = vpack.c.bf16 %v4189_v33, %v4188_v56 }
  0xbf   :  { %2751 = vmatpush3.bf16.msra.mxu1 %v4156_v22  ;;  %1639 = vmatprep.mubr.f32.mxu1 %v4187_v3  ;;  %v2734_v22 = vpack.c.bf16 %v4192_v11, %v4191_v34 }
  0xc0   :  { %2729 = vmatprep.subr.bf16.mxu0 %v2728_v57  ;;  %2753 = vmatprep.subr.bf16.mxu1 %v4157_v14  ;;  %v2738_v14 = vpack.c.bf16 %v4196_v25, %v4195_v15 }
  0xc2   :  { %1643 = vmatmul.mubr.f32.gmra.mrb[18].mxu1 %v4190_v30  ;;  %2731 = vmatpush3.bf16.msra.mxu0 %v2730_v1 }
  0xc3   :  { %2755 = vmatpush3.bf16.msra.mxu1 %v3422_v9  ;;  %2733 = vmatprep.subr.bf16.mxu0 %v2732_v28  ;;  %v4197_v9 = vand.u32 4294901760, %v4163_v44  ;;  %v4204_v44 = vand.u32 4294901760, %v3754_v59 }
  0xc4   :  { %2757 = vmatprep.subr.bf16.mxu1 %v4159_v45  ;;  %1920 = vmatprep.mubr.f32.mxu1 %v4181_v19  ;;  %v4200_v45 = vand.u32 4294901760, %v3697_v26 }
  0xc5   :  { %v2740_v5 = vpack.c.bf16 %v4198_v0, %v4197_v9 }
  0xc6   :  { %2735 = vmatpush3.bf16.msra.mxu0 %v2734_v22  ;;  %v2742_v21 = vpack.c.bf16 %v4200_v45, %v4199_v16 }
  0xc7   :  { %2759 = vmatpush3.bf16.msra.mxu1 %v4162_v43  ;;  %2737 = vmatprep.subr.bf16.mxu0 %v2736_v29  ;;  %v2744_v43 = vpack.c.bf16 %v4202_v4, %v4201_v13 }
  0xc8   :  { %2761 = vmatprep.subr.bf16.mxu1 %v4164_v62  ;;  %v2746_v62 = vpack.c.bf16 %v4204_v44, %v4203_v42 }
  0xca   :  { %2739 = vmatpush3.bf16.msra.mxu0 %v2738_v14 }
  0xcb   :  { %2763 = vmatpush3.bf16.msra.mxu1 %v4165_v54  ;;  %2741 = vmatprep.subr.bf16.mxu0 %v2740_v5 }
  0xcc   :  { %2765 = vmatprep.subr.bf16.mxu1 %v4166_v35 }
  0xce   :  { %2743 = vmatpush3.bf16.msra.mxu0 %v2742_v21 }
  0xcf   :  { %2767 = vmatpush3.bf16.msra.mxu1 %v4167_v17  ;;  %2745 = vmatprep.subr.bf16.mxu0 %v2744_v43 }
  0xd0   :  { %2769 = vmatprep.subr.bf16.mxu1 %v4170_v18 }
  0xd2   :  { %2747 = vmatpush3.bf16.msra.mxu0 %v2746_v62 }
  0xd3   :  { %2771 = vmatpush3.bf16.msra.mxu1 %v3637_v49 }
  0xd4   :  { %2773 = vmatprep.subr.bf16.mxu1 %v3659_v2 }
  0xd5   :  { %1811 = vmatmul.mubr.f32.vlgmr.msra.gmra.mrb[20].mxu0 %v3705_v51 }
  0xd6   :  { %1816 = vmatprep.mubr.f32.mxu0 %v3714_v58 }
  0xd7   :  { %2775 = vmatpush3.bf16.msra.mxu1 %v3681_v20 }
  0xd8   :  { %2777 = vmatprep.subr.bf16.mxu1 %v3767_v37 }
  0xd9   :  { %1818 = vmatmul.mubr.f32.gmra.mrb[22].mxu0 %v3736_v12 }
  0xdb   :  { %2779 = vmatpush3.bf16.msra.mxu1 %v3796_v23 }
  0xde   :  { %1922 = vmatmul.mubr.f32.vlgmr.msra.gmra.mrb[20].mxu1 %v3705_v51 }
  0xdf   :  { %1927 = vmatprep.mubr.f32.mxu1 %v3714_v58 }
  0xe0   :  { %v91_v26 = vpop.permute.xlu0 %90 }
  0xe2   :  { %1929 = vmatmul.mubr.f32.gmra.mrb[22].mxu1 %v3736_v12 }
  0xe4   :  { %v96_v18 = vpop.permute.xlu0 %95 }
 0x108   :  { %v1972_v49 = vpop.f32.mrb[0].mxu0 }
 0x109   :  { %v1973_v2 = vpop.f32.mrb[1].mxu0 }
 0x10a   :  { %v1974_v48 = vadd.f32 %v1973_v2, %v1972_v49 }
 0x10c   :  { %v207_v47 = vadd.f32 %v1974_v48, %v91_v26 }
 0x111   :  { %v2010_v36 = vpop.f32.mrb[0].mxu1 }
 0x112   :  { %v2011_v61 = vpop.f32.mrb[1].mxu1 }
 0x113   :  { %v2012_v20 = vadd.f32 %v2011_v61, %v2010_v36 }
 0x115   :  { %v454_v59 = vadd.f32 %v2012_v20, %v207_v47  ;;  %v2013_v37 = vpop.f32.mrb[2].mxu1 }
 0x116   :  { %v2014_v54 = vpop.f32.mrb[3].mxu1 }
 0x117   :  { %v1975_v35 = vpop.f32.mrb[2].mxu0  ;;  %v2015_v17 = vadd.f32 %v2014_v54, %v2013_v37 }
 0x118   :  { %v1976_v23 = vpop.f32.mrb[3].mxu0 }
 0x119   :  { %v1977_v51 = vadd.f32 %v1976_v23, %v1975_v35 }
 0x11b   :  { %v222_v40 = vadd.f32 %v1977_v51, %v96_v18 }
 0x11d   :  { %v461_v58 = vadd.f32 %v2015_v17, %v222_v40 }
 0x128   :  { %v2048_v55 = vpop.f32.mrb[4].mxu0 }
 0x129   :  { %v2049_v12 = vpop.f32.mrb[5].mxu0 }
 0x12a   :  { %v2050_v27 = vadd.f32 %v2049_v12, %v2048_v55 }
 0x12c   :  { %v599_v32 = vadd.f32 %v2050_v27, %v454_v59  ;;  %v2051_v8 = vpop.f32.mrb[6].mxu0 }
 0x12d   :  { %v2052_v50 = vpop.f32.mrb[7].mxu0 }
 0x12e   :  { %v2053_v60 = vadd.f32 %v2052_v50, %v2051_v8 }
 0x130   :  { %v608_v52 = vadd.f32 %v2053_v60, %v461_v58 }
 0x131   :  { %v2086_v41 = vpop.f32.mrb[4].mxu1 }
 0x132   :  { %v2087_v24 = vpop.f32.mrb[5].mxu1 }
 0x133   :  { %v2088_v38 = vadd.f32 %v2087_v24, %v2086_v41 }
 0x135   :  { %v716_v6 = vadd.f32 %v2088_v38, %v599_v32  ;;  %v2089_v19 = vpop.f32.mrb[6].mxu1 }
 0x136   :  { %v2090_v31 = vpop.f32.mrb[7].mxu1 }
 0x137   :  { %v2091_v7 = vadd.f32 %v2090_v31, %v2089_v19 }
 0x139   :  { %v727_v57 = vadd.f32 %v2091_v7, %v608_v52 }
 0x148   :  { %v2124_v10 = vpop.f32.mrb[8].mxu0 }
 0x149   :  { %v2125_v63 = vpop.f32.mrb[9].mxu0 }
 0x14a   :  { %v2126_v53 = vadd.f32 %v2125_v63, %v2124_v10 }
 0x14c   :  { %v895_v1 = vadd.f32 %v2126_v53, %v716_v6  ;;  %v2127_v3 = vpop.f32.mrb[10].mxu0 }
 0x14d   :  { %v2128_v56 = vpop.f32.mrb[11].mxu0 }
 0x14e   :  { %v2129_v33 = vadd.f32 %v2128_v56, %v2127_v3 }
 0x150   :  { %v902_v28 = vadd.f32 %v2129_v33, %v727_v57 }
 0x151   :  { %v2162_v30 = vpop.f32.mrb[8].mxu1 }
 0x152   :  { %v2163_v34 = vpop.f32.mrb[9].mxu1 }
 0x153   :  { %v2164_v11 = vadd.f32 %v2163_v34, %v2162_v30 }
 0x155   :  { %v1006_v22 = vadd.f32 %v2164_v11, %v895_v1  ;;  %v2165_v46 = vpop.f32.mrb[10].mxu1 }
 0x156   :  { %v2166_v39 = vpop.f32.mrb[11].mxu1 }
 0x157   :  { %v2167_v29 = vadd.f32 %v2166_v39, %v2165_v46 }
 0x159   :  { %v1013_v15 = vadd.f32 %v2167_v29, %v902_v28 }
 0x168   :  { %v2200_v25 = vpop.f32.mrb[12].mxu0 }
 0x169   :  { %v2201_v14 = vpop.f32.mrb[13].mxu0 }
 0x16a   :  { %v2202_v9 = vadd.f32 %v2201_v14, %v2200_v25 }
 0x16c   :  { %v1125_v0 = vadd.f32 %v2202_v9, %v1006_v22  ;;  %v2203_v5 = vpop.f32.mrb[14].mxu0 }
 0x16d   :  { %v2204_v16 = vpop.f32.mrb[15].mxu0 }
 0x16e   :  { %v2205_v45 = vadd.f32 %v2204_v16, %v2203_v5 }
 0x170   :  { %v1140_v21 = vadd.f32 %v2205_v45, %v1013_v15 }
 0x171   :  { %v2238_v13 = vpop.f32.mrb[12].mxu1 }
 0x172   :  { %v2239_v4 = vpop.f32.mrb[13].mxu1 }
 0x173   :  { %v2240_v43 = vadd.f32 %v2239_v4, %v2238_v13 }
 0x175   :  { %v1372_v42 = vadd.f32 %v2240_v43, %v1125_v0  ;;  %v2241_v44 = vpop.f32.mrb[14].mxu1 }
 0x176   :  { %v2242_v62 = vpop.f32.mrb[15].mxu1 }
 0x177   :  { %v2243_v49 = vadd.f32 %v2242_v62, %v2241_v44 }
 0x179   :  { %v1379_v2 = vadd.f32 %v2243_v49, %v1140_v21 }
 0x188   :  { %v2276_v48 = vpop.f32.mrb[16].mxu0 }
 0x189   :  { %v2277_v26 = vpop.f32.mrb[17].mxu0 }
 0x18a   :  { %v2278_v36 = vadd.f32 %v2277_v26, %v2276_v48 }
 0x18c   :  { %v1517_v47 = vadd.f32 %v2278_v36, %v1372_v42  ;;  %v2279_v61 = vpop.f32.mrb[18].mxu0 }
 0x18d   :  { %v2280_v20 = vpop.f32.mrb[19].mxu0 }
 0x18e   :  { %v2281_v59 = vadd.f32 %v2280_v20, %v2279_v61 }
 0x190   :  { %v1526_v37 = vadd.f32 %v2281_v59, %v1379_v2 }
 0x191   :  { %v2314_v54 = vpop.f32.mrb[16].mxu1 }
 0x192   :  { %v2315_v35 = vpop.f32.mrb[17].mxu1 }
 0x193   :  { %v2316_v17 = vadd.f32 %v2315_v35, %v2314_v54 }
 0x195   :  { %v1634_v23 = vadd.f32 %v2316_v17, %v1517_v47  ;;  %v2317_v18 = vpop.f32.mrb[18].mxu1 }
 0x196   :  { %v2318_v51 = vpop.f32.mrb[19].mxu1 }
 0x197   :  { %v2319_v40 = vadd.f32 %v2318_v51, %v2317_v18 }
 0x199   :  { %v1645_v58 = vadd.f32 %v2319_v40, %v1526_v37 }
 0x1a8   :  { %v2352_v55 = vpop.f32.mrb[20].mxu0 }
 0x1a9   :  { %v2353_v12 = vpop.f32.mrb[21].mxu0 }
 0x1aa   :  { %v2354_v27 = vadd.f32 %v2353_v12, %v2352_v55 }
 0x1ac   :  { %v1813_v32 = vadd.f32 %v2354_v27, %v1634_v23  ;;  %v2355_v8 = vpop.f32.mrb[22].mxu0 }
 0x1ad   :  { %v2356_v50 = vpop.f32.mrb[23].mxu0 }
 0x1ae   :  { %v2357_v60 = vadd.f32 %v2356_v50, %v2355_v8 }
 0x1b0   :  { %v1820_v52 = vadd.f32 %v2357_v60, %v1645_v58 }
 0x1b1   :  { %v2390_v41 = vpop.f32.mrb[20].mxu1 }
 0x1b2   :  { %v2391_v24 = vpop.f32.mrb[21].mxu1 }
 0x1b3   :  { %v2392_v38 = vadd.f32 %v2391_v24, %v2390_v41 }
 0x1b5   :  { %v1924_v6 = vadd.f32 %v2392_v38, %v1813_v32  ;;  %v2393_v19 = vpop.f32.mrb[22].mxu1 }
 0x1b6   :  { %v2394_v31 = vpop.f32.mrb[23].mxu1 }
 0x1b7   :  { %1934 = vst [vmem:[%s3972_s3] sm:$0xff] %v1924_v6  ;;  %v2395_v7 = vadd.f32 %v2394_v31, %v2393_v19 }
 0x1b9   :  { %v1931_v57 = vadd.f32 %v2395_v7, %v1820_v52 }
 0x1bb   :  { %1935 = vst [vmem:[%s3972_s3 + $0x8] sm:$0x3] %v1931_v57 }

// kernel: cnn_new_forward.4
= control target key start
LH: loop header
LB: loop body
LE: loop exit
PB: predicated region body
PF: predicated region fallthrough
CT: control target
= control target key end

     0   :  { %vm80_vm0 = vcmask 130048   ;;  %s15202_s0 = inlined_call_operand.vmem [shape: f32[4,400,128], index: 0, kind: input, shape index: {}]   ;;  %s15203_s1 = inlined_call_operand.vmem [shape: f32[32,400], index: 1, kind: input, shape index: {}]   ;;  %s15204_s2 = inlined_call_operand.vmem [shape: f32[32,1], index: 2, kind: input, shape index: {}]   ;;  %s15205_s3 = inlined_call_operand.vmem [shape: f32[32,128], index: 3, kind: output, shape index: {}]  }
   0x1   :  { %v46_v0 = vld [vmem:[%s15202_s0 + $0x80] sm:$0xff]  ;;  %v47_v1 = vld [vmem:[%s15202_s0 + $0x88] sm:$0xff]  ;;  %v48_v7 = vld [vmem:[%s15202_s0 + $0x90] sm:$0xff] }
   0x2   :  { %v30_v2 = vld [vmem:[%s15202_s0] sm:$0xff]  ;;  %v142_v3 = vand.u32 4294901760, %v46_v0  ;;  %v145_v4 = vand.u32 4294901760, %v47_v1  ;;  %v31_v5 = vld [vmem:[%s15202_s0 + $0x8] sm:$0xff]  ;;  %v49_v8 = vld [vmem:[%s15202_s0 + $0x98] sm:$0xff]  ;;  %v148_v10 = vand.u32 4294901760, %v48_v7 }
   0x3   :  { %v94_v6 = vand.u32 4294901760, %v30_v2  ;;  %v97_v9 = vand.u32 4294901760, %v31_v5  ;;  %v151_v11 = vand.u32 4294901760, %v49_v8  ;;  %v32_v12 = vld [vmem:[%s15202_s0 + $0x10] sm:$0xff]  ;;  %v33_v13 = vld [vmem:[%s15202_s0 + $0x18] sm:$0xff]  ;;  %v50_v14 = vld [vmem:[%s15202_s0 + $0xa0] sm:$0xff] }
   0x4   :  { %v10657_v15 = vpack.c.bf16 %v145_v4, %v142_v3  ;;  %v10659_v16 = vsub.f32 %v46_v0, %v142_v3  ;;  %v10661_v17 = vsub.f32 %v47_v1, %v145_v4  ;;  %v51_v18 = vld [vmem:[%s15202_s0 + $0xa8] sm:$0xff]  ;;  %v34_v19 = vld [vmem:[%s15202_s0 + $0x20] sm:$0xff]  ;;  %v52_v25 = vld [vmem:[%s15202_s0 + $0xb0] sm:$0xff]  ;;  %v10688_v27 = vsub.f32 %v48_v7, %v148_v10 }
   0x5   :  { %v35_v20 = vld [vmem:[%s15202_s0 + $0x28] sm:$0xff]  ;;  %v10672_v21 = vpack.c.bf16 %v97_v9, %v94_v6  ;;  %v10674_v22 = vsub.f32 %v30_v2, %v94_v6  ;;  %v10676_v23 = vsub.f32 %v31_v5, %v97_v9  ;;  %v10678_v24 = vpack.c.bf16 %v151_v11, %v148_v10  ;;  %v53_v26 = vld [vmem:[%s15202_s0 + $0xb8] sm:$0xff]  ;;  %v36_v39 = vld [vmem:[%s15202_s0 + $0x30] sm:$0xff] }
   0x6   :  { %15812 = vst [vmem:[#allocation2_spill] sm:$0xff] %v10659_v16  ;;  %15813 = vst [vmem:[#allocation3_spill] sm:$0xff] %v10661_v17  ;;  %9017 = vmatprep.subr.bf16.mxu0 %v10657_v15  ;;  %9113 = vmatprep.subr.bf16.mxu1 %v10657_v15  ;;  %v100_v28 = vand.u32 4294901760, %v32_v12  ;;  %v103_v29 = vand.u32 4294901760, %v33_v13  ;;  %v154_v30 = vand.u32 4294901760, %v50_v14  ;;  %v157_v31 = vand.u32 4294901760, %v51_v18 }
   0x7   :  { %15814 = vst [vmem:[#allocation4_spill] sm:$0xff] %v10674_v22  ;;  %15815 = vst [vmem:[#allocation5_spill] sm:$0xff] %v10676_v23  ;;  %9019 = vmatpush3.bf16.msra.mxu0 %v10672_v21  ;;  %9115 = vmatpush3.bf16.msra.mxu1 %v10672_v21  ;;  %v106_v32 = vand.u32 4294901760, %v34_v19  ;;  %v109_v33 = vand.u32 4294901760, %v35_v20  ;;  %v160_v34 = vand.u32 4294901760, %v52_v25  ;;  %v10693_v35 = vsub.f32 %v49_v8, %v151_v11  ;;  %v37_v40 = vld [vmem:[%s15202_s0 + $0x38] sm:$0xff] }
   0x8   :  { %15816 = vst [vmem:[#allocation6_spill] sm:$0xff] %v10688_v27  ;;  %9021 = vmatprep.subr.bf16.mxu0 %v10678_v24  ;;  %9117 = vmatprep.subr.bf16.mxu1 %v10678_v24  ;;  %v10696_v36 = vpack.c.bf16 %v103_v29, %v100_v28  ;;  %v10698_v37 = vsub.f32 %v32_v12, %v100_v28  ;;  %v163_v38 = vand.u32 4294901760, %v53_v26  ;;  %v54_v41 = vld [vmem:[%s15202_s0 + $0xc0] sm:$0xff]  ;;  %v55_v46 = vld [vmem:[%s15202_s0 + $0xc8] sm:$0xff]  ;;  %v56_v53 = vld [vmem:[%s15202_s0 + $0xd0] sm:$0xff]  ;;  %v112_v55 = vand.u32 4294901760, %v36_v39 }
   0x9   :  { %15817 = vst [vmem:[#allocation7_spill] sm:$0xff] %v10693_v35  ;;  %v10709_v42 = vsub.f32 %v33_v13, %v103_v29  ;;  %v10711_v43 = vpack.c.bf16 %v157_v31, %v154_v30  ;;  %v10713_v44 = vsub.f32 %v50_v14, %v154_v30  ;;  %v10715_v45 = vsub.f32 %v51_v18, %v157_v31  ;;  %v38_v47 = vld [vmem:[%s15202_s0 + $0x40] sm:$0xff]  ;;  %v39_v48 = vld [vmem:[%s15202_s0 + $0x48] sm:$0xff]  ;;  %v57_v62 = vld [vmem:[%s15202_s0 + $0xd8] sm:$0xff] }
   0xa   :  { %15818 = vst [vmem:[#allocation8_spill] sm:$0xff] %v10698_v37  ;;  %v10726_v49 = vpack.c.bf16 %v109_v33, %v106_v32  ;;  %v10728_v50 = vsub.f32 %v34_v19, %v106_v32  ;;  %v10730_v51 = vsub.f32 %v35_v20, %v109_v33  ;;  %v10732_v52 = vpack.c.bf16 %v163_v38, %v160_v34  ;;  %v40_v63 = vld [vmem:[%s15202_s0 + $0x50] sm:$0xff]  ;;  %v41_v0 = vld [vmem:[%s15202_s0 + $0x58] sm:$0xff]  ;;  %v58_v5 = vld [vmem:[%s15202_s0 + $0xe0] sm:$0xff] }
   0xb   :  { %15819 = vst [vmem:[#allocation9_spill] sm:$0xff] %v10709_v42  ;;  %15820 = vst [vmem:[#allocation10_spill] sm:$0xff] %v10713_v44  ;;  %9023 = vmatpush3.bf16.msra.mxu0 %v10696_v36  ;;  %9119 = vmatpush3.bf16.msra.mxu1 %v10696_v36  ;;  %v10739_v54 = vsub.f32 %v52_v25, %v160_v34  ;;  %v115_v56 = vand.u32 4294901760, %v37_v40  ;;  %v166_v57 = vand.u32 4294901760, %v54_v41  ;;  %v169_v59 = vand.u32 4294901760, %v55_v46  ;;  %v59_v6 = vld [vmem:[%s15202_s0 + $0xe8] sm:$0xff] }
   0xc   :  { %15821 = vst [vmem:[#allocation11_spill] sm:$0xff] %v10715_v45  ;;  %15822 = vst [vmem:[#allocation12_spill] sm:$0xff] %v10728_v50  ;;  %9025 = vmatprep.subr.bf16.mxu0 %v10711_v43  ;;  %9121 = vmatprep.subr.bf16.mxu1 %v10711_v43  ;;  %v10743_v58 = vsub.f32 %v53_v26, %v163_v38  ;;  %v118_v60 = vand.u32 4294901760, %v38_v47  ;;  %v121_v61 = vand.u32 4294901760, %v39_v48  ;;  %v172_v4 = vand.u32 4294901760, %v56_v53  ;;  %v42_v7 = vld [vmem:[%s15202_s0 + $0x60] sm:$0xff] }
   0xd   :  { %15823 = vst [vmem:[#allocation13_spill] sm:$0xff] %v10730_v51  ;;  %15824 = vst [vmem:[#allocation14_spill] sm:$0xff] %v10739_v54  ;;  %v10754_v1 = vpack.c.bf16 %v115_v56, %v112_v55  ;;  %v10756_v2 = vsub.f32 %v36_v39, %v112_v55  ;;  %v10758_v3 = vsub.f32 %v37_v40, %v115_v56  ;;  %v43_v12 = vld [vmem:[%s15202_s0 + $0x68] sm:$0xff]  ;;  %v175_v18 = vand.u32 4294901760, %v57_v62  ;;  %v60_v29 = vld [vmem:[%s15202_s0 + $0xf0] sm:$0xff] }
   0xe   :  { %15825 = vst [vmem:[#allocation15_spill] sm:$0xff] %v10743_v58  ;;  %v10769_v8 = vpack.c.bf16 %v169_v59, %v166_v57  ;;  %v10771_v9 = vsub.f32 %v54_v41, %v166_v57  ;;  %v10773_v10 = vsub.f32 %v55_v46, %v169_v59  ;;  %v10775_v11 = vpack.c.bf16 %v121_v61, %v118_v60  ;;  %v61_v34 = vld [vmem:[%s15202_s0 + $0xf8] sm:$0xff]  ;;  %v44_v38 = vld [vmem:[%s15202_s0 + $0x70] sm:$0xff] }
   0xf   :  { %15826 = vst [vmem:[#allocation16_spill] sm:$0xff] %v10756_v2  ;;  %15827 = vst [vmem:[#allocation17_spill] sm:$0xff] %v10758_v3  ;;  %9027 = vmatpush3.bf16.msra.mxu0 %v10726_v49  ;;  %9123 = vmatpush3.bf16.msra.mxu1 %v10726_v49  ;;  %v10782_v13 = vsub.f32 %v38_v47, %v118_v60  ;;  %v10784_v14 = vsub.f32 %v39_v48, %v121_v61  ;;  %v124_v19 = vand.u32 4294901760, %v40_v63  ;;  %v45_v39 = vld [vmem:[%s15202_s0 + $0x78] sm:$0xff]  ;;  %v15_v48 = vld [vmem:[%s15203_s1 + $0x8] sm:$0xff] }
  0x10   :  { %9029 = vmatprep.subr.bf16.mxu0 %v10732_v52  ;;  %9125 = vmatprep.subr.bf16.mxu1 %v10732_v52  ;;  %v127_v20 = vand.u32 4294901760, %v41_v0  ;;  %v178_v25 = vand.u32 4294901760, %v58_v5  ;;  %v181_v26 = vand.u32 4294901760, %v59_v6  ;;  %v130_v28 = vand.u32 4294901760, %v42_v7 }
  0x11   :  { %v10791_v30 = vpack.c.bf16 %v175_v18, %v172_v4  ;;  %v10793_v31 = vsub.f32 %v56_v53, %v172_v4  ;;  %v10795_v32 = vsub.f32 %v57_v62, %v175_v18  ;;  %v133_v33 = vand.u32 4294901760, %v43_v12  ;;  %v14_v53 = vld [vmem:[%s15203_s1] sm:$0xff] }
  0x12   :  { %v10806_v40 = vpack.c.bf16 %v127_v20, %v124_v19  ;;  %v10808_v41 = vsub.f32 %v40_v63, %v124_v19  ;;  %v10810_v46 = vsub.f32 %v41_v0, %v127_v20  ;;  %v10812_v47 = vpack.c.bf16 %v181_v26, %v178_v25 }
  0x13   :  { %15828 = vst [vmem:[#allocation18_spill] sm:$0xff] %v10795_v32  ;;  %9031 = vmatpush3.bf16.msra.mxu0 %v10754_v1  ;;  %9127 = vmatpush3.bf16.msra.mxu1 %v10754_v1  ;;  %v10822_v55 = vsub.f32 %v58_v5, %v178_v25  ;;  %v10824_v56 = vsub.f32 %v59_v6, %v181_v26  ;;  %v184_v59 = vand.u32 4294901760, %v60_v29  ;;  %v187_v61 = vand.u32 4294901760, %v61_v34 }
  0x14   :  { %v10826_v57 = vpack.c.bf16 %v133_v33, %v130_v28  ;;  %9033 = vmatprep.subr.bf16.mxu0 %v10769_v8  ;;  %9129 = vmatprep.subr.bf16.mxu1 %v10769_v8  ;;  %v10830_v60 = vsub.f32 %v42_v7, %v130_v28  ;;  %v136_v62 = vand.u32 4294901760, %v44_v38  ;;  %v139_v63 = vand.u32 4294901760, %v45_v39 }
  0x15   :  { %15829 = vst [vmem:[#allocation19_spill] sm:$0xff] %v10824_v56  ;;  %v10832_v0 = vsub.f32 %v43_v12, %v133_v33  ;;  %v10834_v4 = vand.u32 4294901760, %v15_v48  ;;  %v10836_v5 = vand.u32 4294901760, %v14_v53  ;;  %v15206_v6 = vand.u32 4294901760, %v10659_v16 }
  0x16   :  { %v10839_v18 = vpack.c.bf16 %v187_v61, %v184_v59  ;;  %v10841_v19 = vsub.f32 %v60_v29, %v184_v59  ;;  %v10843_v20 = vsub.f32 %v61_v34, %v187_v61  ;;  %v10845_v25 = vpack.c.bf16 %v139_v63, %v136_v62 }
  0x17   :  { %15830 = vst [vmem:[#allocation20_spill] sm:$0xff] %v10834_v4  ;;  %15831 = vst [vmem:[#allocation21_spill] sm:$0xff] %v10836_v5  ;;  %9035 = vmatpush3.bf16.msra.mxu0 %v10775_v11  ;;  %9131 = vmatpush3.bf16.msra.mxu1 %v10775_v11  ;;  %v10849_v7 = vsub.f32 %v44_v38, %v136_v62  ;;  %v10852_v12 = vsub.f32 %v15_v48, %v10834_v4  ;;  %v15211_v28 = vand.u32 4294901760, %v10661_v17 }
  0x18   :  { %v10855_v26 = vsub.f32 %v14_v53, %v10836_v5  ;;  %9037 = vmatprep.subr.bf16.mxu0 %v10791_v30  ;;  %9133 = vmatprep.subr.bf16.mxu1 %v10791_v30  ;;  %v366_v29 = vsub.f32 %v10659_v16, %v15206_v6  ;;  %v15212_v33 = vand.u32 4294901760, %v10674_v22  ;;  %v15215_v34 = vand.u32 4294901760, %v10676_v23 }
  0x19   :  { %15832 = vst [vmem:[#allocation22_spill] sm:$0xff] %v10849_v7  ;;  %15833 = vst [vmem:[#allocation23_spill] sm:$0xff] %v10852_v12  ;;  %v10867_v48 = vand.u32 4294901760, %v10852_v12  ;;  %v373_v59 = vsub.f32 %v10661_v17, %v15211_v28  ;;  %v15837_v5 = vand.u32 4294901760, %v10688_v27 }
  0x1a   :  { %15834 = vst [vmem:[#allocation24_spill] sm:$0xff] %v10855_v26  ;;  %v10870_v53 = vand.u32 4294901760, %v10855_v26  ;;  %v367_v62 = vand.u32 4294901760, %v366_v29  ;;  %v254_v6 = vsub.f32 %v10674_v22, %v15212_v33  ;;  %v261_v38 = vsub.f32 %v10676_v23, %v15215_v34 }
  0x1b   :  { %15835 = vst [vmem:[#allocation25_spill] sm:$0xff] %v10867_v48  ;;  %v380_v4 = vsub.f32 %v10688_v27, %v15837_v5  ;;  %9039 = vmatpush3.bf16.msra.mxu0 %v10806_v40  ;;  %9135 = vmatpush3.bf16.msra.mxu1 %v10806_v40  ;;  %v192_v28 = vsub.f32 %v10852_v12, %v10867_v48  ;;  %v374_v61 = vand.u32 4294901760, %v373_v59  ;;  %v15838_v33 = vand.u32 4294901760, %v10693_v35 }
  0x1c   :  { %15836 = vst [vmem:[#allocation26_spill] sm:$0xff] %v10870_v53  ;;  %v198_v29 = vsub.f32 %v10855_v26, %v10870_v53  ;;  %9041 = vmatprep.subr.bf16.mxu0 %v10812_v47  ;;  %9137 = vmatprep.subr.bf16.mxu1 %v10812_v47  ;;  %v10896_v5 = vsub.f32 %v45_v39, %v139_v63  ;;  %v255_v34 = vand.u32 4294901760, %v254_v6  ;;  %v262_v27 = vand.u32 4294901760, %v261_v38 }
  0x1d   :  { %v387_v22 = vsub.f32 %v10693_v35, %v15838_v33  ;;  %v15229_v23 = vand.u32 4294901760, %v10698_v37  ;;  %v10899_v17 = vand.u32 4294901760, %v192_v28  ;;  %v9048_v26 = vpack.c.bf16 %v374_v61, %v367_v62  ;;  %767 = vmatprep.mubr.f32.mxu1 %v10867_v48 }
  0x1e   :  { %15839 = vst [vmem:[#allocation27_spill] sm:$0xff] %v10896_v5  ;;  %v10901_v12 = vand.u32 4294901760, %v198_v29  ;;  %v381_v59 = vand.u32 4294901760, %v380_v4  ;;  %v15228_v39 = vand.u32 4294901760, %v10709_v42  ;;  %v15230_v63 = vand.u32 4294901760, %v10713_v44 }
  0x1f   :  { %15840 = vst [vmem:[#allocation28_spill] sm:$0xff] %v10899_v17  ;;  %v388_v16 = vand.u32 4294901760, %v387_v22  ;;  %v268_v33 = vsub.f32 %v10698_v37, %v15229_v23  ;;  %9043 = vmatpush3.bf16.msra.mxu0 %v10826_v57  ;;  %9139 = vmatpush3.bf16.msra.mxu1 %v10826_v57  ;;  %v9050_v6 = vpack.c.bf16 %v262_v27, %v255_v34  ;;  %v15235_v28 = vand.u32 4294901760, %v10715_v45 }
  0x20   :  { %15841 = vst [vmem:[#allocation29_spill] sm:$0xff] %v10901_v12  ;;  %v15236_v38 = vand.u32 4294901760, %v10728_v50  ;;  %v15239_v4 = vand.u32 4294901760, %v10730_v51  ;;  %9045 = vmatprep.subr.bf16.mxu0 %v10839_v18  ;;  %9141 = vmatprep.subr.bf16.mxu1 %v10839_v18  ;;  %v275_v61 = vsub.f32 %v10709_v42, %v15228_v39  ;;  %v394_v62 = vsub.f32 %v10713_v44, %v15230_v63 }
  0x21   :  { %v269_v22 = vand.u32 4294901760, %v268_v33  ;;  %v15240_v27 = vand.u32 4294901760, %v10739_v54  ;;  %194 = vmatprep.mubr.f32.mxu0 %v10899_v17  ;;  %v401_v34 = vsub.f32 %v10715_v45, %v15235_v28  ;;  %v15245_v39 = vand.u32 4294901760, %v10743_v58 }
  0x22   :  { %v282_v29 = vsub.f32 %v10728_v50, %v15236_v38  ;;  %v289_v33 = vsub.f32 %v10730_v51, %v15239_v4  ;;  %v276_v23 = vand.u32 4294901760, %v275_v61  ;;  %v395_v63 = vand.u32 4294901760, %v394_v62 }
  0x23   :  { %v408_v48 = vsub.f32 %v10739_v54, %v15240_v27  ;;  %v15253_v17 = vand.u32 4294901760, %v10756_v2  ;;  %9047 = vmatpush3.bf16.msra.mxu0 %v10845_v25  ;;  %9143 = vmatpush3.bf16.msra.mxu1 %v10845_v25  ;;  %v402_v28 = vand.u32 4294901760, %v401_v34  ;;  %v415_v4 = vsub.f32 %v10743_v58, %v15245_v39  ;;  %v19_v34 = vld [vmem:[%s15203_s1 + $0x28] sm:$0xff] }
  0x24   :  { %v283_v38 = vand.u32 4294901760, %v282_v29  ;;  %v290_v50 = vand.u32 4294901760, %v289_v33  ;;  %9049 = vmatprep.subr.bf16.mxu0 %v9048_v26  ;;  %9177 = vmatprep.subr.bf16.mxu1 %v10657_v15  ;;  %v9052_v61 = vpack.c.bf16 %v388_v16, %v381_v59  ;;  %v9054_v62 = vpack.c.bf16 %v276_v23, %v269_v22  ;;  %v18_v15 = vld [vmem:[%s15203_s1 + $0x20] sm:$0xff] }
  0x25   :  { %v296_v27 = vsub.f32 %v10756_v2, %v15253_v17  ;;  %v15247_v54 = vand.u32 4294901760, %v10758_v3  ;;  %v9056_v29 = vpack.c.bf16 %v402_v28, %v395_v63  ;;  %v409_v33 = vand.u32 4294901760, %v408_v48 }
  0x26   :  { %v416_v51 = vand.u32 4294901760, %v415_v4  ;;  %v15246_v39 = vand.u32 4294901760, %v10771_v9  ;;  %200 = vmatmul.mubr.f32.vlgmr.msra.gmra.mrb[0].mxu0 %v10901_v12  ;;  %771 = vmatmul.mubr.f32.vlgmr.msra.gmra.mrb[0].mxu1 %v10870_v53  ;;  %v15248_v26 = vand.u32 4294901760, %v10773_v10  ;;  %v15249_v48 = vand.u32 4294901760, %v10782_v13 }
  0x27   :  { %v297_v16 = vand.u32 4294901760, %v296_v27  ;;  %v303_v23 = vsub.f32 %v10758_v3, %v15247_v54  ;;  %9051 = vmatpush3.bf16.msra.mxu0 %v9050_v6  ;;  %9179 = vmatpush3.bf16.msra.mxu1 %v10672_v21  ;;  %v9058_v59 = vpack.c.bf16 %v290_v50, %v283_v38  ;;  %v15250_v28 = vand.u32 4294901760, %v10784_v14 }
  0x28   :  { %v422_v63 = vsub.f32 %v10771_v9, %v15246_v39  ;;  %v10967_v4 = vand.u32 4294901760, %v19_v34  ;;  %9053 = vmatprep.subr.bf16.mxu0 %v9052_v61  ;;  %9181 = vmatprep.subr.bf16.mxu1 %v10678_v24  ;;  %v429_v27 = vsub.f32 %v10773_v10, %v15248_v26  ;;  %v310_v21 = vsub.f32 %v10782_v13, %v15249_v48 }
  0x29   :  { %v304_v22 = vand.u32 4294901760, %v303_v23  ;;  %v10976_v50 = vand.u32 4294901760, %v18_v15  ;;  %v317_v38 = vsub.f32 %v10784_v14, %v15250_v28  ;;  %v15252_v24 = vand.u32 4294901760, %v10793_v31 }
  0x2a   :  { %15842 = vst [vmem:[#allocation30_spill] sm:$0xff] %v10967_v4  ;;  %v423_v6 = vand.u32 4294901760, %v422_v63  ;;  %v10982_v61 = vsub.f32 %v19_v34, %v10967_v4  ;;  %v9060_v23 = vpack.c.bf16 %v416_v51, %v409_v33  ;;  %v430_v54 = vand.u32 4294901760, %v429_v27  ;;  %v23_v51 = vld [vmem:[%s15203_s1 + $0x48] sm:$0xff] }
  0x2b   :  { %15843 = vst [vmem:[#allocation31_spill] sm:$0xff] %v10976_v50  ;;  %v9062_v39 = vpack.c.bf16 %v304_v22, %v297_v16  ;;  %v10986_v26 = vsub.f32 %v18_v15, %v10976_v50  ;;  %9055 = vmatpush3.bf16.msra.mxu0 %v9054_v62  ;;  %9183 = vmatpush3.bf16.msra.mxu1 %v10696_v36  ;;  %v311_v48 = vand.u32 4294901760, %v310_v21  ;;  %v15251_v28 = vand.u32 4294901760, %v10795_v32  ;;  %v22_v16 = vld [vmem:[%s15203_s1 + $0x40] sm:$0xff] }
  0x2c   :  { %15844 = vst [vmem:[#allocation32_spill] sm:$0xff] %v10982_v61  ;;  %v10990_v63 = vand.u32 4294901760, %v10982_v61  ;;  %v436_v34 = vsub.f32 %v10793_v31, %v15252_v24  ;;  %9057 = vmatprep.subr.bf16.mxu0 %v9056_v29  ;;  %9185 = vmatprep.subr.bf16.mxu1 %v10711_v43  ;;  %v318_v62 = vand.u32 4294901760, %v317_v38  ;;  %v15254_v33 = vand.u32 4294901760, %v10808_v41 }
  0x2d   :  { %15845 = vst [vmem:[#allocation33_spill] sm:$0xff] %v10986_v26  ;;  %v11001_v36 = vand.u32 4294901760, %v10986_v26  ;;  %v15257_v15 = vand.u32 4294901760, %v10810_v46  ;;  %v9064_v22 = vpack.c.bf16 %v430_v54, %v423_v6  ;;  %v443_v43 = vsub.f32 %v10795_v32, %v15251_v28 }
  0x2e   :  { %15846 = vst [vmem:[#allocation34_spill] sm:$0xff] %v10990_v63  ;;  %v207_v27 = vsub.f32 %v10982_v61, %v10990_v63  ;;  %v437_v21 = vand.u32 4294901760, %v436_v34  ;;  %778 = vmatprep.mubr.f32.mxu1 %v10990_v63  ;;  %v324_v38 = vsub.f32 %v10808_v41, %v15254_v33  ;;  %v11023_v6 = vand.u32 4294901760, %v23_v51 }
  0x2f   :  { %15847 = vst [vmem:[#allocation35_spill] sm:$0xff] %v11001_v36  ;;  %v213_v29 = vsub.f32 %v10986_v26, %v11001_v36  ;;  %v331_v54 = vsub.f32 %v10810_v46, %v15257_v15  ;;  %782 = vmatmul.mubr.f32.gmra.mrb[2].mxu1 %v11001_v36  ;;  %9059 = vmatpush3.bf16.msra.mxu0 %v9058_v59  ;;  %v444_v28 = vand.u32 4294901760, %v443_v43  ;;  %v11028_v24 = vand.u32 4294901760, %v22_v16 }
  0x30   :  { %15848 = vst [vmem:[#allocation36_spill] sm:$0xff] %v11023_v6  ;;  %9187 = vmatpush3.bf16.msra.mxu1 %v10726_v49  ;;  %v11026_v34 = vand.u32 4294901760, %v207_v27  ;;  %v15260_v17 = vand.u32 4294901760, %v10822_v55  ;;  %9061 = vmatprep.subr.bf16.mxu0 %v9060_v23  ;;  %v9066_v33 = vpack.c.bf16 %v318_v62, %v311_v48  ;;  %v325_v15 = vand.u32 4294901760, %v324_v38  ;;  %v27_v49 = vld [vmem:[%s15203_s1 + $0x68] sm:$0xff]  ;;  %v26_v23 = vld [vmem:[%s15203_s1 + $0x60] sm:$0xff] }
  0x31   :  { %15850 = vst [vmem:[#allocation38_spill] sm:$0xff] %v11028_v24  ;;  %9189 = vmatprep.subr.bf16.mxu1 %v10732_v52  ;;  %v11032_v63 = vand.u32 4294901760, %v213_v29  ;;  %v11035_v36 = vsub.f32 %v23_v51, %v11023_v6  ;;  %v332_v59 = vand.u32 4294901760, %v331_v54  ;;  %v11042_v27 = vsub.f32 %v22_v16, %v11028_v24 }
  0x32   :  { %15849 = vst [vmem:[#allocation37_spill] sm:$0xff] %v11026_v34  ;;  %209 = vmatprep.mubr.f32.mxu0 %v11026_v34  ;;  %v450_v52 = vsub.f32 %v10822_v55, %v15260_v17  ;;  %v15261_v48 = vand.u32 4294901760, %v10824_v56  ;;  %v9068_v51 = vpack.c.bf16 %v444_v28, %v437_v21  ;;  %v15266_v43 = vand.u32 4294901760, %v10830_v60  ;;  %v7831_v34 = vld [vmem:[%s15202_s0 + $0x238] sm:$0xff] }
  0x33   :  { %15851 = vst [vmem:[#allocation39_spill] sm:$0xff] %v11032_v63  ;;  %15852 = vst [vmem:[#allocation40_spill] sm:$0xff] %v11035_v36  ;;  %215 = vmatmul.mubr.f32.gmra.mrb[2].mxu0 %v11032_v63  ;;  %v11053_v62 = vand.u32 4294901760, %v11035_v36  ;;  %v15267_v16 = vand.u32 4294901760, %v10832_v0  ;;  %v11059_v29 = vand.u32 4294901760, %v11042_v27  ;;  %v11064_v17 = vand.u32 4294901760, %v27_v49 }
  0x34   :  { %15853 = vst [vmem:[#allocation41_spill] sm:$0xff] %v11042_v27  ;;  %9063 = vmatpush3.bf16.msra.mxu0 %v9062_v39  ;;  %9191 = vmatpush3.bf16.msra.mxu1 %v10754_v1  ;;  %v451_v38 = vand.u32 4294901760, %v450_v52  ;;  %v457_v54 = vsub.f32 %v10824_v56, %v15261_v48  ;;  %v338_v1 = vsub.f32 %v10830_v60, %v15266_v43  ;;  %v11075_v21 = vand.u32 4294901760, %v26_v23  ;;  %v7812_v63 = vld [vmem:[%s15202_s0 + $0x1a0] sm:$0xff] }
  0x35   :  { %15854 = vst [vmem:[#allocation42_spill] sm:$0xff] %v11053_v62  ;;  %15855 = vst [vmem:[#allocation43_spill] sm:$0xff] %v11059_v29  ;;  %9065 = vmatprep.subr.bf16.mxu0 %v9064_v22  ;;  %9193 = vmatprep.subr.bf16.mxu1 %v10769_v8  ;;  %v222_v28 = vsub.f32 %v11035_v36, %v11053_v62  ;;  %v345_v39 = vsub.f32 %v10832_v0, %v15267_v16  ;;  %v15270_v22 = vand.u32 4294901760, %v10841_v19 }
  0x36   :  { %15856 = vst [vmem:[#allocation44_spill] sm:$0xff] %v11064_v17  ;;  %15857 = vst [vmem:[#allocation45_spill] sm:$0xff] %v11075_v21  ;;  %v228_v52 = vsub.f32 %v11042_v27, %v11059_v29  ;;  %v458_v48 = vand.u32 4294901760, %v457_v54  ;;  %789 = vmatprep.mubr.f32.mxu1 %v11053_v62  ;;  %v11081_v8 = vsub.f32 %v27_v49, %v11064_v17  ;;  %v339_v43 = vand.u32 4294901760, %v338_v1 }
  0x37   :  { %v9070_v53 = vpack.c.bf16 %v332_v59, %v325_v15  ;;  %v11084_v36 = vand.u32 4294901760, %v222_v28  ;;  %793 = vmatmul.mubr.f32.gmra.mrb[4].mxu1 %v11059_v29  ;;  %v11088_v16 = vsub.f32 %v26_v23, %v11075_v21  ;;  %v346_v62 = vand.u32 4294901760, %v345_v39  ;;  %v7826_v28 = vld [vmem:[%s15202_s0 + $0x210] sm:$0xff] }
  0x38   :  { %15858 = vst [vmem:[#allocation46_spill] sm:$0xff] %v11081_v8  ;;  %9067 = vmatpush3.bf16.msra.mxu0 %v9066_v33  ;;  %9195 = vmatpush3.bf16.msra.mxu1 %v10775_v11  ;;  %v11091_v54 = vand.u32 4294901760, %v228_v52  ;;  %v11094_v49 = vand.u32 4294901760, %v11081_v8  ;;  %v464_v15 = vsub.f32 %v10841_v19, %v15270_v22  ;;  %v9072_v59 = vpack.c.bf16 %v458_v48, %v451_v38  ;;  %v7827_v48 = vld [vmem:[%s15202_s0 + $0x218] sm:$0xff] }
  0x39   :  { %15859 = vst [vmem:[#allocation47_spill] sm:$0xff] %v11084_v36  ;;  %15860 = vst [vmem:[#allocation48_spill] sm:$0xff] %v11088_v16  ;;  %9069 = vmatprep.subr.bf16.mxu0 %v9068_v51  ;;  %9197 = vmatprep.subr.bf16.mxu1 %v10791_v30  ;;  %v11101_v23 = vand.u32 4294901760, %v11088_v16  ;;  %v15275_v33 = vand.u32 4294901760, %v10843_v20  ;;  %v15276_v11 = vand.u32 4294901760, %v10849_v7  ;;  %v9074_v22 = vpack.c.bf16 %v346_v62, %v339_v43 }
  0x3a   :  { %15861 = vst [vmem:[#allocation49_spill] sm:$0xff] %v11091_v54  ;;  %15862 = vst [vmem:[#allocation50_spill] sm:$0xff] %v11094_v49  ;;  %224 = vmatprep.mubr.f32.mxu0 %v11084_v36  ;;  %v237_v1 = vsub.f32 %v11081_v8, %v11094_v49  ;;  %800 = vmatprep.mubr.f32.mxu1 %v11094_v49  ;;  %v465_v38 = vand.u32 4294901760, %v464_v15  ;;  %v15865_v49 = vand.u32 4294901760, %v10896_v5  ;;  %v2071_v29 = vand.u32 4294901760, %v7826_v28 }
  0x3b   :  { %15863 = vst [vmem:[#allocation51_spill] sm:$0xff] %v11101_v23  ;;  %230 = vmatmul.mubr.f32.gmra.mrb[4].mxu0 %v11091_v54  ;;  %v243_v51 = vsub.f32 %v11088_v16, %v11101_v23  ;;  %v471_v39 = vsub.f32 %v10843_v20, %v15275_v33  ;;  %v352_v52 = vsub.f32 %v10849_v7, %v15276_v11  ;;  %v7810_v33 = vld [vmem:[%s15202_s0 + $0x190] sm:$0xff]  ;;  %v7811_v11 = vld [vmem:[%s15202_s0 + $0x198] sm:$0xff]  ;;  %v2074_v43 = vand.u32 4294901760, %v7827_v48  ;;  %v15867_v16 = vld [vmem:[#allocation2_spill] sm:$0xff] }
  0x3c   :  { %804 = vmatmul.mubr.f32.gmra.mrb[6].mxu1 %v11101_v23  ;;  %9071 = vmatpush3.bf16.msra.mxu0 %v9070_v53  ;;  %v11127_v30 = vand.u32 4294901760, %v237_v1  ;;  %v359_v15 = vsub.f32 %v10896_v5, %v15865_v49  ;;  %v7828_v49 = vld [vmem:[%s15202_s0 + $0x220] sm:$0xff]  ;;  %v7829_v1 = vld [vmem:[%s15202_s0 + $0x228] sm:$0xff]  ;;  %v2023_v27 = vand.u32 4294901760, %v7810_v33  ;;  %v2026_v36 = vand.u32 4294901760, %v7811_v11 }
  0x3d   :  { %9199 = vmatpush3.bf16.msra.mxu1 %v10806_v40  ;;  %9073 = vmatprep.subr.bf16.mxu0 %v9072_v59  ;;  %v11139_v40 = vand.u32 4294901760, %v243_v51  ;;  %v472_v53 = vand.u32 4294901760, %v471_v39  ;;  %v353_v62 = vand.u32 4294901760, %v352_v52  ;;  %v15868_v59 = vld [vmem:[#allocation3_spill] sm:$0xff]  ;;  %v15870_v39 = vld [vmem:[#allocation4_spill] sm:$0xff]  ;;  %v15871_v52 = vld [vmem:[#allocation5_spill] sm:$0xff]  ;;  %v11161_v26 = vsub.f32 %v7826_v28, %v2071_v29 }
  0x3e   :  { %15864 = vst [vmem:[#allocation52_spill] sm:$0xff] %v11127_v30  ;;  %9201 = vmatprep.subr.bf16.mxu1 %v10812_v47  ;;  %239 = vmatprep.mubr.f32.mxu0 %v11127_v30  ;;  %v360_v23 = vand.u32 4294901760, %v359_v15  ;;  %v9080_v8 = vpack.c.bf16 %v15868_v59, %v15867_v16  ;;  %v15869_v47 = vld [vmem:[#allocation20_spill] sm:$0xff]  ;;  %v9082_v54 = vpack.c.bf16 %v15871_v52, %v15870_v39  ;;  %v7813_v15 = vld [vmem:[%s15202_s0 + $0x1a8] sm:$0xff]  ;;  %v2086_v7 = vand.u32 4294901760, %v7831_v34 }
  0x3f   :  { %15866 = vst [vmem:[#allocation53_spill] sm:$0xff] %v11139_v40  ;;  %1095 = vmatprep.mubr.f32.mxu1 %v15869_v47  ;;  %245 = vmatmul.mubr.f32.gmra.mrb[6].mxu0 %v11139_v40  ;;  %v9076_v51 = vpack.c.bf16 %v472_v53, %v465_v38  ;;  %15872 = vst [vmem:[#allocation2_spill] sm:$0xff] %v11161_v26  ;;  %v2077_v38 = vand.u32 4294901760, %v7828_v49  ;;  %v2080_v53 = vand.u32 4294901760, %v7829_v1  ;;  %v7830_v40 = vld [vmem:[%s15202_s0 + $0x230] sm:$0xff] }
  0x40   :  { %9075 = vmatpush3.bf16.msra.mxu0 %v9074_v22  ;;  %v9078_v30 = vpack.c.bf16 %v360_v23, %v353_v62  ;;  %v11170_v61 = vpack.c.bf16 %v2074_v43, %v2071_v29  ;;  %v11172_v22 = vsub.f32 %v7827_v48, %v2074_v43  ;;  %v7814_v28 = vld [vmem:[%s15202_s0 + $0x1b0] sm:$0xff]  ;;  %v7815_v62 = vld [vmem:[%s15202_s0 + $0x1b8] sm:$0xff]  ;;  %475 = vmatprep.mubr.f32.mxu0 %v15869_v47  ;;  %v2029_v29 = vand.u32 4294901760, %v7812_v63 }
  0x41   :  { %9203 = vmatpush3.bf16.msra.mxu1 %v10826_v57  ;;  %9077 = vmatprep.subr.bf16.mxu0 %v9076_v51  ;;  %v15875_v57 = vld [vmem:[#allocation6_spill] sm:$0xff]  ;;  %v11183_v51 = vsub.f32 %v7810_v33, %v2023_v27  ;;  %v2032_v48 = vand.u32 4294901760, %v7813_v15  ;;  %v11187_v43 = vpack.c.bf16 %v2026_v36, %v2023_v27  ;;  %v11189_v12 = vsub.f32 %v7811_v11, %v2026_v36  ;;  %v7833_v36 = vld [vmem:[%s15202_s0 + $0x248] sm:$0xff] }
  0x42   :  { %9205 = vmatprep.subr.bf16.mxu1 %v10839_v18  ;;  %15873 = vst [vmem:[#allocation3_spill] sm:$0xff] %v11170_v61  ;;  %15874 = vst [vmem:[#allocation4_spill] sm:$0xff] %v11172_v22  ;;  %v9084_v23 = vpack.c.bf16 %v10693_v35, %v15875_v57  ;;  %v9086_v18 = vpack.c.bf16 %v10709_v42, %v10698_v37  ;;  %v2083_v5 = vand.u32 4294901760, %v7830_v40  ;;  %v7832_v35 = vld [vmem:[%s15202_s0 + $0x240] sm:$0xff]  ;;  %v2035_v42 = vand.u32 4294901760, %v7814_v28 }
  0x43   :  { %15876 = vst [vmem:[#allocation5_spill] sm:$0xff] %v11183_v51  ;;  %15877 = vst [vmem:[#allocation54_spill] sm:$0xff] %v11187_v43  ;;  %v11195_v33 = vpack.c.bf16 %v2080_v53, %v2077_v38  ;;  %v11197_v47 = vsub.f32 %v7828_v49, %v2077_v38  ;;  %v2038_v37 = vand.u32 4294901760, %v7815_v62  ;;  %v11203_v27 = vsub.f32 %v7829_v1, %v2080_v53  ;;  %v7817_v49 = vld [vmem:[%s15202_s0 + $0x1c8] sm:$0xff]  ;;  %v15886_v1 = vld [vmem:[#allocation13_spill] sm:$0xff] }
  0x44   :  { %15878 = vst [vmem:[#allocation55_spill] sm:$0xff] %v11189_v12  ;;  %9079 = vmatpush3.bf16.msra.mxu0 %v9078_v30  ;;  %v11205_v11 = vsub.f32 %v7812_v63, %v2029_v29  ;;  %v7816_v30 = vld [vmem:[%s15202_s0 + $0x1c0] sm:$0xff]  ;;  %v11215_v38 = vpack.c.bf16 %v2032_v48, %v2029_v29  ;;  %v2089_v63 = vand.u32 4294901760, %v7832_v35  ;;  %v11229_v29 = vpack.c.bf16 %v2086_v7, %v2083_v5 }
  0x45   :  { %9207 = vmatpush3.bf16.msra.mxu1 %v10845_v25  ;;  %15879 = vst [vmem:[#allocation56_spill] sm:$0xff] %v11195_v33  ;;  %15880 = vst [vmem:[#allocation57_spill] sm:$0xff] %v11197_v47  ;;  %9081 = vmatprep.subr.bf16.mxu0 %v9080_v8  ;;  %v9088_v25 = vpack.c.bf16 %v10715_v45, %v10713_v44  ;;  %v11217_v8 = vsub.f32 %v7813_v15, %v2032_v48  ;;  %v7834_v45 = vld [vmem:[%s15202_s0 + $0x250] sm:$0xff]  ;;  %v7835_v44 = vld [vmem:[%s15202_s0 + $0x258] sm:$0xff]  ;;  %v2092_v53 = vand.u32 4294901760, %v7833_v36 }
  0x46   :  { %9371 = vmatprep.subr.bf16.mxu1 %v11170_v61  ;;  %15881 = vst [vmem:[#allocation58_spill] sm:$0xff] %v11203_v27  ;;  %15882 = vst [vmem:[#allocation59_spill] sm:$0xff] %v11205_v11  ;;  %v15885_v61 = vld [vmem:[#allocation12_spill] sm:$0xff]  ;;  %v15887_v11 = vld [vmem:[#allocation21_spill] sm:$0xff]  ;;  %v11231_v15 = vsub.f32 %v7830_v40, %v2083_v5  ;;  %v11233_v48 = vsub.f32 %v7831_v34, %v2086_v7  ;;  %v11238_v27 = vsub.f32 %v7814_v28, %v2035_v42 }
  0x47   :  { %15883 = vst [vmem:[#allocation60_spill] sm:$0xff] %v11215_v38  ;;  %15884 = vst [vmem:[#allocation61_spill] sm:$0xff] %v11217_v8  ;;  %477 = vmatmul.mubr.f32.vlgmr.msra.gmra.mrb[8].mxu0 %v15887_v11  ;;  %v11236_v8 = vpack.c.bf16 %v2038_v37, %v2035_v42  ;;  %v2041_v47 = vand.u32 4294901760, %v7816_v30  ;;  %v2044_v57 = vand.u32 4294901760, %v7817_v49  ;;  %v7819_v5 = vld [vmem:[%s15202_s0 + $0x1d8] sm:$0xff]  ;;  %v11247_v7 = vsub.f32 %v7815_v62, %v2038_v37  ;;  %v15894_v34 = vld [vmem:[#allocation14_spill] sm:$0xff] }
  0x48   :  { %1097 = vmatmul.mubr.f32.vlgmr.msra.gmra.mrb[8].mxu1 %v15887_v11  ;;  %15888 = vst [vmem:[#allocation12_spill] sm:$0xff] %v11229_v29  ;;  %15889 = vst [vmem:[#allocation13_spill] sm:$0xff] %v11231_v15  ;;  %9083 = vmatpush3.bf16.msra.mxu0 %v9082_v54  ;;  %v7818_v11 = vld [vmem:[%s15202_s0 + $0x1d0] sm:$0xff]  ;;  %v9092_v54 = vpack.c.bf16 %v10743_v58, %v15894_v34  ;;  %v2095_v42 = vand.u32 4294901760, %v7834_v45  ;;  %v2098_v40 = vand.u32 4294901760, %v7835_v44  ;;  %v7836_v28 = vld [vmem:[%s15202_s0 + $0x260] sm:$0xff] }
  0x49   :  { %15890 = vst [vmem:[#allocation62_spill] sm:$0xff] %v11233_v48  ;;  %9373 = vmatpush3.bf16.msra.mxu1 %v11187_v43  ;;  %15891 = vst [vmem:[#allocation63_spill] sm:$0xff] %v11236_v8  ;;  %482 = vmatprep.mubr.f32.mxu0 %v10967_v4  ;;  %v7837_v43 = vld [vmem:[%s15202_s0 + $0x268] sm:$0xff]  ;;  %v9094_v37 = vpack.c.bf16 %v10758_v3, %v10756_v2  ;;  %v7820_v58 = vld [vmem:[%s15202_s0 + $0x1e0] sm:$0xff]  ;;  %v11279_v62 = vpack.c.bf16 %v2044_v57, %v2041_v47  ;;  %v2101_v2 = vand.u32 4294901760, %v7836_v28 }
  0x4a   :  { %15892 = vst [vmem:[#allocation64_spill] sm:$0xff] %v11238_v27  ;;  %9085 = vmatprep.subr.bf16.mxu0 %v9084_v23  ;;  %15893 = vst [vmem:[#allocation65_spill] sm:$0xff] %v11247_v7  ;;  %9375 = vmatprep.subr.bf16.mxu1 %v11195_v33  ;;  %v11258_v27 = vpack.c.bf16 %v2092_v53, %v2089_v63  ;;  %v11260_v23 = vsub.f32 %v7832_v35, %v2089_v63  ;;  %v7821_v34 = vld [vmem:[%s15202_s0 + $0x1e8] sm:$0xff]  ;;  %v2047_v63 = vand.u32 4294901760, %v7818_v11 }
  0x4b   :  { %484 = vmatmul.mubr.f32.gmra.mrb[10].mxu0 %v10976_v50  ;;  %v11273_v33 = vsub.f32 %v7833_v36, %v2092_v53  ;;  %v11275_v35 = vsub.f32 %v7816_v30, %v2041_v47  ;;  %1102 = vmatprep.mubr.f32.mxu1 %v10967_v4  ;;  %15898 = vst [vmem:[#allocation69_spill] sm:$0xff] %v11279_v62  ;;  %v2104_v7 = vand.u32 4294901760, %v7837_v43  ;;  %v2053_v53 = vand.u32 4294901760, %v7820_v58  ;;  %v7839_v47 = vld [vmem:[%s15202_s0 + $0x278] sm:$0xff] }
  0x4c   :  { %15895 = vst [vmem:[#allocation66_spill] sm:$0xff] %v11258_v27  ;;  %15896 = vst [vmem:[#allocation67_spill] sm:$0xff] %v11260_v23  ;;  %v2050_v23 = vand.u32 4294901760, %v7819_v5  ;;  %9087 = vmatpush3.bf16.msra.mxu0 %v9086_v18  ;;  %v11281_v3 = vsub.f32 %v7817_v49, %v2044_v57  ;;  %489 = vmatprep.mubr.f32.mxu0 %v11023_v6  ;;  %v11284_v36 = vpack.c.bf16 %v2098_v40, %v2095_v42  ;;  %v7838_v18 = vld [vmem:[%s15202_s0 + $0x270] sm:$0xff] }
  0x4d   :  { %15897 = vst [vmem:[#allocation68_spill] sm:$0xff] %v11275_v35  ;;  %9377 = vmatpush3.bf16.msra.mxu1 %v11215_v38  ;;  %9089 = vmatprep.subr.bf16.mxu0 %v9088_v25  ;;  %v11286_v30 = vsub.f32 %v7834_v45, %v2095_v42  ;;  %v2056_v35 = vand.u32 4294901760, %v7821_v34  ;;  %v11295_v57 = vsub.f32 %v7835_v44, %v2098_v40  ;;  %v7822_v40 = vld [vmem:[%s15202_s0 + $0x1f0] sm:$0xff]  ;;  %v2110_v44 = vand.u32 4294901760, %v7839_v47 }
  0x4e   :  { %15899 = vst [vmem:[#allocation70_spill] sm:$0xff] %v11284_v36  ;;  %9379 = vmatprep.subr.bf16.mxu1 %v11229_v29  ;;  %v9098_v25 = vpack.c.bf16 %v10784_v14, %v10782_v13  ;;  %v11299_v49 = vsub.f32 %v7818_v11, %v2047_v63  ;;  %1104 = vmatmul.mubr.f32.gmra.mrb[10].mxu1 %v10976_v50  ;;  %v7823_v11 = vld [vmem:[%s15202_s0 + $0x1f8] sm:$0xff]  ;;  %v2107_v29 = vand.u32 4294901760, %v7838_v18 }
  0x4f   :  { %491 = vmatmul.mubr.f32.gmra.mrb[12].mxu0 %v11028_v24  ;;  %v11303_v45 = vpack.c.bf16 %v2050_v23, %v2047_v63  ;;  %v11305_v42 = vsub.f32 %v7819_v5, %v2050_v23  ;;  %v9100_v38 = vpack.c.bf16 %v10795_v32, %v10793_v31  ;;  %v15901_v63 = vpack.c.bf16 %v15886_v1, %v15885_v61 }
  0x50   :  { %v11321_v5 = vpack.c.bf16 %v2104_v7, %v2101_v2  ;;  %v11323_v23 = vsub.f32 %v7836_v28, %v2101_v2  ;;  %496 = vmatprep.mubr.f32.mxu0 %v11064_v17  ;;  %v11326_v50 = vsub.f32 %v7837_v43, %v2104_v7  ;;  %v11328_v4 = vpack.c.bf16 %v2056_v35, %v2053_v53  ;;  %v7841_v2 = vld [vmem:[%s15202_s0 + $0x288] sm:$0xff] }
  0x51   :  { %15900 = vst [vmem:[#allocation71_spill] sm:$0xff] %v11303_v45  ;;  %9091 = vmatpush3.bf16.msra.mxu0 %v15901_v63  ;;  %9381 = vmatpush3.bf16.msra.mxu1 %v11236_v8  ;;  %v11330_v32 = vsub.f32 %v7820_v58, %v2053_v53  ;;  %v7840_v63 = vld [vmem:[%s15202_s0 + $0x280] sm:$0xff]  ;;  %v11339_v28 = vsub.f32 %v7821_v34, %v2056_v35  ;;  %v2059_v7 = vand.u32 4294901760, %v7822_v40  ;;  %v2062_v58 = vand.u32 4294901760, %v7823_v11 }
  0x52   :  { %15902 = vst [vmem:[#allocation72_spill] sm:$0xff] %v11321_v5  ;;  %9093 = vmatprep.subr.bf16.mxu0 %v9092_v54  ;;  %15903 = vst [vmem:[#allocation73_spill] sm:$0xff] %v11328_v4  ;;  %9383 = vmatprep.subr.bf16.mxu1 %v11258_v27  ;;  %v9104_v43 = vpack.c.bf16 %v10824_v56, %v10822_v55  ;;  %v11347_v54 = vld [vmem:[%s15202_s0 + $0x200] sm:$0xff]  ;;  %v11350_v53 = vsub.f32 %v7838_v18, %v2107_v29  ;;  %v2113_v8 = vand.u32 4294901760, %v7840_v63 }
  0x53   :  { %1109 = vmatprep.mubr.f32.mxu1 %v11023_v6  ;;  %498 = vmatmul.mubr.f32.gmra.mrb[14].mxu0 %v11075_v21  ;;  %v11358_v27 = vpack.c.bf16 %v2110_v44, %v2107_v29  ;;  %v2116_v6 = vand.u32 4294901760, %v7841_v2  ;;  %v15906_v18 = vpack.c.bf16 %v10773_v10, %v10771_v9  ;;  %v11365_v34 = vsub.f32 %v7839_v47, %v2110_v44 }
  0x54   :  { %15904 = vst [vmem:[#allocation74_spill] sm:$0xff] %v11350_v53  ;;  %1111 = vmatmul.mubr.f32.gmra.mrb[12].mxu1 %v11028_v24  ;;  %v11367_v24 = vsub.f32 %v7822_v40, %v2059_v7  ;;  %v11371_v29 = vpack.c.bf16 %v2062_v58, %v2059_v7  ;;  %v15911_v56 = vand.u32 4294901760, %v15867_v16  ;;  %v15913_v47 = vand.u32 4294901760, %v15870_v39  ;;  %v11392_v7 = vld [vmem:[%s15202_s0 + $0x208] sm:$0xff] }
  0x55   :  { %9095 = vmatpush3.bf16.msra.mxu0 %v9094_v37  ;;  %9385 = vmatpush3.bf16.msra.mxu1 %v11279_v62  ;;  %15905 = vst [vmem:[#allocation75_spill] sm:$0xff] %v11358_v27  ;;  %15907 = vst [vmem:[#allocation76_spill] sm:$0xff] %v11365_v34  ;;  %v2065_v37 = vand.u32 4294901760, %v11347_v54  ;;  %v15910_v62 = vld [vmem:[#allocation23_spill] sm:$0xff]  ;;  %v15914_v44 = vand.u32 4294901760, %v15871_v52  ;;  %v15915_v16 = vand.u32 4294901760, %v11161_v26 }
  0x56   :  { %9097 = vmatprep.subr.bf16.mxu0 %v15906_v18  ;;  %9387 = vmatprep.subr.bf16.mxu1 %v11284_v36  ;;  %15908 = vst [vmem:[#allocation77_spill] sm:$0xff] %v11367_v24  ;;  %15909 = vst [vmem:[#allocation78_spill] sm:$0xff] %v11371_v29  ;;  %v15912_v18 = vand.u32 4294901760, %v15868_v59  ;;  %v15916_v59 = vand.u32 4294901760, %v11172_v22  ;;  %v15924_v24 = vld [vmem:[#allocation8_spill] sm:$0xff] }
  0x57   :  { %1116 = vmatprep.mubr.f32.mxu1 %v11064_v17  ;;  %633 = vmatprep.mubr.f32.mxu0 %v15910_v62  ;;  %v11385_v40 = vpack.c.bf16 %v15914_v44, %v15913_v47  ;;  %v15919_v44 = vld [vmem:[#allocation7_spill] sm:$0xff]  ;;  %v11408_v62 = vsub.f32 %v7823_v11, %v2062_v58  ;;  %v15925_v34 = vand.u32 4294901760, %v15924_v24  ;;  %v15930_v58 = vand.u32 4294901760, %v11189_v12 }
  0x58   :  { %v11379_v53 = vpack.c.bf16 %v15912_v18, %v15911_v56  ;;  %1118 = vmatmul.mubr.f32.gmra.mrb[14].mxu1 %v11075_v21  ;;  %v2295_v56 = vsub.f32 %v11161_v26, %v15915_v16  ;;  %v2302_v39 = vsub.f32 %v11172_v22, %v15916_v59  ;;  %v15917_v18 = vld [vmem:[#allocation6_spill] sm:$0xff]  ;;  %v15920_v35 = vand.u32 4294901760, %v15919_v44  ;;  %v15922_v21 = vld [vmem:[#allocation57_spill] sm:$0xff] }
  0x59   :  { %v15918_v47 = vand.u32 4294901760, %v15917_v18  ;;  %9099 = vmatpush3.bf16.msra.mxu0 %v9098_v25  ;;  %9389 = vmatpush3.bf16.msra.mxu1 %v11303_v45  ;;  %15921 = vst [vmem:[#allocation6_spill] sm:$0xff] %v11408_v62  ;;  %v15923_v16 = vld [vmem:[#allocation58_spill] sm:$0xff]  ;;  %v15926_v59 = vld [vmem:[#allocation9_spill] sm:$0xff]  ;;  %v15929_v25 = vand.u32 4294901760, %v11183_v51  ;;  %v2190_v18 = vsub.f32 %v11189_v12, %v15930_v58  ;;  %v11428_v24 = vsub.f32 %v7840_v63, %v2113_v8  ;;  %v15939_v58 = vld [vmem:[#allocation27_spill] sm:$0xff] }
  0x5a   :  { %v15927_v22 = vand.u32 4294901760, %v15926_v59  ;;  %9101 = vmatprep.subr.bf16.mxu0 %v9100_v38  ;;  %9391 = vmatprep.subr.bf16.mxu1 %v11321_v5  ;;  %v15933_v38 = vld [vmem:[#allocation61_spill] sm:$0xff]  ;;  %v15934_v26 = vld [vmem:[#allocation10_spill] sm:$0xff]  ;;  %v15936_v5 = vld [vmem:[#allocation11_spill] sm:$0xff]  ;;  %v2296_v44 = vand.u32 4294901760, %v2295_v56  ;;  %v15940_v63 = vpack.c.bf16 %v10810_v46, %v10808_v41  ;;  %v15941_v59 = vand.u32 4294901760, %v15922_v21 }
  0x5b   :  { %v11405_v36 = vpack.c.bf16 %v15920_v35, %v15918_v47  ;;  %v11419_v35 = vpack.c.bf16 %v2116_v6, %v2113_v8  ;;  %v2183_v11 = vsub.f32 %v11183_v51, %v15929_v25  ;;  %v15931_v47 = vld [vmem:[#allocation59_spill] sm:$0xff]  ;;  %v15935_v17 = vand.u32 4294901760, %v15934_v26  ;;  %v15938_v51 = vld [vmem:[#allocation22_spill] sm:$0xff] }
  0x5c   :  { %v11416_v52 = vpack.c.bf16 %v15927_v22, %v15925_v34  ;;  %v15932_v34 = vld [vmem:[#allocation28_spill] sm:$0xff]  ;;  %v15937_v45 = vand.u32 4294901760, %v15936_v5  ;;  %v11439_v25 = vsub.f32 %v7841_v2, %v2116_v6  ;;  %v9110_v12 = vpack.c.bf16 %v15939_v58, %v15938_v51 }
  0x5d   :  { %15928 = vst [vmem:[#allocation7_spill] sm:$0xff] %v11419_v35  ;;  %2123 = vmatprep.mubr.f32.mxu1 %v15932_v34  ;;  %v2303_v8 = vand.u32 4294901760, %v2302_v39  ;;  %9103 = vmatpush3.bf16.msra.mxu0 %v15940_v63  ;;  %v2309_v26 = vsub.f32 %v15922_v21, %v15941_v59  ;;  %v2184_v2 = vand.u32 4294901760, %v2183_v11  ;;  %v2191_v56 = vand.u32 4294901760, %v2190_v18  ;;  %v15949_v5 = vld [vmem:[#allocation64_spill] sm:$0xff] }
  0x5e   :  { %v11437_v62 = vpack.c.bf16 %v15937_v45, %v15935_v17  ;;  %9393 = vmatpush3.bf16.msra.mxu1 %v11328_v4  ;;  %v15942_v17 = vand.u32 4294901760, %v15923_v16  ;;  %9105 = vmatprep.subr.bf16.mxu0 %v9104_v43  ;;  %v15943_v39 = vand.u32 4294901760, %v15931_v47  ;;  %v15944_v22 = vand.u32 4294901760, %v15885_v61  ;;  %v15953_v4 = vld [vmem:[#allocation14_spill] sm:$0xff] }
  0x5f   :  { %9395 = vmatprep.subr.bf16.mxu1 %v11358_v27  ;;  %v15945_v59 = vand.u32 4294901760, %v15886_v1  ;;  %v11470_v43 = vsub.f32 %v11347_v54, %v2065_v37  ;;  %v15948_v11 = vand.u32 4294901760, %v15933_v38  ;;  %v15951_v1 = vand.u32 4294901760, %v11233_v48  ;;  %v15955_v54 = vld [vmem:[#allocation15_spill] sm:$0xff] }
  0x60   :  { %v2316_v6 = vsub.f32 %v15923_v16, %v15942_v17  ;;  %v2197_v63 = vsub.f32 %v15931_v47, %v15943_v39  ;;  %v15946_v17 = vand.u32 4294901760, %v11392_v7  ;;  %v15950_v39 = vand.u32 4294901760, %v11231_v15 }
  0x61   :  { %v11463_v34 = vpack.c.bf16 %v15945_v59, %v15944_v22  ;;  %v2204_v18 = vsub.f32 %v15933_v38, %v15948_v11  ;;  %v2330_v22 = vsub.f32 %v11233_v48, %v15951_v1  ;;  %v15952_v59 = vld [vmem:[#allocation65_spill] sm:$0xff]  ;;  %v15954_v47 = vand.u32 4294901760, %v15953_v4  ;;  %v15958_v38 = vld [vmem:[#allocation67_spill] sm:$0xff] }
  0x62   :  { %v11467_v45 = vpack.c.bf16 %v15946_v17, %v2065_v37  ;;  %v2323_v61 = vsub.f32 %v11231_v15, %v15950_v39  ;;  %v15956_v37 = vand.u32 4294901760, %v15955_v54  ;;  %v15957_v11 = vpack.c.bf16 %v10832_v0, %v10830_v60  ;;  %9397 = vmatpush3.bf16.msra.mxu1 %v11371_v29 }
  0x63   :  { %v9402_v27 = vpack.c.bf16 %v2303_v8, %v2296_v44  ;;  %v2310_v39 = vand.u32 4294901760, %v2309_v26  ;;  %v2317_v15 = vand.u32 4294901760, %v2316_v6  ;;  %v15959_v1 = vpack.c.bf16 %v10843_v20, %v10841_v19  ;;  %9399 = vmatprep.subr.bf16.mxu1 %v11419_v35  ;;  %v15965_v6 = vld [vmem:[#allocation68_spill] sm:$0xff] }
  0x64   :  { %15947 = vst [vmem:[#allocation8_spill] sm:$0xff] %v11467_v45  ;;  %v11487_v16 = vpack.c.bf16 %v15956_v37, %v15954_v47  ;;  %9107 = vmatpush3.bf16.msra.mxu0 %v15957_v11  ;;  %v9404_v4 = vpack.c.bf16 %v2191_v56, %v2184_v2  ;;  %v2198_v47 = vand.u32 4294901760, %v2197_v63  ;;  %v15389_v54 = vand.u32 4294901760, %v11273_v33  ;;  %v15960_v37 = vld [vmem:[#allocation16_spill] sm:$0xff]  ;;  %v15962_v11 = vld [vmem:[#allocation17_spill] sm:$0xff] }
  0x65   :  { %9109 = vmatprep.subr.bf16.mxu0 %v15959_v1  ;;  %v15961_v17 = vand.u32 4294901760, %v15960_v37  ;;  %v15963_v48 = vand.u32 4294901760, %v15962_v11  ;;  %v2205_v44 = vand.u32 4294901760, %v2204_v18  ;;  %v15964_v8 = vand.u32 4294901760, %v15949_v5 }
  0x66   :  { %v15390_v21 = vand.u32 4294901760, %v15965_v6  ;;  %v15393_v1 = vand.u32 4294901760, %v11281_v3  ;;  %v2324_v35 = vand.u32 4294901760, %v2323_v61  ;;  %v2331_v2 = vand.u32 4294901760, %v2330_v22  ;;  %9401 = vmatpush3.bf16.msra.mxu1 %v11467_v45 }
  0x67   :  { %v11503_v29 = vpack.c.bf16 %v15963_v48, %v15961_v17  ;;  %v2211_v26 = vsub.f32 %v15949_v5, %v15964_v8  ;;  %v15966_v56 = vand.u32 4294901760, %v15952_v59  ;;  %v15967_v37 = vand.u32 4294901760, %v10771_v9  ;;  %9403 = vmatprep.subr.bf16.mxu1 %v9402_v27 }
  0x68   :  { %v15968_v48 = vand.u32 4294901760, %v10773_v10  ;;  %9111 = vmatpush3.bf16.msra.mxu0 %v9110_v12  ;;  %v9406_v18 = vpack.c.bf16 %v2317_v15, %v2310_v39  ;;  %v15969_v11 = vand.u32 4294901760, %v15958_v38  ;;  %v15391_v61 = vand.u32 4294901760, %v11286_v30 }
  0x69   :  { %v2218_v63 = vsub.f32 %v15952_v59, %v15966_v56  ;;  %v15392_v22 = vand.u32 4294901760, %v11295_v57  ;;  %9145 = vmatprep.subr.bf16.mxu0 %v11379_v53  ;;  %v2344_v9 = vsub.f32 %v11273_v33, %v15389_v54  ;;  %v2225_v10 = vsub.f32 %v15965_v6, %v15390_v21 }
  0x6a   :  { %v11517_v17 = vpack.c.bf16 %v15968_v48, %v15967_v37  ;;  %v2337_v8 = vsub.f32 %v15958_v38, %v15969_v11  ;;  %v15970_v12 = vand.u32 4294901760, %v10782_v13  ;;  %v15971_v15 = vand.u32 4294901760, %v10784_v14  ;;  %v15972_v48 = vld [vmem:[#allocation24_spill] sm:$0xff]  ;;  %v15973_v11 = vld [vmem:[#allocation29_spill] sm:$0xff] }
  0x6b   :  { %v9408_v56 = vpack.c.bf16 %v2205_v44, %v2198_v47  ;;  %v2212_v37 = vand.u32 4294901760, %v2211_v26  ;;  %v2232_v27 = vsub.f32 %v11281_v3, %v15393_v1  ;;  %v15395_v53 = vand.u32 4294901760, %v11299_v49  ;;  %636 = vmatmul.mubr.f32.vlgmr.msra.gmra.mrb[16].mxu0 %v15972_v48  ;;  %2129 = vmatmul.mubr.f32.vlgmr.msra.gmra.mrb[16].mxu1 %v15973_v11 }
  0x6c   :  { %v11536_v39 = vpack.c.bf16 %v15971_v15, %v15970_v12  ;;  %v9410_v54 = vpack.c.bf16 %v2331_v2, %v2324_v35  ;;  %v2219_v21 = vand.u32 4294901760, %v2218_v63  ;;  %v15394_v13 = vand.u32 4294901760, %v11305_v42  ;;  %v15975_v12 = vld [vmem:[#allocation18_spill] sm:$0xff]  ;;  %9147 = vmatpush3.bf16.msra.mxu0 %v11385_v40  ;;  %9405 = vmatpush3.bf16.msra.mxu1 %v9404_v4 }
  0x6d   :  { %v15974_v14 = vand.u32 4294901760, %v10793_v31  ;;  %v15976_v15 = vand.u32 4294901760, %v15975_v12  ;;  %v2351_v44 = vsub.f32 %v11286_v30, %v15391_v61  ;;  %v2358_v35 = vsub.f32 %v11295_v57, %v15392_v22  ;;  %v15977_v31 = vld [vmem:[#allocation32_spill] sm:$0xff]  ;;  %9149 = vmatprep.subr.bf16.mxu0 %v11405_v36  ;;  %9407 = vmatprep.subr.bf16.mxu1 %v9406_v18  ;;  %v15980_v36 = vld [vmem:[#allocation37_spill] sm:$0xff] }
  0x6e   :  { %v15396_v26 = vand.u32 4294901760, %v11323_v23  ;;  %v15397_v2 = vand.u32 4294901760, %v11326_v50  ;;  %642 = vmatprep.mubr.f32.mxu0 %v15977_v31  ;;  %v2338_v63 = vand.u32 4294901760, %v2337_v8  ;;  %v2226_v40 = vand.u32 4294901760, %v2225_v10  ;;  %2138 = vmatprep.mubr.f32.mxu1 %v15980_v36  ;;  %v15986_v36 = vld [vmem:[#allocation74_spill] sm:$0xff]  ;;  %v15988_v10 = vld [vmem:[#allocation40_spill] sm:$0xff] }
  0x6f   :  { %v11549_v47 = vpack.c.bf16 %v15976_v15, %v15974_v14  ;;  %v2345_v14 = vand.u32 4294901760, %v2344_v9  ;;  %v15978_v4 = vand.u32 4294901760, %v10808_v41  ;;  %v15979_v12 = vand.u32 4294901760, %v10810_v46  ;;  %v15981_v9 = vld [vmem:[#allocation33_spill] sm:$0xff]  ;;  %v15982_v41 = vld [vmem:[#allocation39_spill] sm:$0xff] }
  0x70   :  { %v2233_v61 = vand.u32 4294901760, %v2232_v27  ;;  %v2239_v22 = vsub.f32 %v11299_v49, %v15395_v53  ;;  %v2246_v1 = vsub.f32 %v11305_v42, %v15394_v13  ;;  %645 = vmatmul.mubr.f32.gmra.mrb[18].mxu0 %v15981_v9  ;;  %2144 = vmatmul.mubr.f32.gmra.mrb[18].mxu1 %v15982_v41  ;;  %v2365_v46 = vsub.f32 %v11323_v23, %v15396_v26 }
  0x71   :  { %v11566_v15 = vpack.c.bf16 %v15979_v12, %v15978_v4  ;;  %v2372_v18 = vsub.f32 %v11326_v50, %v15397_v2  ;;  %v15983_v27 = vand.u32 4294901760, %v10822_v55  ;;  %v15984_v4 = vld [vmem:[#allocation19_spill] sm:$0xff]  ;;  %9151 = vmatpush3.bf16.msra.mxu0 %v11416_v52  ;;  %9409 = vmatpush3.bf16.msra.mxu1 %v9408_v56  ;;  %v9412_v53 = vpack.c.bf16 %v2219_v21, %v2212_v37 }
  0x72   :  { %v15985_v12 = vand.u32 4294901760, %v15984_v4  ;;  %v2352_v8 = vand.u32 4294901760, %v2351_v44  ;;  %v2359_v41 = vand.u32 4294901760, %v2358_v35  ;;  %v15398_v26 = vand.u32 4294901760, %v15986_v36  ;;  %651 = vmatprep.mubr.f32.mxu0 %v15988_v10  ;;  %9153 = vmatprep.subr.bf16.mxu0 %v11437_v62  ;;  %v15994_v62 = vld [vmem:[#allocation41_spill] sm:$0xff] }
  0x73   :  { %v15987_v11 = vand.u32 4294901760, %v11392_v7  ;;  %v9414_v55 = vpack.c.bf16 %v2345_v14, %v2338_v63  ;;  %v15990_v52 = vand.u32 4294901760, %v10830_v60  ;;  %v15991_v21 = vand.u32 4294901760, %v10832_v0  ;;  %9411 = vmatprep.subr.bf16.mxu1 %v9410_v54 }
  0x74   :  { %v11589_v13 = vpack.c.bf16 %v15985_v12, %v15983_v27  ;;  %v15989_v27 = vld [vmem:[#allocation76_spill] sm:$0xff]  ;;  %v9416_v37 = vpack.c.bf16 %v2233_v61, %v2226_v40  ;;  %v2240_v44 = vand.u32 4294901760, %v2239_v22  ;;  %v2247_v35 = vand.u32 4294901760, %v2246_v1  ;;  %v15993_v12 = vld [vmem:[#allocation47_spill] sm:$0xff]  ;;  %654 = vmatmul.mubr.f32.gmra.mrb[20].mxu0 %v15994_v62  ;;  %v25_v62 = vld [vmem:[%s15203_s1 + $0x58] sm:$0xff] }
  0x75   :  { %v11596_v2 = vsub.f32 %v11392_v7, %v15987_v11  ;;  %v15399_v4 = vand.u32 4294901760, %v15989_v27  ;;  %v11605_v56 = vpack.c.bf16 %v15991_v21, %v15990_v52  ;;  %v15992_v7 = vand.u32 4294901760, %v11330_v32  ;;  %2153 = vmatprep.mubr.f32.mxu1 %v15993_v12  ;;  %v15996_v52 = vld [vmem:[#allocation49_spill] sm:$0xff]  ;;  %9155 = vmatpush3.bf16.msra.mxu0 %v11463_v34  ;;  %v16000_v21 = vld [vmem:[#allocation6_spill] sm:$0xff] }
  0x76   :  { %v2366_v63 = vand.u32 4294901760, %v2365_v46  ;;  %v2373_v14 = vand.u32 4294901760, %v2372_v18  ;;  %v15995_v60 = vand.u32 4294901760, %v11339_v28  ;;  %2159 = vmatmul.mubr.f32.gmra.mrb[20].mxu1 %v15996_v52  ;;  %v15997_v54 = vand.u32 4294901760, %v10841_v19  ;;  %v15999_v46 = vld [vmem:[#allocation77_spill] sm:$0xff]  ;;  %9157 = vmatprep.subr.bf16.mxu0 %v11487_v16 }
  0x77   :  { %v2253_v11 = vsub.f32 %v11330_v32, %v15992_v7  ;;  %v15998_v1 = vand.u32 4294901760, %v10843_v20  ;;  %9413 = vmatpush3.bf16.msra.mxu1 %v9412_v53  ;;  %v9418_v22 = vpack.c.bf16 %v2359_v41, %v2352_v8  ;;  %v2379_v40 = vsub.f32 %v15986_v36, %v15398_v26  ;;  %v16006_v52 = vld [vmem:[#allocation53_spill] sm:$0xff] }
  0x78   :  { %v2260_v0 = vsub.f32 %v11339_v28, %v15995_v60  ;;  %v16001_v60 = vld [vmem:[#allocation46_spill] sm:$0xff]  ;;  %v2386_v19 = vsub.f32 %v15989_v27, %v15399_v4  ;;  %v15403_v20 = vand.u32 4294901760, %v11428_v24  ;;  %v15402_v34 = vand.u32 4294901760, %v11439_v25  ;;  %9415 = vmatprep.subr.bf16.mxu1 %v9414_v55  ;;  %v69_v12 = vld [vmem:[%s15202_s0 + $0x138] sm:$0xff] }
  0x79   :  { %v9172_v61 = vpack.c.bf16 %v15998_v1, %v15997_v54  ;;  %660 = vmatprep.mubr.f32.mxu0 %v16001_v60  ;;  %v16002_v53 = vand.u32 4294901760, %v15938_v51  ;;  %v16003_v8 = vand.u32 4294901760, %v15939_v58  ;;  %v16004_v54 = vld [vmem:[#allocation52_spill] sm:$0xff]  ;;  %v9420_v26 = vpack.c.bf16 %v2247_v35, %v2240_v44  ;;  %9159 = vmatpush3.bf16.msra.mxu0 %v11503_v29 }
  0x7a   :  { %2168 = vmatprep.mubr.f32.mxu1 %v16004_v54  ;;  %v16005_v1 = vld [vmem:[#allocation48_spill] sm:$0xff]  ;;  %v9422_v16 = vpack.c.bf16 %v2373_v14, %v2366_v63  ;;  %v2254_v7 = vand.u32 4294901760, %v2253_v11  ;;  %v2261_v18 = vand.u32 4294901760, %v2260_v0  ;;  %v16007_v4 = vand.u32 4294901760, %v15999_v46  ;;  %9161 = vmatprep.subr.bf16.mxu0 %v11517_v17 }
  0x7b   :  { %v9174_v41 = vpack.c.bf16 %v16003_v8, %v16002_v53  ;;  %663 = vmatmul.mubr.f32.gmra.mrb[22].mxu0 %v16005_v1  ;;  %2174 = vmatmul.mubr.f32.gmra.mrb[22].mxu1 %v16006_v52  ;;  %v16008_v58 = vand.u32 4294901760, %v16000_v21  ;;  %v15401_v53 = vand.u32 4294901760, %v11470_v43  ;;  %v15400_v44 = vand.u32 4294901760, %v11596_v2  ;;  %v68_v54 = vld [vmem:[%s15202_s0 + $0x130] sm:$0xff] }
  0x7c   :  { %9417 = vmatpush3.bf16.msra.mxu1 %v9416_v37  ;;  %v2267_v51 = vsub.f32 %v15999_v46, %v16007_v4  ;;  %v2380_v35 = vand.u32 4294901760, %v2379_v40  ;;  %v2387_v11 = vand.u32 4294901760, %v2386_v19  ;;  %v2393_v29 = vsub.f32 %v11428_v24, %v15403_v20  ;;  %v16009_v37 = vld [vmem:[#allocation20_spill] sm:$0xff] }
  0x7d   :  { %v2274_v55 = vsub.f32 %v16000_v21, %v16008_v58  ;;  %9419 = vmatprep.subr.bf16.mxu1 %v9418_v22  ;;  %v2400_v4 = vsub.f32 %v11439_v25, %v15402_v34  ;;  %970 = vmatprep.mubr.f32.mxu0 %v16009_v37  ;;  %v9424_v63 = vpack.c.bf16 %v2261_v18, %v2254_v7  ;;  %v16024_v52 = vmov 0.0|0.0   ;;  %v20_v60 = vld [vmem:[%s15203_s1 + $0x30] sm:$0xff] }
  0x7e   :  { %2404 = vmatprep.mubr.f32.mxu1 %v16009_v37  ;;  %9163 = vmatpush3.bf16.msra.mxu0 %v11536_v39  ;;  %v2268_v17 = vand.u32 4294901760, %v2267_v51  ;;  %v2281_v0 = vsub.f32 %v11470_v43, %v15401_v53  ;;  %v2288_v22 = vsub.f32 %v11596_v2, %v15400_v44  ;;  %v9426_v40 = vpack.c.bf16 %v2387_v11, %v2380_v35  ;;  %v62_v51 = vld [vmem:[%s15202_s0 + $0x100] sm:$0xff]  ;;  %v11680_v11 = vld [vmem:[%s15202_s0 + $0x110] sm:$0xff]  ;;  %v16028_v37 = vld [vmem:[#allocation31_spill] sm:$0xff] }
  0x7f   :  { %v2275_v14 = vand.u32 4294901760, %v2274_v55  ;;  %9165 = vmatprep.subr.bf16.mxu0 %v11549_v47  ;;  %v2394_v19 = vand.u32 4294901760, %v2393_v29  ;;  %v2401_v8 = vand.u32 4294901760, %v2400_v4  ;;  %v63_v47 = vld [vmem:[%s15202_s0 + $0x108] sm:$0xff]  ;;  %v16010_v55 = vld [vmem:[#allocation2_spill] sm:$0xff]  ;;  %v11685_v29 = vld [vmem:[%s15202_s0 + $0x118] sm:$0xff] }
  0x80   :  { %9421 = vmatpush3.bf16.msra.mxu1 %v9420_v26  ;;  %v2282_v26 = vand.u32 4294901760, %v2281_v0  ;;  %v2289_v18 = vand.u32 4294901760, %v2288_v22  ;;  %v1127_v58 = vand.u32 4294901760, %v63_v47  ;;  %v16012_v4 = vld [vmem:[#allocation5_spill] sm:$0xff]  ;;  %v1133_v0 = vand.u32 4294901760, %v11685_v29 }
  0x81   :  { %9423 = vmatprep.subr.bf16.mxu1 %v9422_v16  ;;  %v9428_v39 = vpack.c.bf16 %v2275_v14, %v2268_v17  ;;  %v9430_v7 = vpack.c.bf16 %v2401_v8, %v2394_v19  ;;  %v1124_v16 = vand.u32 4294901760, %v62_v51  ;;  %v1130_v14 = vand.u32 4294901760, %v11680_v11  ;;  %v16015_v8 = vld [vmem:[#allocation57_spill] sm:$0xff] }
  0x82   :  { %9167 = vmatpush3.bf16.msra.mxu0 %v11566_v15  ;;  %v9432_v15 = vpack.c.bf16 %v2289_v18, %v2282_v26  ;;  %v15404_v22 = vmov 0.0|0.0  }
  0x83   :  { %9169 = vmatprep.subr.bf16.mxu0 %v11589_v13  ;;  %v16011_v13 = vld [vmem:[#allocation4_spill] sm:$0xff]  ;;  %v11692_v17 = vpack.c.bf16 %v1127_v58, %v1124_v16  ;;  %v11713_v53 = vpack.c.bf16 %v1133_v0, %v1130_v14 }
  0x84   :  { %9425 = vmatpush3.bf16.msra.mxu1 %v9424_v63  ;;  %v9434_v35 = vpack.c.bf16 %v16011_v13, %v16010_v55 }
  0x85   :  { %9427 = vmatprep.subr.bf16.mxu1 %v9426_v40  ;;  %16014 = vst [vmem:[#allocation9_spill] sm:$0xff] %v11692_v17  ;;  %v66_v40 = vld [vmem:[%s15202_s0 + $0x120] sm:$0xff]  ;;  %16021 = vst [vmem:[#allocation11_spill] sm:$0xff] %v11713_v53 }
  0x86   :  { %9171 = vmatpush3.bf16.msra.mxu0 %v11605_v56  ;;  %v17_v56 = vld [vmem:[%s15203_s1 + $0x18] sm:$0xff]  ;;  %v1136_v34 = vand.u32 4294901760, %v66_v40 }
  0x87   :  { %9173 = vmatprep.subr.bf16.mxu0 %v9172_v61  ;;  %v16013_v61 = vld [vmem:[#allocation55_spill] sm:$0xff]  ;;  %v82_v19 = vsel %vm80_vm0, %v17_v56, 0 }
  0x88   :  { %9429 = vmatpush3.bf16.msra.mxu1 %v9428_v39  ;;  %v9436_v63 = vpack.c.bf16 %v16013_v61, %v16012_v4  ;;  %v16016_v39 = vld [vmem:[#allocation58_spill] sm:$0xff]  ;;  %v11706_v18 = vand.u32 4294901760, %v82_v19  ;;  %v16047_v10 = vand.u32 4294901760, %v16013_v61 }
  0x89   :  { %9431 = vmatprep.subr.bf16.mxu1 %v9430_v7  ;;  %v9438_v26 = vpack.c.bf16 %v16016_v39, %v16015_v8  ;;  %v16018_v7 = vld [vmem:[#allocation21_spill] sm:$0xff]  ;;  %v16030_v39 = vld [vmem:[#allocation36_spill] sm:$0xff] }
  0x8a   :  { %9175 = vmatpush3.bf16.msra.mxu0 %v9174_v41  ;;  %v67_v41 = vld [vmem:[%s15202_s0 + $0x128] sm:$0xff]  ;;  %16017 = vst [vmem:[#allocation10_spill] sm:$0xff] %v11706_v18  ;;  %v11716_v56 = vsub.f32 %v82_v19, %v11706_v18 }
  0x8b   :  { %9208 = vmatprep.subr.bf16.mxu0 %v15404_v22  ;;  %v1139_v20 = vand.u32 4294901760, %v67_v41  ;;  %v16023_v22 = vld [vmem:[#allocation30_spill] sm:$0xff]  ;;  %v16044_v18 = vld [vmem:[#allocation23_spill] sm:$0xff] }
  0x8c   :  { %9433 = vmatpush3.bf16.msra.mxu1 %v9432_v15  ;;  %v16019_v15 = vld [vmem:[#allocation59_spill] sm:$0xff]  ;;  %16022 = vst [vmem:[#allocation22_spill] sm:$0xff] %v11716_v56  ;;  %v11730_v19 = vand.u32 4294901760, %v11716_v56 }
  0x8d   :  { %9435 = vmatprep.subr.bf16.mxu1 %v9434_v35  ;;  %972 = vmatmul.mubr.f32.vlgmr.msra.gmra.mrb[24].mxu0 %v16018_v7  ;;  %v16020_v35 = vld [vmem:[#allocation61_spill] sm:$0xff] }
  0x8e   :  { %v9440_v44 = vpack.c.bf16 %v16020_v35, %v16019_v15  ;;  %9210 = vmatpush1.bf16.msra.mxu0 %v11692_v17  ;;  %977 = vmatprep.mubr.f32.mxu0 %v16023_v22  ;;  %v16026_v17 = vld [vmem:[#allocation62_spill] sm:$0xff]  ;;  %16027 = vst [vmem:[#allocation27_spill] sm:$0xff] %v11730_v19  ;;  %v11735_v35 = vpack.c.bf16 %v1139_v20, %v1136_v34  ;;  %v1142_v15 = vand.u32 4294901760, %v68_v54 }
  0x8f   :  { %2406 = vmatmul.mubr.f32.vlgmr.msra.gmra.mrb[24].mxu1 %v16018_v7  ;;  %9211 = vmatprep.subr.bf16.mxu0 %v16024_v52 }
  0x90   :  { %9437 = vmatpush3.bf16.msra.mxu1 %v9436_v63  ;;  %2411 = vmatprep.mubr.f32.mxu1 %v16023_v22  ;;  %v16025_v63 = vld [vmem:[#allocation13_spill] sm:$0xff]  ;;  %16029 = vst [vmem:[#allocation14_spill] sm:$0xff] %v11735_v35  ;;  %v1145_v22 = vand.u32 4294901760, %v69_v12 }
  0x91   :  { %9439 = vmatprep.subr.bf16.mxu1 %v9438_v26  ;;  %v9442_v7 = vpack.c.bf16 %v16026_v17, %v16025_v63  ;;  %979 = vmatmul.mubr.f32.gmra.mrb[26].mxu0 %v16028_v37  ;;  %v9444_v26 = vpack.c.bf16 %v15952_v59, %v15949_v5  ;;  %v70_v17 = vld [vmem:[%s15202_s0 + $0x140] sm:$0xff]  ;;  %v11752_v59 = vsub.f32 %v62_v51, %v1124_v16  ;;  %v72_v51 = vld [vmem:[%s15202_s0 + $0x150] sm:$0xff] }
  0x92   :  { %9213 = vmatpush1.bf16.msra.mxu0 %v11713_v53  ;;  %984 = vmatprep.mubr.f32.mxu0 %v16030_v39  ;;  %v71_v53 = vld [vmem:[%s15202_s0 + $0x148] sm:$0xff]  ;;  %v11754_v5 = vsub.f32 %v63_v47, %v1127_v58  ;;  %v16031_v63 = vld [vmem:[#allocation38_spill] sm:$0xff]  ;;  %v1148_v8 = vand.u32 4294901760, %v70_v17  ;;  %v73_v47 = vld [vmem:[%s15202_s0 + $0x158] sm:$0xff]  ;;  %v11770_v16 = vsub.f32 %v11680_v11, %v1130_v14  ;;  %v11773_v58 = vsub.f32 %v11685_v29, %v1133_v0 }
  0x93   :  { %2413 = vmatmul.mubr.f32.gmra.mrb[26].mxu1 %v16028_v37  ;;  %9214 = vmatprep.subr.bf16.mxu0 %v16024_v52  ;;  %v1208_v37 = vsub.f32 %v11716_v56, %v11730_v19  ;;  %v1151_v45 = vand.u32 4294901760, %v71_v53  ;;  %v9450_v19 = vpack.c.bf16 %v11295_v57, %v11286_v30  ;;  %v11783_v56 = vsub.f32 %v68_v54, %v1142_v15  ;;  %v16_v29 = vld [vmem:[%s15203_s1 + $0x10] sm:$0xff]  ;;  %v16035_v14 = vld [vmem:[#allocation45_spill] sm:$0xff] }
  0x94   :  { %9441 = vmatpush3.bf16.msra.mxu1 %v9440_v44  ;;  %2418 = vmatprep.mubr.f32.mxu1 %v16030_v39  ;;  %v9446_v44 = vpack.c.bf16 %v11273_v33, %v15958_v38  ;;  %v9448_v39 = vpack.c.bf16 %v11281_v3, %v15965_v6  ;;  %v11792_v0 = vsub.f32 %v69_v12, %v1145_v22  ;;  %v1157_v54 = vand.u32 4294901760, %v73_v47  ;;  %v21_v12 = vld [vmem:[%s15203_s1 + $0x38] sm:$0xff] }
  0x95   :  { %9443 = vmatprep.subr.bf16.mxu1 %v9442_v7  ;;  %986 = vmatmul.mubr.f32.gmra.mrb[28].mxu0 %v16031_v63  ;;  %v11759_v7 = vpack.c.bf16 %v1145_v22, %v1142_v15  ;;  %v11786_v11 = vand.u32 4294901760, %v1208_v37  ;;  %v74_v37 = vld [vmem:[%s15202_s0 + $0x160] sm:$0xff]  ;;  %v11807_v22 = vpack.c.bf16 %v1151_v45, %v1148_v8  ;;  %v11811_v15 = vsub.f32 %v71_v53, %v1151_v45 }
  0x96   :  { %9216 = vmatpush1.bf16.msra.mxu0 %v11735_v35  ;;  %v11779_v35 = vsub.f32 %v66_v40, %v1136_v34  ;;  %v1154_v34 = vand.u32 4294901760, %v72_v51  ;;  %v75_v40 = vld [vmem:[%s15202_s0 + $0x168] sm:$0xff]  ;;  %v16041_v45 = vand.u32 4294901760, %v16010_v55  ;;  %v16042_v53 = vand.u32 4294901760, %v16011_v13 }
  0x97   :  { %2420 = vmatmul.mubr.f32.gmra.mrb[28].mxu1 %v16031_v63  ;;  %16032 = vst [vmem:[#allocation15_spill] sm:$0xff] %v11759_v7  ;;  %9217 = vmatprep.subr.bf16.mxu0 %v16024_v52  ;;  %v11781_v63 = vsub.f32 %v67_v41, %v1139_v20  ;;  %16034 = vst [vmem:[#allocation67_spill] sm:$0xff] %v11786_v11  ;;  %v9452_v20 = vpack.c.bf16 %v11305_v42, %v11299_v49  ;;  %v85_v1 = vsel %vm80_vm0, %v21_v12, 0  ;;  %v11856_v12 = vld [vmem:[%s15202_s0 + $0x188] sm:$0xff] }
  0x98   :  { %9445 = vmatpush3.bf16.msra.mxu1 %v9444_v26  ;;  %v16033_v26 = vld [vmem:[#allocation44_spill] sm:$0xff]  ;;  %16036 = vst [vmem:[#allocation16_spill] sm:$0xff] %v11807_v22  ;;  %v11809_v41 = vsub.f32 %v70_v17, %v1148_v8  ;;  %16038 = vst [vmem:[#allocation68_spill] sm:$0xff] %v11811_v15  ;;  %v11824_v17 = vand.u32 4294901760, %v16_v29  ;;  %v11830_v8 = vpack.c.bf16 %v16042_v53, %v16041_v45 }
  0x99   :  { %991 = vmatprep.mubr.f32.mxu0 %v16033_v26  ;;  %9447 = vmatprep.subr.bf16.mxu1 %v9446_v44  ;;  %v9454_v44 = vpack.c.bf16 %v11326_v50, %v11323_v23  ;;  %v11840_v55 = vpack.c.bf16 %v1157_v54, %v1154_v34  ;;  %v9458_v13 = vpack.c.bf16 %v15989_v27, %v15986_v36 }
  0x9a   :  { %2425 = vmatprep.mubr.f32.mxu1 %v16033_v26  ;;  %993 = vmatmul.mubr.f32.gmra.mrb[30].mxu0 %v16035_v14  ;;  %16037 = vst [vmem:[#allocation17_spill] sm:$0xff] %v11809_v41  ;;  %v76_v26 = vld [vmem:[%s15202_s0 + $0x170] sm:$0xff]  ;;  %16040 = vst [vmem:[#allocation19_spill] sm:$0xff] %v11824_v17  ;;  %v9460_v45 = vpack.c.bf16 %v16000_v21, %v15999_v46  ;;  %v9462_v53 = vpack.c.bf16 %v11439_v25, %v11428_v24 }
  0x9b   :  { %2427 = vmatmul.mubr.f32.gmra.mrb[30].mxu1 %v16035_v14  ;;  %9219 = vmatpush1.bf16.msra.mxu0 %v11759_v7  ;;  %v11816_v14 = vsub.f32 %v72_v51, %v1154_v34  ;;  %16043 = vst [vmem:[#allocation74_spill] sm:$0xff] %v11830_v8  ;;  %v1160_v51 = vand.u32 4294901760, %v74_v37  ;;  %v1163_v7 = vand.u32 4294901760, %v75_v40  ;;  %16045 = vst [vmem:[#allocation76_spill] sm:$0xff] %v11840_v55  ;;  %v1166_v34 = vand.u32 4294901760, %v76_v26 }
  0x9c   :  { %9449 = vmatpush3.bf16.msra.mxu1 %v9448_v39  ;;  %9220 = vmatprep.subr.bf16.mxu0 %v16024_v52  ;;  %v77_v39 = vld [vmem:[%s15202_s0 + $0x178] sm:$0xff]  ;;  %v11870_v9 = vsub.f32 %v73_v47, %v1157_v54  ;;  %v11877_v8 = vand.u32 4294901760, %v20_v60 }
  0x9d   :  { %9451 = vmatprep.subr.bf16.mxu1 %v9450_v19  ;;  %16039 = vst [vmem:[#allocation18_spill] sm:$0xff] %v11816_v14  ;;  %v9456_v19 = vpack.c.bf16 %v11339_v28, %v11330_v32  ;;  %2562 = vmatprep.mubr.f32.mxu1 %v16044_v18  ;;  %v11851_v18 = vld [vmem:[%s15202_s0 + $0x180] sm:$0xff]  ;;  %v16046_v14 = vand.u32 4294901760, %v16012_v4  ;;  %v11879_v41 = vpack.c.bf16 %v1163_v7, %v1160_v51 }
  0x9e   :  { %1210 = vmatprep.mubr.f32.mxu0 %v11786_v11  ;;  %v1169_v11 = vand.u32 4294901760, %v77_v39  ;;  %16051 = vst [vmem:[#allocation4_spill] sm:$0xff] %v11877_v8  ;;  %v11881_v31 = vsub.f32 %v74_v37, %v1160_v51  ;;  %v15445_v4 = vand.u32 4294901760, %v11851_v18  ;;  %v11885_v61 = vsub.f32 %v75_v40, %v1163_v7  ;;  %v24_v40 = vld [vmem:[%s15203_s1 + $0x50] sm:$0xff] }
  0x9f   :  { %9222 = vmatpush1.bf16.msra.mxu0 %v11807_v22  ;;  %v11867_v15 = vpack.c.bf16 %v16047_v10, %v16046_v14  ;;  %v11875_v22 = vand.u32 4294901760, %v85_v1  ;;  %16052 = vst [vmem:[#allocation5_spill] sm:$0xff] %v11879_v41  ;;  %v9464_v37 = vpack.c.bf16 %v11596_v2, %v11470_v43  ;;  %v11916_v7 = vsub.f32 %v20_v60, %v11877_v8 }
  0xa0   :  { %9453 = vmatpush3.bf16.msra.mxu1 %v9452_v20  ;;  %9223 = vmatprep.subr.bf16.mxu0 %v16024_v52  ;;  %v11873_v20 = vsub.f32 %v16_v29, %v11824_v17  ;;  %v88_v29 = vsel %vm80_vm0, %v25_v62, 0  ;;  %v11891_v54 = vpack.c.bf16 %v1169_v11, %v1166_v34  ;;  %v29_v62 = vld [vmem:[%s15203_s1 + $0x78] sm:$0xff]  ;;  %v11918_v47 = vsub.f32 %v76_v26, %v1166_v34 }
  0xa1   :  { %16048 = vst [vmem:[#allocation77_spill] sm:$0xff] %v11867_v15  ;;  %9455 = vmatprep.subr.bf16.mxu1 %v9454_v44  ;;  %16050 = vst [vmem:[#allocation2_spill] sm:$0xff] %v11875_v22  ;;  %v16054_v44 = vand.u32 4294901760, %v11752_v59  ;;  %v11920_v10 = vsub.f32 %v77_v39, %v1169_v11  ;;  %v11928_v17 = vand.u32 4294901760, %v88_v29  ;;  %v16061_v14 = vand.u32 4294901760, %v11754_v5 }
  0xa2   :  { %16049 = vst [vmem:[#allocation6_spill] sm:$0xff] %v11873_v20  ;;  %16053 = vst [vmem:[#allocation55_spill] sm:$0xff] %v11891_v54  ;;  %v11938_v26 = vand.u32 4294901760, %v24_v40  ;;  %v91_v11 = vsel %vm80_vm0, %v29_v62, 0  ;;  %v16066_v62 = vand.u32 4294901760, %v11273_v33 }
  0xa3   :  { %9225 = vmatpush1.bf16.msra.mxu0 %v11840_v55  ;;  %v11898_v51 = vsub.f32 %v11752_v59, %v16054_v44  ;;  %v11913_v44 = vsub.f32 %v85_v1, %v11875_v22  ;;  %16057 = vst [vmem:[#allocation81_spill] sm:$0xff] %v11916_v7  ;;  %v16058_v55 = vand.u32 4294901760, %v11856_v12  ;;  %16060 = vst [vmem:[#allocation83_spill] sm:$0xff] %v11928_v17  ;;  %v16062_v22 = vand.u32 4294901760, %v11770_v16 }
  0xa4   :  { %9457 = vmatpush3.bf16.msra.mxu1 %v9456_v19  ;;  %9226 = vmatprep.subr.bf16.mxu0 %v16024_v52  ;;  %v11909_v19 = vand.u32 4294901760, %v11873_v20  ;;  %v1277_v1 = vsub.f32 %v11754_v5, %v16061_v14  ;;  %16063 = vst [vmem:[#allocation84_spill] sm:$0xff] %v11938_v26  ;;  %v11973_v33 = vsub.f32 %v88_v29, %v11928_v17  ;;  %v16079_v29 = vand.u32 4294901760, %v11299_v49 }
  0xa5   :  { %9459 = vmatprep.subr.bf16.mxu1 %v9458_v13  ;;  %16056 = vst [vmem:[#allocation80_spill] sm:$0xff] %v11913_v44  ;;  %v11926_v13 = vpack.c.bf16 %v16058_v55, %v15445_v4  ;;  %v11936_v60 = vsub.f32 %v11770_v16, %v16062_v22  ;;  %v1271_v39 = vand.u32 4294901760, %v11898_v51  ;;  %v16064_v55 = vand.u32 4294901760, %v11773_v58  ;;  %v28_v22 = vld [vmem:[%s15203_s1 + $0x70] sm:$0xff] }
  0xa6   :  { %16055 = vst [vmem:[#allocation79_spill] sm:$0xff] %v11909_v19  ;;  %v16065_v4 = vand.u32 4294901760, %v15958_v38  ;;  %v16068_v51 = vand.u32 4294901760, %v11779_v35  ;;  %v11967_v14 = vand.u32 4294901760, %v11913_v44  ;;  %v11970_v38 = vand.u32 4294901760, %v11916_v7  ;;  %16071 = vst [vmem:[#allocation88_spill] sm:$0xff] %v11973_v33 }
  0xa7   :  { %16059 = vst [vmem:[#allocation82_spill] sm:$0xff] %v11926_v13  ;;  %9228 = vmatpush1.bf16.msra.mxu0 %v11879_v41  ;;  %v11946_v34 = vsub.f32 %v11773_v58, %v16064_v55  ;;  %v16076_v41 = vand.u32 4294901760, %v11295_v57  ;;  %v11992_v15 = vand.u32 4294901760, %v28_v22  ;;  %v16080_v17 = vand.u32 4294901760, %v11305_v42 }
  0xa8   :  { %9461 = vmatpush3.bf16.msra.mxu1 %v9460_v45  ;;  %v11956_v8 = vpack.c.bf16 %v16066_v62, %v16065_v4  ;;  %9229 = vmatprep.subr.bf16.mxu0 %v16024_v52  ;;  %v1214_v45 = vsub.f32 %v11873_v20, %v11909_v19  ;;  %v11964_v55 = vsub.f32 %v11779_v35, %v16068_v51  ;;  %v11975_v4 = vand.u32 4294901760, %v91_v11 }
  0xa9   :  { %9463 = vmatprep.subr.bf16.mxu1 %v9462_v53  ;;  %16069 = vst [vmem:[#allocation86_spill] sm:$0xff] %v11967_v14  ;;  %16070 = vst [vmem:[#allocation87_spill] sm:$0xff] %v11970_v38  ;;  %v16073_v53 = vand.u32 4294901760, %v15965_v6  ;;  %v16074_v62 = vand.u32 4294901760, %v11281_v3  ;;  %v16075_v51 = vand.u32 4294901760, %v11286_v30  ;;  %v11998_v6 = vpack.c.bf16 %v16080_v17, %v16079_v29 }
  0xaa   :  { %16067 = vst [vmem:[#allocation85_spill] sm:$0xff] %v11956_v8  ;;  %16072 = vst [vmem:[#allocation89_spill] sm:$0xff] %v11975_v4  ;;  %v11990_v8 = vsub.f32 %v24_v40, %v11938_v26  ;;  %v16081_v3 = vand.u32 4294901760, %v11323_v23  ;;  %v1278_v57 = vand.u32 4294901760, %v1277_v1  ;;  %v16084_v49 = vand.u32 4294901760, %v11330_v32 }
  0xab   :  { %v11981_v19 = vpack.c.bf16 %v16074_v62, %v16073_v53  ;;  %v11987_v20 = vpack.c.bf16 %v16076_v41, %v16075_v51  ;;  %16078 = vst [vmem:[#allocation91_spill] sm:$0xff] %v11992_v15  ;;  %v16082_v53 = vand.u32 4294901760, %v11326_v50  ;;  %9231 = vmatpush1.bf16.msra.mxu0 %v11891_v54  ;;  %v16083_v41 = vand.u32 4294901760, %v11781_v63 }
  0xac   :  { %16077 = vst [vmem:[#allocation90_spill] sm:$0xff] %v11990_v8  ;;  %9465 = vmatpush3.bf16.msra.mxu1 %v9464_v37  ;;  %v16085_v42 = vand.u32 4294901760, %v11339_v28  ;;  %v16086_v23 = vand.u32 4294901760, %v15986_v36  ;;  %v16087_v50 = vand.u32 4294901760, %v15989_v27  ;;  %9232 = vmatprep.subr.bf16.mxu0 %v16024_v52  ;;  %v16088_v37 = vld [vmem:[#allocation3_spill] sm:$0xff]  ;;  %v1311_v1 = vand.u32 4294901760, %v11783_v56 }
  0xad   :  { %v12004_v30 = vpack.c.bf16 %v16082_v53, %v16081_v3  ;;  %v1305_v40 = vsub.f32 %v11781_v63, %v16083_v41  ;;  %9467 = vmatprep.subr.bf16.mxu1 %v16088_v37  ;;  %v1318_v51 = vand.u32 4294901760, %v11792_v0  ;;  %v16089_v32 = vand.u32 4294901760, %v15999_v46 }
  0xae   :  { %v12014_v17 = vpack.c.bf16 %v16085_v42, %v16084_v49  ;;  %v12020_v62 = vpack.c.bf16 %v16087_v50, %v16086_v23  ;;  %v16090_v28 = vand.u32 4294901760, %v16000_v21  ;;  %v16091_v36 = vand.u32 4294901760, %v11428_v24 }
  0xaf   :  { %v16092_v27 = vand.u32 4294901760, %v11439_v25  ;;  %v1223_v53 = vsub.f32 %v11913_v44, %v11967_v14  ;;  %v12041_v41 = vand.u32 4294901760, %v11973_v33  ;;  %v12044_v49 = vsub.f32 %v91_v11, %v11975_v4  ;;  %2565 = vmatmul.mubr.f32.vlgmr.msra.gmra.mrb[32].mxu1 %v15972_v48  ;;  %9234 = vmatpush1.bf16.msra.mxu0 %v11926_v13  ;;  %v16109_v48 = vld [vmem:[#allocation33_spill] sm:$0xff]  ;;  %v16117_v13 = vld [vmem:[#allocation68_spill] sm:$0xff] }
  0xb0   :  { %v12030_v29 = vpack.c.bf16 %v16090_v28, %v16089_v32  ;;  %v16095_v46 = vand.u32 4294901760, %v11470_v43  ;;  %v16096_v21 = vand.u32 4294901760, %v11596_v2  ;;  %v12053_v24 = vand.u32 4294901760, %v1214_v45  ;;  %v16100_v43 = vld [vmem:[#allocation54_spill] sm:$0xff]  ;;  %v16101_v28 = vld [vmem:[#allocation32_spill] sm:$0xff]  ;;  %9235 = vmatprep.subr.bf16.mxu0 %v16024_v52 }
  0xb1   :  { %v12036_v3 = vpack.c.bf16 %v16092_v27, %v16091_v36  ;;  %16093 = vst [vmem:[#allocation3_spill] sm:$0xff] %v12041_v41  ;;  %16094 = vst [vmem:[#allocation92_spill] sm:$0xff] %v12044_v49  ;;  %v1229_v25 = vsub.f32 %v11916_v7, %v11970_v38  ;;  %v12058_v23 = vand.u32 4294901760, %v11990_v8  ;;  %v12061_v50 = vsub.f32 %v28_v22, %v11992_v15 }
  0xb2   :  { %v12050_v42 = vpack.c.bf16 %v16096_v21, %v16095_v46  ;;  %16097 = vst [vmem:[#allocation93_spill] sm:$0xff] %v12053_v24  ;;  %9469 = vmatpush3.bf16.msra.mxu1 %v16100_v43  ;;  %v9236_v2 = vpack.c.bf16 %v1278_v57, %v1271_v39  ;;  %v1285_v11 = vand.u32 4294901760, %v11936_v60  ;;  %v1292_v32 = vand.u32 4294901760, %v11946_v34  ;;  %2571 = vmatprep.mubr.f32.mxu1 %v16101_v28  ;;  %v16105_v60 = vld [vmem:[#allocation56_spill] sm:$0xff]  ;;  %v16106_v34 = vld [vmem:[#allocation17_spill] sm:$0xff] }
  0xb3   :  { %16098 = vst [vmem:[#allocation94_spill] sm:$0xff] %v12058_v23  ;;  %16099 = vst [vmem:[#allocation95_spill] sm:$0xff] %v12061_v50  ;;  %v1299_v45 = vand.u32 4294901760, %v11964_v55  ;;  %v1306_v36 = vand.u32 4294901760, %v1305_v40  ;;  %v1312_v27 = vsub.f32 %v11783_v56, %v1311_v1  ;;  %v1319_v22 = vsub.f32 %v11792_v0, %v1318_v51  ;;  %9471 = vmatprep.subr.bf16.mxu1 %v16105_v60 }
  0xb4   :  { %v16102_v46 = vand.u32 4294901760, %v11752_v59  ;;  %v16103_v21 = vand.u32 4294901760, %v11754_v5  ;;  %v1325_v57 = vand.u32 4294901760, %v16106_v34  ;;  %v12080_v55 = vand.u32 4294901760, %v1223_v53  ;;  %2574 = vmatmul.mubr.f32.gmra.mrb[34].mxu1 %v16109_v48  ;;  %1216 = vmatmul.mubr.f32.vlgmr.msra.gmra.mrb[32].mxu0 %v12053_v24 }
  0xb5   :  { %v1238_v28 = vsub.f32 %v11973_v33, %v12041_v41  ;;  %v12085_v40 = vand.u32 4294901760, %v12044_v49  ;;  %v12089_v38 = vand.u32 4294901760, %v1229_v25  ;;  %v16112_v53 = vand.u32 4294901760, %v11770_v16  ;;  %9237 = vmatpush1.bf16.msra.mxu0 %v9236_v2  ;;  %v16116_v25 = vld [vmem:[#allocation60_spill] sm:$0xff] }
  0xb6   :  { %v12076_v39 = vpack.c.bf16 %v16103_v21, %v16102_v46  ;;  %16107 = vst [vmem:[#allocation56_spill] sm:$0xff] %v12080_v55  ;;  %v1244_v46 = vsub.f32 %v11990_v8, %v12058_v23  ;;  %v12094_v21 = vand.u32 4294901760, %v12061_v50  ;;  %v16113_v14 = vand.u32 4294901760, %v11773_v58  ;;  %9473 = vmatpush3.bf16.msra.mxu1 %v16116_v25  ;;  %9238 = vmatprep.subr.bf16.mxu0 %v16024_v52 }
  0xb7   :  { %16108 = vst [vmem:[#allocation17_spill] sm:$0xff] %v12085_v40  ;;  %16110 = vst [vmem:[#allocation96_spill] sm:$0xff] %v12089_v38  ;;  %v9239_v24 = vpack.c.bf16 %v1292_v32, %v1285_v11  ;;  %v1332_v23 = vand.u32 4294901760, %v16117_v13  ;;  %v16118_v54 = vand.u32 4294901760, %v11779_v35  ;;  %v16119_v8 = vand.u32 4294901760, %v11781_v63  ;;  %v16123_v11 = vld [vmem:[#allocation18_spill] sm:$0xff]  ;;  %1225 = vmatprep.mubr.f32.mxu0 %v12080_v55 }
  0xb8   :  { %16104 = vst [vmem:[#allocation54_spill] sm:$0xff] %v12076_v39  ;;  %16111 = vst [vmem:[#allocation97_spill] sm:$0xff] %v12094_v21  ;;  %v12100_v41 = vpack.c.bf16 %v16113_v14, %v16112_v53  ;;  %v16115_v39 = vand.u32 4294901760, %v11851_v18  ;;  %v16121_v14 = vand.u32 4294901760, %v11856_v12  ;;  %v1313_v2 = vand.u32 4294901760, %v1312_v27  ;;  %1231 = vmatmul.mubr.f32.gmra.mrb[34].mxu0 %v12089_v38  ;;  %v16131_v55 = vld [vmem:[#allocation46_spill] sm:$0xff] }
  0xb9   :  { %v12113_v33 = vpack.c.bf16 %v16119_v8, %v16118_v54  ;;  %v1339_v32 = vand.u32 4294901760, %v16123_v11  ;;  %v1320_v7 = vand.u32 4294901760, %v1319_v22  ;;  %v12125_v8 = vand.u32 4294901760, %v1238_v28  ;;  %9240 = vmatpush1.bf16.msra.mxu0 %v9239_v24  ;;  %v16129_v28 = vld [vmem:[#allocation63_spill] sm:$0xff] }
  0xba   :  { %16114 = vst [vmem:[#allocation98_spill] sm:$0xff] %v12100_v41  ;;  %v12105_v48 = vsub.f32 %v11851_v18, %v16115_v39  ;;  %v12118_v53 = vsub.f32 %v11856_v12, %v16121_v14  ;;  %v16122_v41 = vld [vmem:[#allocation40_spill] sm:$0xff]  ;;  %v9242_v18 = vpack.c.bf16 %v1306_v36, %v1299_v45  ;;  %v1253_v54 = vsub.f32 %v12044_v49, %v12085_v40  ;;  %v16127_v14 = vld [vmem:[#allocation41_spill] sm:$0xff] }
  0xbb   :  { %16120 = vst [vmem:[#allocation60_spill] sm:$0xff] %v12113_v33  ;;  %2580 = vmatprep.mubr.f32.mxu1 %v16122_v41  ;;  %v16124_v39 = vld [vmem:[#allocation12_spill] sm:$0xff]  ;;  %16125 = vst [vmem:[#allocation68_spill] sm:$0xff] %v12125_v8  ;;  %v12129_v12 = vpack.c.bf16 %v1318_v51, %v1311_v1  ;;  %v1326_v41 = vsub.f32 %v16106_v34, %v1325_v57  ;;  %v1346_v45 = vand.u32 4294901760, %v11870_v9  ;;  %v12135_v36 = vand.u32 4294901760, %v1244_v46 }
  0xbc   :  { %9475 = vmatprep.subr.bf16.mxu1 %v16124_v39  ;;  %2583 = vmatmul.mubr.f32.gmra.mrb[36].mxu1 %v16127_v14  ;;  %v1259_v27 = vsub.f32 %v12061_v50, %v12094_v21  ;;  %v1333_v22 = vsub.f32 %v16117_v13, %v1332_v23  ;;  %v1353_v1 = vand.u32 4294901760, %v11881_v31  ;;  %v1360_v51 = vand.u32 4294901760, %v11885_v61 }
  0xbd   :  { %16126 = vst [vmem:[#allocation18_spill] sm:$0xff] %v12129_v12  ;;  %16128 = vst [vmem:[#allocation12_spill] sm:$0xff] %v12135_v36  ;;  %9477 = vmatpush3.bf16.msra.mxu1 %v16129_v28  ;;  %v12143_v14 = vpack.c.bf16 %v1332_v23, %v1325_v57  ;;  %2589 = vmatprep.mubr.f32.mxu1 %v16131_v55  ;;  %v1340_v46 = vsub.f32 %v16123_v11, %v1339_v32  ;;  %v16133_v12 = vld [vmem:[#allocation66_spill] sm:$0xff]  ;;  %v1367_v24 = vand.u32 4294901760, %v11918_v47  ;;  %v16136_v57 = vld [vmem:[#allocation48_spill] sm:$0xff] }
  0xbe   :  { %9241 = vmatprep.subr.bf16.mxu0 %v16024_v52  ;;  %v12148_v38 = vpack.c.bf16 %v1346_v45, %v1339_v32  ;;  %9479 = vmatprep.subr.bf16.mxu1 %v16133_v12  ;;  %v1374_v21 = vand.u32 4294901760, %v11920_v10  ;;  %v12154_v40 = vand.u32 4294901760, %v1253_v54  ;;  %v12156_v23 = vpack.c.bf16 %v1360_v51, %v1353_v1 }
  0xbf   :  { %16130 = vst [vmem:[#allocation63_spill] sm:$0xff] %v12143_v14  ;;  %1240 = vmatprep.mubr.f32.mxu0 %v12125_v8  ;;  %v9245_v55 = vpack.c.bf16 %v1320_v7, %v1313_v2  ;;  %v12160_v14 = vand.u32 4294901760, %v1259_v27  ;;  %v1381_v32 = vand.u32 4294901760, %v12105_v48  ;;  %9243 = vmatpush1.bf16.msra.mxu0 %v9242_v18  ;;  %v16138_v8 = vld [vmem:[#allocation69_spill] sm:$0xff]  ;;  %v1327_v33 = vand.u32 4294901760, %v1326_v41  ;;  %v16140_v7 = vld [vmem:[#allocation70_spill] sm:$0xff] }
  0xc0   :  { %16132 = vst [vmem:[#allocation99_spill] sm:$0xff] %v12148_v38  ;;  %16134 = vst [vmem:[#allocation66_spill] sm:$0xff] %v12154_v40  ;;  %2592 = vmatmul.mubr.f32.gmra.mrb[38].mxu1 %v16136_v57  ;;  %1246 = vmatmul.mubr.f32.gmra.mrb[36].mxu0 %v12135_v36  ;;  %v1388_v38 = vand.u32 4294901760, %v12118_v53  ;;  %v1334_v50 = vand.u32 4294901760, %v1333_v22  ;;  %v1347_v54 = vsub.f32 %v11870_v9, %v1346_v45  ;;  %v16142_v27 = vld [vmem:[#allocation25_spill] sm:$0xff]  ;;  %v16143_v41 = vld [vmem:[#allocation71_spill] sm:$0xff] }
  0xc1   :  { %16135 = vst [vmem:[#allocation100_spill] sm:$0xff] %v12156_v23  ;;  %16137 = vst [vmem:[#allocation101_spill] sm:$0xff] %v12160_v14  ;;  %9481 = vmatpush3.bf16.msra.mxu1 %v16138_v8  ;;  %v12166_v49 = vpack.c.bf16 %v1374_v21, %v1367_v24  ;;  %9244 = vmatprep.subr.bf16.mxu0 %v16024_v52  ;;  %v1354_v18 = vsub.f32 %v11881_v31, %v1353_v1  ;;  %v1341_v22 = vand.u32 4294901760, %v1340_v46  ;;  %v16146_v1 = vld [vmem:[#allocation73_spill] sm:$0xff]  ;;  %v16148_v46 = vld [vmem:[#allocation78_spill] sm:$0xff] }
  0xc2   :  { %9483 = vmatprep.subr.bf16.mxu1 %v16140_v7  ;;  %v12170_v2 = vpack.c.bf16 %v1388_v38, %v1381_v32  ;;  %2696 = vmatprep.mubr.f32.mxu1 %v16142_v27  ;;  %v1361_v57 = vsub.f32 %v11885_v61, %v1360_v51  ;;  %v9248_v45 = vpack.c.bf16 %v1334_v50, %v1327_v33  ;;  %v1348_v36 = vand.u32 4294901760, %v1347_v54  ;;  %v16147_v33 = vld [vmem:[#allocation75_spill] sm:$0xff] }
  0xc3   :  { %16139 = vst [vmem:[#allocation69_spill] sm:$0xff] %v12166_v49  ;;  %1255 = vmatprep.mubr.f32.mxu0 %v12154_v40  ;;  %9246 = vmatpush1.bf16.msra.mxu0 %v9245_v55  ;;  %v16144_v49 = vld [vmem:[#allocation72_spill] sm:$0xff]  ;;  %v1355_v27 = vand.u32 4294901760, %v1354_v18  ;;  %v1375_v55 = vsub.f32 %v11920_v10, %v1374_v21  ;;  %v1389_v18 = vsub.f32 %v12118_v53, %v1388_v38  ;;  %v16156_v38 = vld [vmem:[#allocation26_spill] sm:$0xff] }
  0xc4   :  { %16141 = vst [vmem:[#allocation70_spill] sm:$0xff] %v12170_v2  ;;  %1261 = vmatmul.mubr.f32.gmra.mrb[38].mxu0 %v12160_v14  ;;  %9247 = vmatprep.subr.bf16.mxu0 %v16024_v52  ;;  %v16145_v2 = vld [vmem:[#allocation10_spill] sm:$0xff]  ;;  %v1362_v40 = vand.u32 4294901760, %v1361_v57  ;;  %v9251_v51 = vpack.c.bf16 %v1348_v36, %v1341_v22  ;;  %v1368_v14 = vsub.f32 %v11918_v47, %v1367_v24  ;;  %v16149_v36 = vld [vmem:[#allocation7_spill] sm:$0xff]  ;;  %v16150_v21 = vld [vmem:[#allocation8_spill] sm:$0xff] }
  0xc5   :  { %9485 = vmatpush3.bf16.msra.mxu1 %v16143_v41  ;;  %1421 = vmatprep.mubr.f32.mxu0 %v16145_v2  ;;  %v1376_v23 = vand.u32 4294901760, %v1375_v55  ;;  %v1382_v57 = vsub.f32 %v12105_v48, %v1381_v32  ;;  %v1390_v22 = vand.u32 4294901760, %v1389_v18  ;;  %v16157_v2 = vld [vmem:[#allocation77_spill] sm:$0xff]  ;;  %v16162_v18 = vld [vmem:[#allocation34_spill] sm:$0xff] }
  0xc6   :  { %9487 = vmatprep.subr.bf16.mxu1 %v16144_v49  ;;  %v9254_v50 = vpack.c.bf16 %v1362_v40, %v1355_v27  ;;  %v1369_v54 = vand.u32 4294901760, %v1368_v14  ;;  %v16151_v40 = vld [vmem:[#allocation74_spill] sm:$0xff]  ;;  %v16152_v14 = vld [vmem:[#allocation57_spill] sm:$0xff] }
  0xc7   :  { %9249 = vmatpush1.bf16.msra.mxu0 %v9248_v45  ;;  %v1383_v45 = vand.u32 4294901760, %v1382_v57  ;;  %v16153_v27 = vand.u32 4294901760, %v16152_v14 }
  0xc8   :  { %9250 = vmatprep.subr.bf16.mxu0 %v16024_v52  ;;  %v9257_v24 = vpack.c.bf16 %v1376_v23, %v1369_v54  ;;  %v16160_v23 = vld [vmem:[#allocation61_spill] sm:$0xff] }
  0xc9   :  { %9489 = vmatpush3.bf16.msra.mxu1 %v16146_v1  ;;  %v16161_v54 = vand.u32 4294901760, %v16160_v23  ;;  %v16172_v23 = vld [vmem:[#allocation42_spill] sm:$0xff] }
  0xca   :  { %9491 = vmatprep.subr.bf16.mxu1 %v16147_v33 }
  0xcb   :  { %9252 = vmatpush1.bf16.msra.mxu0 %v9251_v51  ;;  %v16154_v51 = vld [vmem:[#allocation58_spill] sm:$0xff] }
  0xcc   :  { %9253 = vmatprep.subr.bf16.mxu0 %v16024_v52  ;;  %v16155_v32 = vand.u32 4294901760, %v16154_v51  ;;  %v16165_v51 = vld [vmem:[#allocation62_spill] sm:$0xff] }
  0xcd   :  { %9493 = vmatpush3.bf16.msra.mxu1 %v16148_v46 }
  0xce   :  { %9495 = vmatprep.subr.bf16.mxu1 %v16149_v36  ;;  %v9502_v55 = vpack.c.bf16 %v16155_v32, %v16153_v27  ;;  %v16158_v36 = vld [vmem:[#allocation59_spill] sm:$0xff]  ;;  %v16166_v27 = vand.u32 4294901760, %v16165_v51  ;;  %v9269_v51 = vpack.c.bf16 %v11781_v63, %v11779_v35  ;;  %v9275_v35 = vpack.c.bf16 %v16117_v13, %v16106_v34  ;;  %v16182_v63 = vld [vmem:[#allocation22_spill] sm:$0xff] }
  0xcf   :  { %9255 = vmatpush1.bf16.msra.mxu0 %v9254_v50  ;;  %v9260_v50 = vpack.c.bf16 %v1390_v22, %v1383_v45  ;;  %v16185_v13 = vld [vmem:[#allocation31_spill] sm:$0xff] }
  0xd0   :  { %9256 = vmatprep.subr.bf16.mxu0 %v16024_v52 }
  0xd1   :  { %9497 = vmatpush3.bf16.msra.mxu1 %v16150_v21  ;;  %v16159_v21 = vand.u32 4294901760, %v16158_v36  ;;  %v16168_v36 = vld [vmem:[#allocation64_spill] sm:$0xff] }
  0xd2   :  { %9499 = vmatprep.subr.bf16.mxu1 %v16151_v40  ;;  %v16163_v40 = vld [vmem:[#allocation13_spill] sm:$0xff] }
  0xd3   :  { %9258 = vmatpush1.bf16.msra.mxu0 %v9257_v24  ;;  %v9504_v57 = vpack.c.bf16 %v16161_v54, %v16159_v21  ;;  %v16164_v14 = vand.u32 4294901760, %v16163_v40  ;;  %v16169_v24 = vand.u32 4294901760, %v16168_v36  ;;  %v16170_v21 = vld [vmem:[#allocation65_spill] sm:$0xff]  ;;  %v16174_v54 = vld [vmem:[#allocation19_spill] sm:$0xff] }
  0xd4   :  { %2700 = vmatmul.mubr.f32.vlgmr.msra.gmra.mrb[40].mxu1 %v16156_v38  ;;  %9259 = vmatprep.subr.bf16.mxu0 %v16024_v52  ;;  %v16167_v38 = vld [vmem:[#allocation35_spill] sm:$0xff]  ;;  %v16171_v45 = vand.u32 4294901760, %v16170_v21  ;;  %v12345_v21 = vld [vmem:[%s15202_s0 + $0x2b0] sm:$0xff] }
  0xd5   :  { %9501 = vmatpush3.bf16.msra.mxu1 %v16157_v2  ;;  %2707 = vmatprep.mubr.f32.mxu1 %v16162_v18  ;;  %v9506_v32 = vpack.c.bf16 %v16166_v27, %v16164_v14  ;;  %v9263_v2 = vpack.c.bf16 %v11754_v5, %v11752_v59  ;;  %v16175_v5 = vld [vmem:[#allocation50_spill] sm:$0xff]  ;;  %v16176_v59 = vld [vmem:[#allocation85_spill] sm:$0xff]  ;;  %v16178_v40 = vld [vmem:[#allocation51_spill] sm:$0xff]  ;;  %v9272_v27 = vpack.c.bf16 %v11792_v0, %v11783_v56 }
  0xd6   :  { %9503 = vmatprep.subr.bf16.mxu1 %v9502_v55  ;;  %v9508_v22 = vpack.c.bf16 %v16171_v45, %v16169_v24  ;;  %v16173_v55 = vld [vmem:[#allocation43_spill] sm:$0xff]  ;;  %v16179_v14 = vld [vmem:[#allocation4_spill] sm:$0xff]  ;;  %v9278_v56 = vpack.c.bf16 %v11870_v9, %v16123_v11  ;;  %v9281_v0 = vpack.c.bf16 %v11885_v61, %v11881_v31  ;;  %v9284_v9 = vpack.c.bf16 %v11920_v10, %v11918_v47  ;;  %v16187_v10 = vld [vmem:[#allocation38_spill] sm:$0xff] }
  0xd7   :  { %9261 = vmatpush1.bf16.msra.mxu0 %v9260_v50  ;;  %v9266_v50 = vpack.c.bf16 %v11773_v58, %v11770_v16  ;;  %v16180_v16 = vld [vmem:[#allocation20_spill] sm:$0xff]  ;;  %v16181_v58 = vld [vmem:[#allocation83_spill] sm:$0xff]  ;;  %v9287_v31 = vpack.c.bf16 %v12118_v53, %v12105_v48  ;;  %v16190_v48 = vld [vmem:[#allocation6_spill] sm:$0xff] }
  0xd8   :  { %2711 = vmatmul.mubr.f32.gmra.mrb[42].mxu1 %v16167_v38  ;;  %9262 = vmatprep.subr.bf16.mxu0 %v16024_v52  ;;  %v16186_v61 = vld [vmem:[#allocation36_spill] sm:$0xff]  ;;  %v16200_v24 = vld [vmem:[#allocation7_spill] sm:$0xff] }
  0xd9   :  { %9505 = vmatpush3.bf16.msra.mxu1 %v9504_v57  ;;  %2718 = vmatprep.mubr.f32.mxu1 %v16172_v23  ;;  %v16177_v57 = vld [vmem:[#allocation2_spill] sm:$0xff]  ;;  %v16188_v47 = vld [vmem:[#allocation44_spill] sm:$0xff]  ;;  %v16201_v45 = vld [vmem:[#allocation27_spill] sm:$0xff] }
  0xda   :  { %9507 = vmatprep.subr.bf16.mxu1 %v9506_v32  ;;  %1423 = vmatmul.mubr.f32.vlgmr.msra.gmra.mrb[32].mxu0 %v16174_v54  ;;  %v16198_v32 = vld [vmem:[#allocation95_spill] sm:$0xff] }
  0xdb   :  { %9264 = vmatpush1.bf16.msra.mxu0 %v9263_v2  ;;  %1428 = vmatprep.mubr.f32.mxu0 %v16177_v57  ;;  %v16199_v2 = vld [vmem:[#allocation15_spill] sm:$0xff] }
  0xdc   :  { %2722 = vmatmul.mubr.f32.gmra.mrb[44].mxu1 %v16173_v55  ;;  %9265 = vmatprep.subr.bf16.mxu0 %v16024_v52 }
  0xdd   :  { %9509 = vmatpush3.bf16.msra.mxu1 %v9508_v22  ;;  %2729 = vmatprep.mubr.f32.mxu1 %v16175_v5  ;;  %v16211_v5 = vld [vmem:[#allocation5_spill] sm:$0xff] }
  0xde   :  { %9511 = vmatprep.subr.bf16.mxu1 %v16176_v59  ;;  %1430 = vmatmul.mubr.f32.gmra.mrb[34].mxu0 %v16179_v14 }
  0xdf   :  { %9267 = vmatpush1.bf16.msra.mxu0 %v9266_v50  ;;  %1435 = vmatprep.mubr.f32.mxu0 %v16181_v58 }
  0xe0   :  { %2733 = vmatmul.mubr.f32.gmra.mrb[46].mxu1 %v16178_v40  ;;  %9268 = vmatprep.subr.bf16.mxu0 %v16024_v52 }
  0xe1   :  { %9513 = vmatpush3.bf16.msra.mxu1 %v11981_v19  ;;  %2899 = vmatprep.mubr.f32.mxu1 %v16180_v16  ;;  %v16184_v19 = vld [vmem:[#allocation30_spill] sm:$0xff] }
  0xe2   :  { %9515 = vmatprep.subr.bf16.mxu1 %v11987_v20  ;;  %1437 = vmatmul.mubr.f32.gmra.mrb[36].mxu0 %v11938_v26  ;;  %v16183_v20 = vld [vmem:[#allocation21_spill] sm:$0xff] }
  0xe3   :  { %9270 = vmatpush1.bf16.msra.mxu0 %v9269_v51  ;;  %1442 = vmatprep.mubr.f32.mxu0 %v11975_v4 }
  0xe4   :  { %9271 = vmatprep.subr.bf16.mxu0 %v16024_v52 }
  0xe5   :  { %9517 = vmatpush3.bf16.msra.mxu1 %v11998_v6  ;;  %v16189_v6 = vld [vmem:[#allocation45_spill] sm:$0xff] }
  0xe6   :  { %9519 = vmatprep.subr.bf16.mxu1 %v12004_v30  ;;  %1444 = vmatmul.mubr.f32.gmra.mrb[38].mxu0 %v11992_v15  ;;  %v16191_v30 = vld [vmem:[#allocation9_spill] sm:$0xff] }
  0xe7   :  { %9273 = vmatpush1.bf16.msra.mxu0 %v9272_v27  ;;  %1551 = vmatprep.mubr.f32.mxu0 %v16182_v63  ;;  %v16204_v27 = vld [vmem:[#allocation16_spill] sm:$0xff] }
  0xe8   :  { %9274 = vmatprep.subr.bf16.mxu0 %v16024_v52 }
  0xe9   :  { %9521 = vmatpush3.bf16.msra.mxu1 %v12014_v17  ;;  %v16192_v17 = vld [vmem:[#allocation81_spill] sm:$0xff] }
  0xea   :  { %9523 = vmatprep.subr.bf16.mxu1 %v12020_v62  ;;  %v16193_v62 = vld [vmem:[#allocation11_spill] sm:$0xff] }
  0xeb   :  { %9276 = vmatpush1.bf16.msra.mxu0 %v9275_v35  ;;  %v16205_v35 = vld [vmem:[#allocation8_spill] sm:$0xff] }
  0xec   :  { %9277 = vmatprep.subr.bf16.mxu0 %v16024_v52 }
  0xed   :  { %9525 = vmatpush3.bf16.msra.mxu1 %v12030_v29  ;;  %v12300_v29 = vld [vmem:[%s15202_s0 + $0x298] sm:$0xff] }
  0xee   :  { %9527 = vmatprep.subr.bf16.mxu1 %v12036_v3 }
  0xef   :  { %9279 = vmatpush1.bf16.msra.mxu0 %v9278_v56 }
  0xf0   :  { %9280 = vmatprep.subr.bf16.mxu0 %v16024_v52 }
  0xf1   :  { %9529 = vmatpush3.bf16.msra.mxu1 %v12050_v42 }
  0xf2   :  { %9531 = vmatprep.subr.bf16.mxu1 %v16088_v37  ;;  %v12295_v37 = vld [vmem:[%s15202_s0 + $0x290] sm:$0xff] }
  0xf3   :  { %9282 = vmatpush1.bf16.msra.mxu0 %v9281_v0  ;;  %v15500_v11 = vand.u32 4294901760, %v12295_v37  ;;  %v15502_v0 = vand.u32 4294901760, %v12345_v21 }
  0xf4   :  { %2901 = vmatmul.mubr.f32.vlgmr.msra.gmra.mrb[48].mxu1 %v16183_v20  ;;  %9283 = vmatprep.subr.bf16.mxu0 %v16024_v52 }
  0xf5   :  { %9533 = vmatpush3.bf16.msra.mxu1 %v16100_v43  ;;  %2906 = vmatprep.mubr.f32.mxu1 %v16184_v19  ;;  %v16194_v43 = vld [vmem:[#allocation88_spill] sm:$0xff]  ;;  %v12333_v36 = vsub.f32 %v12295_v37, %v15500_v11 }
  0xf6   :  { %9535 = vmatprep.subr.bf16.mxu1 %v16105_v60  ;;  %v12404_v11 = vld [vmem:[%s15202_s0 + $0x2d0] sm:$0xff] }
  0xf7   :  { %9285 = vmatpush1.bf16.msra.mxu0 %v9284_v9 }
  0xf8   :  { %2908 = vmatmul.mubr.f32.gmra.mrb[50].mxu1 %v16185_v13  ;;  %9286 = vmatprep.subr.bf16.mxu0 %v16024_v52 }
  0xf9   :  { %9537 = vmatpush3.bf16.msra.mxu1 %v16116_v25  ;;  %2913 = vmatprep.mubr.f32.mxu1 %v16186_v61  ;;  %v7992_v3 = vpop.f32.mrb[0].mxu0  ;;  %v8124_v42 = vpop.f32.mrb[0].mxu1  ;;  %v16195_v25 = vld [vmem:[#allocation90_spill] sm:$0xff] }
  0xfa   :  { %9539 = vmatprep.subr.bf16.mxu1 %v16124_v39  ;;  %v7993_v60 = vpop.f32.mrb[1].mxu0  ;;  %v8125_v34 = vpop.f32.mrb[1].mxu1  ;;  %v15499_v39 = vand.u32 4294901760, %v12300_v29 }
  0xfb   :  { %9288 = vmatpush1.bf16.msra.mxu0 %v9287_v31  ;;  %v12304_v53 = vadd.f32 %v7993_v60, %v7992_v3  ;;  %v12372_v31 = vld [vmem:[%s15202_s0 + $0x2c0] sm:$0xff]  ;;  %v12377_v3 = vld [vmem:[%s15202_s0 + $0x2c8] sm:$0xff] }
  0xfc   :  { %2915 = vmatmul.mubr.f32.gmra.mrb[52].mxu1 %v16187_v10  ;;  %9289 = vmatprep.subr.bf16.mxu0 %v16024_v52 }
  0xfd   :  { %9541 = vmatpush3.bf16.msra.mxu1 %v16129_v28  ;;  %2920 = vmatprep.mubr.f32.mxu1 %v16188_v47  ;;  %v12320_v28 = vadd.f32 %v8125_v34, %v8124_v42 }
  0xfe   :  { %9543 = vmatprep.subr.bf16.mxu1 %v16133_v12  ;;  %1554 = vmatmul.mubr.f32.vlgmr.msra.gmra.mrb[32].mxu0 %v16190_v48  ;;  %v12318_v12 = vld [vmem:[%s15202_s0 + $0x2a8] sm:$0xff] }
  0xff   :  { %9291 = vmatpush1.bf16.msra.mxu0 %v16191_v30  ;;  %1560 = vmatprep.mubr.f32.mxu0 %v11913_v44 }
 0x100   :  { %2922 = vmatmul.mubr.f32.gmra.mrb[54].mxu1 %v16189_v6  ;;  %9292 = vmatprep.subr.bf16.mxu0 %v16024_v52 }
 0x101   :  { %9545 = vmatpush3.bf16.msra.mxu1 %v16138_v8  ;;  %3024 = vmatprep.mubr.f32.mxu1 %v16180_v16  ;;  %v12313_v8 = vld [vmem:[%s15202_s0 + $0x2a0] sm:$0xff] }
 0x102   :  { %9547 = vmatprep.subr.bf16.mxu1 %v16140_v7  ;;  %1563 = vmatmul.mubr.f32.gmra.mrb[34].mxu0 %v16192_v17  ;;  %v16197_v7 = vld [vmem:[#allocation92_spill] sm:$0xff]  ;;  %v8127_v22 = vpop.f32.mrb[2].mxu1 }
 0x103   :  { %9294 = vmatpush1.bf16.msra.mxu0 %v16193_v62  ;;  %1569 = vmatprep.mubr.f32.mxu0 %v16194_v43  ;;  %v8128_v51 = vpop.f32.mrb[3].mxu1 }
 0x104   :  { %9295 = vmatprep.subr.bf16.mxu0 %v16024_v52  ;;  %v12379_v42 = vadd.f32 %v8128_v51, %v8127_v22  ;;  %v12394_v51 = vsub.f32 %v12345_v21, %v15502_v0 }
 0x105   :  { %9549 = vmatpush3.bf16.msra.mxu1 %v16143_v41  ;;  %v15498_v41 = vand.u32 4294901760, %v12313_v8 }
 0x106   :  { %9551 = vmatprep.subr.bf16.mxu1 %v16144_v49  ;;  %1572 = vmatmul.mubr.f32.gmra.mrb[36].mxu0 %v16195_v25  ;;  %v16196_v49 = vld [vmem:[#allocation14_spill] sm:$0xff]  ;;  %v7995_v60 = vpop.f32.mrb[2].mxu0  ;;  %16207 = vst [vmem:[#allocation73_spill] sm:$0xff] %v12394_v51 }
 0x107   :  { %9297 = vmatpush1.bf16.msra.mxu0 %v16196_v49  ;;  %1578 = vmatprep.mubr.f32.mxu0 %v16197_v7  ;;  %v12356_v50 = vsub.f32 %v12313_v8, %v15498_v41  ;;  %v16206_v41 = vld [vmem:[#allocation76_spill] sm:$0xff] }
 0x108   :  { %9298 = vmatprep.subr.bf16.mxu0 %v16024_v52 }
 0x109   :  { %9553 = vmatpush3.bf16.msra.mxu1 %v16146_v1  ;;  %v15497_v1 = vand.u32 4294901760, %v12318_v12  ;;  %16202 = vst [vmem:[#allocation71_spill] sm:$0xff] %v12356_v50 }
 0x10a   :  { %9555 = vmatprep.subr.bf16.mxu1 %v16147_v33  ;;  %1581 = vmatmul.mubr.f32.gmra.mrb[38].mxu0 %v16198_v32  ;;  %v12338_v33 = vsub.f32 %v12300_v29, %v15499_v39 }
 0x10b   :  { %9300 = vmatpush1.bf16.msra.mxu0 %v16199_v2  ;;  %1671 = vmatprep.mubr.f32.mxu0 %v16201_v45  ;;  %v12361_v59 = vsub.f32 %v12318_v12, %v15497_v1  ;;  %v15504_v1 = vand.u32 4294901760, %v12377_v3 }
 0x10c   :  { %9301 = vmatprep.subr.bf16.mxu0 %v16024_v52  ;;  %v9617_v56 = vpack.c.bf16 %v12338_v33, %v12333_v36 }
 0x10d   :  { %9557 = vmatpush3.bf16.msra.mxu1 %v16148_v46  ;;  %v12350_v46 = vld [vmem:[%s15202_s0 + $0x2b8] sm:$0xff]  ;;  %16203 = vst [vmem:[#allocation72_spill] sm:$0xff] %v12361_v59  ;;  %v9620_v34 = vpack.c.bf16 %v12361_v59, %v12356_v50  ;;  %v16231_v59 = vld [vmem:[#allocation98_spill] sm:$0xff] }
 0x10e   :  { %9559 = vmatprep.subr.bf16.mxu1 %v16200_v24  ;;  %v15501_v9 = vand.u32 4294901760, %v12350_v46  ;;  %v7996_v24 = vpop.f32.mrb[3].mxu0 }
 0x10f   :  { %9303 = vmatpush1.bf16.msra.mxu0 %v16204_v27  ;;  %v12389_v22 = vadd.f32 %v7996_v24, %v7995_v60  ;;  %v8130_v60 = vpop.f32.mrb[4].mxu1 }
 0x110   :  { %9304 = vmatprep.subr.bf16.mxu0 %v16024_v52  ;;  %v12399_v39 = vsub.f32 %v12350_v46, %v15501_v9  ;;  %v12423_v9 = vsub.f32 %v12377_v3, %v15504_v1  ;;  %v8131_v40 = vpop.f32.mrb[5].mxu1  ;;  %v7998_v1 = vpop.f32.mrb[4].mxu0 }
 0x111   :  { %9561 = vmatpush3.bf16.msra.mxu1 %v16205_v35  ;;  %v15503_v35 = vand.u32 4294901760, %v12372_v31  ;;  %v12435_v38 = vadd.f32 %v8131_v40, %v8130_v60  ;;  %v8133_v23 = vpop.f32.mrb[6].mxu1  ;;  %v7999_v0 = vpop.f32.mrb[5].mxu0  ;;  %v16212_v60 = vand.u32 4294901760, %v12404_v11 }
 0x112   :  { %9616 = vmatprep.subr.bf16.mxu1 %v16024_v52  ;;  %16208 = vst [vmem:[#allocation75_spill] sm:$0xff] %v12399_v39  ;;  %16210 = vst [vmem:[#allocation74_spill] sm:$0xff] %v12423_v9  ;;  %v9623_v55 = vpack.c.bf16 %v12399_v39, %v12394_v51 }
 0x113   :  { %9306 = vmatpush1.bf16.msra.mxu0 %v16206_v41  ;;  %v12418_v24 = vsub.f32 %v12372_v31, %v15503_v35  ;;  %v12433_v35 = vld [vmem:[%s15202_s0 + $0x2e0] sm:$0xff]  ;;  %v12451_v18 = vsub.f32 %v12404_v11, %v16212_v60  ;;  %v12466_v60 = vld [vmem:[%s15202_s0 + $0x2f0] sm:$0xff] }
 0x114   :  { %3026 = vmatmul.mubr.f32.vlgmr.msra.gmra.mrb[56].mxu1 %v16183_v20  ;;  %9307 = vmatprep.subr.bf16.mxu0 %v16024_v52  ;;  %v12455_v20 = vadd.f32 %v7999_v0, %v7998_v1  ;;  %v16218_v0 = vand.u32 4294901760, %v12433_v35 }
 0x115   :  { %9618 = vmatpush1.bf16.msra.mxu1 %v9617_v56  ;;  %3031 = vmatprep.mubr.f32.mxu1 %v16184_v19  ;;  %v12411_v56 = vld [vmem:[%s15202_s0 + $0x2d8] sm:$0xff]  ;;  %16209 = vst [vmem:[#allocation78_spill] sm:$0xff] %v12418_v24  ;;  %v9626_v40 = vpack.c.bf16 %v12423_v9, %v12418_v24  ;;  %16213 = vst [vmem:[#allocation57_spill] sm:$0xff] %v12451_v18  ;;  %v16214_v19 = vld [vmem:[#allocation55_spill] sm:$0xff] }
 0x116   :  { %9619 = vmatprep.subr.bf16.mxu1 %v16024_v52  ;;  %v16215_v16 = vand.u32 4294901760, %v12411_v56  ;;  %v12482_v9 = vsub.f32 %v12433_v35, %v16218_v0  ;;  %v12499_v0 = vld [vmem:[%s15202_s0 + $0x300] sm:$0xff] }
 0x117   :  { %9309 = vmatpush1.bf16.msra.mxu0 %v16211_v5 }
 0x118   :  { %3033 = vmatmul.mubr.f32.gmra.mrb[58].mxu1 %v16185_v13  ;;  %9310 = vmatprep.subr.bf16.mxu0 %v16024_v52  ;;  %v8134_v13 = vpop.f32.mrb[7].mxu1  ;;  %16219 = vst [vmem:[#allocation59_spill] sm:$0xff] %v12482_v9 }
 0x119   :  { %9621 = vmatpush1.bf16.msra.mxu1 %v9620_v34  ;;  %3038 = vmatprep.mubr.f32.mxu1 %v16186_v61  ;;  %v12442_v34 = vld [vmem:[%s15202_s0 + $0x2e8] sm:$0xff]  ;;  %v12471_v61 = vld [vmem:[%s15202_s0 + $0x2f8] sm:$0xff] }
 0x11a   :  { %9622 = vmatprep.subr.bf16.mxu1 %v16024_v52 }
 0x11b   :  { %9312 = vmatpush1.bf16.msra.mxu0 %v16214_v19  ;;  %v15522_v19 = vand.u32 4294901760, %v12466_v60 }
 0x11c   :  { %3040 = vmatmul.mubr.f32.gmra.mrb[60].mxu1 %v16187_v10  ;;  %v12460_v10 = vsub.f32 %v12411_v56, %v16215_v16  ;;  %9313 = vmatprep.subr.bf16.mxu0 %v16024_v52  ;;  %v8001_v16 = vpop.f32.mrb[6].mxu0 }
 0x11d   :  { %9624 = vmatpush1.bf16.msra.mxu1 %v9623_v55  ;;  %v12473_v55 = vadd.f32 %v8134_v13, %v8133_v23  ;;  %3045 = vmatprep.mubr.f32.mxu1 %v16188_v47  ;;  %v8002_v1 = vpop.f32.mrb[7].mxu0  ;;  %v15523_v23 = vand.u32 4294901760, %v12471_v61  ;;  %v16220_v13 = vld [vmem:[#allocation82_spill] sm:$0xff] }
 0x11e   :  { %16216 = vst [vmem:[#allocation58_spill] sm:$0xff] %v12460_v10  ;;  %9625 = vmatprep.subr.bf16.mxu1 %v16024_v52  ;;  %v12487_v47 = vadd.f32 %v8002_v1, %v8001_v16  ;;  %v9629_v24 = vpack.c.bf16 %v12460_v10, %v12451_v18  ;;  %v16223_v16 = vld [vmem:[#allocation79_spill] sm:$0xff]  ;;  %v16226_v10 = vld [vmem:[#allocation54_spill] sm:$0xff] }
 0x11f   :  { %16217 = vst [vmem:[#allocation77_spill] sm:$0xff] %v12473_v55  ;;  %9315 = vmatpush1.bf16.msra.mxu0 %v16220_v13  ;;  %v12518_v1 = vsub.f32 %v12471_v61, %v15523_v23  ;;  %v12535_v23 = vld [vmem:[%s15202_s0 + $0x318] sm:$0xff]  ;;  %v16227_v13 = vld [vmem:[#allocation86_spill] sm:$0xff] }
 0x120   :  { %3047 = vmatmul.mubr.f32.gmra.mrb[62].mxu1 %v16189_v6  ;;  %v16221_v6 = vand.u32 4294901760, %v12442_v34  ;;  %9316 = vmatprep.subr.bf16.mxu0 %v16024_v52 }
 0x121   :  { %9627 = vmatpush1.bf16.msra.mxu1 %v9626_v40  ;;  %v12506_v40 = vld [vmem:[%s15202_s0 + $0x308] sm:$0xff]  ;;  %3480 = vmatprep.mubr.f32.mxu1 %v16182_v63  ;;  %16225 = vst [vmem:[#allocation62_spill] sm:$0xff] %v12518_v1 }
 0x122   :  { %v12494_v5 = vsub.f32 %v12442_v34, %v16221_v6  ;;  %9628 = vmatprep.subr.bf16.mxu1 %v16024_v52  ;;  %1675 = vmatmul.mubr.f32.vlgmr.msra.gmra.mrb[32].mxu0 %v16223_v16  ;;  %v12513_v6 = vsub.f32 %v12466_v60, %v15522_v19  ;;  %v12528_v19 = vld [vmem:[%s15202_s0 + $0x310] sm:$0xff]  ;;  %v16230_v16 = vld [vmem:[#allocation87_spill] sm:$0xff] }
 0x123   :  { %9318 = vmatpush1.bf16.msra.mxu0 %v16226_v10  ;;  %v8036_v10 = vpop.f32.mrb[8].mxu0  ;;  %1682 = vmatprep.mubr.f32.mxu0 %v16227_v13  ;;  %v15540_v51 = vand.u32 4294901760, %v12528_v19  ;;  %v16232_v13 = vand.u32 4294901760, %v12506_v40 }
 0x124   :  { %16222 = vst [vmem:[#allocation61_spill] sm:$0xff] %v12494_v5  ;;  %16224 = vst [vmem:[#allocation13_spill] sm:$0xff] %v12513_v6  ;;  %v9632_v63 = vpack.c.bf16 %v12494_v5, %v12482_v9  ;;  %9319 = vmatprep.subr.bf16.mxu0 %v16024_v52  ;;  %v8037_v5 = vpop.f32.mrb[9].mxu0  ;;  %v9635_v18 = vpack.c.bf16 %v12518_v1, %v12513_v6  ;;  %v16228_v9 = vand.u32 4294901760, %v12499_v0 }
 0x125   :  { %9630 = vmatpush1.bf16.msra.mxu1 %v9629_v24  ;;  %v8212_v24 = vpop.f32.mrb[8].mxu1  ;;  %v8038_v55 = vadd.f32 %v8037_v5, %v8036_v10  ;;  %v12551_v50 = vsub.f32 %v12506_v40, %v16232_v13  ;;  %v8039_v5 = vpop.f32.mrb[10].mxu0  ;;  %v16235_v10 = vld [vmem:[#allocation3_spill] sm:$0xff]  ;;  %v16236_v13 = vld [vmem:[#allocation94_spill] sm:$0xff] }
 0x126   :  { %9631 = vmatprep.subr.bf16.mxu1 %v16024_v52  ;;  %v12543_v39 = vsub.f32 %v12499_v0, %v16228_v9  ;;  %v8213_v41 = vpop.f32.mrb[9].mxu1  ;;  %1686 = vmatmul.mubr.f32.gmra.mrb[34].mxu0 %v16230_v16 }
 0x127   :  { %9321 = vmatpush1.bf16.msra.mxu0 %v16231_v59  ;;  %16233 = vst [vmem:[#allocation65_spill] sm:$0xff] %v12551_v50  ;;  %v12554_v6 = vadd.f32 %v8213_v41, %v8212_v24  ;;  %v12559_v9 = vadd.f32 %v8038_v55, %v12304_v53  ;;  %1693 = vmatprep.mubr.f32.mxu0 %v16235_v10  ;;  %v16237_v24 = vld [vmem:[#allocation60_spill] sm:$0xff]  ;;  %v16238_v53 = vand.u32 4294901760, %v12535_v23 }
 0x128   :  { %16229 = vst [vmem:[#allocation64_spill] sm:$0xff] %v12543_v39  ;;  %9322 = vmatprep.subr.bf16.mxu0 %v16024_v52  ;;  %v12565_v59 = vsub.f32 %v12528_v19, %v15540_v51  ;;  %v9638_v1 = vpack.c.bf16 %v12551_v50, %v12543_v39  ;;  %v8215_v51 = vpop.f32.mrb[10].mxu1 }
 0x129   :  { %9633 = vmatpush1.bf16.msra.mxu1 %v9632_v63  ;;  %16234 = vst [vmem:[#allocation85_spill] sm:$0xff] %v12554_v6  ;;  %v8040_v63 = vpop.f32.mrb[11].mxu0  ;;  %v12574_v55 = vsub.f32 %v12535_v23, %v16238_v53  ;;  %v16243_v53 = vld [vmem:[#allocation18_spill] sm:$0xff] }
 0x12a   :  { %9634 = vmatprep.subr.bf16.mxu1 %v16024_v52  ;;  %1697 = vmatmul.mubr.f32.gmra.mrb[36].mxu0 %v16236_v13  ;;  %v8041_v41 = vadd.f32 %v8040_v63, %v8039_v5  ;;  %v8042_v5 = vpop.f32.mrb[12].mxu0  ;;  %v16240_v63 = vld [vmem:[#allocation17_spill] sm:$0xff] }
 0x12b   :  { %9324 = vmatpush1.bf16.msra.mxu0 %v16237_v24  ;;  %16239 = vst [vmem:[#allocation9_spill] sm:$0xff] %v12574_v55  ;;  %1704 = vmatprep.mubr.f32.mxu0 %v16240_v63  ;;  %v8043_v24 = vpop.f32.mrb[13].mxu0  ;;  %v16241_v13 = vld [vmem:[#allocation97_spill] sm:$0xff]  ;;  %v9641_v10 = vpack.c.bf16 %v12574_v55, %v12565_v59  ;;  %v16244_v63 = vld [vmem:[#allocation10_spill] sm:$0xff] }
 0x12c   :  { %9325 = vmatprep.subr.bf16.mxu0 %v16024_v52  ;;  %v12579_v6 = vadd.f32 %v8041_v41, %v12389_v22  ;;  %v8044_v39 = vadd.f32 %v8043_v24, %v8042_v5  ;;  %v8045_v41 = vpop.f32.mrb[14].mxu0  ;;  %v16245_v24 = vld [vmem:[#allocation63_spill] sm:$0xff] }
 0x12d   :  { %9636 = vmatpush1.bf16.msra.mxu1 %v9635_v18  ;;  %v8216_v18 = vpop.f32.mrb[11].mxu1 }
 0x12e   :  { %9637 = vmatprep.subr.bf16.mxu1 %v16024_v52  ;;  %1708 = vmatmul.mubr.f32.gmra.mrb[38].mxu0 %v16241_v13  ;;  %v12583_v50 = vadd.f32 %v8216_v18, %v8215_v51  ;;  %v12591_v22 = vadd.f32 %v8044_v39, %v12455_v20  ;;  %v8218_v13 = vpop.f32.mrb[12].mxu1  ;;  %v8046_v51 = vpop.f32.mrb[15].mxu0 }
 0x12f   :  { %9327 = vmatpush1.bf16.msra.mxu0 %v16243_v53  ;;  %1832 = vmatprep.mubr.f32.mxu0 %v16244_v63  ;;  %v8219_v18 = vpop.f32.mrb[13].mxu1  ;;  %v8047_v5 = vadd.f32 %v8046_v51, %v8045_v41  ;;  %v16247_v53 = vand.u32 4294901760, %v12300_v29  ;;  %v16251_v29 = vand.u32 4294901760, %v12318_v12  ;;  %v16255_v12 = vand.u32 4294901760, %v12350_v46  ;;  %v16260_v46 = vld [vmem:[#allocation70_spill] sm:$0xff] }
 0x130   :  { %16242 = vst [vmem:[#allocation11_spill] sm:$0xff] %v12583_v50  ;;  %9328 = vmatprep.subr.bf16.mxu0 %v16024_v52  ;;  %v12601_v55 = vadd.f32 %v8219_v18, %v8218_v13  ;;  %v8221_v39 = vpop.f32.mrb[14].mxu1 }
 0x131   :  { %9639 = vmatpush1.bf16.msra.mxu1 %v9638_v1  ;;  %v16246_v1 = vand.u32 4294901760, %v12295_v37  ;;  %v12606_v20 = vadd.f32 %v8047_v5, %v12487_v47  ;;  %v8222_v41 = vpop.f32.mrb[15].mxu1  ;;  %v16250_v37 = vand.u32 4294901760, %v12313_v8  ;;  %v16253_v47 = vld [vmem:[#allocation100_spill] sm:$0xff]  ;;  %v16254_v8 = vand.u32 4294901760, %v12345_v21  ;;  %v16256_v5 = vld [vmem:[#allocation69_spill] sm:$0xff] }
 0x132   :  { %9640 = vmatprep.subr.bf16.mxu1 %v16024_v52  ;;  %16248 = vst [vmem:[#allocation14_spill] sm:$0xff] %v12601_v55  ;;  %v12617_v51 = vadd.f32 %v8222_v41, %v8221_v39  ;;  %v16258_v21 = vand.u32 4294901760, %v12377_v3 }
 0x133   :  { %9330 = vmatpush1.bf16.msra.mxu0 %v16245_v24  ;;  %v12599_v50 = vpack.c.bf16 %v16247_v53, %v16246_v1  ;;  %v12615_v13 = vpack.c.bf16 %v16251_v29, %v16250_v37  ;;  %v12629_v18 = vpack.c.bf16 %v16255_v12, %v16254_v8  ;;  %v16257_v24 = vand.u32 4294901760, %v12372_v31 }
 0x134   :  { %9331 = vmatprep.subr.bf16.mxu0 %v16024_v52  ;;  %16252 = vst [vmem:[#allocation15_spill] sm:$0xff] %v12617_v51  ;;  %v16261_v53 = vand.u32 4294901760, %v12404_v11  ;;  %v16262_v31 = vand.u32 4294901760, %v12411_v56  ;;  %v16264_v11 = vand.u32 4294901760, %v12433_v35  ;;  %v16265_v56 = vand.u32 4294901760, %v12442_v34 }
 0x135   :  { %9642 = vmatpush1.bf16.msra.mxu1 %v9641_v10  ;;  %v16249_v10 = vld [vmem:[#allocation99_spill] sm:$0xff]  ;;  %v12641_v1 = vpack.c.bf16 %v16258_v21, %v16257_v24  ;;  %v16267_v21 = vand.u32 4294901760, %v12466_v60  ;;  %v16268_v35 = vand.u32 4294901760, %v12471_v61 }
 0x136   :  { %9643 = vmatprep.subr.bf16.mxu1 %v16024_v52  ;;  %v12653_v39 = vpack.c.bf16 %v16262_v31, %v16261_v53 }
 0x137   :  { %9333 = vmatpush1.bf16.msra.mxu0 %v16249_v10  ;;  %16259 = vst [vmem:[#allocation7_spill] sm:$0xff] %v12641_v1  ;;  %v12677_v34 = vpack.c.bf16 %v16268_v35, %v16267_v21 }
 0x138   :  { %3483 = vmatmul.mubr.f32.vlgmr.msra.gmra.mrb[64].mxu1 %v16190_v48  ;;  %9334 = vmatprep.subr.bf16.mxu0 %v16024_v52  ;;  %16263 = vst [vmem:[#allocation16_spill] sm:$0xff] %v12653_v39  ;;  %v16298_v48 = vld [vmem:[#allocation94_spill] sm:$0xff] }
 0x139   :  { %9645 = vmatpush1.bf16.msra.mxu1 %v12599_v50  ;;  %3489 = vmatprep.mubr.f32.mxu1 %v11913_v44  ;;  %16269 = vst [vmem:[#allocation54_spill] sm:$0xff] %v12677_v34 }
 0x13a   :  { %9646 = vmatprep.subr.bf16.mxu1 %v16024_v52 }
 0x13b   :  { %9336 = vmatpush1.bf16.msra.mxu0 %v16253_v47  ;;  %v12665_v47 = vpack.c.bf16 %v16265_v56, %v16264_v11 }
 0x13c   :  { %3492 = vmatmul.mubr.f32.gmra.mrb[66].mxu1 %v16192_v17  ;;  %9337 = vmatprep.subr.bf16.mxu0 %v16024_v52  ;;  %v16297_v17 = vld [vmem:[#allocation65_spill] sm:$0xff] }
 0x13d   :  { %9648 = vmatpush1.bf16.msra.mxu1 %v12615_v13  ;;  %3498 = vmatprep.mubr.f32.mxu1 %v16194_v43  ;;  %16266 = vst [vmem:[#allocation8_spill] sm:$0xff] %v12665_v47 }
 0x13e   :  { %9649 = vmatprep.subr.bf16.mxu1 %v16024_v52  ;;  %v8080_v3 = vpop.f32.mrb[16].mxu0  ;;  %v8256_v41 = vpop.f32.mrb[16].mxu1 }
 0x13f   :  { %9339 = vmatpush1.bf16.msra.mxu0 %v16256_v5  ;;  %v8081_v10 = vpop.f32.mrb[17].mxu0  ;;  %v8257_v37 = vpop.f32.mrb[17].mxu1 }
 0x140   :  { %3501 = vmatmul.mubr.f32.gmra.mrb[68].mxu1 %v16195_v25  ;;  %9340 = vmatprep.subr.bf16.mxu0 %v16024_v52  ;;  %v8082_v29 = vadd.f32 %v8081_v10, %v8080_v3  ;;  %v12667_v8 = vadd.f32 %v8257_v37, %v8256_v41  ;;  %v16271_v10 = vand.u32 4294901760, %v12506_v40  ;;  %v16296_v25 = vld [vmem:[#allocation64_spill] sm:$0xff] }
 0x141   :  { %9651 = vmatpush1.bf16.msra.mxu1 %v12629_v18  ;;  %3507 = vmatprep.mubr.f32.mxu1 %v16197_v7  ;;  %v16295_v7 = vld [vmem:[#allocation3_spill] sm:$0xff] }
 0x142   :  { %9652 = vmatprep.subr.bf16.mxu1 %v16024_v52  ;;  %v638_v12 = vadd.f32 %v8082_v29, %v12559_v9 }
 0x143   :  { %9342 = vmatpush1.bf16.msra.mxu0 %v16260_v46  ;;  %v8083_v5 = vpop.f32.mrb[18].mxu0 }
 0x144   :  { %3510 = vmatmul.mubr.f32.gmra.mrb[70].mxu1 %v16198_v32  ;;  %9343 = vmatprep.subr.bf16.mxu0 %v16024_v52  ;;  %v8084_v24 = vpop.f32.mrb[19].mxu0  ;;  %v12685_v31 = vadd.f32 %v12320_v28, %v638_v12 }
 0x145   :  { %9654 = vmatpush1.bf16.msra.mxu1 %v12641_v1  ;;  %3600 = vmatprep.mubr.f32.mxu1 %v16201_v45  ;;  %v8085_v53 = vadd.f32 %v8084_v24, %v8083_v5  ;;  %v16274_v5 = vand.u32 4294901760, %v12535_v23  ;;  %v16293_v45 = vld [vmem:[#allocation13_spill] sm:$0xff] }
 0x146   :  { %9655 = vmatprep.subr.bf16.mxu1 %v16024_v52  ;;  %1834 = vmatmul.mubr.f32.vlgmr.msra.gmra.mrb[32].mxu0 %v16174_v54  ;;  %v16300_v44 = vand.u32 4294901760, %v16293_v45 }
 0x147   :  { %9345 = vmatpush1.bf16.msra.mxu0 %v16191_v30  ;;  %1839 = vmatprep.mubr.f32.mxu0 %v16177_v57  ;;  %v8259_v30 = vpop.f32.mrb[18].mxu1  ;;  %v647_v61 = vadd.f32 %v8085_v53, %v12579_v6  ;;  %v8086_v60 = vpop.f32.mrb[20].mxu0 }
 0x148   :  { %9346 = vmatprep.subr.bf16.mxu0 %v16024_v52  ;;  %v8260_v46 = vpop.f32.mrb[19].mxu1  ;;  %v8087_v41 = vpop.f32.mrb[21].mxu0 }
 0x149   :  { %9657 = vmatpush1.bf16.msra.mxu1 %v12653_v39  ;;  %v12682_v9 = vadd.f32 %v8260_v46, %v8259_v30  ;;  %v8262_v3 = vpop.f32.mrb[20].mxu1  ;;  %v8088_v29 = vadd.f32 %v8087_v41, %v8086_v60  ;;  %v12703_v11 = vadd.f32 %v12379_v42, %v647_v61  ;;  %v3198_v42 = vand.u32 4294901760, %v12333_v36  ;;  %v16277_v46 = vld [vmem:[#allocation71_spill] sm:$0xff]  ;;  %v16278_v61 = vld [vmem:[#allocation72_spill] sm:$0xff] }
 0x14a   :  { %9658 = vmatprep.subr.bf16.mxu1 %v16024_v52  ;;  %1841 = vmatmul.mubr.f32.gmra.mrb[34].mxu0 %v16179_v14  ;;  %v8263_v28 = vpop.f32.mrb[21].mxu1  ;;  %v3212_v53 = vand.u32 4294901760, %v16277_v46  ;;  %v3219_v60 = vand.u32 4294901760, %v16278_v61  ;;  %v16281_v41 = vld [vmem:[#allocation79_spill] sm:$0xff] }
 0x14b   :  { %9348 = vmatpush1.bf16.msra.mxu0 %v16193_v62  ;;  %1846 = vmatprep.mubr.f32.mxu0 %v16181_v58  ;;  %v16270_v62 = vand.u32 4294901760, %v12499_v0  ;;  %v12700_v6 = vadd.f32 %v8263_v28, %v8262_v3  ;;  %v656_v0 = vadd.f32 %v8088_v29, %v12591_v22  ;;  %v3205_v22 = vand.u32 4294901760, %v12338_v33  ;;  %v16279_v3 = vld [vmem:[#allocation77_spill] sm:$0xff]  ;;  %v16284_v28 = vld [vmem:[#allocation75_spill] sm:$0xff] }
 0x14c   :  { %9349 = vmatprep.subr.bf16.mxu0 %v16024_v52  ;;  %v3233_v29 = vand.u32 4294901760, %v16284_v28  ;;  %v3199_v51 = vsub.f32 %v12333_v36, %v3198_v42 }
 0x14d   :  { %9660 = vmatpush1.bf16.msra.mxu1 %v12665_v47  ;;  %v12695_v37 = vpack.c.bf16 %v16271_v10, %v16270_v62  ;;  %v16283_v62 = vld [vmem:[#allocation73_spill] sm:$0xff]  ;;  %v3206_v55 = vsub.f32 %v12338_v33, %v3205_v22  ;;  %v16302_v33 = vand.u32 4294901760, %v16296_v25 }
 0x14e   :  { %9661 = vmatprep.subr.bf16.mxu1 %v16024_v52  ;;  %1848 = vmatmul.mubr.f32.gmra.mrb[36].mxu0 %v11938_v26  ;;  %v8089_v40 = vpop.f32.mrb[22].mxu0  ;;  %v8265_v56 = vpop.f32.mrb[22].mxu1  ;;  %v3226_v10 = vand.u32 4294901760, %v16283_v62  ;;  %v3234_v47 = vsub.f32 %v16284_v28, %v3233_v29 }
 0x14f   :  { %16272 = vst [vmem:[#allocation98_spill] sm:$0xff] %v12695_v37  ;;  %9351 = vmatpush1.bf16.msra.mxu0 %v16196_v49  ;;  %1853 = vmatprep.mubr.f32.mxu0 %v11975_v4  ;;  %v8090_v12 = vpop.f32.mrb[23].mxu0  ;;  %v16273_v49 = vand.u32 4294901760, %v12528_v19  ;;  %v8266_v24 = vpop.f32.mrb[23].mxu1  ;;  %v12723_v19 = vadd.f32 %v12435_v38, %v656_v0  ;;  %v16285_v0 = vld [vmem:[#allocation86_spill] sm:$0xff] }
 0x150   :  { %9352 = vmatprep.subr.bf16.mxu0 %v16024_v52  ;;  %v8091_v21 = vadd.f32 %v8090_v12, %v8089_v40  ;;  %v12720_v35 = vadd.f32 %v8266_v24, %v8265_v56  ;;  %v16286_v40 = vld [vmem:[#allocation5_spill] sm:$0xff]  ;;  %v9677_v56 = vpack.c.bf16 %v3233_v29, %v3226_v10  ;;  %v16287_v12 = vld [vmem:[#allocation78_spill] sm:$0xff] }
 0x151   :  { %9663 = vmatpush1.bf16.msra.mxu1 %v12677_v34  ;;  %v12713_v30 = vpack.c.bf16 %v16274_v5, %v16273_v49  ;;  %v3240_v49 = vand.u32 4294901760, %v16287_v12  ;;  %v16288_v5 = vld [vmem:[#allocation74_spill] sm:$0xff]  ;;  %v16305_v34 = vld [vmem:[#allocation9_spill] sm:$0xff] }
 0x152   :  { %9664 = vmatprep.subr.bf16.mxu1 %v16024_v52  ;;  %1855 = vmatmul.mubr.f32.gmra.mrb[38].mxu0 %v11992_v15  ;;  %16276 = vst [vmem:[#allocation18_spill] sm:$0xff] %v12720_v35  ;;  %v665_v23 = vadd.f32 %v8091_v21, %v12606_v20  ;;  %v16282_v20 = vld [vmem:[#allocation76_spill] sm:$0xff]  ;;  %v3247_v24 = vand.u32 4294901760, %v16288_v5  ;;  %v16289_v21 = vld [vmem:[#allocation57_spill] sm:$0xff]  ;;  %v3200_v35 = vand.u32 4294901760, %v3199_v51 }
 0x153   :  { %16275 = vst [vmem:[#allocation60_spill] sm:$0xff] %v12713_v30  ;;  %9354 = vmatpush1.bf16.msra.mxu0 %v16199_v2  ;;  %1943 = vmatprep.mubr.f32.mxu0 %v16244_v63  ;;  %v9671_v2 = vpack.c.bf16 %v3205_v22, %v3198_v42  ;;  %v16304_v22 = vld [vmem:[#allocation17_spill] sm:$0xff]  ;;  %v12792_v51 = vsub.f32 %v16287_v12, %v3240_v49  ;;  %v12819_v12 = vld [vmem:[%s15202_s0 + $0x530] sm:$0xff] }
 0x154   :  { %9355 = vmatprep.subr.bf16.mxu0 %v16024_v52  ;;  %v12734_v38 = vadd.f32 %v16279_v3, %v665_v23  ;;  %v3254_v23 = vand.u32 4294901760, %v16289_v21  ;;  %v16306_v15 = vld [vmem:[#allocation97_spill] sm:$0xff] }
 0x155   :  { %9666 = vmatpush1.bf16.msra.mxu1 %v12695_v37  ;;  %v9680_v37 = vpack.c.bf16 %v3247_v24, %v3240_v49 }
 0x156   :  { %9667 = vmatprep.subr.bf16.mxu1 %v16024_v52  ;;  %16280 = vst [vmem:[#allocation63_spill] sm:$0xff] %v12734_v38  ;;  %v3207_v38 = vand.u32 4294901760, %v3206_v55  ;;  %v3248_v55 = vsub.f32 %v16288_v5, %v3247_v24 }
 0x157   :  { %9357 = vmatpush1.bf16.msra.mxu0 %v16204_v27  ;;  %v9674_v27 = vpack.c.bf16 %v3219_v60, %v3212_v53 }
 0x158   :  { %9358 = vmatprep.subr.bf16.mxu0 %v16024_v52 }
 0x159   :  { %9669 = vmatpush1.bf16.msra.mxu1 %v12713_v30  ;;  %v16299_v30 = vld [vmem:[#allocation55_spill] sm:$0xff] }
 0x15a   :  { %9670 = vmatprep.subr.bf16.mxu1 %v16024_v52 }
 0x15b   :  { %9360 = vmatpush1.bf16.msra.mxu0 %v16282_v20  ;;  %v16291_v20 = vld [vmem:[#allocation59_spill] sm:$0xff] }
 0x15c   :  { %3604 = vmatmul.mubr.f32.vlgmr.msra.gmra.mrb[64].mxu1 %v16281_v41  ;;  %9361 = vmatprep.subr.bf16.mxu0 %v16024_v52  ;;  %v16292_v41 = vld [vmem:[#allocation61_spill] sm:$0xff] }
 0x15d   :  { %9672 = vmatpush1.bf16.msra.mxu1 %v9671_v2  ;;  %3611 = vmatprep.mubr.f32.mxu1 %v16285_v0  ;;  %v16290_v2 = vld [vmem:[#allocation58_spill] sm:$0xff]  ;;  %v3268_v0 = vand.u32 4294901760, %v16291_v20 }
 0x15e   :  { %9673 = vmatprep.subr.bf16.mxu1 %v16024_v52  ;;  %v3261_v3 = vand.u32 4294901760, %v16290_v2 }
 0x15f   :  { %9363 = vmatpush1.bf16.msra.mxu0 %v16286_v40 }
 0x160   :  { %3615 = vmatmul.mubr.f32.gmra.mrb[66].mxu1 %v16230_v16  ;;  %9364 = vmatprep.subr.bf16.mxu0 %v16024_v52  ;;  %v3275_v16 = vand.u32 4294901760, %v16292_v41  ;;  %v9683_v32 = vpack.c.bf16 %v3261_v3, %v3254_v23  ;;  %v8168_v43 = vpop.f32.mrb[24].mxu0 }
 0x161   :  { %9675 = vmatpush1.bf16.msra.mxu1 %v9674_v27  ;;  %v16294_v27 = vld [vmem:[#allocation62_spill] sm:$0xff]  ;;  %3622 = vmatprep.mubr.f32.mxu1 %v16295_v7  ;;  %v8169_v39 = vpop.f32.mrb[25].mxu0 }
 0x162   :  { %9676 = vmatprep.subr.bf16.mxu1 %v16024_v52  ;;  %v12766_v40 = vpack.c.bf16 %v3275_v16, %v3268_v0  ;;  %v8300_v7 = vpop.f32.mrb[24].mxu1  ;;  %v8170_v4 = vadd.f32 %v8169_v39, %v8168_v43  ;;  %v3255_v39 = vsub.f32 %v16289_v21, %v3254_v23 }
 0x163   :  { %9366 = vmatpush1.bf16.msra.mxu0 %v16299_v30  ;;  %v16303_v30 = vand.u32 4294901760, %v16297_v17  ;;  %v8301_v1 = vpop.f32.mrb[25].mxu1 }
 0x164   :  { %3626 = vmatmul.mubr.f32.gmra.mrb[68].mxu1 %v16298_v48  ;;  %9367 = vmatprep.subr.bf16.mxu0 %v16024_v52  ;;  %v16301_v48 = vand.u32 4294901760, %v16294_v27  ;;  %v8302_v17 = vadd.f32 %v8301_v1, %v8300_v7  ;;  %v8171_v7 = vpop.f32.mrb[26].mxu0  ;;  %v3256_v21 = vand.u32 4294901760, %v3255_v39  ;;  %v16310_v39 = vand.u32 4294901760, %v16294_v27 }
 0x165   :  { %9678 = vmatpush1.bf16.msra.mxu1 %v9677_v56  ;;  %v12778_v42 = vpack.c.bf16 %v16303_v30, %v16302_v33  ;;  %3633 = vmatprep.mubr.f32.mxu1 %v16304_v22  ;;  %v15574_v56 = vand.u32 4294901760, %v12565_v59  ;;  %v16307_v33 = vld [vmem:[#allocation82_spill] sm:$0xff]  ;;  %v3227_v30 = vsub.f32 %v16283_v62, %v3226_v10 }
 0x166   :  { %9679 = vmatprep.subr.bf16.mxu1 %v16024_v52  ;;  %v12772_v36 = vpack.c.bf16 %v16301_v48, %v16300_v44  ;;  %v3213_v44 = vsub.f32 %v16277_v46, %v3212_v53  ;;  %v3220_v48 = vsub.f32 %v16278_v61, %v3219_v60  ;;  %v12796_v46 = vadd.f32 %v8170_v4, %v12685_v31  ;;  %v8303_v1 = vpop.f32.mrb[26].mxu1  ;;  %v8172_v53 = vpop.f32.mrb[27].mxu0 }
 0x167   :  { %9369 = vmatpush1.bf16.msra.mxu0 %v16307_v33  ;;  %v12799_v43 = vadd.f32 %v8302_v17, %v12667_v8  ;;  %v8304_v61 = vpop.f32.mrb[27].mxu1  ;;  %v16308_v4 = vand.u32 4294901760, %v16305_v34  ;;  %v12811_v17 = vpack.c.bf16 %v3207_v38, %v3200_v35  ;;  %v3269_v8 = vsub.f32 %v16291_v20, %v3268_v0  ;;  %v12824_v35 = vld [vmem:[%s15202_s0 + $0x538] sm:$0xff] }
 0x168   :  { %3637 = vmatmul.mubr.f32.gmra.mrb[70].mxu1 %v16306_v15  ;;  %9562 = vmatprep.subr.bf16.mxu0 %v16024_v52  ;;  %v3276_v60 = vsub.f32 %v16292_v41, %v3275_v16  ;;  %v8173_v62 = vadd.f32 %v8172_v53, %v8171_v7  ;;  %v8305_v10 = vadd.f32 %v8304_v61, %v8303_v1  ;;  %v3214_v28 = vand.u32 4294901760, %v3213_v44  ;;  %v8174_v5 = vpop.f32.mrb[28].mxu0 }
 0x169   :  { %9681 = vmatpush1.bf16.msra.mxu1 %v9680_v37  ;;  %3761 = vmatprep.mubr.f32.mxu1 %v16244_v63  ;;  %v3262_v37 = vsub.f32 %v16290_v2, %v3261_v3  ;;  %v12809_v31 = vpack.c.bf16 %v16308_v4, %v15574_v56  ;;  %v3221_v29 = vand.u32 4294901760, %v3220_v48  ;;  %v3228_v16 = vand.u32 4294901760, %v3227_v30  ;;  %v8175_v2 = vpop.f32.mrb[29].mxu0  ;;  %v7910_v30 = vld [vmem:[%s15202_s0 + $0x4b0] sm:$0xff] }
 0x16a   :  { %9682 = vmatprep.subr.bf16.mxu1 %v16024_v52  ;;  %1945 = vmatmul.mubr.f32.vlgmr.msra.gmra.mrb[32].mxu0 %v16174_v54  ;;  %v3235_v38 = vand.u32 4294901760, %v3234_v47  ;;  %v3249_v41 = vand.u32 4294901760, %v3248_v55  ;;  %v12830_v0 = vadd.f32 %v8173_v62, %v12703_v11  ;;  %v12833_v49 = vadd.f32 %v8305_v10, %v12682_v9  ;;  %v8306_v24 = vpop.f32.mrb[28].mxu1 }
 0x16b   :  { %9564 = vmatpush1.bf16.msra.mxu0 %v12599_v50  ;;  %1950 = vmatprep.mubr.f32.mxu0 %v16177_v57  ;;  %v3263_v23 = vand.u32 4294901760, %v3262_v37  ;;  %v8307_v3 = vpop.f32.mrb[29].mxu1  ;;  %v5937_v47 = vand.u32 4294901760, %v12819_v12  ;;  %v5940_v20 = vand.u32 4294901760, %v12824_v35  ;;  %v3270_v44 = vand.u32 4294901760, %v3269_v8 }
 0x16c   :  { %9565 = vmatprep.subr.bf16.mxu0 %v16024_v52  ;;  %v3277_v11 = vand.u32 4294901760, %v3276_v60  ;;  %v8176_v48 = vadd.f32 %v8175_v2, %v8174_v5  ;;  %v8308_v9 = vadd.f32 %v8307_v3, %v8306_v24  ;;  %v12841_v33 = vpack.c.bf16 %v3221_v29, %v3214_v28  ;;  %v7930_v24 = vld [vmem:[%s15202_s0 + $0x550] sm:$0xff]  ;;  %v16316_v3 = vld [vmem:[#allocation89_spill] sm:$0xff] }
 0x16d   :  { %9684 = vmatpush1.bf16.msra.mxu1 %v9683_v32  ;;  %v3242_v32 = vand.u32 4294901760, %v12792_v51  ;;  %v7911_v51 = vld [vmem:[%s15202_s0 + $0x4b8] sm:$0xff]  ;;  %v12851_v55 = vpack.c.bf16 %v3235_v38, %v3228_v16  ;;  %v16309_v7 = vand.u32 4294901760, %v16293_v45  ;;  %v3290_v37 = vsub.f32 %v16294_v27, %v16310_v39  ;;  %v8177_v4 = vpop.f32.mrb[30].mxu0  ;;  %v7912_v16 = vld [vmem:[%s15202_s0 + $0x4c0] sm:$0xff]  ;;  %v7913_v38 = vld [vmem:[%s15202_s0 + $0x4c8] sm:$0xff] }
 0x16e   :  { %9685 = vmatprep.subr.bf16.mxu1 %v16024_v52  ;;  %1952 = vmatmul.mubr.f32.gmra.mrb[34].mxu0 %v16179_v14  ;;  %v12867_v53 = vadd.f32 %v8176_v48, %v12723_v19  ;;  %v12870_v61 = vadd.f32 %v8308_v9, %v12700_v6  ;;  %v8309_v8 = vpop.f32.mrb[30].mxu1  ;;  %v12875_v62 = vpack.c.bf16 %v3263_v23, %v3256_v21  ;;  %v8178_v10 = vpop.f32.mrb[31].mxu0  ;;  %v5889_v28 = vand.u32 4294901760, %v7910_v30  ;;  %v7931_v21 = vld [vmem:[%s15202_s0 + $0x558] sm:$0xff]  ;;  %v16319_v39 = vld [vmem:[#allocation63_spill] sm:$0xff] }
 0x16f   :  { %9567 = vmatpush1.bf16.msra.mxu0 %v12615_v13  ;;  %1957 = vmatprep.mubr.f32.mxu0 %v16181_v58  ;;  %v12861_v1 = vsub.f32 %v16293_v45, %v16309_v7  ;;  %v12873_v60 = vpack.c.bf16 %v3249_v41, %v3242_v32  ;;  %v7929_v45 = vld [vmem:[%s15202_s0 + $0x548] sm:$0xff]  ;;  %v8310_v19 = vpop.f32.mrb[31].mxu1  ;;  %v12881_v27 = vpack.c.bf16 %v5940_v20, %v5937_v47  ;;  %v5892_v29 = vand.u32 4294901760, %v7911_v51  ;;  %v16317_v48 = vld [vmem:[#allocation65_spill] sm:$0xff] }
 0x170   :  { %9568 = vmatprep.subr.bf16.mxu0 %v16024_v52  ;;  %16311 = vst [vmem:[#allocation99_spill] sm:$0xff] %v12867_v53  ;;  %16312 = vst [vmem:[#allocation100_spill] sm:$0xff] %v12875_v62  ;;  %v12883_v6 = vpack.c.bf16 %v3277_v11, %v3270_v44  ;;  %v8179_v32 = vadd.f32 %v8178_v10, %v8177_v4  ;;  %v8311_v41 = vadd.f32 %v8310_v19, %v8309_v8  ;;  %v16321_v8 = vld [vmem:[#allocation18_spill] sm:$0xff] }
 0x171   :  { %9687 = vmatpush1.bf16.msra.mxu1 %v12766_v40  ;;  %v12856_v40 = vld [vmem:[%s15202_s0 + $0x540] sm:$0xff]  ;;  %16313 = vst [vmem:[#allocation69_spill] sm:$0xff] %v12881_v27  ;;  %v16315_v23 = vand.u32 4294901760, %v16296_v25  ;;  %v3284_v44 = vand.u32 4294901760, %v12861_v1  ;;  %v3291_v11 = vand.u32 4294901760, %v3290_v37  ;;  %v16318_v9 = vand.u32 4294901760, %v16317_v48 }
 0x172   :  { %9688 = vmatprep.subr.bf16.mxu1 %v16024_v52  ;;  %1959 = vmatmul.mubr.f32.gmra.mrb[36].mxu0 %v11938_v26  ;;  %16314 = vst [vmem:[#allocation70_spill] sm:$0xff] %v12883_v6  ;;  %v5943_v5 = vand.u32 4294901760, %v12856_v40  ;;  %v12910_v4 = vadd.f32 %v8179_v32, %v16319_v39  ;;  %v12913_v10 = vadd.f32 %v8311_v41, %v16321_v8  ;;  %v5898_v19 = vand.u32 4294901760, %v7913_v38  ;;  %v7915_v1 = vld [vmem:[%s15202_s0 + $0x4d8] sm:$0xff]  ;;  %v16322_v37 = vld [vmem:[#allocation91_spill] sm:$0xff] }
 0x173   :  { %9570 = vmatpush1.bf16.msra.mxu0 %v12629_v18  ;;  %v3297_v2 = vsub.f32 %v16296_v25, %v16315_v23  ;;  %1964 = vmatprep.mubr.f32.mxu0 %v16316_v3  ;;  %v3304_v7 = vsub.f32 %v16317_v48, %v16318_v9  ;;  %v5895_v25 = vand.u32 4294901760, %v7912_v16  ;;  %v7914_v23 = vld [vmem:[%s15202_s0 + $0x4d0] sm:$0xff]  ;;  %v12924_v32 = vsub.f32 %v12819_v12, %v5937_v47  ;;  %v16325_v39 = vld [vmem:[#allocation7_spill] sm:$0xff]  ;;  %v7932_v12 = vld [vmem:[%s15202_s0 + $0x560] sm:$0xff] }
 0x174   :  { %9571 = vmatprep.subr.bf16.mxu0 %v16024_v52  ;;  %16320 = vst [vmem:[#allocation71_spill] sm:$0xff] %v12910_v4  ;;  %v12927_v41 = vsub.f32 %v12824_v35, %v5940_v20  ;;  %v5949_v48 = vand.u32 4294901760, %v7930_v24  ;;  %v5952_v9 = vand.u32 4294901760, %v7931_v21  ;;  %v12931_v8 = vpack.c.bf16 %v5892_v29, %v5889_v28 }
 0x175   :  { %9690 = vmatpush1.bf16.msra.mxu1 %v12772_v36  ;;  %v5946_v36 = vand.u32 4294901760, %v7929_v45  ;;  %16323 = vst [vmem:[#allocation72_spill] sm:$0xff] %v12924_v32  ;;  %v12933_v56 = vsub.f32 %v7910_v30, %v5889_v28  ;;  %v12935_v15 = vsub.f32 %v7911_v51, %v5892_v29  ;;  %v3298_v22 = vand.u32 4294901760, %v3297_v2  ;;  %v7933_v30 = vld [vmem:[%s15202_s0 + $0x568] sm:$0xff]  ;;  %v7916_v51 = vld [vmem:[%s15202_s0 + $0x4e0] sm:$0xff] }
 0x176   :  { %9691 = vmatprep.subr.bf16.mxu1 %v16024_v52  ;;  %1966 = vmatmul.mubr.f32.gmra.mrb[38].mxu0 %v16322_v37  ;;  %16324 = vst [vmem:[#allocation77_spill] sm:$0xff] %v12927_v41  ;;  %16326 = vst [vmem:[#allocation76_spill] sm:$0xff] %v12931_v8  ;;  %v3305_v47 = vand.u32 4294901760, %v3304_v7  ;;  %v5901_v20 = vand.u32 4294901760, %v7914_v23  ;;  %v7917_v28 = vld [vmem:[%s15202_s0 + $0x4e8] sm:$0xff]  ;;  %v12954_v2 = vpack.c.bf16 %v3291_v11, %v3284_v44  ;;  %v16333_v7 = vand.u32 4294901760, %v12565_v59 }
 0x177   :  { %9573 = vmatpush1.bf16.msra.mxu0 %v16325_v39  ;;  %16327 = vst [vmem:[#allocation73_spill] sm:$0xff] %v12933_v56  ;;  %16328 = vst [vmem:[#allocation75_spill] sm:$0xff] %v12935_v15  ;;  %v12942_v35 = vpack.c.bf16 %v5946_v36, %v5943_v5  ;;  %v16330_v29 = vld [vmem:[#allocation67_spill] sm:$0xff]  ;;  %v16334_v6 = vand.u32 4294901760, %v16305_v34  ;;  %v12965_v62 = vsub.f32 %v12856_v40, %v5943_v5  ;;  %v16339_v44 = vld [vmem:[#allocation16_spill] sm:$0xff]  ;;  %v5955_v11 = vand.u32 4294901760, %v7932_v12 }
 0x178   :  { %9574 = vmatprep.subr.bf16.mxu0 %v16024_v52  ;;  %3139 = vmatprep.mubr.f32.mxu0 %v16330_v29  ;;  %16331 = vst [vmem:[#allocation78_spill] sm:$0xff] %v12954_v2  ;;  %v3311_v8 = vsub.f32 %v12565_v59, %v16333_v7  ;;  %v12967_v4 = vsub.f32 %v7929_v45, %v5946_v36  ;;  %v5907_v59 = vand.u32 4294901760, %v7916_v51  ;;  %v5910_v7 = vand.u32 4294901760, %v7917_v28  ;;  %v7877_v40 = vld [vmem:[%s15202_s0 + $0x3a8] sm:$0xff]  ;;  %v7935_v5 = vld [vmem:[%s15202_s0 + $0x578] sm:$0xff] }
 0x179   :  { %9693 = vmatpush1.bf16.msra.mxu1 %v12778_v42  ;;  %16329 = vst [vmem:[#allocation5_spill] sm:$0xff] %v12942_v35  ;;  %v5904_v42 = vand.u32 4294901760, %v7915_v1  ;;  %v12956_v35 = vpack.c.bf16 %v5898_v19, %v5895_v25  ;;  %v3318_v27 = vsub.f32 %v16305_v34, %v16334_v6  ;;  %16335 = vst [vmem:[#allocation57_spill] sm:$0xff] %v12965_v62  ;;  %v7876_v34 = vld [vmem:[%s15202_s0 + $0x3a0] sm:$0xff] }
 0x17a   :  { %9694 = vmatprep.subr.bf16.mxu1 %v16024_v52  ;;  %16336 = vst [vmem:[#allocation58_spill] sm:$0xff] %v12967_v4  ;;  %v12969_v53 = vsub.f32 %v7912_v16, %v5895_v25  ;;  %v12971_v29 = vpack.c.bf16 %v5952_v9, %v5949_v48  ;;  %v12983_v45 = vsub.f32 %v7913_v38, %v5898_v19  ;;  %v7934_v16 = vld [vmem:[%s15202_s0 + $0x570] sm:$0xff]  ;;  %v7861_v38 = vld [vmem:[%s15202_s0 + $0x328] sm:$0xff] }
 0x17b   :  { %16332 = vst [vmem:[#allocation74_spill] sm:$0xff] %v12956_v35  ;;  %9576 = vmatpush1.bf16.msra.mxu0 %v16339_v44  ;;  %v5958_v35 = vand.u32 4294901760, %v7933_v30  ;;  %v12985_v6 = vpack.c.bf16 %v3305_v47, %v3298_v22  ;;  %v12995_v36 = vsub.f32 %v7930_v24, %v5949_v48  ;;  %v12997_v25 = vsub.f32 %v7931_v21, %v5952_v9  ;;  %v7860_v22 = vld [vmem:[%s15202_s0 + $0x320] sm:$0xff]  ;;  %v7919_v21 = vld [vmem:[%s15202_s0 + $0x4f8] sm:$0xff]  ;;  %v16347_v9 = vld [vmem:[#allocation8_spill] sm:$0xff] }
 0x17c   :  { %16337 = vst [vmem:[#allocation59_spill] sm:$0xff] %v12969_v53  ;;  %16338 = vst [vmem:[#allocation61_spill] sm:$0xff] %v12971_v29  ;;  %9577 = vmatprep.subr.bf16.mxu0 %v16024_v52  ;;  %v3312_v29 = vand.u32 4294901760, %v3311_v8  ;;  %v3319_v2 = vand.u32 4294901760, %v3318_v27  ;;  %v13006_v19 = vsub.f32 %v7914_v23, %v5901_v20  ;;  %v13008_v47 = vsub.f32 %v7915_v1, %v5904_v42  ;;  %v7918_v27 = vld [vmem:[%s15202_s0 + $0x4f0] sm:$0xff] }
 0x17d   :  { %9696 = vmatpush1.bf16.msra.mxu1 %v12809_v31  ;;  %16340 = vst [vmem:[#allocation13_spill] sm:$0xff] %v12983_v45  ;;  %16341 = vst [vmem:[#allocation62_spill] sm:$0xff] %v12985_v6  ;;  %v12987_v31 = vpack.c.bf16 %v5904_v42, %v5901_v20  ;;  %v4004_v24 = vand.u32 4294901760, %v7876_v34  ;;  %v4007_v48 = vand.u32 4294901760, %v7877_v40  ;;  %v13018_v8 = vpack.c.bf16 %v5958_v35, %v5955_v11  ;;  %v7878_v42 = vld [vmem:[%s15202_s0 + $0x3b0] sm:$0xff] }
 0x17e   :  { %9697 = vmatprep.subr.bf16.mxu1 %v16024_v52  ;;  %16343 = vst [vmem:[#allocation55_spill] sm:$0xff] %v12995_v36  ;;  %16344 = vst [vmem:[#allocation9_spill] sm:$0xff] %v12997_v25  ;;  %v13020_v23 = vpack.c.bf16 %v5910_v7, %v5907_v59  ;;  %v5961_v1 = vand.u32 4294901760, %v7934_v16  ;;  %v5964_v20 = vand.u32 4294901760, %v7935_v5  ;;  %v13030_v6 = vsub.f32 %v7932_v12, %v5955_v11  ;;  %v7937_v12 = vld [vmem:[%s15202_s0 + $0x588] sm:$0xff] }
 0x17f   :  { %16342 = vst [vmem:[#allocation64_spill] sm:$0xff] %v12987_v31  ;;  %16345 = vst [vmem:[#allocation82_spill] sm:$0xff] %v13006_v19  ;;  %9579 = vmatpush1.bf16.msra.mxu0 %v16347_v9  ;;  %v7879_v31 = vld [vmem:[%s15202_s0 + $0x3b8] sm:$0xff]  ;;  %v13038_v19 = vpack.c.bf16 %v3319_v2, %v3312_v29  ;;  %v5913_v25 = vand.u32 4294901760, %v7918_v27  ;;  %v5916_v36 = vand.u32 4294901760, %v7919_v21  ;;  %v4010_v11 = vand.u32 4294901760, %v7878_v42 }
 0x180   :  { %3763 = vmatmul.mubr.f32.vlgmr.msra.gmra.mrb[64].mxu1 %v16174_v54  ;;  %16346 = vst [vmem:[#allocation65_spill] sm:$0xff] %v13008_v47  ;;  %16348 = vst [vmem:[#allocation63_spill] sm:$0xff] %v13018_v8  ;;  %9580 = vmatprep.subr.bf16.mxu0 %v16024_v52  ;;  %v3956_v8 = vand.u32 4294901760, %v7860_v22  ;;  %v7936_v47 = vld [vmem:[%s15202_s0 + $0x580] sm:$0xff]  ;;  %v13040_v54 = vsub.f32 %v7916_v51, %v5907_v59  ;;  %v13052_v51 = vsub.f32 %v7876_v34, %v4004_v24 }
 0x181   :  { %9699 = vmatpush1.bf16.msra.mxu1 %v12599_v50  ;;  %16349 = vst [vmem:[#allocation18_spill] sm:$0xff] %v13020_v23  ;;  %16350 = vst [vmem:[#allocation7_spill] sm:$0xff] %v13030_v6  ;;  %v13032_v50 = vsub.f32 %v7933_v30, %v5958_v35  ;;  %v3959_v23 = vand.u32 4294901760, %v7861_v38  ;;  %3768 = vmatprep.mubr.f32.mxu1 %v16177_v57  ;;  %v13046_v35 = vsub.f32 %v7917_v28, %v5910_v7  ;;  %v16356_v6 = vld [vmem:[#allocation54_spill] sm:$0xff]  ;;  %v7862_v28 = vld [vmem:[%s15202_s0 + $0x330] sm:$0xff] }
 0x182   :  { %9700 = vmatprep.subr.bf16.mxu1 %v16024_v52  ;;  %16352 = vst [vmem:[#allocation8_spill] sm:$0xff] %v13038_v19  ;;  %16353 = vst [vmem:[#allocation102_spill] sm:$0xff] %v13040_v54  ;;  %v13048_v30 = vpack.c.bf16 %v4007_v48, %v4004_v24  ;;  %v13054_v29 = vsub.f32 %v7877_v40, %v4007_v48  ;;  %v13056_v2 = vpack.c.bf16 %v5964_v20, %v5961_v1  ;;  %v7863_v7 = vld [vmem:[%s15202_s0 + $0x338] sm:$0xff]  ;;  %v7920_v48 = vld [vmem:[%s15202_s0 + $0x500] sm:$0xff] }
 0x183   :  { %16351 = vst [vmem:[#allocation16_spill] sm:$0xff] %v13032_v50  ;;  %16354 = vst [vmem:[#allocation103_spill] sm:$0xff] %v13046_v35  ;;  %v4013_v50 = vand.u32 4294901760, %v7879_v31  ;;  %9582 = vmatpush1.bf16.msra.mxu0 %v16356_v6  ;;  %v5967_v59 = vand.u32 4294901760, %v7936_v47  ;;  %v13068_v34 = vsub.f32 %v7935_v5, %v5964_v20  ;;  %v13070_v40 = vpack.c.bf16 %v3959_v23, %v3956_v8  ;;  %v7880_v20 = vld [vmem:[%s15202_s0 + $0x3c0] sm:$0xff] }
 0x184   :  { %3770 = vmatmul.mubr.f32.gmra.mrb[66].mxu1 %v16179_v14  ;;  %16355 = vst [vmem:[#allocation104_spill] sm:$0xff] %v13048_v30  ;;  %16357 = vst [vmem:[#allocation54_spill] sm:$0xff] %v13052_v51  ;;  %9583 = vmatprep.subr.bf16.mxu0 %v16024_v52  ;;  %v5970_v24 = vand.u32 4294901760, %v7937_v12  ;;  %v8344_v30 = vpop.f32.mrb[32].mxu1  ;;  %v13079_v19 = vsub.f32 %v7860_v22, %v3956_v8  ;;  %v13083_v5 = vpack.c.bf16 %v5916_v36, %v5913_v25 }
 0x185   :  { %9702 = vmatpush1.bf16.msra.mxu1 %v12615_v13  ;;  %16358 = vst [vmem:[#allocation105_spill] sm:$0xff] %v13054_v29  ;;  %16359 = vst [vmem:[#allocation106_spill] sm:$0xff] %v13056_v2  ;;  %v13066_v13 = vsub.f32 %v7934_v16, %v5961_v1  ;;  %v7921_v2 = vld [vmem:[%s15202_s0 + $0x508] sm:$0xff]  ;;  %3775 = vmatprep.mubr.f32.mxu1 %v16181_v58  ;;  %v13081_v16 = vsub.f32 %v7861_v38, %v3959_v23  ;;  %v3962_v38 = vand.u32 4294901760, %v7862_v28 }
 0x186   :  { %9703 = vmatprep.subr.bf16.mxu1 %v16024_v52  ;;  %16361 = vst [vmem:[#allocation108_spill] sm:$0xff] %v13068_v34  ;;  %16362 = vst [vmem:[#allocation109_spill] sm:$0xff] %v13070_v40  ;;  %v13085_v1 = vsub.f32 %v7918_v27, %v5913_v25  ;;  %v7881_v40 = vld [vmem:[%s15202_s0 + $0x3c8] sm:$0xff]  ;;  %v8345_v34 = vpop.f32.mrb[33].mxu1  ;;  %v13096_v22 = vpack.c.bf16 %v4013_v50, %v4010_v11  ;;  %v3965_v8 = vand.u32 4294901760, %v7863_v7  ;;  %v16369_v25 = vld [vmem:[#allocation98_spill] sm:$0xff] }
 0x187   :  { %16360 = vst [vmem:[#allocation107_spill] sm:$0xff] %v13066_v13  ;;  %16363 = vst [vmem:[#allocation110_spill] sm:$0xff] %v13079_v19  ;;  %v13094_v13 = vsub.f32 %v7919_v21, %v5916_v36  ;;  %v8346_v23 = vadd.f32 %v8345_v34, %v8344_v30  ;;  %9585 = vmatpush1.bf16.msra.mxu0 %v16369_v25  ;;  %v13100_v27 = vsub.f32 %v7878_v42, %v4010_v11  ;;  %v7939_v36 = vld [vmem:[%s15202_s0 + $0x598] sm:$0xff]  ;;  %v7864_v11 = vld [vmem:[%s15202_s0 + $0x340] sm:$0xff] }
 0x188   :  { %16364 = vst [vmem:[#allocation111_spill] sm:$0xff] %v13081_v16  ;;  %16365 = vst [vmem:[#allocation112_spill] sm:$0xff] %v13083_v5  ;;  %3777 = vmatmul.mubr.f32.gmra.mrb[68].mxu1 %v11938_v26  ;;  %v5922_v5 = vand.u32 4294901760, %v7921_v2  ;;  %v7938_v16 = vld [vmem:[%s15202_s0 + $0x590] sm:$0xff]  ;;  %9586 = vmatprep.subr.bf16.mxu0 %v16024_v52  ;;  %v13110_v21 = vsub.f32 %v7879_v31, %v4013_v50  ;;  %v13112_v30 = vpack.c.bf16 %v5970_v24, %v5967_v59  ;;  %v7865_v50 = vld [vmem:[%s15202_s0 + $0x348] sm:$0xff] }
 0x189   :  { %16366 = vst [vmem:[#allocation113_spill] sm:$0xff] %v13085_v1  ;;  %16367 = vst [vmem:[#allocation114_spill] sm:$0xff] %v13094_v13  ;;  %9705 = vmatpush1.bf16.msra.mxu1 %v12629_v18  ;;  %v5919_v1 = vand.u32 4294901760, %v7920_v48  ;;  %v4016_v18 = vand.u32 4294901760, %v7880_v20  ;;  %v4019_v42 = vand.u32 4294901760, %v7881_v40  ;;  %v13118_v34 = vadd.f32 %v8346_v23, %v12799_v43  ;;  %3782 = vmatprep.mubr.f32.mxu1 %v16316_v3 }
 0x18a   :  { %16368 = vst [vmem:[#allocation115_spill] sm:$0xff] %v13096_v22  ;;  %16370 = vst [vmem:[#allocation98_spill] sm:$0xff] %v13100_v27  ;;  %9706 = vmatprep.subr.bf16.mxu1 %v16024_v52  ;;  %v8347_v27 = vpop.f32.mrb[34].mxu1  ;;  %v13121_v13 = vsub.f32 %v7936_v47, %v5967_v59  ;;  %v13123_v22 = vsub.f32 %v7937_v12, %v5970_v24  ;;  %v13125_v31 = vsub.f32 %v7862_v28, %v3962_v38  ;;  %v7922_v47 = vld [vmem:[%s15202_s0 + $0x510] sm:$0xff]  ;;  %v7923_v12 = vld [vmem:[%s15202_s0 + $0x518] sm:$0xff] }
 0x18b   :  { %16371 = vst [vmem:[#allocation116_spill] sm:$0xff] %v13110_v21  ;;  %16372 = vst [vmem:[#allocation117_spill] sm:$0xff] %v13112_v30  ;;  %v8348_v21 = vpop.f32.mrb[35].mxu1  ;;  %v13131_v30 = vpack.c.bf16 %v3965_v8, %v3962_v38  ;;  %v13133_v43 = vsub.f32 %v7863_v7, %v3965_v8  ;;  %v5973_v23 = vand.u32 4294901760, %v7938_v16  ;;  %v5976_v19 = vand.u32 4294901760, %v7939_v36  ;;  %v16378_v28 = vld [vmem:[#allocation60_spill] sm:$0xff] }
 0x18c   :  { %16373 = vst [vmem:[#allocation118_spill] sm:$0xff] %v13121_v13  ;;  %16374 = vst [vmem:[#allocation119_spill] sm:$0xff] %v13123_v22  ;;  %3784 = vmatmul.mubr.f32.gmra.mrb[70].mxu1 %v16322_v37  ;;  %v8349_v59 = vadd.f32 %v8348_v21, %v8347_v27  ;;  %9588 = vmatpush1.bf16.msra.mxu0 %v16378_v28  ;;  %v13143_v24 = vpack.c.bf16 %v5922_v5, %v5919_v1  ;;  %v3968_v7 = vand.u32 4294901760, %v7864_v11  ;;  %v7882_v8 = vld [vmem:[%s15202_s0 + $0x3d0] sm:$0xff] }
 0x18d   :  { %16375 = vst [vmem:[#allocation120_spill] sm:$0xff] %v13125_v31  ;;  %16376 = vst [vmem:[#allocation121_spill] sm:$0xff] %v13131_v30  ;;  %9708 = vmatpush1.bf16.msra.mxu1 %v16325_v39  ;;  %v13145_v38 = vsub.f32 %v7920_v48, %v5919_v1  ;;  %9589 = vmatprep.subr.bf16.mxu0 %v16024_v52  ;;  %v13155_v27 = vsub.f32 %v7921_v2, %v5922_v5  ;;  %v3971_v48 = vand.u32 4294901760, %v7865_v50  ;;  %v7940_v2 = vld [vmem:[%s15202_s0 + $0x5a0] sm:$0xff]  ;;  %v7941_v5 = vld [vmem:[%s15202_s0 + $0x5a8] sm:$0xff] }
 0x18e   :  { %16377 = vst [vmem:[#allocation122_spill] sm:$0xff] %v13133_v43  ;;  %16379 = vst [vmem:[#allocation60_spill] sm:$0xff] %v13143_v24  ;;  %v7883_v43 = vld [vmem:[%s15202_s0 + $0x3d8] sm:$0xff]  ;;  %9709 = vmatprep.subr.bf16.mxu1 %v16024_v52  ;;  %v13157_v39 = vpack.c.bf16 %v4019_v42, %v4016_v18  ;;  %v13159_v21 = vsub.f32 %v7880_v20, %v4016_v18  ;;  %v13162_v1 = vadd.f32 %v8349_v59, %v12833_v49 }
 0x18f   :  { %16380 = vst [vmem:[#allocation123_spill] sm:$0xff] %v13145_v38  ;;  %16381 = vst [vmem:[#allocation124_spill] sm:$0xff] %v13155_v27  ;;  %v8350_v38 = vpop.f32.mrb[36].mxu1  ;;  %3872 = vmatprep.mubr.f32.mxu1 %v16244_v63  ;;  %v13165_v31 = vsub.f32 %v7881_v40, %v4019_v42  ;;  %v5925_v22 = vand.u32 4294901760, %v7922_v47  ;;  %v5928_v13 = vand.u32 4294901760, %v7923_v12  ;;  %v16385_v18 = vld [vmem:[#allocation93_spill] sm:$0xff]  ;;  %v13174_v49 = vpack.c.bf16 %v5976_v19, %v5973_v23 }
 0x190   :  { %16382 = vst [vmem:[#allocation125_spill] sm:$0xff] %v13157_v39  ;;  %16383 = vst [vmem:[#allocation126_spill] sm:$0xff] %v13159_v21  ;;  %v8351_v20 = vpop.f32.mrb[37].mxu1  ;;  %3145 = vmatmul.mubr.f32.vlgmr.msra.gmra.mrb[40].mxu0 %v16385_v18  ;;  %v13176_v59 = vsub.f32 %v7938_v16, %v5973_v23  ;;  %v4022_v21 = vand.u32 4294901760, %v7882_v8  ;;  %v4025_v40 = vand.u32 4294901760, %v7883_v43  ;;  %v13182_v27 = vsub.f32 %v7864_v11, %v3968_v7  ;;  %v7866_v39 = vld [vmem:[%s15202_s0 + $0x350] sm:$0xff] }
 0x191   :  { %16384 = vst [vmem:[#allocation127_spill] sm:$0xff] %v13165_v31  ;;  %16386 = vst [vmem:[#allocation128_spill] sm:$0xff] %v13174_v49  ;;  %v8352_v42 = vadd.f32 %v8351_v20, %v8350_v38  ;;  %9591 = vmatpush1.bf16.msra.mxu0 %v12811_v17  ;;  %9711 = vmatpush1.bf16.msra.mxu1 %v16339_v44  ;;  %v13180_v31 = vsub.f32 %v7939_v36, %v5976_v19  ;;  %v7867_v16 = vld [vmem:[%s15202_s0 + $0x358] sm:$0xff]  ;;  %v5979_v44 = vand.u32 4294901760, %v7940_v2  ;;  %v7924_v36 = vld [vmem:[%s15202_s0 + $0x520] sm:$0xff] }
 0x192   :  { %16387 = vst [vmem:[#allocation129_spill] sm:$0xff] %v13176_v59  ;;  %16389 = vst [vmem:[#allocation131_spill] sm:$0xff] %v13182_v27  ;;  %9592 = vmatprep.subr.bf16.mxu0 %v16024_v52  ;;  %9712 = vmatprep.subr.bf16.mxu1 %v16024_v52  ;;  %v13192_v23 = vpack.c.bf16 %v3971_v48, %v3968_v7  ;;  %v13194_v17 = vsub.f32 %v7865_v50, %v3971_v48  ;;  %v5982_v19 = vand.u32 4294901760, %v7941_v5  ;;  %v7925_v11 = vld [vmem:[%s15202_s0 + $0x528] sm:$0xff]  ;;  %v16392_v18 = vld [vmem:[#allocation56_spill] sm:$0xff] }
 0x193   :  { %16388 = vst [vmem:[#allocation130_spill] sm:$0xff] %v13180_v31  ;;  %v13203_v38 = vadd.f32 %v8352_v42, %v12870_v61  ;;  %v8353_v20 = vpop.f32.mrb[38].mxu1  ;;  %3154 = vmatprep.mubr.f32.mxu0 %v16392_v18  ;;  %v13206_v7 = vpack.c.bf16 %v5928_v13, %v5925_v22  ;;  %v13208_v50 = vsub.f32 %v7922_v47, %v5925_v22  ;;  %v16396_v31 = vld [vmem:[#allocation96_spill] sm:$0xff]  ;;  %v3974_v42 = vand.u32 4294901760, %v7866_v39  ;;  %v13223_v22 = vld [vmem:[%s15202_s0 + $0x3e8] sm:$0xff] }
 0x194   :  { %16390 = vst [vmem:[#allocation132_spill] sm:$0xff] %v13192_v23  ;;  %16391 = vst [vmem:[#allocation133_spill] sm:$0xff] %v13194_v17  ;;  %v13210_v48 = vsub.f32 %v7923_v12, %v5928_v13  ;;  %v7884_v17 = vld [vmem:[%s15202_s0 + $0x3e0] sm:$0xff]  ;;  %v8354_v27 = vpop.f32.mrb[39].mxu1  ;;  %3160 = vmatmul.mubr.f32.gmra.mrb[42].mxu0 %v16396_v31  ;;  %v13216_v59 = vpack.c.bf16 %v4025_v40, %v4022_v21  ;;  %v13218_v61 = vsub.f32 %v7882_v8, %v4022_v21 }
 0x195   :  { %16393 = vst [vmem:[#allocation134_spill] sm:$0xff] %v13206_v7  ;;  %16394 = vst [vmem:[#allocation135_spill] sm:$0xff] %v13208_v50  ;;  %v3977_v23 = vand.u32 4294901760, %v7867_v16  ;;  %v8355_v13 = vadd.f32 %v8354_v27, %v8353_v20  ;;  %9594 = vmatpush1.bf16.msra.mxu0 %v12841_v33  ;;  %9714 = vmatpush1.bf16.msra.mxu1 %v16347_v9  ;;  %v13227_v47 = vsub.f32 %v7883_v43, %v4025_v40  ;;  %v16401_v33 = vld [vmem:[#allocation68_spill] sm:$0xff] }
 0x196   :  { %16395 = vst [vmem:[#allocation136_spill] sm:$0xff] %v13210_v48  ;;  %16397 = vst [vmem:[#allocation137_spill] sm:$0xff] %v13216_v59  ;;  %v5931_v12 = vand.u32 4294901760, %v7924_v36  ;;  %v5934_v31 = vand.u32 4294901760, %v7925_v11  ;;  %9595 = vmatprep.subr.bf16.mxu0 %v16024_v52  ;;  %9715 = vmatprep.subr.bf16.mxu1 %v16024_v52  ;;  %v13231_v8 = vpack.c.bf16 %v5982_v19, %v5979_v44  ;;  %v4028_v21 = vand.u32 4294901760, %v7884_v17  ;;  %v16402_v20 = vld [vmem:[#allocation12_spill] sm:$0xff] }
 0x197   :  { %16398 = vst [vmem:[#allocation138_spill] sm:$0xff] %v13218_v61  ;;  %16399 = vst [vmem:[#allocation139_spill] sm:$0xff] %v13227_v47  ;;  %v13236_v27 = vadd.f32 %v8355_v13, %v12913_v10  ;;  %3169 = vmatprep.mubr.f32.mxu0 %v16401_v33  ;;  %v4031_v9 = vand.u32 4294901760, %v13223_v22  ;;  %v15621_v43 = vand.u32 4294901760, %v12933_v56  ;;  %v13243_v47 = vsub.f32 %v7940_v2, %v5979_v44  ;;  %v7868_v10 = vld [vmem:[%s15202_s0 + $0x360] sm:$0xff]  ;;  %v16414_v33 = vld [vmem:[#allocation85_spill] sm:$0xff] }
 0x198   :  { %16400 = vst [vmem:[#allocation140_spill] sm:$0xff] %v13231_v8  ;;  %3175 = vmatmul.mubr.f32.gmra.mrb[44].mxu0 %v16402_v20  ;;  %v13245_v8 = vsub.f32 %v7941_v5, %v5982_v19  ;;  %v13247_v18 = vpack.c.bf16 %v3977_v23, %v3974_v42  ;;  %v13249_v61 = vsub.f32 %v7866_v39, %v3974_v42  ;;  %v16407_v5 = vand.u32 4294901760, %v12924_v32  ;;  %v16421_v20 = vld [vmem:[#allocation71_spill] sm:$0xff] }
 0x199   :  { %16403 = vst [vmem:[#allocation141_spill] sm:$0xff] %v13243_v47  ;;  %9597 = vmatpush1.bf16.msra.mxu0 %v12851_v55  ;;  %9717 = vmatpush1.bf16.msra.mxu1 %v16356_v6  ;;  %v13256_v13 = vsub.f32 %v7867_v16, %v3977_v23  ;;  %v13258_v40 = vpack.c.bf16 %v5934_v31, %v5931_v12  ;;  %v16408_v55 = vand.u32 4294901760, %v12927_v41  ;;  %v7869_v16 = vld [vmem:[%s15202_s0 + $0x368] sm:$0xff]  ;;  %v16409_v23 = vld [vmem:[#allocation66_spill] sm:$0xff] }
 0x19a   :  { %16404 = vst [vmem:[#allocation142_spill] sm:$0xff] %v13245_v8  ;;  %16405 = vst [vmem:[#allocation143_spill] sm:$0xff] %v13247_v18  ;;  %v13260_v2 = vsub.f32 %v7924_v36, %v5931_v12  ;;  %9598 = vmatprep.subr.bf16.mxu0 %v16024_v52  ;;  %9718 = vmatprep.subr.bf16.mxu1 %v16024_v52  ;;  %v13264_v39 = vsub.f32 %v7925_v11, %v5934_v31  ;;  %v3980_v36 = vand.u32 4294901760, %v7868_v10  ;;  %v16412_v12 = vld [vmem:[#allocation101_spill] sm:$0xff] }
 0x19b   :  { %16406 = vst [vmem:[#allocation144_spill] sm:$0xff] %v13258_v40  ;;  %v6161_v44 = vsub.f32 %v12924_v32, %v16407_v5  ;;  %v6168_v6 = vsub.f32 %v12927_v41, %v16408_v55  ;;  %3184 = vmatprep.mubr.f32.mxu0 %v16409_v23  ;;  %v13276_v19 = vpack.c.bf16 %v4031_v9, %v4028_v21  ;;  %v16411_v11 = vand.u32 4294901760, %v12935_v15  ;;  %v7886_v55 = vld [vmem:[%s15202_s0 + $0x3f0] sm:$0xff]  ;;  %v7887_v23 = vld [vmem:[%s15202_s0 + $0x3f8] sm:$0xff]  ;;  %v16422_v32 = vld [vmem:[#allocation15_spill] sm:$0xff] }
 0x19c   :  { %v6049_v31 = vsub.f32 %v12933_v56, %v15621_v43  ;;  %3190 = vmatmul.mubr.f32.gmra.mrb[46].mxu0 %v16412_v12  ;;  %v13285_v5 = vsub.f32 %v7884_v17, %v4028_v21  ;;  %v13297_v56 = vadd.f32 %v16414_v33, %v12796_v46  ;;  %v3983_v17 = vand.u32 4294901760, %v7869_v16  ;;  %v16416_v21 = vld [vmem:[#allocation11_spill] sm:$0xff] }
 0x19d   :  { %16410 = vst [vmem:[#allocation145_spill] sm:$0xff] %v13276_v19  ;;  %v6056_v42 = vsub.f32 %v12935_v15, %v16411_v11  ;;  %9600 = vmatpush1.bf16.msra.mxu0 %v12873_v60  ;;  %9720 = vmatpush1.bf16.msra.mxu1 %v16369_v25  ;;  %v13303_v11 = vadd.f32 %v16416_v21, %v12830_v0  ;;  %v16418_v12 = vld [vmem:[#allocation99_spill] sm:$0xff]  ;;  %v16419_v15 = vld [vmem:[#allocation14_spill] sm:$0xff]  ;;  %v6162_v46 = vand.u32 4294901760, %v6161_v44  ;;  %v6169_v60 = vand.u32 4294901760, %v6168_v6 }
 0x19e   :  { %16413 = vst [vmem:[#allocation146_spill] sm:$0xff] %v13285_v5  ;;  %16415 = vst [vmem:[#allocation85_spill] sm:$0xff] %v13297_v56  ;;  %v13307_v41 = vadd.f32 %v16419_v15, %v16418_v12  ;;  %v13311_v43 = vadd.f32 %v16422_v32, %v16421_v20  ;;  %9601 = vmatprep.subr.bf16.mxu0 %v16024_v52  ;;  %9721 = vmatprep.subr.bf16.mxu1 %v16024_v52  ;;  %v6050_v0 = vand.u32 4294901760, %v6049_v31  ;;  %v7870_v32 = vld [vmem:[%s15202_s0 + $0x370] sm:$0xff]  ;;  %v7871_v20 = vld [vmem:[%s15202_s0 + $0x378] sm:$0xff] }
 0x19f   :  { %16417 = vst [vmem:[#allocation11_spill] sm:$0xff] %v13303_v11  ;;  %3350 = vmatprep.mubr.f32.mxu0 %v16244_v63  ;;  %v6057_v21 = vand.u32 4294901760, %v6056_v42  ;;  %v4034_v15 = vand.u32 4294901760, %v7886_v55  ;;  %v4037_v12 = vand.u32 4294901760, %v7887_v23  ;;  %v13325_v44 = vsub.f32 %v13223_v22, %v4031_v9  ;;  %v16427_v63 = vld [vmem:[#allocation100_spill] sm:$0xff]  ;;  %v7888_v22 = vld [vmem:[%s15202_s0 + $0x400] sm:$0xff] }
 0x1a0   :  { %16420 = vst [vmem:[#allocation99_spill] sm:$0xff] %v13307_v41  ;;  %16423 = vst [vmem:[#allocation14_spill] sm:$0xff] %v13311_v43  ;;  %v13327_v6 = vsub.f32 %v7868_v10, %v3980_v36  ;;  %v16425_v33 = vand.u32 4294901760, %v12965_v62  ;;  %v16426_v42 = vand.u32 4294901760, %v12967_v4  ;;  %v13337_v43 = vpack.c.bf16 %v3983_v17, %v3980_v36  ;;  %v7889_v9 = vld [vmem:[%s15202_s0 + $0x408] sm:$0xff]  ;;  %v16430_v11 = vld [vmem:[#allocation9_spill] sm:$0xff] }
 0x1a1   :  { %16424 = vst [vmem:[#allocation71_spill] sm:$0xff] %v13325_v44  ;;  %9603 = vmatpush1.bf16.msra.mxu0 %v16427_v63  ;;  %9723 = vmatpush1.bf16.msra.mxu1 %v16378_v28  ;;  %v13339_v41 = vsub.f32 %v7869_v16, %v3983_v17  ;;  %v16429_v10 = vld [vmem:[#allocation55_spill] sm:$0xff]  ;;  %v16431_v63 = vld [vmem:[#allocation69_spill] sm:$0xff]  ;;  %v3986_v28 = vand.u32 4294901760, %v7870_v32  ;;  %v3989_v36 = vand.u32 4294901760, %v7871_v20  ;;  %v16432_v16 = vand.u32 4294901760, %v12969_v53 }
 0x1a2   :  { %v6175_v31 = vsub.f32 %v12965_v62, %v16425_v33  ;;  %v6182_v25 = vsub.f32 %v12967_v4, %v16426_v42  ;;  %16428 = vst [vmem:[#allocation15_spill] sm:$0xff] %v13337_v43  ;;  %9604 = vmatprep.subr.bf16.mxu0 %v16024_v52  ;;  %10079 = vmatprep.subr.bf16.mxu1 %v16431_v63  ;;  %v16433_v56 = vand.u32 4294901760, %v12983_v45  ;;  %v16436_v5 = vld [vmem:[#allocation19_spill] sm:$0xff]  ;;  %v4040_v47 = vand.u32 4294901760, %v7888_v22 }
 0x1a3   :  { %v6063_v17 = vsub.f32 %v12969_v53, %v16432_v16  ;;  %v13357_v62 = vpack.c.bf16 %v6169_v60, %v6162_v46  ;;  %v13359_v44 = vpack.c.bf16 %v6057_v21, %v6050_v0  ;;  %v13361_v33 = vpack.c.bf16 %v4037_v12, %v4034_v15  ;;  %v7872_v16 = vld [vmem:[%s15202_s0 + $0x380] sm:$0xff]  ;;  %v16438_v60 = vld [vmem:[#allocation76_spill] sm:$0xff] }
 0x1a4   :  { %v6070_v4 = vsub.f32 %v12983_v45, %v16433_v56  ;;  %v13363_v42 = vsub.f32 %v7886_v55, %v4034_v15  ;;  %3874 = vmatmul.mubr.f32.vlgmr.msra.gmra.mrb[64].mxu1 %v16436_v5  ;;  %v6176_v63 = vand.u32 4294901760, %v6175_v31  ;;  %v6183_v8 = vand.u32 4294901760, %v6182_v25  ;;  %v7873_v56 = vld [vmem:[%s15202_s0 + $0x388] sm:$0xff]  ;;  %v16437_v46 = vld [vmem:[#allocation70_spill] sm:$0xff] }
 0x1a5   :  { %16434 = vst [vmem:[#allocation100_spill] sm:$0xff] %v13361_v33  ;;  %v4043_v43 = vand.u32 4294901760, %v7889_v9  ;;  %9606 = vmatpush1.bf16.msra.mxu0 %v16437_v46  ;;  %10081 = vmatpush3.bf16.msra.mxu1 %v16438_v60  ;;  %v13374_v55 = vsub.f32 %v7887_v23, %v4037_v12  ;;  %v16440_v0 = vand.u32 4294901760, %v16429_v10  ;;  %v16441_v21 = vand.u32 4294901760, %v16430_v11  ;;  %v16444_v12 = vld [vmem:[#allocation5_spill] sm:$0xff]  ;;  %v16451_v33 = vld [vmem:[#allocation7_spill] sm:$0xff] }
 0x1a6   :  { %16435 = vst [vmem:[#allocation147_spill] sm:$0xff] %v13363_v42  ;;  %3879 = vmatprep.mubr.f32.mxu1 %v16177_v57  ;;  %9607 = vmatprep.subr.bf16.mxu0 %v16024_v52  ;;  %v13384_v31 = vpack.c.bf16 %v3989_v36, %v3986_v28  ;;  %v13386_v45 = vsub.f32 %v7870_v32, %v3986_v28  ;;  %v6064_v46 = vand.u32 4294901760, %v6063_v17  ;;  %v6071_v60 = vand.u32 4294901760, %v6070_v4  ;;  %v16448_v17 = vld [vmem:[#allocation65_spill] sm:$0xff] }
 0x1a7   :  { %16439 = vst [vmem:[#allocation70_spill] sm:$0xff] %v13374_v55  ;;  %v6189_v25 = vsub.f32 %v16429_v10, %v16440_v0  ;;  %v6196_v15 = vsub.f32 %v16430_v11, %v16441_v21  ;;  %v8388_v23 = vpop.f32.mrb[40].mxu1  ;;  %10083 = vmatprep.subr.bf16.mxu1 %v16444_v12  ;;  %v13389_v53 = vsub.f32 %v7871_v20, %v3989_v36  ;;  %v3992_v0 = vand.u32 4294901760, %v7872_v16  ;;  %v16446_v55 = vld [vmem:[#allocation82_spill] sm:$0xff]  ;;  %v7890_v21 = vld [vmem:[%s15202_s0 + $0x410] sm:$0xff] }
 0x1a8   :  { %16442 = vst [vmem:[#allocation148_spill] sm:$0xff] %v13384_v31  ;;  %16443 = vst [vmem:[#allocation149_spill] sm:$0xff] %v13386_v45  ;;  %v3995_v10 = vand.u32 4294901760, %v7873_v56  ;;  %v8389_v11 = vpop.f32.mrb[41].mxu1  ;;  %3881 = vmatmul.mubr.f32.gmra.mrb[66].mxu1 %v16179_v14  ;;  %v13396_v32 = vpack.c.bf16 %v6183_v8, %v6176_v63  ;;  %v13398_v28 = vpack.c.bf16 %v4043_v43, %v4040_v47  ;;  %v16449_v12 = vld [vmem:[#allocation78_spill] sm:$0xff]  ;;  %v7891_v45 = vld [vmem:[%s15202_s0 + $0x418] sm:$0xff] }
 0x1a9   :  { %16445 = vst [vmem:[#allocation150_spill] sm:$0xff] %v13389_v53  ;;  %v13400_v4 = vsub.f32 %v7888_v22, %v4040_v47  ;;  %v8390_v36 = vadd.f32 %v8389_v11, %v8388_v23  ;;  %9609 = vmatpush1.bf16.msra.mxu0 %v16449_v12  ;;  %v16450_v31 = vld [vmem:[#allocation74_spill] sm:$0xff]  ;;  %v6190_v42 = vand.u32 4294901760, %v6189_v25  ;;  %v6197_v53 = vand.u32 4294901760, %v6196_v15  ;;  %3886 = vmatprep.mubr.f32.mxu1 %v16181_v58  ;;  %v16452_v63 = vld [vmem:[#allocation16_spill] sm:$0xff]  ;;  %v16454_v12 = vld [vmem:[#allocation61_spill] sm:$0xff] }
 0x1aa   :  { %16447 = vst [vmem:[#allocation151_spill] sm:$0xff] %v13398_v28  ;;  %10085 = vmatpush3.bf16.msra.mxu1 %v16450_v31  ;;  %9610 = vmatprep.subr.bf16.mxu0 %v16024_v52  ;;  %v13411_v47 = vpack.c.bf16 %v6071_v60, %v6064_v46  ;;  %v13413_v22 = vsub.f32 %v7889_v9, %v4043_v43  ;;  %v4046_v11 = vand.u32 4294901760, %v7890_v21  ;;  %v16456_v31 = vand.u32 4294901760, %v16446_v55  ;;  %v7874_v43 = vld [vmem:[%s15202_s0 + $0x390] sm:$0xff] }
 0x1ab   :  { %v13417_v25 = vadd.f32 %v8390_v36, %v13118_v34  ;;  %v8391_v15 = vpop.f32.mrb[42].mxu1  ;;  %10087 = vmatprep.subr.bf16.mxu1 %v16454_v12  ;;  %v13420_v20 = vpack.c.bf16 %v3995_v10, %v3992_v0  ;;  %v13422_v8 = vsub.f32 %v7872_v16, %v3992_v0  ;;  %v13431_v34 = vsub.f32 %v7873_v56, %v3995_v10  ;;  %v16460_v12 = vld [vmem:[#allocation62_spill] sm:$0xff] }
 0x1ac   :  { %v6077_v60 = vsub.f32 %v16446_v55, %v16456_v31  ;;  %v8392_v9 = vpop.f32.mrb[43].mxu1  ;;  %3888 = vmatmul.mubr.f32.gmra.mrb[68].mxu1 %v11938_v26  ;;  %v16458_v46 = vand.u32 4294901760, %v16448_v17  ;;  %v4049_v23 = vand.u32 4294901760, %v7891_v45  ;;  %v13436_v16 = vsub.f32 %v7890_v21, %v4046_v11  ;;  %v16461_v31 = vld [vmem:[#allocation64_spill] sm:$0xff]  ;;  %v7875_v21 = vld [vmem:[%s15202_s0 + $0x398] sm:$0xff] }
 0x1ad   :  { %16453 = vst [vmem:[#allocation78_spill] sm:$0xff] %v13417_v25  ;;  %16455 = vst [vmem:[#allocation152_spill] sm:$0xff] %v13420_v20  ;;  %v8393_v0 = vadd.f32 %v8392_v9, %v8391_v15  ;;  %9612 = vmatpush1.bf16.msra.mxu0 %v16460_v12  ;;  %v13440_v55 = vpack.c.bf16 %v6197_v53, %v6190_v42  ;;  %v16462_v20 = vand.u32 4294901760, %v16451_v33  ;;  %3893 = vmatprep.mubr.f32.mxu1 %v16316_v3  ;;  %v16465_v9 = vld [vmem:[#allocation63_spill] sm:$0xff]  ;;  %v16468_v42 = vld [vmem:[#allocation108_spill] sm:$0xff] }
 0x1ae   :  { %16457 = vst [vmem:[#allocation153_spill] sm:$0xff] %v13431_v34  ;;  %v6084_v36 = vsub.f32 %v16448_v17, %v16458_v46  ;;  %16459 = vst [vmem:[#allocation154_spill] sm:$0xff] %v13436_v16  ;;  %10089 = vmatpush3.bf16.msra.mxu1 %v16461_v31  ;;  %9613 = vmatprep.subr.bf16.mxu0 %v16024_v52  ;;  %v16463_v10 = vand.u32 4294901760, %v16452_v63  ;;  %v3998_v15 = vand.u32 4294901760, %v7874_v43  ;;  %v6078_v46 = vand.u32 4294901760, %v6077_v60  ;;  %v16467_v53 = vld [vmem:[#allocation107_spill] sm:$0xff] }
 0x1af   :  { %v6203_v25 = vsub.f32 %v16451_v33, %v16462_v20  ;;  %v13456_v12 = vadd.f32 %v8393_v0, %v13162_v1  ;;  %v8394_v20 = vpop.f32.mrb[44].mxu1  ;;  %10091 = vmatprep.subr.bf16.mxu1 %v16465_v9  ;;  %v13462_v33 = vpack.c.bf16 %v4049_v23, %v4046_v11  ;;  %v16469_v0 = vld [vmem:[#allocation8_spill] sm:$0xff]  ;;  %v13468_v60 = vsub.f32 %v7891_v45, %v4049_v23  ;;  %v16472_v34 = vld [vmem:[#allocation106_spill] sm:$0xff] }
 0x1b0   :  { %v6210_v56 = vsub.f32 %v16452_v63, %v16463_v10  ;;  %v8395_v31 = vpop.f32.mrb[45].mxu1  ;;  %3895 = vmatmul.mubr.f32.gmra.mrb[70].mxu1 %v16322_v37  ;;  %v6085_v63 = vand.u32 4294901760, %v6084_v36  ;;  %v4001_v9 = vand.u32 4294901760, %v7875_v21  ;;  %v16471_v10 = vld [vmem:[#allocation104_spill] sm:$0xff]  ;;  %v16473_v11 = vand.u32 4294901760, %v13040_v54 }
 0x1b1   :  { %16464 = vst [vmem:[#allocation62_spill] sm:$0xff] %v13456_v12  ;;  %16466 = vst [vmem:[#allocation155_spill] sm:$0xff] %v13462_v33  ;;  %v8396_v1 = vadd.f32 %v8395_v31, %v8394_v20  ;;  %9615 = vmatpush1.bf16.msra.mxu0 %v16469_v0  ;;  %v16470_v12 = vld [vmem:[#allocation18_spill] sm:$0xff]  ;;  %v6204_v52 = vand.u32 4294901760, %v6203_v25  ;;  %v16474_v16 = vand.u32 4294901760, %v13046_v35  ;;  %v16477_v25 = vld [vmem:[#allocation28_spill] sm:$0xff] }
 0x1b2   :  { %10093 = vmatpush3.bf16.msra.mxu1 %v16470_v12  ;;  %9725 = vmatprep.subr.bf16.mxu0 %v16471_v10  ;;  %v6211_v36 = vand.u32 4294901760, %v6210_v56  ;;  %v6091_v17 = vsub.f32 %v13040_v54, %v16473_v11  ;;  %v16475_v20 = vld [vmem:[#allocation110_spill] sm:$0xff]  ;;  %v13483_v10 = vsub.f32 %v7874_v43, %v3998_v15  ;;  %v16479_v56 = vand.u32 4294901760, %v13052_v51 }
 0x1b3   :  { %10095 = vmatprep.subr.bf16.mxu1 %v16472_v34  ;;  %v6098_v31 = vsub.f32 %v13046_v35, %v16474_v16  ;;  %v13480_v45 = vadd.f32 %v8396_v1, %v13203_v38  ;;  %v8397_v23 = vpop.f32.mrb[46].mxu1  ;;  %5989 = vmatprep.mubr.f32.mxu1 %v16477_v25  ;;  %v16480_v11 = vand.u32 4294901760, %v13054_v29  ;;  %v13492_v16 = vpack.c.bf16 %v6085_v63, %v6078_v46  ;;  %v16483_v35 = vld [vmem:[#allocation111_spill] sm:$0xff] }
 0x1b4   :  { %16478 = vst [vmem:[#allocation28_spill] sm:$0xff] %v13483_v10  ;;  %v4228_v34 = vsub.f32 %v13052_v51, %v16479_v56  ;;  %v8398_v54 = vpop.f32.mrb[47].mxu1  ;;  %3352 = vmatmul.mubr.f32.vlgmr.msra.gmra.mrb[40].mxu0 %v16436_v5  ;;  %v16481_v38 = vand.u32 4294901760, %v16467_v53  ;;  %v16482_v43 = vand.u32 4294901760, %v16468_v42  ;;  %v16484_v51 = vld [vmem:[#allocation109_spill] sm:$0xff]  ;;  %v16485_v10 = vld [vmem:[#allocation112_spill] sm:$0xff]  ;;  %v13505_v5 = vsub.f32 %v7875_v21, %v4001_v9 }
 0x1b5   :  { %16476 = vst [vmem:[#allocation8_spill] sm:$0xff] %v13480_v45  ;;  %v4235_v12 = vsub.f32 %v13054_v29, %v16480_v11  ;;  %v8399_v56 = vadd.f32 %v8398_v54, %v8397_v23  ;;  %9727 = vmatpush3.bf16.msra.mxu0 %v16484_v51  ;;  %v13503_v11 = vpack.c.bf16 %v4001_v9, %v3998_v15  ;;  %v16487_v63 = vld [vmem:[#allocation115_spill] sm:$0xff]  ;;  %v16489_v15 = vld [vmem:[#allocation117_spill] sm:$0xff] }
 0x1b6   :  { %v6217_v1 = vsub.f32 %v16467_v53, %v16481_v38  ;;  %v6224_v0 = vsub.f32 %v16468_v42, %v16482_v43  ;;  %10097 = vmatpush3.bf16.msra.mxu1 %v16485_v10  ;;  %3357 = vmatprep.mubr.f32.mxu0 %v16177_v57  ;;  %v13509_v46 = vpack.c.bf16 %v6211_v36, %v6204_v52  ;;  %v6092_v38 = vand.u32 4294901760, %v6091_v17  ;;  %v16490_v45 = vld [vmem:[#allocation113_spill] sm:$0xff]  ;;  %v16499_v10 = vld [vmem:[#allocation122_spill] sm:$0xff] }
 0x1b7   :  { %16486 = vst [vmem:[#allocation156_spill] sm:$0xff] %v13503_v11  ;;  %9729 = vmatprep.subr.bf16.mxu0 %v16487_v63  ;;  %v6099_v53 = vand.u32 4294901760, %v6098_v31  ;;  %v16488_v43 = vand.u32 4294901760, %v16475_v20  ;;  %v13517_v23 = vadd.f32 %v8399_v56, %v13236_v27  ;;  %10099 = vmatprep.subr.bf16.mxu1 %v16489_v15  ;;  %v4229_v21 = vand.u32 4294901760, %v4228_v34  ;;  %v16493_v27 = vld [vmem:[#allocation98_spill] sm:$0xff]  ;;  %v16497_v15 = vld [vmem:[#allocation119_spill] sm:$0xff] }
 0x1b8   :  { %v4236_v9 = vand.u32 4294901760, %v4235_v12  ;;  %3359 = vmatmul.mubr.f32.gmra.mrb[42].mxu0 %v16179_v14  ;;  %v6218_v52 = vand.u32 4294901760, %v6217_v1  ;;  %v6225_v36 = vand.u32 4294901760, %v6224_v0  ;;  %v16491_v17 = vand.u32 4294901760, %v16483_v35  ;;  %v16494_v12 = vld [vmem:[#allocation116_spill] sm:$0xff]  ;;  %v16495_v0 = vld [vmem:[#allocation125_spill] sm:$0xff] }
 0x1b9   :  { %v13514_v54 = vsub.f32 %v16475_v20, %v16488_v43  ;;  %v16492_v43 = vld [vmem:[#allocation114_spill] sm:$0xff]  ;;  %9731 = vmatpush3.bf16.msra.mxu0 %v13131_v30  ;;  %3364 = vmatprep.mubr.f32.mxu0 %v16181_v58  ;;  %v16498_v56 = vld [vmem:[#allocation120_spill] sm:$0xff]  ;;  %v16500_v58 = vand.u32 4294901760, %v13208_v50  ;;  %v16576_v20 = vld [vmem:[#allocation53_spill] sm:$0xff] }
 0x1ba   :  { %v13525_v31 = vsub.f32 %v16483_v35, %v16491_v17  ;;  %10101 = vmatpush3.bf16.msra.mxu1 %v13143_v24  ;;  %9733 = vmatprep.subr.bf16.mxu0 %v16495_v0  ;;  %v13536_v17 = vpack.c.bf16 %v6099_v53, %v6092_v38  ;;  %v16496_v14 = vld [vmem:[#allocation118_spill] sm:$0xff]  ;;  %v13542_v34 = vpack.c.bf16 %v4236_v9, %v4229_v21  ;;  %v16501_v0 = vand.u32 4294901760, %v13210_v48  ;;  %v16504_v21 = vld [vmem:[#allocation123_spill] sm:$0xff]  ;;  %v16505_v30 = vld [vmem:[#allocation124_spill] sm:$0xff] }
 0x1bb   :  { %v4117_v63 = vand.u32 4294901760, %v13514_v54  ;;  %10103 = vmatprep.subr.bf16.mxu1 %v13174_v49  ;;  %v13553_v38 = vpack.c.bf16 %v6225_v36, %v6218_v52  ;;  %v16503_v54 = vand.u32 4294901760, %v16490_v45  ;;  %v16506_v49 = vld [vmem:[#allocation132_spill] sm:$0xff]  ;;  %v16508_v52 = vand.u32 4294901760, %v16493_v27  ;;  %v16564_v35 = vld [vmem:[#allocation141_spill] sm:$0xff] }
 0x1bc   :  { %v13550_v53 = vpack.c.bf16 %v16501_v0, %v16500_v58  ;;  %3366 = vmatmul.mubr.f32.gmra.mrb[44].mxu0 %v11938_v26  ;;  %v4124_v1 = vand.u32 4294901760, %v13525_v31  ;;  %v16507_v58 = vand.u32 4294901760, %v16492_v43  ;;  %v16510_v57 = vand.u32 4294901760, %v16496_v14 }
 0x1bd   :  { %v6105_v24 = vsub.f32 %v16490_v45, %v16503_v54  ;;  %9735 = vmatpush3.bf16.msra.mxu0 %v16506_v49  ;;  %v4242_v36 = vsub.f32 %v16493_v27, %v16508_v52  ;;  %v16509_v54 = vand.u32 4294901760, %v16494_v12  ;;  %3371 = vmatprep.mubr.f32.mxu0 %v16316_v3  ;;  %v16511_v26 = vand.u32 4294901760, %v16497_v15 }
 0x1be   :  { %16502 = vst [vmem:[#allocation157_spill] sm:$0xff] %v13550_v53  ;;  %10105 = vmatpush3.bf16.msra.mxu1 %v13206_v7  ;;  %v6112_v0 = vsub.f32 %v16492_v43, %v16507_v58  ;;  %9737 = vmatprep.subr.bf16.mxu0 %v13216_v59  ;;  %v6231_v31 = vsub.f32 %v16496_v14, %v16510_v57  ;;  %v16512_v7 = vld [vmem:[#allocation140_spill] sm:$0xff]  ;;  %v16514_v59 = vand.u32 4294901760, %v16499_v10  ;;  %v16516_v53 = vand.u32 4294901760, %v16505_v30  ;;  %v16563_v43 = vld [vmem:[#allocation139_spill] sm:$0xff] }
 0x1bf   :  { %v4249_v9 = vsub.f32 %v16494_v12, %v16509_v54  ;;  %v6238_v58 = vsub.f32 %v16497_v15, %v16511_v26  ;;  %10107 = vmatprep.subr.bf16.mxu1 %v16512_v7  ;;  %v16513_v54 = vand.u32 4294901760, %v16498_v56  ;;  %v16515_v26 = vand.u32 4294901760, %v16504_v21  ;;  %v16517_v15 = vld [vmem:[#allocation126_spill] sm:$0xff] }
 0x1c0   :  { %v4137_v49 = vsub.f32 %v16499_v10, %v16514_v59  ;;  %3373 = vmatmul.mubr.f32.gmra.mrb[46].mxu0 %v16322_v37  ;;  %v6126_v7 = vsub.f32 %v16505_v30, %v16516_v53  ;;  %v16519_v59 = vand.u32 4294901760, %v13256_v13  ;;  %v6106_v51 = vand.u32 4294901760, %v6105_v24  ;;  %v16521_v37 = vld [vmem:[#allocation127_spill] sm:$0xff] }
 0x1c1   :  { %v4130_v3 = vsub.f32 %v16498_v56, %v16513_v54  ;;  %v6119_v52 = vsub.f32 %v16504_v21, %v16515_v26  ;;  %v16518_v56 = vand.u32 4294901760, %v13249_v61  ;;  %9739 = vmatpush3.bf16.msra.mxu0 %v13247_v18  ;;  %v6113_v57 = vand.u32 4294901760, %v6112_v0  ;;  %4056 = vmatprep.mubr.f32.mxu0 %v16477_v25  ;;  %v16525_v18 = vld [vmem:[#allocation29_spill] sm:$0xff]  ;;  %v16528_v25 = vld [vmem:[#allocation15_spill] sm:$0xff] }
 0x1c2   :  { %10109 = vmatpush3.bf16.msra.mxu1 %v13258_v40  ;;  %v16522_v21 = vand.u32 4294901760, %v13260_v2  ;;  %v16523_v53 = vand.u32 4294901760, %v13264_v39  ;;  %9741 = vmatprep.subr.bf16.mxu0 %v13276_v19  ;;  %v15696_v54 = vand.u32 4294901760, %v13327_v6  ;;  %v6232_v24 = vand.u32 4294901760, %v6231_v31 }
 0x1c3   :  { %v13603_v10 = vpack.c.bf16 %v16519_v59, %v16518_v56  ;;  %10111 = vmatprep.subr.bf16.mxu1 %v13357_v62  ;;  %v4243_v56 = vand.u32 4294901760, %v4242_v36  ;;  %v4250_v59 = vand.u32 4294901760, %v4249_v9  ;;  %v6239_v0 = vand.u32 4294901760, %v6238_v58  ;;  %v16531_v58 = vld [vmem:[#allocation100_spill] sm:$0xff] }
 0x1c4   :  { %v13612_v30 = vpack.c.bf16 %v16523_v53, %v16522_v21  ;;  %v4131_v26 = vand.u32 4294901760, %v4130_v3  ;;  %v4138_v40 = vand.u32 4294901760, %v4137_v49  ;;  %v6120_v21 = vand.u32 4294901760, %v6119_v52  ;;  %v16532_v52 = vld [vmem:[#allocation147_spill] sm:$0xff] }
 0x1c5   :  { %16520 = vst [vmem:[#allocation158_spill] sm:$0xff] %v13603_v10  ;;  %v15695_v10 = vand.u32 4294901760, %v13339_v41  ;;  %5995 = vmatmul.mubr.f32.vlgmr.msra.gmra.mrb[72].mxu1 %v16525_v18  ;;  %v6127_v53 = vand.u32 4294901760, %v6126_v7  ;;  %9743 = vmatpush3.bf16.msra.mxu0 %v16528_v25  ;;  %v13633_v3 = vpack.c.bf16 %v4124_v1, %v4117_v63  ;;  %v13635_v49 = vpack.c.bf16 %v6113_v57, %v6106_v51  ;;  %v16535_v1 = vld [vmem:[#allocation150_spill] sm:$0xff]  ;;  %v16536_v25 = vld [vmem:[#allocation37_spill] sm:$0xff] }
 0x1c6   :  { %16524 = vst [vmem:[#allocation159_spill] sm:$0xff] %v13612_v30  ;;  %v16526_v30 = vand.u32 4294901760, %v16517_v15  ;;  %10113 = vmatpush3.bf16.msra.mxu1 %v13359_v44  ;;  %v16529_v7 = vand.u32 4294901760, %v16521_v37  ;;  %9745 = vmatprep.subr.bf16.mxu0 %v16531_v58  ;;  %v16534_v44 = vld [vmem:[#allocation149_spill] sm:$0xff]  ;;  %v13650_v19 = vpack.c.bf16 %v4250_v59, %v4243_v56  ;;  %v13654_v31 = vpack.c.bf16 %v4138_v40, %v4131_v26  ;;  %v16537_v58 = vld [vmem:[#allocation130_spill] sm:$0xff] }
 0x1c7   :  { %v13629_v9 = vpack.c.bf16 %v15695_v10, %v15696_v54  ;;  %10115 = vmatprep.subr.bf16.mxu1 %v13396_v32  ;;  %v16533_v54 = vld [vmem:[#allocation70_spill] sm:$0xff]  ;;  %v8432_v57 = vpop.f32.mrb[48].mxu1  ;;  %6004 = vmatprep.mubr.f32.mxu1 %v16536_v25  ;;  %v13658_v10 = vpack.c.bf16 %v6127_v53, %v6120_v21  ;;  %v16539_v51 = vand.u32 4294901760, %v16532_v52  ;;  %v16541_v56 = vand.u32 4294901760, %v16534_v44 }
 0x1c8   :  { %v13623_v62 = vsub.f32 %v16517_v15, %v16526_v30  ;;  %v13640_v36 = vsub.f32 %v16521_v37, %v16529_v7  ;;  %v16530_v30 = vld [vmem:[#allocation129_spill] sm:$0xff]  ;;  %v13652_v7 = vpack.c.bf16 %v6239_v0, %v6232_v24  ;;  %v8433_v32 = vpop.f32.mrb[49].mxu1  ;;  %v16538_v15 = vld [vmem:[#allocation39_spill] sm:$0xff]  ;;  %v16542_v40 = vand.u32 4294901760, %v16535_v1  ;;  %v16544_v24 = vld [vmem:[#allocation148_spill] sm:$0xff] }
 0x1c9   :  { %16527 = vst [vmem:[#allocation29_spill] sm:$0xff] %v13629_v9  ;;  %v15702_v9 = vand.u32 4294901760, %v16533_v54  ;;  %6010 = vmatmul.mubr.f32.gmra.mrb[74].mxu1 %v16538_v15  ;;  %v8434_v59 = vadd.f32 %v8433_v32, %v8432_v57  ;;  %9747 = vmatpush3.bf16.msra.mxu0 %v16544_v24  ;;  %v16545_v21 = vand.u32 4294901760, %v16530_v30  ;;  %v16553_v57 = vld [vmem:[#allocation49_spill] sm:$0xff]  ;;  %v16554_v32 = vld [vmem:[#allocation154_spill] sm:$0xff]  ;;  %v16558_v27 = vand.u32 4294901760, %v13422_v8 }
 0x1ca   :  { %v4257_v63 = vand.u32 4294901760, %v13623_v62  ;;  %v13671_v26 = vpack.c.bf16 %v16542_v40, %v16541_v56  ;;  %10117 = vmatpush3.bf16.msra.mxu1 %v13411_v47  ;;  %v4264_v0 = vand.u32 4294901760, %v13640_v36  ;;  %v16546_v62 = vld [vmem:[#allocation131_spill] sm:$0xff]  ;;  %9749 = vmatprep.subr.bf16.mxu0 %v13398_v28  ;;  %v16547_v47 = vld [vmem:[#allocation153_spill] sm:$0xff]  ;;  %v16548_v36 = vld [vmem:[#allocation78_spill] sm:$0xff] }
 0x1cb   :  { %v13665_v14 = vpack.c.bf16 %v15702_v9, %v16539_v51  ;;  %v13679_v53 = vsub.f32 %v16530_v30, %v16545_v21  ;;  %10119 = vmatprep.subr.bf16.mxu1 %v13440_v55  ;;  %v13689_v9 = vadd.f32 %v8434_v59, %v16548_v36  ;;  %v8435_v37 = vpop.f32.mrb[50].mxu1  ;;  %v16549_v21 = vld [vmem:[#allocation47_spill] sm:$0xff]  ;;  %v16550_v51 = vand.u32 4294901760, %v16537_v58  ;;  %v16552_v28 = vld [vmem:[#allocation138_spill] sm:$0xff] }
 0x1cc   :  { %16543 = vst [vmem:[#allocation70_spill] sm:$0xff] %v13671_v26  ;;  %6019 = vmatprep.mubr.f32.mxu1 %v16549_v21  ;;  %v8436_v24 = vpop.f32.mrb[51].mxu1  ;;  %v16555_v59 = vand.u32 4294901760, %v13400_v4  ;;  %v16556_v36 = vand.u32 4294901760, %v13413_v22  ;;  %v16562_v30 = vand.u32 4294901760, %v16546_v62 }
 0x1cd   :  { %16540 = vst [vmem:[#allocation147_spill] sm:$0xff] %v13665_v14  ;;  %v6252_v26 = vsub.f32 %v16537_v58, %v16550_v51  ;;  %v16551_v14 = vld [vmem:[#allocation133_spill] sm:$0xff]  ;;  %6025 = vmatmul.mubr.f32.gmra.mrb[76].mxu1 %v16553_v57  ;;  %v16559_v51 = vand.u32 4294901760, %v16547_v47  ;;  %v8437_v56 = vadd.f32 %v8436_v24, %v8435_v37  ;;  %v16561_v58 = vld [vmem:[#allocation152_spill] sm:$0xff]  ;;  %v16573_v24 = vand.u32 4294901760, %v13210_v48 }
 0x1ce   :  { %v13704_v12 = vpack.c.bf16 %v16556_v36, %v16555_v59  ;;  %9751 = vmatpush3.bf16.msra.mxu0 %v16561_v58  ;;  %10121 = vmatpush3.bf16.msra.mxu1 %v13492_v16  ;;  %v4144_v40 = vsub.f32 %v16546_v62, %v16562_v30  ;;  %v16565_v36 = vld [vmem:[#allocation142_spill] sm:$0xff]  ;;  %v16567_v16 = vand.u32 4294901760, %v16554_v32  ;;  %v16574_v62 = vld [vmem:[#allocation52_spill] sm:$0xff] }
 0x1cf   :  { %v13710_v55 = vpack.c.bf16 %v16559_v51, %v16558_v27  ;;  %9753 = vmatprep.subr.bf16.mxu0 %v13462_v33  ;;  %10123 = vmatprep.subr.bf16.mxu1 %v13509_v46  ;;  %v16566_v51 = vld [vmem:[#allocation28_spill] sm:$0xff]  ;;  %v16570_v30 = vld [vmem:[#allocation62_spill] sm:$0xff]  ;;  %v8438_v59 = vpop.f32.mrb[52].mxu1  ;;  %v16571_v33 = vand.u32 4294901760, %v16551_v14  ;;  %v16572_v27 = vand.u32 4294901760, %v13208_v50  ;;  %v6140_v58 = vsub.f32 %v13210_v48, %v16573_v24 }
 0x1d0   :  { %16557 = vst [vmem:[#allocation149_spill] sm:$0xff] %v13704_v12  ;;  %v13731_v45 = vadd.f32 %v8437_v56, %v16570_v30  ;;  %6034 = vmatprep.mubr.f32.mxu1 %v16574_v62  ;;  %v6253_v56 = vand.u32 4294901760, %v6252_v26  ;;  %v16575_v30 = vand.u32 4294901760, %v16552_v28  ;;  %v9764_v24 = vpack.c.bf16 %v4264_v0, %v4257_v63  ;;  %v16584_v63 = vld [vmem:[#allocation71_spill] sm:$0xff] }
 0x1d1   :  { %16560 = vst [vmem:[#allocation150_spill] sm:$0xff] %v13710_v55  ;;  %v16568_v55 = vand.u32 4294901760, %v13468_v60  ;;  %v4151_v46 = vsub.f32 %v16551_v14, %v16571_v33  ;;  %v6133_v37 = vsub.f32 %v13208_v50, %v16572_v27  ;;  %6040 = vmatmul.mubr.f32.gmra.mrb[78].mxu1 %v16576_v20  ;;  %v16577_v33 = vand.u32 4294901760, %v16566_v51 }
 0x1d2   :  { %v16578_v27 = vand.u32 4294901760, %v13505_v5  ;;  %9755 = vmatpush3.bf16.msra.mxu0 %v13503_v11  ;;  %10125 = vmatpush3.bf16.msra.mxu1 %v13536_v17  ;;  %v16580_v26 = vand.u32 4294901760, %v16563_v43  ;;  %v16588_v0 = vand.u32 4294901760, %v13256_v13 }
 0x1d3   :  { %v13728_v12 = vpack.c.bf16 %v16568_v55, %v16567_v16  ;;  %v8439_v55 = vpop.f32.mrb[53].mxu1  ;;  %v6246_v16 = vand.u32 4294901760, %v13679_v53  ;;  %v4145_v53 = vand.u32 4294901760, %v4144_v40  ;;  %9757 = vmatprep.subr.bf16.mxu0 %v13542_v34  ;;  %10127 = vmatprep.subr.bf16.mxu1 %v13553_v38  ;;  %v16585_v40 = vld [vmem:[#allocation8_spill] sm:$0xff]  ;;  %v4152_v11 = vand.u32 4294901760, %v4151_v46 }
 0x1d4   :  { %v13752_v50 = vpack.c.bf16 %v16578_v27, %v16577_v33  ;;  %v8440_v14 = vadd.f32 %v8439_v55, %v8438_v59  ;;  %v4277_v48 = vsub.f32 %v16563_v43, %v16580_v26  ;;  %v16582_v59 = vand.u32 4294901760, %v16565_v36  ;;  %v16583_v27 = vld [vmem:[#allocation146_spill] sm:$0xff]  ;;  %v8441_v26 = vpop.f32.mrb[54].mxu1  ;;  %v16586_v38 = vld [vmem:[#allocation20_spill] sm:$0xff] }
 0x1d5   :  { %16569 = vst [vmem:[#allocation37_spill] sm:$0xff] %v13728_v12  ;;  %v4270_v12 = vsub.f32 %v16552_v28, %v16575_v30  ;;  %v16581_v30 = vand.u32 4294901760, %v16564_v35  ;;  %v6134_v34 = vand.u32 4294901760, %v6133_v37  ;;  %v6141_v43 = vand.u32 4294901760, %v6140_v58  ;;  %6270 = vmatprep.mubr.f32.mxu1 %v16586_v38  ;;  %v8442_v28 = vpop.f32.mrb[55].mxu1  ;;  %4062 = vmatmul.mubr.f32.vlgmr.msra.gmra.mrb[48].mxu0 %v16525_v18 }
 0x1d6   :  { %16579 = vst [vmem:[#allocation39_spill] sm:$0xff] %v13752_v50  ;;  %v6266_v55 = vsub.f32 %v16565_v36, %v16582_v59  ;;  %v13770_v50 = vadd.f32 %v8440_v14, %v16585_v40  ;;  %v16587_v59 = vand.u32 4294901760, %v13249_v61  ;;  %v4165_v14 = vsub.f32 %v13256_v13, %v16588_v0  ;;  %9759 = vmatpush3.bf16.msra.mxu0 %v13633_v3 }
 0x1d7   :  { %v6259_v33 = vsub.f32 %v16564_v35, %v16581_v30  ;;  %v10134_v30 = vpack.c.bf16 %v6253_v56, %v6246_v16  ;;  %v4271_v35 = vand.u32 4294901760, %v4270_v12  ;;  %v8443_v40 = vadd.f32 %v8442_v28, %v8441_v26  ;;  %10129 = vmatpush3.bf16.msra.mxu1 %v13635_v49  ;;  %9761 = vmatprep.subr.bf16.mxu0 %v13650_v19 }
 0x1d8   :  { %v4158_v17 = vsub.f32 %v13249_v61, %v16587_v59  ;;  %v4278_v58 = vand.u32 4294901760, %v4277_v48  ;;  %v16589_v37 = vand.u32 4294901760, %v13260_v2  ;;  %v16590_v12 = vand.u32 4294901760, %v13264_v39  ;;  %10131 = vmatprep.subr.bf16.mxu1 %v13652_v7  ;;  %4071 = vmatprep.mubr.f32.mxu0 %v16536_v25 }
 0x1d9   :  { %v6260_v16 = vand.u32 4294901760, %v6259_v33  ;;  %v6267_v56 = vand.u32 4294901760, %v6266_v55  ;;  %v16591_v28 = vand.u32 4294901760, %v16583_v27  ;;  %v16592_v48 = vand.u32 4294901760, %v16584_v63  ;;  %4077 = vmatmul.mubr.f32.gmra.mrb[50].mxu0 %v16538_v15 }
 0x1da   :  { %v6147_v18 = vsub.f32 %v13260_v2, %v16589_v37  ;;  %v6154_v46 = vsub.f32 %v13264_v39, %v16590_v12  ;;  %v13797_v0 = vadd.f32 %v8443_v40, %v13517_v23  ;;  %v9766_v26 = vpack.c.bf16 %v4152_v11, %v4145_v53  ;;  %9763 = vmatpush3.bf16.msra.mxu0 %v13654_v31  ;;  %v16598_v31 = vld [vmem:[#allocation77_spill] sm:$0xff] }
 0x1db   :  { %v4284_v3 = vsub.f32 %v16583_v27, %v16591_v28  ;;  %v4291_v49 = vsub.f32 %v16584_v63, %v16592_v48  ;;  %v10136_v59 = vpack.c.bf16 %v6141_v43, %v6134_v34  ;;  %v4159_v19 = vand.u32 4294901760, %v4158_v17  ;;  %10133 = vmatpush3.bf16.msra.mxu1 %v13658_v10  ;;  %9765 = vmatprep.subr.bf16.mxu0 %v9764_v24  ;;  %v16597_v28 = vld [vmem:[#allocation72_spill] sm:$0xff] }
 0x1dc   :  { %v4166_v37 = vand.u32 4294901760, %v4165_v14  ;;  %v16593_v7 = vand.u32 4294901760, %v13327_v6  ;;  %v16594_v55 = vand.u32 4294901760, %v13339_v41  ;;  %v6148_v11 = vand.u32 4294901760, %v6147_v18  ;;  %10135 = vmatprep.subr.bf16.mxu1 %v10134_v30  ;;  %4086 = vmatprep.mubr.f32.mxu0 %v16549_v21 }
 0x1dd   :  { %v6155_v23 = vand.u32 4294901760, %v6154_v46  ;;  %v16595_v43 = vand.u32 4294901760, %v16532_v52  ;;  %v16596_v53 = vand.u32 4294901760, %v16533_v54  ;;  %v9768_v34 = vpack.c.bf16 %v4278_v58, %v4271_v35  ;;  %4092 = vmatmul.mubr.f32.gmra.mrb[52].mxu0 %v16553_v57 }
 0x1de   :  { %v4172_v33 = vsub.f32 %v13327_v6, %v16593_v7  ;;  %v4179_v12 = vsub.f32 %v13339_v41, %v16594_v55  ;;  %v10138_v14 = vpack.c.bf16 %v6267_v56, %v6260_v16  ;;  %v4285_v40 = vand.u32 4294901760, %v4284_v3  ;;  %9767 = vmatpush3.bf16.msra.mxu0 %v9766_v26  ;;  %4101 = vmatprep.mubr.f32.mxu0 %v16574_v62 }
 0x1df   :  { %v4298_v25 = vsub.f32 %v16532_v52, %v16595_v43  ;;  %v4305_v17 = vsub.f32 %v16533_v54, %v16596_v53  ;;  %v4292_v15 = vand.u32 4294901760, %v4291_v49  ;;  %v10142_v48 = vpack.c.bf16 %v16598_v31, %v16597_v28  ;;  %10137 = vmatpush3.bf16.msra.mxu1 %v10136_v59  ;;  %9769 = vmatprep.subr.bf16.mxu0 %v9768_v34  ;;  %v16604_v43 = vld [vmem:[#allocation75_spill] sm:$0xff]  ;;  %v16605_v59 = vld [vmem:[#allocation57_spill] sm:$0xff] }
 0x1e0   :  { %v4173_v10 = vand.u32 4294901760, %v4172_v33  ;;  %v4180_v18 = vand.u32 4294901760, %v4179_v12  ;;  %v16599_v46 = vand.u32 4294901760, %v16534_v44  ;;  %v16600_v55 = vand.u32 4294901760, %v16535_v1  ;;  %10139 = vmatprep.subr.bf16.mxu1 %v10138_v14  ;;  %v16603_v12 = vld [vmem:[#allocation73_spill] sm:$0xff] }
 0x1e1   :  { %v9770_v35 = vpack.c.bf16 %v4166_v37, %v4159_v19  ;;  %v10140_v30 = vpack.c.bf16 %v6155_v23, %v6148_v11  ;;  %v4299_v58 = vand.u32 4294901760, %v4298_v25  ;;  %v4306_v16 = vand.u32 4294901760, %v4305_v17  ;;  %v16606_v19 = vld [vmem:[#allocation58_spill] sm:$0xff]  ;;  %4107 = vmatmul.mubr.f32.gmra.mrb[54].mxu0 %v16576_v20 }
 0x1e2   :  { %v4186_v7 = vsub.f32 %v16534_v44, %v16599_v46  ;;  %v4193_v24 = vsub.f32 %v16535_v1, %v16600_v55  ;;  %v9772_v21 = vpack.c.bf16 %v4292_v15, %v4285_v40  ;;  %v16601_v56 = vand.u32 4294901760, %v13400_v4  ;;  %4337 = vmatprep.mubr.f32.mxu0 %v16586_v38  ;;  %v16611_v46 = vld [vmem:[#allocation21_spill] sm:$0xff]  ;;  %v16612_v55 = vld [vmem:[#allocation59_spill] sm:$0xff] }
 0x1e3   :  { %v16602_v49 = vand.u32 4294901760, %v13413_v22  ;;  %v10144_v57 = vpack.c.bf16 %v16604_v43, %v16603_v12  ;;  %v9774_v26 = vpack.c.bf16 %v4180_v18, %v4173_v10  ;;  %v10146_v37 = vpack.c.bf16 %v16606_v19, %v16605_v59  ;;  %9771 = vmatpush3.bf16.msra.mxu0 %v9770_v35  ;;  %10141 = vmatpush3.bf16.msra.mxu1 %v10140_v30 }
 0x1e4   :  { %v4312_v3 = vsub.f32 %v13400_v4, %v16601_v56  ;;  %v4187_v11 = vand.u32 4294901760, %v4186_v7  ;;  %v4194_v23 = vand.u32 4294901760, %v4193_v24  ;;  %v9776_v25 = vpack.c.bf16 %v4306_v16, %v4299_v58  ;;  %9773 = vmatprep.subr.bf16.mxu0 %v9772_v21  ;;  %10143 = vmatprep.subr.bf16.mxu1 %v10142_v48  ;;  %v16613_v24 = vld [vmem:[#allocation13_spill] sm:$0xff] }
 0x1e5   :  { %v4319_v33 = vsub.f32 %v13413_v22, %v16602_v49  ;;  %v16607_v53 = vand.u32 4294901760, %v13422_v8  ;;  %v16608_v34 = vand.u32 4294901760, %v16547_v47  ;;  %v16609_v15 = vand.u32 4294901760, %v16554_v32  ;;  %v16616_v49 = vld [vmem:[#allocation55_spill] sm:$0xff] }
 0x1e6   :  { %v4313_v62 = vand.u32 4294901760, %v4312_v3  ;;  %v16610_v20 = vand.u32 4294901760, %v13468_v60  ;;  %6272 = vmatmul.mubr.f32.vlgmr.msra.gmra.mrb[80].mxu1 %v16611_v46  ;;  %v9778_v7 = vpack.c.bf16 %v4194_v23, %v4187_v11  ;;  %v10148_v35 = vpack.c.bf16 %v16613_v24, %v16612_v55 }
 0x1e7   :  { %v4200_v17 = vsub.f32 %v13422_v8, %v16607_v53  ;;  %v4207_v14 = vsub.f32 %v16547_v47, %v16608_v34  ;;  %v4320_v40 = vand.u32 4294901760, %v4319_v33  ;;  %v4326_v10 = vsub.f32 %v16554_v32, %v16609_v15  ;;  %9775 = vmatpush3.bf16.msra.mxu0 %v9774_v26  ;;  %10145 = vmatpush3.bf16.msra.mxu1 %v10144_v57  ;;  %v16617_v33 = vld [vmem:[#allocation9_spill] sm:$0xff]  ;;  %v8476_v26 = vpop.f32.mrb[56].mxu1  ;;  %v16618_v57 = vld [vmem:[#allocation30_spill] sm:$0xff]  ;;  %v16619_v34 = vld [vmem:[#allocation31_spill] sm:$0xff] }
 0x1e8   :  { %v4333_v18 = vsub.f32 %v13468_v60, %v16610_v20  ;;  %v16614_v58 = vand.u32 4294901760, %v16566_v51  ;;  %v16615_v21 = vand.u32 4294901760, %v13505_v5  ;;  %9777 = vmatprep.subr.bf16.mxu0 %v9776_v25  ;;  %10147 = vmatprep.subr.bf16.mxu1 %v10146_v37  ;;  %v10150_v11 = vpack.c.bf16 %v16617_v33, %v16616_v49  ;;  %v16621_v15 = vld [vmem:[#allocation65_spill] sm:$0xff]  ;;  %v16624_v33 = vld [vmem:[#allocation36_spill] sm:$0xff] }
 0x1e9   :  { %v4201_v48 = vand.u32 4294901760, %v4200_v17  ;;  %v4208_v30 = vand.u32 4294901760, %v4207_v14  ;;  %v9780_v3 = vpack.c.bf16 %v4320_v40, %v4313_v62  ;;  %v4327_v23 = vand.u32 4294901760, %v4326_v10  ;;  %6277 = vmatprep.mubr.f32.mxu1 %v16618_v57  ;;  %v8477_v17 = vpop.f32.mrb[57].mxu1  ;;  %v16620_v14 = vld [vmem:[#allocation82_spill] sm:$0xff]  ;;  %v16622_v10 = vld [vmem:[#allocation7_spill] sm:$0xff] }
 0x1ea   :  { %v4214_v16 = vsub.f32 %v16566_v51, %v16614_v58  ;;  %v4221_v56 = vsub.f32 %v13505_v5, %v16615_v21  ;;  %v4334_v53 = vand.u32 4294901760, %v4333_v18  ;;  %6279 = vmatmul.mubr.f32.gmra.mrb[82].mxu1 %v16619_v34  ;;  %v10152_v20 = vpack.c.bf16 %v16621_v15, %v16620_v14  ;;  %v16623_v18 = vld [vmem:[#allocation16_spill] sm:$0xff]  ;;  %v16626_v15 = vld [vmem:[#allocation38_spill] sm:$0xff] }
 0x1eb   :  { %v8478_v58 = vadd.f32 %v8477_v17, %v8476_v26  ;;  %9779 = vmatpush3.bf16.msra.mxu0 %v9778_v7  ;;  %10149 = vmatpush3.bf16.msra.mxu1 %v10148_v35  ;;  %v9782_v25 = vpack.c.bf16 %v4208_v30, %v4201_v48  ;;  %v10154_v21 = vpack.c.bf16 %v16623_v18, %v16622_v10  ;;  %v8479_v38 = vpop.f32.mrb[58].mxu1  ;;  %v16627_v48 = vld [vmem:[#allocation102_spill] sm:$0xff]  ;;  %v16628_v30 = vld [vmem:[#allocation103_spill] sm:$0xff] }
 0x1ec   :  { %v4215_v37 = vand.u32 4294901760, %v4214_v16  ;;  %v4222_v62 = vand.u32 4294901760, %v4221_v56  ;;  %9781 = vmatprep.subr.bf16.mxu0 %v9780_v3  ;;  %10151 = vmatprep.subr.bf16.mxu1 %v10150_v11  ;;  %v9784_v40 = vpack.c.bf16 %v4334_v53, %v4327_v23  ;;  %v8480_v24 = vpop.f32.mrb[59].mxu1  ;;  %v10156_v16 = vpack.c.bf16 %v16628_v30, %v16627_v48  ;;  %v16629_v56 = vld [vmem:[#allocation54_spill] sm:$0xff]  ;;  %v16630_v11 = vld [vmem:[#allocation107_spill] sm:$0xff]  ;;  %v16631_v53 = vld [vmem:[#allocation44_spill] sm:$0xff] }
 0x1ed   :  { %6284 = vmatprep.mubr.f32.mxu1 %v16624_v33  ;;  %v13869_v49 = vadd.f32 %v8478_v58, %v13689_v9  ;;  %v8481_v7 = vadd.f32 %v8480_v24, %v8479_v38  ;;  %v9788_v3 = vpack.c.bf16 %v13054_v29, %v16629_v56  ;;  %v10158_v23 = vpack.c.bf16 %v16468_v42, %v16630_v11  ;;  %v16633_v24 = vld [vmem:[#allocation45_spill] sm:$0xff]  ;;  %v16635_v58 = vld [vmem:[#allocation111_spill] sm:$0xff] }
 0x1ee   :  { %6286 = vmatmul.mubr.f32.gmra.mrb[84].mxu1 %v16626_v15  ;;  %v9786_v35 = vpack.c.bf16 %v4222_v62, %v4215_v37  ;;  %v16636_v37 = vld [vmem:[#allocation113_spill] sm:$0xff]  ;;  %v16637_v62 = vld [vmem:[#allocation114_spill] sm:$0xff]  ;;  %v16642_v29 = vld [vmem:[#allocation23_spill] sm:$0xff] }
 0x1ef   :  { %16625 = vst [vmem:[#allocation153_spill] sm:$0xff] %v13869_v49  ;;  %9783 = vmatpush3.bf16.msra.mxu0 %v9782_v25  ;;  %10153 = vmatpush3.bf16.msra.mxu1 %v10152_v20  ;;  %v8482_v9 = vpop.f32.mrb[60].mxu1  ;;  %v13880_v26 = vadd.f32 %v8481_v7, %v13731_v45  ;;  %v16634_v20 = vld [vmem:[#allocation110_spill] sm:$0xff]  ;;  %v16639_v49 = vld [vmem:[#allocation116_spill] sm:$0xff]  ;;  %v16641_v7 = vld [vmem:[#allocation119_spill] sm:$0xff] }
 0x1f0   :  { %9785 = vmatprep.subr.bf16.mxu0 %v9784_v40  ;;  %10155 = vmatprep.subr.bf16.mxu1 %v10154_v21  ;;  %v8483_v38 = vpop.f32.mrb[61].mxu1  ;;  %v9790_v25 = vpack.c.bf16 %v16635_v58, %v16634_v20  ;;  %v10160_v40 = vpack.c.bf16 %v16637_v62, %v16636_v37  ;;  %v16638_v21 = vld [vmem:[#allocation98_spill] sm:$0xff]  ;;  %v16646_v62 = vld [vmem:[#allocation123_spill] sm:$0xff] }
 0x1f1   :  { %6291 = vmatprep.mubr.f32.mxu1 %v16631_v53  ;;  %16632 = vst [vmem:[#allocation78_spill] sm:$0xff] %v13880_v26  ;;  %v8484_v17 = vadd.f32 %v8483_v38, %v8482_v9  ;;  %v9792_v42 = vpack.c.bf16 %v16639_v49, %v16638_v21  ;;  %v16640_v45 = vld [vmem:[#allocation118_spill] sm:$0xff]  ;;  %v16647_v49 = vld [vmem:[#allocation124_spill] sm:$0xff] }
 0x1f2   :  { %6293 = vmatmul.mubr.f32.gmra.mrb[86].mxu1 %v16633_v24  ;;  %v10162_v26 = vpack.c.bf16 %v16641_v7, %v16640_v45  ;;  %v10164_v21 = vpack.c.bf16 %v16647_v49, %v16646_v62  ;;  %v16648_v7 = vld [vmem:[#allocation126_spill] sm:$0xff]  ;;  %v16649_v45 = vld [vmem:[#allocation127_spill] sm:$0xff] }
 0x1f3   :  { %9787 = vmatpush3.bf16.msra.mxu0 %v9786_v35  ;;  %10157 = vmatpush3.bf16.msra.mxu1 %v10156_v16  ;;  %v8485_v11 = vpop.f32.mrb[62].mxu1  ;;  %v13893_v35 = vadd.f32 %v8484_v17, %v13770_v50  ;;  %v9796_v37 = vpack.c.bf16 %v16649_v45, %v16648_v7  ;;  %v16650_v50 = vld [vmem:[#allocation129_spill] sm:$0xff]  ;;  %v16651_v17 = vld [vmem:[#allocation130_spill] sm:$0xff]  ;;  %v16658_v45 = vld [vmem:[#allocation139_spill] sm:$0xff] }
 0x1f4   :  { %9789 = vmatprep.subr.bf16.mxu0 %v9788_v3  ;;  %10159 = vmatprep.subr.bf16.mxu1 %v10158_v23  ;;  %v8486_v16 = vpop.f32.mrb[63].mxu1  ;;  %v16644_v3 = vld [vmem:[#allocation120_spill] sm:$0xff]  ;;  %v16645_v23 = vld [vmem:[#allocation122_spill] sm:$0xff] }
 0x1f5   :  { %6428 = vmatprep.mubr.f32.mxu1 %v16642_v29  ;;  %16643 = vst [vmem:[#allocation47_spill] sm:$0xff] %v13893_v35  ;;  %v8487_v9 = vadd.f32 %v8486_v16, %v8485_v11  ;;  %v9794_v38 = vpack.c.bf16 %v16645_v23, %v16644_v3  ;;  %v10166_v35 = vpack.c.bf16 %v16651_v17, %v16650_v50  ;;  %v16659_v17 = vld [vmem:[#allocation141_spill] sm:$0xff] }
 0x1f6   :  { %4339 = vmatmul.mubr.f32.vlgmr.msra.gmra.mrb[56].mxu0 %v16611_v46  ;;  %v16655_v46 = vld [vmem:[#allocation135_spill] sm:$0xff] }
 0x1f7   :  { %9791 = vmatpush3.bf16.msra.mxu0 %v9790_v25  ;;  %10161 = vmatpush3.bf16.msra.mxu1 %v10160_v40  ;;  %v13906_v11 = vadd.f32 %v8487_v9, %v13797_v0  ;;  %v16653_v25 = vld [vmem:[#allocation131_spill] sm:$0xff]  ;;  %v16654_v40 = vld [vmem:[#allocation133_spill] sm:$0xff]  ;;  %v10170_v0 = vpack.c.bf16 %v16565_v36, %v16659_v17 }
 0x1f8   :  { %4344 = vmatprep.mubr.f32.mxu0 %v16618_v57  ;;  %9793 = vmatprep.subr.bf16.mxu0 %v9792_v42  ;;  %v9798_v16 = vpack.c.bf16 %v16654_v40, %v16653_v25  ;;  %v16656_v57 = vld [vmem:[#allocation136_spill] sm:$0xff]  ;;  %v16665_v9 = vld [vmem:[#allocation33_spill] sm:$0xff] }
 0x1f9   :  { %10163 = vmatprep.subr.bf16.mxu1 %v10162_v26  ;;  %16652 = vst [vmem:[#allocation49_spill] sm:$0xff] %v13906_v11  ;;  %v10168_v42 = vpack.c.bf16 %v16656_v57, %v16655_v46  ;;  %v16657_v26 = vld [vmem:[#allocation138_spill] sm:$0xff]  ;;  %v10172_v46 = vpack.c.bf16 %v13264_v39, %v13260_v2  ;;  %v9804_v57 = vpack.c.bf16 %v16584_v63, %v16583_v27  ;;  %v16662_v2 = vld [vmem:[#allocation76_spill] sm:$0xff]  ;;  %v16694_v11 = vand.u32 4294901760, %v16603_v12 }
 0x1fa   :  { %4346 = vmatmul.mubr.f32.gmra.mrb[58].mxu0 %v16619_v34  ;;  %v9800_v7 = vpack.c.bf16 %v16658_v45, %v16657_v26  ;;  %v9810_v39 = vpack.c.bf16 %v16535_v1, %v16534_v44  ;;  %v9816_v44 = vpack.c.bf16 %v13468_v60, %v16554_v32  ;;  %v16668_v1 = vld [vmem:[#allocation61_spill] sm:$0xff]  ;;  %v16675_v60 = vld [vmem:[#allocation104_spill] sm:$0xff]  ;;  %v16676_v32 = vld [vmem:[#allocation106_spill] sm:$0xff]  ;;  %v16701_v12 = vand.u32 4294901760, %v16612_v55 }
 0x1fb   :  { %9795 = vmatpush3.bf16.msra.mxu0 %v9794_v38  ;;  %10165 = vmatpush3.bf16.msra.mxu1 %v10164_v21  ;;  %v9802_v21 = vpack.c.bf16 %v13256_v13, %v13249_v61  ;;  %v9808_v61 = vpack.c.bf16 %v16533_v54, %v16532_v52  ;;  %v16661_v13 = vld [vmem:[#allocation24_spill] sm:$0xff]  ;;  %v9814_v54 = vpack.c.bf16 %v16547_v47, %v13422_v8  ;;  %v16669_v38 = vld [vmem:[#allocation41_spill] sm:$0xff]  ;;  %v16672_v8 = vld [vmem:[#allocation63_spill] sm:$0xff]  ;;  %v16712_v55 = vand.u32 4294901760, %v16620_v14 }
 0x1fc   :  { %4351 = vmatprep.mubr.f32.mxu0 %v16624_v33  ;;  %9797 = vmatprep.subr.bf16.mxu0 %v9796_v37  ;;  %v9806_v37 = vpack.c.bf16 %v13339_v41, %v13327_v6  ;;  %v9812_v41 = vpack.c.bf16 %v13413_v22, %v13400_v4  ;;  %v16664_v6 = vld [vmem:[#allocation5_spill] sm:$0xff]  ;;  %v16667_v52 = vld [vmem:[#allocation40_spill] sm:$0xff]  ;;  %v9818_v22 = vpack.c.bf16 %v13505_v5, %v16566_v51  ;;  %v16680_v51 = vld [vmem:[#allocation115_spill] sm:$0xff]  ;;  %v16721_v14 = vand.u32 4294901760, %v16627_v48 }
 0x1fd   :  { %10167 = vmatprep.subr.bf16.mxu1 %v10166_v35  ;;  %v16660_v35 = vld [vmem:[#allocation69_spill] sm:$0xff]  ;;  %v16670_v4 = vld [vmem:[#allocation64_spill] sm:$0xff] }
 0x1fe   :  { %4353 = vmatmul.mubr.f32.gmra.mrb[60].mxu0 %v16626_v15  ;;  %v16673_v47 = vld [vmem:[#allocation48_spill] sm:$0xff] }
 0x1ff   :  { %9799 = vmatpush3.bf16.msra.mxu0 %v9798_v16  ;;  %10169 = vmatpush3.bf16.msra.mxu1 %v10168_v42  ;;  %v16671_v16 = vld [vmem:[#allocation46_spill] sm:$0xff]  ;;  %v16679_v5 = vld [vmem:[#allocation112_spill] sm:$0xff] }
 0x200   :  { %4358 = vmatprep.mubr.f32.mxu0 %v16631_v53  ;;  %9801 = vmatprep.subr.bf16.mxu0 %v9800_v7  ;;  %v16663_v7 = vld [vmem:[#allocation32_spill] sm:$0xff]  ;;  %v16674_v42 = vld [vmem:[#allocation18_spill] sm:$0xff] }
 0x201   :  { %10171 = vmatprep.subr.bf16.mxu1 %v10170_v0  ;;  %v16677_v0 = vld [vmem:[#allocation25_spill] sm:$0xff]  ;;  %v16733_v48 = vld [vmem:[#allocation156_spill] sm:$0xff] }
 0x202   :  { %4360 = vmatmul.mubr.f32.gmra.mrb[62].mxu0 %v16633_v24 }
 0x203   :  { %9803 = vmatpush3.bf16.msra.mxu0 %v9802_v21  ;;  %10173 = vmatpush3.bf16.msra.mxu1 %v10172_v46  ;;  %v16678_v21 = vld [vmem:[#allocation109_spill] sm:$0xff] }
 0x204   :  { %9805 = vmatprep.subr.bf16.mxu0 %v9804_v57  ;;  %10175 = vmatprep.subr.bf16.mxu1 %v16660_v35  ;;  %v16681_v46 = vld [vmem:[#allocation117_spill] sm:$0xff] }
 0x205   :  { %4495 = vmatprep.mubr.f32.mxu0 %v16642_v29  ;;  %v16666_v29 = vld [vmem:[#allocation74_spill] sm:$0xff]  ;;  %v16682_v57 = vld [vmem:[#allocation121_spill] sm:$0xff] }
 0x206   :  { %6431 = vmatmul.mubr.f32.vlgmr.msra.gmra.mrb[88].mxu1 %v16661_v13 }
 0x207   :  { %9807 = vmatpush3.bf16.msra.mxu0 %v9806_v37  ;;  %10177 = vmatpush3.bf16.msra.mxu1 %v16662_v2  ;;  %v16683_v37 = vld [vmem:[#allocation60_spill] sm:$0xff] }
 0x208   :  { %6437 = vmatprep.mubr.f32.mxu1 %v16663_v7  ;;  %9809 = vmatprep.subr.bf16.mxu0 %v9808_v61  ;;  %v16684_v61 = vld [vmem:[#allocation125_spill] sm:$0xff] }
 0x209   :  { %10179 = vmatprep.subr.bf16.mxu1 %v16664_v6 }
 0x20a   :  { %6440 = vmatmul.mubr.f32.gmra.mrb[90].mxu1 %v16665_v9 }
 0x20b   :  { %9811 = vmatpush3.bf16.msra.mxu0 %v9810_v39  ;;  %10181 = vmatpush3.bf16.msra.mxu1 %v16666_v29  ;;  %v16686_v39 = vld [vmem:[#allocation132_spill] sm:$0xff] }
 0x20c   :  { %6446 = vmatprep.mubr.f32.mxu1 %v16667_v52  ;;  %9813 = vmatprep.subr.bf16.mxu0 %v9812_v41  ;;  %v16688_v41 = vld [vmem:[#allocation137_spill] sm:$0xff] }
 0x20d   :  { %10183 = vmatprep.subr.bf16.mxu1 %v16668_v1 }
 0x20e   :  { %6449 = vmatmul.mubr.f32.gmra.mrb[92].mxu1 %v16669_v38 }
 0x20f   :  { %9815 = vmatpush3.bf16.msra.mxu0 %v9814_v54  ;;  %10185 = vmatpush3.bf16.msra.mxu1 %v16670_v4  ;;  %v16690_v54 = vand.u32 4294901760, %v16598_v31  ;;  %v16698_v31 = vand.u32 4294901760, %v16606_v19 }
 0x210   :  { %6455 = vmatprep.mubr.f32.mxu1 %v16671_v16  ;;  %9817 = vmatprep.subr.bf16.mxu0 %v9816_v44 }
 0x211   :  { %10187 = vmatprep.subr.bf16.mxu1 %v16672_v8 }
 0x212   :  { %6458 = vmatmul.mubr.f32.gmra.mrb[94].mxu1 %v16673_v47 }
 0x213   :  { %9819 = vmatpush3.bf16.msra.mxu0 %v9818_v22  ;;  %10189 = vmatpush3.bf16.msra.mxu1 %v16674_v42  ;;  %v16692_v22 = vld [vmem:[#allocation143_spill] sm:$0xff] }
 0x214   :  { %9821 = vmatprep.subr.bf16.mxu0 %v16675_v60  ;;  %10191 = vmatprep.subr.bf16.mxu1 %v16676_v32 }
 0x215   :  { %6562 = vmatprep.mubr.f32.mxu1 %v16677_v0 }
 0x216   :  { %4498 = vmatmul.mubr.f32.vlgmr.msra.gmra.mrb[64].mxu0 %v16661_v13  ;;  %v16685_v13 = vld [vmem:[#allocation128_spill] sm:$0xff] }
 0x217   :  { %9823 = vmatpush3.bf16.msra.mxu0 %v16678_v21  ;;  %10193 = vmatpush3.bf16.msra.mxu1 %v16679_v5 }
 0x218   :  { %4504 = vmatprep.mubr.f32.mxu0 %v16663_v7  ;;  %9825 = vmatprep.subr.bf16.mxu0 %v16680_v51  ;;  %v16687_v7 = vld [vmem:[#allocation134_spill] sm:$0xff] }
 0x219   :  { %10195 = vmatprep.subr.bf16.mxu1 %v16681_v46 }
 0x21a   :  { %4507 = vmatmul.mubr.f32.gmra.mrb[66].mxu0 %v16665_v9  ;;  %v16689_v9 = vand.u32 4294901760, %v16597_v28  ;;  %v16697_v28 = vand.u32 4294901760, %v16605_v59  ;;  %v16706_v59 = vld [vmem:[#allocation55_spill] sm:$0xff] }
 0x21b   :  { %9827 = vmatpush3.bf16.msra.mxu0 %v16682_v57  ;;  %10197 = vmatpush3.bf16.msra.mxu1 %v16683_v37  ;;  %v16707_v19 = vand.u32 4294901760, %v16706_v59  ;;  %v16718_v59 = vand.u32 4294901760, %v16623_v18 }
 0x21c   :  { %4513 = vmatprep.mubr.f32.mxu0 %v16667_v52  ;;  %9829 = vmatprep.subr.bf16.mxu0 %v16684_v61  ;;  %v10206_v44 = vpack.c.bf16 %v16690_v54, %v16689_v9  ;;  %v16691_v52 = vld [vmem:[#allocation140_spill] sm:$0xff]  ;;  %v10210_v9 = vpack.c.bf16 %v16698_v31, %v16697_v28  ;;  %v16700_v54 = vld [vmem:[#allocation15_spill] sm:$0xff]  ;;  %v16708_v28 = vld [vmem:[#allocation9_spill] sm:$0xff] }
 0x21d   :  { %10199 = vmatprep.subr.bf16.mxu1 %v16685_v13  ;;  %v16709_v31 = vand.u32 4294901760, %v16708_v28  ;;  %v16719_v28 = vld [vmem:[#allocation43_spill] sm:$0xff]  ;;  %v16748_v13 = vld [vmem:[#allocation20_spill] sm:$0xff] }
 0x21e   :  { %4516 = vmatmul.mubr.f32.gmra.mrb[68].mxu0 %v16669_v38  ;;  %v16693_v38 = vld [vmem:[#allocation144_spill] sm:$0xff] }
 0x21f   :  { %9831 = vmatpush3.bf16.msra.mxu0 %v16686_v39  ;;  %10201 = vmatpush3.bf16.msra.mxu1 %v16687_v7  ;;  %v16695_v7 = vand.u32 4294901760, %v16604_v43  ;;  %v16696_v39 = vld [vmem:[#allocation145_spill] sm:$0xff] }
 0x220   :  { %4522 = vmatprep.mubr.f32.mxu0 %v16671_v16  ;;  %9833 = vmatprep.subr.bf16.mxu0 %v16688_v41 }
 0x221   :  { %10203 = vmatprep.subr.bf16.mxu1 %v16691_v52  ;;  %v10208_v16 = vpack.c.bf16 %v16695_v7, %v16694_v11  ;;  %v16704_v7 = vld [vmem:[#allocation34_spill] sm:$0xff] }
 0x222   :  { %4525 = vmatmul.mubr.f32.gmra.mrb[70].mxu0 %v16673_v47  ;;  %v16699_v47 = vld [vmem:[#allocation26_spill] sm:$0xff] }
 0x223   :  { %9835 = vmatpush3.bf16.msra.mxu0 %v16692_v22  ;;  %10205 = vmatpush3.bf16.msra.mxu1 %v16693_v38  ;;  %v16702_v38 = vld [vmem:[#allocation13_spill] sm:$0xff]  ;;  %v16711_v22 = vld [vmem:[#allocation148_spill] sm:$0xff]  ;;  %v16744_v52 = vld [vmem:[#allocation118_spill] sm:$0xff] }
 0x224   :  { %9837 = vmatprep.subr.bf16.mxu0 %v16696_v39  ;;  %10207 = vmatprep.subr.bf16.mxu1 %v10206_v44  ;;  %v16703_v43 = vand.u32 4294901760, %v16702_v38  ;;  %v16705_v44 = vld [vmem:[#allocation100_spill] sm:$0xff]  ;;  %v16710_v39 = vld [vmem:[#allocation35_spill] sm:$0xff] }
 0x225   :  { %4629 = vmatprep.mubr.f32.mxu0 %v16677_v0  ;;  %v10214_v0 = vpack.c.bf16 %v16709_v31, %v16707_v19  ;;  %v16720_v31 = vld [vmem:[#allocation152_spill] sm:$0xff] }
 0x226   :  { %6566 = vmatmul.mubr.f32.vlgmr.msra.gmra.mrb[96].mxu1 %v16699_v47  ;;  %v10212_v11 = vpack.c.bf16 %v16703_v43, %v16701_v12  ;;  %v16715_v43 = vld [vmem:[#allocation42_spill] sm:$0xff] }
 0x227   :  { %9839 = vmatpush3.bf16.msra.mxu0 %v16700_v54  ;;  %10209 = vmatpush3.bf16.msra.mxu1 %v10208_v16  ;;  %v16713_v16 = vld [vmem:[#allocation65_spill] sm:$0xff]  ;;  %v16716_v54 = vld [vmem:[#allocation151_spill] sm:$0xff] }
 0x228   :  { %6573 = vmatprep.mubr.f32.mxu1 %v16704_v7  ;;  %9841 = vmatprep.subr.bf16.mxu0 %v16705_v44  ;;  %v16714_v38 = vand.u32 4294901760, %v16713_v16  ;;  %v16723_v16 = vld [vmem:[#allocation50_spill] sm:$0xff] }
 0x229   :  { %10211 = vmatprep.subr.bf16.mxu1 %v10210_v9  ;;  %v16717_v9 = vand.u32 4294901760, %v16622_v10  ;;  %v16726_v10 = vld [vmem:[#allocation105_spill] sm:$0xff] }
 0x22a   :  { %6577 = vmatmul.mubr.f32.gmra.mrb[98].mxu1 %v16710_v39  ;;  %v10216_v12 = vpack.c.bf16 %v16714_v38, %v16712_v55  ;;  %v16724_v38 = vld [vmem:[#allocation155_spill] sm:$0xff] }
 0x22b   :  { %9843 = vmatpush3.bf16.msra.mxu0 %v16711_v22  ;;  %10213 = vmatpush3.bf16.msra.mxu1 %v10212_v11  ;;  %v10218_v19 = vpack.c.bf16 %v16718_v59, %v16717_v9  ;;  %v16722_v11 = vand.u32 4294901760, %v16628_v30  ;;  %v16728_v9 = vld [vmem:[#allocation107_spill] sm:$0xff]  ;;  %v16730_v22 = vld [vmem:[#allocation108_spill] sm:$0xff]  ;;  %v16734_v30 = vand.u32 4294901760, %v16634_v20 }
 0x22c   :  { %6584 = vmatprep.mubr.f32.mxu1 %v16715_v43  ;;  %9845 = vmatprep.subr.bf16.mxu0 %v16716_v54  ;;  %v16727_v54 = vand.u32 4294901760, %v16726_v10  ;;  %v16729_v59 = vand.u32 4294901760, %v16728_v9  ;;  %v16731_v44 = vand.u32 4294901760, %v16730_v22  ;;  %v16738_v10 = vld [vmem:[#allocation114_spill] sm:$0xff] }
 0x22d   :  { %10215 = vmatprep.subr.bf16.mxu1 %v10214_v0  ;;  %v10220_v55 = vpack.c.bf16 %v16722_v11, %v16721_v14  ;;  %v16725_v0 = vand.u32 4294901760, %v16629_v56  ;;  %v16735_v14 = vand.u32 4294901760, %v16635_v58  ;;  %v16736_v56 = vld [vmem:[#allocation113_spill] sm:$0xff]  ;;  %v16740_v22 = vld [vmem:[#allocation98_spill] sm:$0xff]  ;;  %v16749_v58 = vand.u32 4294901760, %v16644_v3 }
 0x22e   :  { %6588 = vmatmul.mubr.f32.gmra.mrb[100].mxu1 %v16719_v28  ;;  %v16758_v3 = vld [vmem:[#allocation130_spill] sm:$0xff] }
 0x22f   :  { %9847 = vmatpush3.bf16.msra.mxu0 %v16720_v31  ;;  %10217 = vmatpush3.bf16.msra.mxu1 %v10216_v12  ;;  %v9852_v18 = vpack.c.bf16 %v16727_v54, %v16725_v0  ;;  %v10222_v31 = vpack.c.bf16 %v16731_v44, %v16729_v59  ;;  %v16732_v12 = vld [vmem:[#allocation51_spill] sm:$0xff]  ;;  %v9854_v11 = vpack.c.bf16 %v16735_v14, %v16734_v30  ;;  %v16739_v54 = vand.u32 4294901760, %v16738_v10 }
 0x230   :  { %6595 = vmatprep.mubr.f32.mxu1 %v16723_v16  ;;  %9849 = vmatprep.subr.bf16.mxu0 %v16724_v38  ;;  %v16737_v38 = vand.u32 4294901760, %v16736_v56  ;;  %v16741_v44 = vand.u32 4294901760, %v16740_v22  ;;  %v16752_v30 = vand.u32 4294901760, %v16647_v49  ;;  %v16759_v10 = vand.u32 4294901760, %v16758_v3 }
 0x231   :  { %10219 = vmatprep.subr.bf16.mxu1 %v10218_v19  ;;  %v16742_v19 = vld [vmem:[#allocation116_spill] sm:$0xff]  ;;  %v16760_v49 = vand.u32 4294901760, %v16653_v25  ;;  %v16764_v22 = vand.u32 4294901760, %v16659_v17  ;;  %v16766_v25 = vld [vmem:[#allocation157_spill] sm:$0xff] }
 0x232   :  { %6599 = vmatmul.mubr.f32.gmra.mrb[102].mxu1 %v16732_v12  ;;  %v10224_v0 = vpack.c.bf16 %v16739_v54, %v16737_v38  ;;  %v16743_v9 = vand.u32 4294901760, %v16742_v19  ;;  %v16762_v54 = vand.u32 4294901760, %v16657_v26  ;;  %v16768_v26 = vand.u32 4294901760, %v16584_v63  ;;  %v16769_v19 = vld [vmem:[#allocation85_spill] sm:$0xff] }
 0x233   :  { %9851 = vmatpush3.bf16.msra.mxu0 %v16733_v48  ;;  %10221 = vmatpush3.bf16.msra.mxu1 %v10220_v55  ;;  %v16745_v48 = vand.u32 4294901760, %v16744_v52  ;;  %v16746_v55 = vld [vmem:[#allocation119_spill] sm:$0xff] }
 0x234   :  { %9853 = vmatprep.subr.bf16.mxu0 %v9852_v18  ;;  %10223 = vmatprep.subr.bf16.mxu1 %v10222_v31  ;;  %v9856_v59 = vpack.c.bf16 %v16743_v9, %v16741_v44  ;;  %v16747_v41 = vand.u32 4294901760, %v16746_v55  ;;  %v16750_v31 = vand.u32 4294901760, %v16645_v23  ;;  %v16751_v18 = vand.u32 4294901760, %v16646_v62  ;;  %v16772_v9 = vld [vmem:[#allocation159_spill] sm:$0xff]  ;;  %v16775_v55 = vld [vmem:[#allocation21_spill] sm:$0xff] }
 0x235   :  { %6765 = vmatprep.mubr.f32.mxu1 %v16748_v13  ;;  %v16761_v62 = vand.u32 4294901760, %v16654_v40  ;;  %v16767_v40 = vand.u32 4294901760, %v16583_v27  ;;  %v16773_v27 = vld [vmem:[#allocation11_spill] sm:$0xff] }
 0x236   :  { %v10226_v20 = vpack.c.bf16 %v16747_v41, %v16745_v48  ;;  %4633 = vmatmul.mubr.f32.vlgmr.msra.gmra.mrb[72].mxu0 %v16699_v47  ;;  %v9858_v38 = vpack.c.bf16 %v16750_v31, %v16749_v58  ;;  %v10228_v14 = vpack.c.bf16 %v16752_v30, %v16751_v18  ;;  %v16753_v41 = vld [vmem:[#allocation126_spill] sm:$0xff]  ;;  %v16755_v48 = vld [vmem:[#allocation127_spill] sm:$0xff] }
 0x237   :  { %9855 = vmatpush3.bf16.msra.mxu0 %v9854_v11  ;;  %10225 = vmatpush3.bf16.msra.mxu1 %v10224_v0  ;;  %v16754_v52 = vand.u32 4294901760, %v16753_v41  ;;  %v16756_v56 = vand.u32 4294901760, %v16755_v48  ;;  %v16757_v11 = vand.u32 4294901760, %v16650_v50  ;;  %v16763_v0 = vand.u32 4294901760, %v16658_v45  ;;  %v16778_v58 = vld [vmem:[#allocation147_spill] sm:$0xff]  ;;  %v16781_v30 = vld [vmem:[#allocation70_spill] sm:$0xff] }
 0x238   :  { %4640 = vmatprep.mubr.f32.mxu0 %v16704_v7  ;;  %9857 = vmatprep.subr.bf16.mxu0 %v9856_v59  ;;  %v9862_v7 = vpack.c.bf16 %v16761_v62, %v16760_v49  ;;  %v9868_v45 = vpack.c.bf16 %v16768_v26, %v16767_v40  ;;  %v16783_v41 = vld [vmem:[#allocation14_spill] sm:$0xff]  ;;  %v7946_v49 = vld [vmem:[%s15202_s0 + $0x5d0] sm:$0xff]  ;;  %v7947_v62 = vld [vmem:[%s15202_s0 + $0x5d8] sm:$0xff] }
 0x239   :  { %v9860_v47 = vpack.c.bf16 %v16756_v56, %v16754_v52  ;;  %10227 = vmatprep.subr.bf16.mxu1 %v10226_v20  ;;  %v10230_v23 = vpack.c.bf16 %v16759_v10, %v16757_v11  ;;  %v9864_v50 = vpack.c.bf16 %v16763_v0, %v16762_v54  ;;  %v16776_v20 = vld [vmem:[#allocation29_spill] sm:$0xff]  ;;  %v16785_v48 = vld [vmem:[#allocation150_spill] sm:$0xff]  ;;  %v16787_v56 = vld [vmem:[#allocation39_spill] sm:$0xff]  ;;  %v6931_v0 = vand.u32 4294901760, %v7946_v49 }
 0x23a   :  { %4644 = vmatmul.mubr.f32.gmra.mrb[74].mxu0 %v16710_v39  ;;  %v16765_v39 = vand.u32 4294901760, %v16565_v36  ;;  %v16796_v10 = vld [vmem:[#allocation145_spill] sm:$0xff] }
 0x23b   :  { %9859 = vmatpush3.bf16.msra.mxu0 %v9858_v38  ;;  %10229 = vmatpush3.bf16.msra.mxu1 %v10228_v14 }
 0x23c   :  { %4651 = vmatprep.mubr.f32.mxu0 %v16715_v43  ;;  %9861 = vmatprep.subr.bf16.mxu0 %v9860_v47  ;;  %v10234_v44 = vpack.c.bf16 %v16765_v39, %v16764_v22  ;;  %v16800_v22 = vld [vmem:[#allocation100_spill] sm:$0xff]  ;;  %v14211_v39 = vld [vmem:[%s15202_s0 + $0x5e8] sm:$0xff] }
 0x23d   :  { %10231 = vmatprep.subr.bf16.mxu1 %v10230_v23  ;;  %v1946_v43 = vpop.f32.mrb[32].mxu0  ;;  %v16797_v23 = vmov 0.0|0.0   ;;  %v6940_v26 = vand.u32 4294901760, %v14211_v39 }
 0x23e   :  { %4655 = vmatmul.mubr.f32.gmra.mrb[76].mxu0 %v16719_v28  ;;  %v14094_v17 = vadd.f32 %v1946_v43, %v16769_v19  ;;  %v1948_v36 = vpop.f32.mrb[33].mxu0  ;;  %v16771_v28 = vld [vmem:[#allocation158_spill] sm:$0xff]  ;;  %v16803_v43 = vld [vmem:[#allocation151_spill] sm:$0xff] }
 0x23f   :  { %9863 = vmatpush3.bf16.msra.mxu0 %v9862_v7  ;;  %10233 = vmatpush3.bf16.msra.mxu1 %v16766_v25  ;;  %v16798_v7 = vld [vmem:[#allocation15_spill] sm:$0xff]  ;;  %v7950_v36 = vld [vmem:[%s15202_s0 + $0x5f0] sm:$0xff] }
 0x240   :  { %4662 = vmatprep.mubr.f32.mxu0 %v16723_v16  ;;  %9865 = vmatprep.subr.bf16.mxu0 %v9864_v50  ;;  %16770 = vst [vmem:[#allocation154_spill] sm:$0xff] %v14094_v17  ;;  %v6934_v50 = vand.u32 4294901760, %v7947_v62  ;;  %v7893_v19 = vld [vmem:[%s15202_s0 + $0x428] sm:$0xff] }
 0x241   :  { %10235 = vmatprep.subr.bf16.mxu1 %v10234_v44  ;;  %v1953_v16 = vpop.f32.mrb[34].mxu0  ;;  %v16801_v44 = vld [vmem:[#allocation148_spill] sm:$0xff] }
 0x242   :  { %4666 = vmatmul.mubr.f32.gmra.mrb[78].mxu0 %v16732_v12  ;;  %v14102_v63 = vadd.f32 %v1953_v16, %v16773_v27  ;;  %v1955_v59 = vpop.f32.mrb[35].mxu0  ;;  %v16777_v12 = vld [vmem:[#allocation30_spill] sm:$0xff]  ;;  %v14217_v25 = vpack.c.bf16 %v6934_v50, %v6931_v0  ;;  %v7894_v16 = vld [vmem:[%s15202_s0 + $0x430] sm:$0xff] }
 0x243   :  { %9867 = vmatpush3.bf16.msra.mxu0 %v16771_v28  ;;  %10237 = vmatpush3.bf16.msra.mxu1 %v16772_v9  ;;  %v7951_v28 = vld [vmem:[%s15202_s0 + $0x5f8] sm:$0xff]  ;;  %v16804_v27 = vld [vmem:[#allocation152_spill] sm:$0xff] }
 0x244   :  { %9869 = vmatprep.subr.bf16.mxu0 %v9868_v45  ;;  %10239 = vmatprep.subr.bf16.mxu1 %v16660_v35  ;;  %16774 = vst [vmem:[#allocation142_spill] sm:$0xff] %v14102_v63  ;;  %v16779_v35 = vld [vmem:[#allocation99_spill] sm:$0xff]  ;;  %16802 = vst [vmem:[#allocation146_spill] sm:$0xff] %v14217_v25  ;;  %v7892_v45 = vld [vmem:[%s15202_s0 + $0x420] sm:$0xff] }
 0x245   :  { %4832 = vmatprep.mubr.f32.mxu0 %v16748_v13  ;;  %v1960_v31 = vpop.f32.mrb[36].mxu0  ;;  %v4986_v9 = vand.u32 4294901760, %v7892_v45 }
 0x246   :  { %6767 = vmatmul.mubr.f32.vlgmr.msra.gmra.mrb[104].mxu1 %v16775_v55  ;;  %v14111_v38 = vadd.f32 %v1960_v31, %v16779_v35  ;;  %v1962_v18 = vpop.f32.mrb[37].mxu0  ;;  %v6946_v31 = vand.u32 4294901760, %v7951_v28  ;;  %v7895_v35 = vld [vmem:[%s15202_s0 + $0x438] sm:$0xff] }
 0x247   :  { %9871 = vmatpush3.bf16.msra.mxu0 %v16776_v20  ;;  %10241 = vmatpush3.bf16.msra.mxu1 %v16662_v2  ;;  %v16782_v2 = vld [vmem:[#allocation149_spill] sm:$0xff]  ;;  %v4989_v20 = vand.u32 4294901760, %v7893_v19  ;;  %v14249_v18 = vld [vmem:[%s15202_s0 + $0x600] sm:$0xff] }
 0x248   :  { %6772 = vmatprep.mubr.f32.mxu1 %v16777_v12  ;;  %9873 = vmatprep.subr.bf16.mxu0 %v16778_v58  ;;  %16780 = vst [vmem:[#allocation28_spill] sm:$0xff] %v14111_v38  ;;  %v6943_v58 = vand.u32 4294901760, %v7950_v36 }
 0x249   :  { %10243 = vmatprep.subr.bf16.mxu1 %v16664_v6  ;;  %v1967_v14 = vpop.f32.mrb[38].mxu0 }
 0x24a   :  { %6774 = vmatmul.mubr.f32.gmra.mrb[106].mxu1 %v16619_v34  ;;  %v14120_v52 = vadd.f32 %v1967_v14, %v16783_v41  ;;  %v1969_v6 = vpop.f32.mrb[39].mxu0  ;;  %v4992_v14 = vand.u32 4294901760, %v7894_v16  ;;  %v4995_v41 = vand.u32 4294901760, %v7895_v35 }
 0x24b   :  { %9875 = vmatpush3.bf16.msra.mxu0 %v16781_v30  ;;  %10245 = vmatpush3.bf16.msra.mxu1 %v16666_v29  ;;  %v16786_v29 = vld [vmem:[#allocation37_spill] sm:$0xff]  ;;  %v14254_v30 = vld [vmem:[%s15202_s0 + $0x608] sm:$0xff]  ;;  %v6949_v6 = vand.u32 4294901760, %v14249_v18 }
 0x24c   :  { %6779 = vmatprep.mubr.f32.mxu1 %v16624_v33  ;;  %9877 = vmatprep.subr.bf16.mxu0 %v16782_v2  ;;  %16784 = vst [vmem:[#allocation62_spill] sm:$0xff] %v14120_v52  ;;  %v16806_v2 = vld [vmem:[#allocation155_spill] sm:$0xff] }
 0x24d   :  { %10247 = vmatprep.subr.bf16.mxu1 %v16668_v1  ;;  %v14148_v1 = vld [vmem:[%s15202_s0 + $0x5b0] sm:$0xff] }
 0x24e   :  { %6781 = vmatmul.mubr.f32.gmra.mrb[108].mxu1 %v16626_v15 }
 0x24f   :  { %9879 = vmatpush3.bf16.msra.mxu0 %v16785_v48  ;;  %10249 = vmatpush3.bf16.msra.mxu1 %v16670_v4  ;;  %v14153_v4 = vld [vmem:[%s15202_s0 + $0x5b8] sm:$0xff]  ;;  %v6952_v48 = vand.u32 4294901760, %v14254_v30 }
 0x250   :  { %6786 = vmatprep.mubr.f32.mxu1 %v16631_v53  ;;  %9881 = vmatprep.subr.bf16.mxu0 %v16786_v29  ;;  %v16807_v29 = vld [vmem:[#allocation156_spill] sm:$0xff] }
 0x251   :  { %10251 = vmatprep.subr.bf16.mxu1 %v16672_v8  ;;  %v16788_v8 = vld [vmem:[#allocation128_spill] sm:$0xff] }
 0x252   :  { %6788 = vmatmul.mubr.f32.gmra.mrb[110].mxu1 %v16633_v24 }
 0x253   :  { %9883 = vmatpush3.bf16.msra.mxu0 %v16787_v56  ;;  %10253 = vmatpush3.bf16.msra.mxu1 %v16674_v42  ;;  %v16789_v42 = vld [vmem:[#allocation132_spill] sm:$0xff]  ;;  %v14264_v56 = vpack.c.bf16 %v4989_v20, %v4986_v9 }
 0x254   :  { %9885 = vmatprep.subr.bf16.mxu0 %v16675_v60  ;;  %10255 = vmatprep.subr.bf16.mxu1 %v16676_v32  ;;  %v16790_v60 = vld [vmem:[#allocation134_spill] sm:$0xff]  ;;  %v6919_v32 = vand.u32 4294901760, %v14148_v1 }
 0x255   :  { %6890 = vmatprep.mubr.f32.mxu1 %v16748_v13  ;;  %16808 = vst [vmem:[#allocation8_spill] sm:$0xff] %v14264_v56 }
 0x256   :  { %4834 = vmatmul.mubr.f32.vlgmr.msra.gmra.mrb[80].mxu0 %v16775_v55 }
 0x257   :  { %9887 = vmatpush3.bf16.msra.mxu0 %v16678_v21  ;;  %10257 = vmatpush3.bf16.msra.mxu1 %v16679_v5  ;;  %v6922_v21 = vand.u32 4294901760, %v14153_v4  ;;  %v16791_v5 = vld [vmem:[#allocation137_spill] sm:$0xff] }
 0x258   :  { %4839 = vmatprep.mubr.f32.mxu0 %v16777_v12  ;;  %9889 = vmatprep.subr.bf16.mxu0 %v16680_v51  ;;  %v14166_v51 = vld [vmem:[%s15202_s0 + $0x5c0] sm:$0xff] }
 0x259   :  { %10259 = vmatprep.subr.bf16.mxu1 %v16681_v46  ;;  %v14171_v46 = vld [vmem:[%s15202_s0 + $0x5c8] sm:$0xff]  ;;  %v14181_v47 = vpack.c.bf16 %v6922_v21, %v6919_v32  ;;  %v6925_v11 = vand.u32 4294901760, %v14166_v51 }
 0x25a   :  { %4841 = vmatmul.mubr.f32.gmra.mrb[82].mxu0 %v16619_v34  ;;  %v6928_v3 = vand.u32 4294901760, %v14171_v46 }
 0x25b   :  { %9891 = vmatpush3.bf16.msra.mxu0 %v16682_v57  ;;  %10261 = vmatpush3.bf16.msra.mxu1 %v16683_v37  ;;  %v16792_v57 = vld [vmem:[#allocation140_spill] sm:$0xff]  ;;  %v16793_v37 = vld [vmem:[#allocation143_spill] sm:$0xff]  ;;  %16795 = vst [vmem:[#allocation52_spill] sm:$0xff] %v14181_v47 }
 0x25c   :  { %4846 = vmatprep.mubr.f32.mxu0 %v16624_v33  ;;  %9893 = vmatprep.subr.bf16.mxu0 %v16684_v61  ;;  %v16794_v61 = vld [vmem:[#allocation144_spill] sm:$0xff]  ;;  %v14201_v54 = vpack.c.bf16 %v6928_v3, %v6925_v11 }
 0x25d   :  { %10263 = vmatprep.subr.bf16.mxu1 %v16788_v8  ;;  %v14266_v8 = vpack.c.bf16 %v6946_v31, %v6943_v58 }
 0x25e   :  { %4848 = vmatmul.mubr.f32.gmra.mrb[84].mxu0 %v16626_v15  ;;  %16799 = vst [vmem:[#allocation53_spill] sm:$0xff] %v14201_v54 }
 0x25f   :  { %9895 = vmatpush3.bf16.msra.mxu0 %v16789_v42  ;;  %10265 = vmatpush3.bf16.msra.mxu1 %v16790_v60  ;;  %16809 = vst [vmem:[#allocation72_spill] sm:$0xff] %v14266_v8  ;;  %v7896_v42 = vld [vmem:[%s15202_s0 + $0x440] sm:$0xff]  ;;  %v14274_v60 = vsub.f32 %v14148_v1, %v6919_v32  ;;  %v14292_v1 = vsub.f32 %v14153_v4, %v6922_v21 }
 0x260   :  { %4853 = vmatprep.mubr.f32.mxu0 %v16631_v53  ;;  %9897 = vmatprep.subr.bf16.mxu0 %v16791_v5  ;;  %v7897_v5 = vld [vmem:[%s15202_s0 + $0x448] sm:$0xff]  ;;  %v14297_v32 = vsub.f32 %v14166_v51, %v6925_v11  ;;  %v14312_v4 = vpack.c.bf16 %v4995_v41, %v4992_v14  ;;  %v14314_v21 = vpack.c.bf16 %v6952_v48, %v6949_v6  ;;  %v14319_v51 = vld [vmem:[%s15202_s0 + $0x450] sm:$0xff]  ;;  %v4998_v11 = vand.u32 4294901760, %v7896_v42 }
 0x261   :  { %10267 = vmatprep.subr.bf16.mxu1 %v16792_v57  ;;  %v7954_v57 = vld [vmem:[%s15202_s0 + $0x610] sm:$0xff] }
 0x262   :  { %4855 = vmatmul.mubr.f32.gmra.mrb[86].mxu0 %v16633_v24  ;;  %16813 = vst [vmem:[#allocation75_spill] sm:$0xff] %v14312_v4  ;;  %16814 = vst [vmem:[#allocation57_spill] sm:$0xff] %v14314_v21 }
 0x263   :  { %9899 = vmatpush3.bf16.msra.mxu0 %v16793_v37  ;;  %10269 = vmatpush3.bf16.msra.mxu1 %v16794_v61  ;;  %v14287_v37 = vld [vmem:[%s15202_s0 + $0x618] sm:$0xff]  ;;  %v14302_v61 = vsub.f32 %v14171_v46, %v6928_v3  ;;  %v6955_v3 = vand.u32 4294901760, %v7954_v57 }
 0x264   :  { %9901 = vmatprep.subr.bf16.mxu0 %v16796_v10  ;;  %10270 = vmatprep.subr.bf16.mxu1 %v16797_v23  ;;  %v14304_v10 = vsub.f32 %v7946_v49, %v6931_v0  ;;  %v14324_v46 = vld [vmem:[%s15202_s0 + $0x458] sm:$0xff]  ;;  %v6958_v49 = vand.u32 4294901760, %v14287_v37  ;;  %v14335_v0 = vld [vmem:[%s15202_s0 + $0x628] sm:$0xff] }
 0x265   :  { %4957 = vmatprep.mubr.f32.mxu0 %v16748_v13  ;;  %v7948_v13 = vld [vmem:[%s15202_s0 + $0x5e0] sm:$0xff] }
 0x266   :  { %6892 = vmatmul.mubr.f32.vlgmr.msra.gmra.mrb[112].mxu1 %v16775_v55  ;;  %v6937_v40 = vand.u32 4294901760, %v7948_v13 }
 0x267   :  { %9903 = vmatpush3.bf16.msra.mxu0 %v16798_v7  ;;  %10272 = vmatpush1.bf16.msra.mxu1 %v14181_v47  ;;  %v16810_v7 = vld [vmem:[#allocation67_spill] sm:$0xff] }
 0x268   :  { %6897 = vmatprep.mubr.f32.mxu1 %v16777_v12  ;;  %9905 = vmatprep.subr.bf16.mxu0 %v16800_v22  ;;  %v14241_v59 = vpack.c.bf16 %v6940_v26, %v6937_v40  ;;  %v14307_v22 = vsub.f32 %v7947_v62, %v6934_v50  ;;  %v7956_v62 = vld [vmem:[%s15202_s0 + $0x620] sm:$0xff]  ;;  %v14338_v50 = vsub.f32 %v14211_v39, %v6940_v26  ;;  %v5007_v39 = vand.u32 4294901760, %v14324_v46 }
 0x269   :  { %10273 = vmatprep.subr.bf16.mxu1 %v16797_v23 }
 0x26a   :  { %6899 = vmatmul.mubr.f32.gmra.mrb[114].mxu1 %v16619_v34  ;;  %16805 = vst [vmem:[#allocation71_spill] sm:$0xff] %v14241_v59  ;;  %16811 = vst [vmem:[#allocation77_spill] sm:$0xff] %v14307_v22 }
 0x26b   :  { %9907 = vmatpush3.bf16.msra.mxu0 %v16801_v44  ;;  %10275 = vmatpush1.bf16.msra.mxu1 %v14201_v54  ;;  %v14309_v44 = vsub.f32 %v7948_v13, %v6937_v40  ;;  %v14340_v13 = vsub.f32 %v7892_v45, %v4986_v9  ;;  %v14342_v40 = vsub.f32 %v7893_v19, %v4989_v20  ;;  %v6961_v19 = vand.u32 4294901760, %v7956_v62 }
 0x26c   :  { %6904 = vmatprep.mubr.f32.mxu1 %v16624_v33  ;;  %9909 = vmatprep.subr.bf16.mxu0 %v16803_v43  ;;  %v14346_v43 = vsub.f32 %v7950_v36, %v6943_v58  ;;  %v14356_v45 = vsub.f32 %v7894_v16, %v4992_v14  ;;  %v6964_v36 = vand.u32 4294901760, %v14335_v0  ;;  %v14368_v20 = vpack.c.bf16 %v6958_v49, %v6955_v3  ;;  %v14376_v16 = vld [vmem:[%s15202_s0 + $0x630] sm:$0xff]  ;;  %v14381_v58 = vld [vmem:[%s15202_s0 + $0x638] sm:$0xff] }
 0x26d   :  { %10276 = vmatprep.subr.bf16.mxu1 %v16797_v23  ;;  %16812 = vst [vmem:[#allocation73_spill] sm:$0xff] %v14309_v44  ;;  %16815 = vst [vmem:[#allocation58_spill] sm:$0xff] %v14340_v13  ;;  %v14386_v14 = vsub.f32 %v14249_v18, %v6949_v6 }
 0x26e   :  { %6906 = vmatmul.mubr.f32.gmra.mrb[116].mxu1 %v16626_v15  ;;  %16816 = vst [vmem:[#allocation59_spill] sm:$0xff] %v14342_v40  ;;  %16817 = vst [vmem:[#allocation31_spill] sm:$0xff] %v14346_v43 }
 0x26f   :  { %9911 = vmatpush3.bf16.msra.mxu0 %v16804_v27  ;;  %10278 = vmatpush1.bf16.msra.mxu1 %v14217_v25  ;;  %v14348_v27 = vsub.f32 %v7951_v28, %v6946_v31  ;;  %16819 = vst [vmem:[#allocation7_spill] sm:$0xff] %v14356_v45  ;;  %v7900_v28 = vld [vmem:[%s15202_s0 + $0x460] sm:$0xff]  ;;  %16822 = vst [vmem:[#allocation38_spill] sm:$0xff] %v14368_v20  ;;  %v14400_v31 = vsub.f32 %v7954_v57, %v6955_v3  ;;  %v7903_v57 = vld [vmem:[%s15202_s0 + $0x478] sm:$0xff] }
 0x270   :  { %6911 = vmatprep.mubr.f32.mxu1 %v16631_v53  ;;  %9913 = vmatprep.subr.bf16.mxu0 %v16806_v2  ;;  %v5010_v18 = vand.u32 4294901760, %v7900_v28 }
 0x271   :  { %10279 = vmatprep.subr.bf16.mxu1 %v16797_v23  ;;  %16818 = vst [vmem:[#allocation82_spill] sm:$0xff] %v14348_v27  ;;  %16823 = vst [vmem:[#allocation102_spill] sm:$0xff] %v14400_v31 }
 0x272   :  { %6913 = vmatmul.mubr.f32.gmra.mrb[118].mxu1 %v16633_v24 }
 0x273   :  { %9915 = vmatpush3.bf16.msra.mxu0 %v16807_v29  ;;  %10281 = vmatpush1.bf16.msra.mxu1 %v14241_v59  ;;  %v5004_v29 = vand.u32 4294901760, %v14319_v51  ;;  %v14498_v59 = vld [vmem:[%s15202_s0 + $0x498] sm:$0xff] }
 0x274   :  { %9916 = vmatprep.subr.bf16.mxu0 %v16797_v23  ;;  %10282 = vmatprep.subr.bf16.mxu1 %v16797_v23 }
 0x275   :  { %7005 = vmatprep.mubr.f32.mxu1 %v16810_v7 }
 0x276   :  { %4959 = vmatmul.mubr.f32.vlgmr.msra.gmra.mrb[88].mxu0 %v16775_v55  ;;  %v5001_v55 = vand.u32 4294901760, %v7897_v5 }
 0x277   :  { %9918 = vmatpush1.bf16.msra.mxu0 %v14264_v56  ;;  %10284 = vmatpush1.bf16.msra.mxu1 %v14266_v8  ;;  %v14350_v2 = vpop.f32.mrb[64].mxu1  ;;  %v14426_v56 = vsub.f32 %v14287_v37, %v6958_v49  ;;  %v14440_v8 = vsub.f32 %v7956_v62, %v6961_v19  ;;  %v5019_v49 = vand.u32 4294901760, %v7903_v57 }
 0x278   :  { %4964 = vmatprep.mubr.f32.mxu0 %v16777_v12  ;;  %9919 = vmatprep.subr.bf16.mxu0 %v16797_v23  ;;  %v3877_v26 = vpop.f32.mrb[65].mxu1  ;;  %v14358_v12 = vsub.f32 %v7895_v35, %v4995_v41  ;;  %v14366_v9 = vpack.c.bf16 %v5001_v55, %v4998_v11  ;;  %v14389_v41 = vsub.f32 %v14254_v30, %v6952_v48  ;;  %v6967_v48 = vand.u32 4294901760, %v14376_v16 }
 0x279   :  { %10285 = vmatprep.subr.bf16.mxu1 %v16797_v23  ;;  %v14393_v26 = vsub.f32 %v7896_v42, %v4998_v11  ;;  %v14402_v35 = vpack.c.bf16 %v5007_v39, %v5004_v29  ;;  %v14405_v30 = vpack.c.bf16 %v6964_v36, %v6961_v19  ;;  %v6970_v42 = vand.u32 4294901760, %v14381_v58 }
 0x27a   :  { %4966 = vmatmul.mubr.f32.gmra.mrb[90].mxu0 %v16619_v34  ;;  %16820 = vst [vmem:[#allocation16_spill] sm:$0xff] %v14358_v12  ;;  %16821 = vst [vmem:[#allocation36_spill] sm:$0xff] %v14366_v9  ;;  %v7901_v34 = vld [vmem:[%s15202_s0 + $0x468] sm:$0xff] }
 0x27b   :  { %9921 = vmatpush1.bf16.msra.mxu0 %v14312_v4  ;;  %10287 = vmatpush1.bf16.msra.mxu1 %v14314_v21  ;;  %v14395_v21 = vpop.f32.mrb[66].mxu1  ;;  %v14398_v4 = vsub.f32 %v7897_v5, %v5001_v55  ;;  %16824 = vst [vmem:[#allocation103_spill] sm:$0xff] %v14402_v35  ;;  %16825 = vst [vmem:[#allocation54_spill] sm:$0xff] %v14405_v30  ;;  %v7902_v5 = vld [vmem:[%s15202_s0 + $0x470] sm:$0xff]  ;;  %v16827_v55 = vand.u32 4294901760, %v14292_v1 }
 0x27c   :  { %4971 = vmatprep.mubr.f32.mxu0 %v16624_v33  ;;  %9922 = vmatprep.subr.bf16.mxu0 %v16797_v23  ;;  %v3884_v6 = vpop.f32.mrb[67].mxu1  ;;  %v5013_v33 = vand.u32 4294901760, %v7901_v34  ;;  %v5016_v37 = vand.u32 4294901760, %v7902_v5 }
 0x27d   :  { %10288 = vmatprep.subr.bf16.mxu1 %v16797_v23  ;;  %v7072_v3 = vsub.f32 %v14292_v1, %v16827_v55 }
 0x27e   :  { %4973 = vmatmul.mubr.f32.gmra.mrb[92].mxu0 %v16626_v15  ;;  %v16826_v15 = vand.u32 4294901760, %v14274_v60  ;;  %v14504_v25 = vsub.f32 %v7902_v5, %v5016_v37 }
 0x27f   :  { %9924 = vmatpush1.bf16.msra.mxu0 %v14366_v9  ;;  %10290 = vmatpush1.bf16.msra.mxu1 %v14368_v20  ;;  %v14431_v20 = vsub.f32 %v14319_v51, %v5004_v29  ;;  %v15747_v9 = vand.u32 4294901760, %v14304_v10  ;;  %v14437_v55 = vpop.f32.mrb[68].mxu1  ;;  %v14445_v51 = vsub.f32 %v14335_v0, %v6964_v36  ;;  %v14449_v29 = vsub.f32 %v7900_v28, %v5010_v18 }
 0x280   :  { %v7065_v11 = vsub.f32 %v14274_v60, %v16826_v15  ;;  %4978 = vmatprep.mubr.f32.mxu0 %v16631_v53  ;;  %9925 = vmatprep.subr.bf16.mxu0 %v16797_v23  ;;  %v14434_v15 = vsub.f32 %v14324_v46, %v5007_v39  ;;  %v3891_v6 = vpop.f32.mrb[69].mxu1  ;;  %v14447_v46 = vpack.c.bf16 %v5013_v33, %v5010_v18  ;;  %v7073_v19 = vand.u32 4294901760, %v7072_v3  ;;  %v14478_v3 = vld [vmem:[%s15202_s0 + $0x490] sm:$0xff] }
 0x281   :  { %10291 = vmatprep.subr.bf16.mxu1 %v16797_v23  ;;  %v14451_v39 = vpack.c.bf16 %v6970_v42, %v6967_v48  ;;  %v14458_v6 = vld [vmem:[%s15202_s0 + $0x480] sm:$0xff]  ;;  %v16830_v0 = vand.u32 4294901760, %v14297_v32  ;;  %v16831_v28 = vand.u32 4294901760, %v14302_v61  ;;  %v7093_v53 = vsub.f32 %v14304_v10, %v15747_v9 }
 0x282   :  { %4980 = vmatmul.mubr.f32.gmra.mrb[94].mxu0 %v16633_v24  ;;  %16828 = vst [vmem:[#allocation44_spill] sm:$0xff] %v14447_v46  ;;  %v7066_v62 = vand.u32 4294901760, %v7065_v11  ;;  %v14463_v24 = vld [vmem:[%s15202_s0 + $0x488] sm:$0xff]  ;;  %v14473_v11 = vsub.f32 %v7901_v34, %v5013_v33  ;;  %v14491_v34 = vsub.f32 %v14381_v58, %v6970_v42  ;;  %v14493_v33 = vpack.c.bf16 %v5019_v49, %v5016_v37 }
 0x283   :  { %16829 = vst [vmem:[#allocation45_spill] sm:$0xff] %v14451_v39  ;;  %9927 = vmatpush1.bf16.msra.mxu0 %v14402_v35  ;;  %10293 = vmatpush1.bf16.msra.mxu1 %v14405_v30  ;;  %v7079_v36 = vsub.f32 %v14297_v32, %v16830_v0  ;;  %v7086_v18 = vsub.f32 %v14302_v61, %v16831_v28  ;;  %v14485_v28 = vpop.f32.mrb[70].mxu1  ;;  %v16833_v9 = vand.u32 4294901760, %v14307_v22  ;;  %v16834_v37 = vand.u32 4294901760, %v14309_v44 }
 0x284   :  { %9928 = vmatprep.subr.bf16.mxu0 %v16797_v23  ;;  %10294 = vmatprep.subr.bf16.mxu1 %v16797_v23  ;;  %v14488_v35 = vsub.f32 %v14376_v16, %v6967_v48  ;;  %16832 = vst [vmem:[#allocation110_spill] sm:$0xff] %v14493_v33  ;;  %v3898_v30 = vpop.f32.mrb[71].mxu1  ;;  %v14506_v16 = vsub.f32 %v7903_v57, %v5019_v49  ;;  %v7094_v57 = vand.u32 4294901760, %v7093_v53  ;;  %v16837_v53 = vld [vmem:[#allocation93_spill] sm:$0xff] }
 0x285   :  { %v7100_v0 = vsub.f32 %v14307_v22, %v16833_v9  ;;  %5072 = vmatprep.mubr.f32.mxu0 %v16810_v7  ;;  %v10298_v42 = vpack.c.bf16 %v7073_v19, %v7066_v62  ;;  %v7080_v54 = vand.u32 4294901760, %v7079_v36  ;;  %v7087_v47 = vand.u32 4294901760, %v7086_v18  ;;  %v14516_v7 = vld [vmem:[%s15202_s0 + $0x4a0] sm:$0xff]  ;;  %v14521_v30 = vld [vmem:[%s15202_s0 + $0x4a8] sm:$0xff] }
 0x286   :  { %v7107_v49 = vsub.f32 %v14309_v44, %v16834_v37  ;;  %v16835_v62 = vand.u32 4294901760, %v14338_v50  ;;  %v15764_v9 = vand.u32 4294901760, %v14340_v13  ;;  %v16843_v44 = vand.u32 4294901760, %v14498_v59 }
 0x287   :  { %9930 = vmatpush1.bf16.msra.mxu0 %v14447_v46  ;;  %10296 = vmatpush1.bf16.msra.mxu1 %v14451_v39  ;;  %v3353_v36 = vpop.f32.mrb[40].mxu0  ;;  %v7101_v18 = vand.u32 4294901760, %v7100_v0  ;;  %v16836_v39 = vld [vmem:[#allocation153_spill] sm:$0xff]  ;;  %v16838_v0 = vand.u32 4294901760, %v14458_v6  ;;  %v10301_v58 = vpack.c.bf16 %v7087_v47, %v7080_v54 }
 0x288   :  { %9931 = vmatprep.subr.bf16.mxu0 %v16797_v23  ;;  %10297 = vmatprep.subr.bf16.mxu1 %v16797_v23  ;;  %v7114_v19 = vsub.f32 %v14338_v50, %v16835_v62  ;;  %v10436_v46 = vadd.f32 %v3353_v36, %v16836_v39  ;;  %v3355_v5 = vpop.f32.mrb[41].mxu0  ;;  %v16839_v62 = vand.u32 4294901760, %v14463_v24  ;;  %v16846_v39 = vand.u32 4294901760, %v14346_v43 }
 0x289   :  { %v10304_v54 = vpack.c.bf16 %v7101_v18, %v7094_v57  ;;  %v5132_v5 = vsub.f32 %v14340_v13, %v15764_v9  ;;  %v16850_v57 = vand.u32 4294901760, %v14521_v30  ;;  %v16851_v9 = vand.u32 4294901760, %v14348_v27 }
 0x28a   :  { %7011 = vmatmul.mubr.f32.vlgmr.msra.gmra.mrb[120].mxu1 %v16837_v53  ;;  %v14545_v48 = vpack.c.bf16 %v16839_v62, %v16838_v0  ;;  %v14550_v36 = vadd.f32 %v10436_v46, %v14350_v2  ;;  %v7108_v0 = vand.u32 4294901760, %v7107_v49  ;;  %v7115_v62 = vand.u32 4294901760, %v7114_v19 }
 0x28b   :  { %9933 = vmatpush1.bf16.msra.mxu0 %v14493_v33  ;;  %10299 = vmatpush1.bf16.msra.mxu1 %v10298_v42  ;;  %v16842_v42 = vand.u32 4294901760, %v14478_v3  ;;  %v3360_v47 = vpop.f32.mrb[42].mxu0  ;;  %v16845_v2 = vand.u32 4294901760, %v14342_v40  ;;  %v7121_v22 = vsub.f32 %v14346_v43, %v16846_v39  ;;  %v16847_v33 = vld [vmem:[#allocation56_spill] sm:$0xff]  ;;  %v16849_v19 = vand.u32 4294901760, %v14516_v7 }
 0x28c   :  { %16840 = vst [vmem:[#allocation111_spill] sm:$0xff] %v14545_v48  ;;  %16841 = vst [vmem:[#allocation23_spill] sm:$0xff] %v14550_v36  ;;  %9934 = vmatprep.subr.bf16.mxu0 %v16797_v23  ;;  %10300 = vmatprep.subr.bf16.mxu1 %v16797_v23  ;;  %v3362_v49 = vpop.f32.mrb[43].mxu0  ;;  %v7128_v13 = vsub.f32 %v14348_v27, %v16851_v9  ;;  %v15781_v39 = vand.u32 4294901760, %v14393_v26  ;;  %v5133_v17 = vand.u32 4294901760, %v5132_v5  ;;  %v16857_v9 = vld [vmem:[#allocation47_spill] sm:$0xff] }
 0x28d   :  { %v14558_v37 = vpack.c.bf16 %v16843_v44, %v16842_v42  ;;  %v5139_v46 = vsub.f32 %v14342_v40, %v16845_v2  ;;  %7020 = vmatprep.mubr.f32.mxu1 %v16847_v33  ;;  %v16848_v44 = vld [vmem:[#allocation78_spill] sm:$0xff]  ;;  %v14575_v18 = vpack.c.bf16 %v16850_v57, %v16849_v19  ;;  %v16852_v2 = vld [vmem:[#allocation96_spill] sm:$0xff]  ;;  %v16854_v49 = vand.u32 4294901760, %v14358_v12 }
 0x28e   :  { %v10438_v42 = vadd.f32 %v3360_v47, %v16848_v44  ;;  %7026 = vmatmul.mubr.f32.gmra.mrb[122].mxu1 %v16852_v2  ;;  %v16853_v47 = vand.u32 4294901760, %v14356_v45  ;;  %v15787_v57 = vand.u32 4294901760, %v14400_v31  ;;  %v16858_v40 = vld [vmem:[#allocation12_spill] sm:$0xff] }
 0x28f   :  { %16844 = vst [vmem:[#allocation120_spill] sm:$0xff] %v14558_v37  ;;  %9936 = vmatpush1.bf16.msra.mxu0 %v14545_v48  ;;  %10302 = vmatpush1.bf16.msra.mxu1 %v10301_v58  ;;  %v5153_v19 = vsub.f32 %v14358_v12, %v16854_v49  ;;  %v10307_v58 = vpack.c.bf16 %v7115_v62, %v7108_v0  ;;  %v3367_v36 = vpop.f32.mrb[44].mxu0  ;;  %v5140_v48 = vand.u32 4294901760, %v5139_v46  ;;  %v7122_v49 = vand.u32 4294901760, %v7121_v22  ;;  %v16856_v12 = vld [vmem:[#allocation68_spill] sm:$0xff]  ;;  %v16862_v0 = vld [vmem:[#allocation66_spill] sm:$0xff] }
 0x290   :  { %v5146_v44 = vsub.f32 %v14356_v45, %v16853_v47  ;;  %v14593_v27 = vadd.f32 %v10438_v42, %v14395_v21  ;;  %9937 = vmatprep.subr.bf16.mxu0 %v16797_v23  ;;  %10303 = vmatprep.subr.bf16.mxu1 %v16797_v23  ;;  %v15784_v47 = vand.u32 4294901760, %v14398_v4  ;;  %v10440_v21 = vadd.f32 %v3367_v36, %v16857_v9  ;;  %v3369_v42 = vpop.f32.mrb[45].mxu0 }
 0x291   :  { %7035 = vmatprep.mubr.f32.mxu1 %v16856_v12  ;;  %v7129_v45 = vand.u32 4294901760, %v7128_v13  ;;  %v5154_v22 = vand.u32 4294901760, %v5153_v19  ;;  %v16859_v62 = vand.u32 4294901760, %v14386_v14  ;;  %v16860_v36 = vand.u32 4294901760, %v14389_v41 }
 0x292   :  { %16855 = vst [vmem:[#allocation122_spill] sm:$0xff] %v14593_v27  ;;  %7041 = vmatmul.mubr.f32.gmra.mrb[124].mxu1 %v16858_v40  ;;  %v5147_v5 = vand.u32 4294901760, %v5146_v44  ;;  %v14614_v9 = vadd.f32 %v10440_v21, %v14437_v55  ;;  %v5167_v44 = vsub.f32 %v14398_v4, %v15784_v47  ;;  %v7149_v55 = vsub.f32 %v14400_v31, %v15787_v57 }
 0x293   :  { %9939 = vmatpush1.bf16.msra.mxu0 %v14558_v37  ;;  %10305 = vmatpush1.bf16.msra.mxu1 %v10304_v54  ;;  %v7135_v46 = vsub.f32 %v14386_v14, %v16859_v62  ;;  %v7142_v13 = vsub.f32 %v14389_v41, %v16860_v36  ;;  %v5160_v54 = vsub.f32 %v14393_v26, %v15781_v39  ;;  %v3374_v42 = vpop.f32.mrb[46].mxu0  ;;  %v16863_v39 = vld [vmem:[#allocation49_spill] sm:$0xff]  ;;  %v16864_v47 = vand.u32 4294901760, %v14426_v56 }
 0x294   :  { %16861 = vst [vmem:[#allocation123_spill] sm:$0xff] %v14614_v9  ;;  %9940 = vmatprep.subr.bf16.mxu0 %v16797_v23  ;;  %10306 = vmatprep.subr.bf16.mxu1 %v16797_v23  ;;  %v10442_v43 = vadd.f32 %v3374_v42, %v16863_v39  ;;  %v3376_v27 = vpop.f32.mrb[47].mxu0  ;;  %v9944_v63 = vpack.c.bf16 %v5140_v48, %v5133_v17  ;;  %v16865_v37 = vld [vmem:[#allocation101_spill] sm:$0xff]  ;;  %v16867_v48 = vand.u32 4294901760, %v14431_v20  ;;  %v7150_v42 = vand.u32 4294901760, %v7149_v55 }
 0x295   :  { %7050 = vmatprep.mubr.f32.mxu1 %v16862_v0  ;;  %v7156_v19 = vsub.f32 %v14426_v56, %v16864_v47  ;;  %v10310_v62 = vpack.c.bf16 %v7129_v45, %v7122_v49  ;;  %v9947_v36 = vpack.c.bf16 %v5154_v22, %v5147_v5  ;;  %v7136_v21 = vand.u32 4294901760, %v7135_v46  ;;  %v16871_v46 = vld [vmem:[#allocation10_spill] sm:$0xff] }
 0x296   :  { %7056 = vmatmul.mubr.f32.gmra.mrb[126].mxu1 %v16865_v37  ;;  %v7143_v31 = vand.u32 4294901760, %v7142_v13  ;;  %v14641_v39 = vadd.f32 %v10442_v43, %v14485_v28  ;;  %v5161_v17 = vand.u32 4294901760, %v5160_v54  ;;  %v5168_v27 = vand.u32 4294901760, %v5167_v44 }
 0x297   :  { %9942 = vmatpush1.bf16.msra.mxu0 %v14575_v18  ;;  %10308 = vmatpush1.bf16.msra.mxu1 %v10307_v58  ;;  %v5174_v47 = vsub.f32 %v14431_v20, %v16867_v48  ;;  %v16868_v58 = vand.u32 4294901760, %v14434_v15  ;;  %v16869_v49 = vand.u32 4294901760, %v14440_v8  ;;  %v16870_v28 = vand.u32 4294901760, %v14445_v51 }
 0x298   :  { %16866 = vst [vmem:[#allocation124_spill] sm:$0xff] %v14641_v39  ;;  %9943 = vmatprep.subr.bf16.mxu0 %v16797_v23  ;;  %10309 = vmatprep.subr.bf16.mxu1 %v16797_v23  ;;  %v8784_v22 = vpop.f32.mrb[72].mxu1  ;;  %v7157_v13 = vand.u32 4294901760, %v7156_v19  ;;  %v16873_v44 = vand.u32 4294901760, %v14463_v24  ;;  %v16874_v48 = vand.u32 4294901760, %v14449_v29  ;;  %v16898_v39 = vld [vmem:[#allocation22_spill] sm:$0xff]  ;;  %v10340_v9 = vpack.c.bf16 %v14389_v41, %v14386_v14 }
 0x299   :  { %v5181_v45 = vsub.f32 %v14434_v15, %v16868_v58  ;;  %v7163_v43 = vsub.f32 %v14440_v8, %v16869_v49  ;;  %v7170_v5 = vsub.f32 %v14445_v51, %v16870_v28  ;;  %7216 = vmatprep.mubr.f32.mxu1 %v16871_v46  ;;  %v8785_v55 = vpop.f32.mrb[73].mxu1  ;;  %v10313_v58 = vpack.c.bf16 %v7143_v31, %v7136_v21 }
 0x29a   :  { %5078 = vmatmul.mubr.f32.vlgmr.msra.gmra.mrb[96].mxu0 %v16837_v53  ;;  %v15798_v49 = vand.u32 4294901760, %v14488_v35  ;;  %v14665_v57 = vadd.f32 %v8785_v55, %v8784_v22  ;;  %v16872_v53 = vand.u32 4294901760, %v14458_v6  ;;  %v14675_v54 = vsub.f32 %v14463_v24, %v16873_v44 }
 0x29b   :  { %9945 = vmatpush1.bf16.msra.mxu0 %v9944_v63  ;;  %10311 = vmatpush1.bf16.msra.mxu1 %v10310_v62  ;;  %v9950_v63 = vpack.c.bf16 %v5168_v27, %v5161_v17  ;;  %v5175_v31 = vand.u32 4294901760, %v5174_v47  ;;  %v5182_v21 = vand.u32 4294901760, %v5181_v45  ;;  %v7164_v62 = vand.u32 4294901760, %v7163_v43 }
 0x29c   :  { %v14670_v19 = vsub.f32 %v14458_v6, %v16872_v53  ;;  %9946 = vmatprep.subr.bf16.mxu0 %v16797_v23  ;;  %10312 = vmatprep.subr.bf16.mxu1 %v16797_v23  ;;  %v7171_v22 = vand.u32 4294901760, %v7170_v5  ;;  %v15797_v55 = vand.u32 4294901760, %v14504_v25  ;;  %v8787_v6 = vpop.f32.mrb[74].mxu1  ;;  %v10316_v53 = vpack.c.bf16 %v7157_v13, %v7150_v42 }
 0x29d   :  { %5087 = vmatprep.mubr.f32.mxu0 %v16847_v33  ;;  %v5188_v24 = vsub.f32 %v14449_v29, %v16874_v48  ;;  %v16875_v44 = vand.u32 4294901760, %v14473_v11  ;;  %v15796_v17 = vand.u32 4294901760, %v14506_v16  ;;  %v8788_v27 = vpop.f32.mrb[75].mxu1  ;;  %v7177_v33 = vsub.f32 %v14488_v35, %v15798_v49 }
 0x29e   :  { %5093 = vmatmul.mubr.f32.gmra.mrb[98].mxu0 %v16852_v2  ;;  %v16876_v47 = vand.u32 4294901760, %v14491_v34  ;;  %v14695_v45 = vadd.f32 %v8788_v27, %v8787_v6  ;;  %v16877_v43 = vand.u32 4294901760, %v14478_v3  ;;  %v16879_v2 = vand.u32 4294901760, %v14498_v59 }
 0x29f   :  { %v5195_v28 = vsub.f32 %v14473_v11, %v16875_v44  ;;  %9948 = vmatpush1.bf16.msra.mxu0 %v9947_v36  ;;  %10314 = vmatpush1.bf16.msra.mxu1 %v10313_v58  ;;  %v9953_v13 = vpack.c.bf16 %v5182_v21, %v5175_v31  ;;  %v10319_v48 = vpack.c.bf16 %v7171_v22, %v7164_v62  ;;  %v15795_v27 = vand.u32 4294901760, %v14670_v19 }
 0x2a0   :  { %v7184_v42 = vsub.f32 %v14491_v34, %v16876_v47  ;;  %v14700_v5 = vsub.f32 %v14478_v3, %v16877_v43  ;;  %9949 = vmatprep.subr.bf16.mxu0 %v16797_v23  ;;  %10315 = vmatprep.subr.bf16.mxu1 %v16797_v23  ;;  %v14707_v36 = vsub.f32 %v14498_v59, %v16879_v2  ;;  %v8790_v6 = vpop.f32.mrb[76].mxu1  ;;  %v5189_v3 = vand.u32 4294901760, %v5188_v24 }
 0x2a1   :  { %v5202_v58 = vsub.f32 %v14504_v25, %v15797_v55  ;;  %5102 = vmatprep.mubr.f32.mxu0 %v16856_v12  ;;  %v5209_v44 = vsub.f32 %v14506_v16, %v15796_v17  ;;  %v15794_v47 = vand.u32 4294901760, %v14675_v54  ;;  %v8791_v59 = vpop.f32.mrb[77].mxu1  ;;  %v5196_v31 = vand.u32 4294901760, %v5195_v28  ;;  %v16897_v55 = vld [vmem:[#allocation82_spill] sm:$0xff] }
 0x2a2   :  { %16878 = vst [vmem:[#allocation129_spill] sm:$0xff] %v14700_v5  ;;  %16880 = vst [vmem:[#allocation131_spill] sm:$0xff] %v14707_v36  ;;  %5108 = vmatmul.mubr.f32.gmra.mrb[100].mxu0 %v16858_v40  ;;  %v7178_v21 = vand.u32 4294901760, %v7177_v33  ;;  %v7185_v62 = vand.u32 4294901760, %v7184_v42  ;;  %v14719_v22 = vadd.f32 %v8791_v59, %v8790_v6  ;;  %v16881_v12 = vand.u32 4294901760, %v14516_v7 }
 0x2a3   :  { %9951 = vmatpush1.bf16.msra.mxu0 %v9950_v63  ;;  %10317 = vmatpush1.bf16.msra.mxu1 %v10316_v53  ;;  %v16883_v43 = vand.u32 4294901760, %v14521_v30  ;;  %v5203_v63 = vand.u32 4294901760, %v5202_v58  ;;  %v5210_v53 = vand.u32 4294901760, %v5209_v44  ;;  %v5216_v33 = vsub.f32 %v14670_v19, %v15795_v27  ;;  %v16890_v27 = vld [vmem:[#allocation84_spill] sm:$0xff] }
 0x2a4   :  { %9952 = vmatprep.subr.bf16.mxu0 %v16797_v23  ;;  %10318 = vmatprep.subr.bf16.mxu1 %v16797_v23  ;;  %v14726_v24 = vsub.f32 %v14516_v7, %v16881_v12  ;;  %v8793_v28 = vpop.f32.mrb[78].mxu1  ;;  %v5223_v42 = vsub.f32 %v14675_v54, %v15794_v47  ;;  %v15793_v7 = vand.u32 4294901760, %v14700_v5  ;;  %v10322_v58 = vpack.c.bf16 %v7185_v62, %v7178_v21 }
 0x2a5   :  { %v14731_v40 = vsub.f32 %v14521_v30, %v16883_v43  ;;  %5117 = vmatprep.mubr.f32.mxu0 %v16862_v0  ;;  %v8794_v2 = vpop.f32.mrb[79].mxu1  ;;  %v9956_v30 = vpack.c.bf16 %v5196_v31, %v5189_v3  ;;  %v15791_v0 = vand.u32 4294901760, %v14707_v36  ;;  %v10325_v59 = vpack.c.bf16 %v14292_v1, %v14274_v60 }
 0x2a6   :  { %16882 = vst [vmem:[#allocation133_spill] sm:$0xff] %v14726_v24  ;;  %5123 = vmatmul.mubr.f32.gmra.mrb[102].mxu0 %v16865_v37  ;;  %v14743_v6 = vadd.f32 %v8794_v2, %v8793_v28  ;;  %v9959_v37 = vpack.c.bf16 %v5210_v53, %v5203_v63  ;;  %v5230_v3 = vsub.f32 %v14700_v5, %v15793_v7  ;;  %v15790_v62 = vand.u32 4294901760, %v14726_v24  ;;  %v16885_v28 = vld [vmem:[#allocation19_spill] sm:$0xff] }
 0x2a7   :  { %16884 = vst [vmem:[#allocation135_spill] sm:$0xff] %v14731_v40  ;;  %9954 = vmatpush1.bf16.msra.mxu0 %v9953_v13  ;;  %10320 = vmatpush1.bf16.msra.mxu1 %v10319_v48  ;;  %v5217_v13 = vand.u32 4294901760, %v5216_v33  ;;  %v5224_v48 = vand.u32 4294901760, %v5223_v42  ;;  %v5237_v21 = vsub.f32 %v14707_v36, %v15791_v0  ;;  %v15792_v43 = vand.u32 4294901760, %v14731_v40  ;;  %v16889_v7 = vld [vmem:[#allocation83_spill] sm:$0xff] }
 0x2a8   :  { %9955 = vmatprep.subr.bf16.mxu0 %v16797_v23  ;;  %10321 = vmatprep.subr.bf16.mxu1 %v16797_v23  ;;  %v8520_v44 = vpop.f32.mrb[48].mxu0  ;;  %v10328_v33 = vpack.c.bf16 %v14302_v61, %v14297_v32  ;;  %v5231_v42 = vand.u32 4294901760, %v5230_v3 }
 0x2a9   :  { %5283 = vmatprep.mubr.f32.mxu0 %v16871_v46  ;;  %v8521_v12 = vpop.f32.mrb[49].mxu0  ;;  %v9962_v53 = vpack.c.bf16 %v5224_v48, %v5217_v13  ;;  %v16886_v48 = vld [vmem:[#allocation2_spill] sm:$0xff] }
 0x2aa   :  { %v14753_v31 = vadd.f32 %v8521_v12, %v8520_v44  ;;  %v5251_v44 = vsub.f32 %v14731_v40, %v15792_v43 }
 0x2ab   :  { %9957 = vmatpush1.bf16.msra.mxu0 %v9956_v30  ;;  %10323 = vmatpush1.bf16.msra.mxu1 %v10322_v58  ;;  %v5238_v30 = vand.u32 4294901760, %v5237_v21  ;;  %v5244_v58 = vsub.f32 %v14726_v24, %v15790_v62  ;;  %v16888_v21 = vld [vmem:[#allocation4_spill] sm:$0xff] }
 0x2ac   :  { %9958 = vmatprep.subr.bf16.mxu0 %v16797_v23  ;;  %10324 = vmatprep.subr.bf16.mxu1 %v16797_v23  ;;  %v8523_v63 = vpop.f32.mrb[50].mxu0  ;;  %v5252_v43 = vand.u32 4294901760, %v5251_v44 }
 0x2ad   :  { %v8524_v2 = vpop.f32.mrb[51].mxu0  ;;  %v9965_v62 = vpack.c.bf16 %v5238_v30, %v5231_v42  ;;  %v5245_v0 = vand.u32 4294901760, %v5244_v58  ;;  %v16892_v58 = vld [vmem:[#allocation89_spill] sm:$0xff] }
 0x2ae   :  { %7218 = vmatmul.mubr.f32.vlgmr.msra.gmra.mrb[120].mxu1 %v16885_v28  ;;  %v14771_v12 = vadd.f32 %v8524_v2, %v8523_v63 }
 0x2af   :  { %9960 = vmatpush1.bf16.msra.mxu0 %v9959_v37  ;;  %10326 = vmatpush1.bf16.msra.mxu1 %v10325_v59  ;;  %v16887_v59 = vld [vmem:[#allocation77_spill] sm:$0xff]  ;;  %v9968_v17 = vpack.c.bf16 %v5252_v43, %v5245_v0  ;;  %v16895_v0 = vld [vmem:[#allocation59_spill] sm:$0xff] }
 0x2b0   :  { %9961 = vmatprep.subr.bf16.mxu0 %v16797_v23  ;;  %10327 = vmatprep.subr.bf16.mxu1 %v16797_v23  ;;  %v8526_v13 = vpop.f32.mrb[52].mxu0  ;;  %v10331_v37 = vpack.c.bf16 %v16887_v59, %v14304_v10 }
 0x2b1   :  { %7223 = vmatprep.mubr.f32.mxu1 %v16886_v48  ;;  %v8527_v3 = vpop.f32.mrb[53].mxu0 }
 0x2b2   :  { %7225 = vmatmul.mubr.f32.gmra.mrb[122].mxu1 %v16888_v21  ;;  %v14779_v63 = vadd.f32 %v8527_v3, %v8526_v13  ;;  %v16893_v13 = vld [vmem:[#allocation91_spill] sm:$0xff] }
 0x2b3   :  { %9963 = vmatpush1.bf16.msra.mxu0 %v9962_v53  ;;  %10329 = vmatpush1.bf16.msra.mxu1 %v10328_v33  ;;  %v16891_v53 = vld [vmem:[#allocation73_spill] sm:$0xff] }
 0x2b4   :  { %9964 = vmatprep.subr.bf16.mxu0 %v16797_v23  ;;  %10330 = vmatprep.subr.bf16.mxu1 %v16797_v23  ;;  %v8529_v2 = vpop.f32.mrb[54].mxu0  ;;  %v10334_v33 = vpack.c.bf16 %v14338_v50, %v16891_v53 }
 0x2b5   :  { %7230 = vmatprep.mubr.f32.mxu1 %v16889_v7  ;;  %v8530_v47 = vpop.f32.mrb[55].mxu0 }
 0x2b6   :  { %7232 = vmatmul.mubr.f32.gmra.mrb[124].mxu1 %v16890_v27  ;;  %v14787_v42 = vadd.f32 %v8530_v47, %v8529_v2 }
 0x2b7   :  { %9966 = vmatpush1.bf16.msra.mxu0 %v9965_v62  ;;  %10332 = vmatpush1.bf16.msra.mxu1 %v10331_v37  ;;  %v16894_v62 = vld [vmem:[#allocation58_spill] sm:$0xff]  ;;  %v16896_v37 = vld [vmem:[#allocation31_spill] sm:$0xff] }
 0x2b8   :  { %9967 = vmatprep.subr.bf16.mxu0 %v16797_v23  ;;  %10333 = vmatprep.subr.bf16.mxu1 %v16797_v23  ;;  %v9971_v43 = vpack.c.bf16 %v16895_v0, %v16894_v62  ;;  %v10337_v47 = vpack.c.bf16 %v16897_v55, %v16896_v37 }
 0x2b9   :  { %v8828_v30 = vpop.f32.mrb[80].mxu1  ;;  %7237 = vmatprep.mubr.f32.mxu1 %v16892_v58 }
 0x2ba   :  { %v8829_v44 = vpop.f32.mrb[81].mxu1  ;;  %7239 = vmatmul.mubr.f32.gmra.mrb[126].mxu1 %v16893_v13 }
 0x2bb   :  { %v8830_v3 = vadd.f32 %v8829_v44, %v8828_v30  ;;  %9969 = vmatpush1.bf16.msra.mxu0 %v9968_v17  ;;  %10335 = vmatpush1.bf16.msra.mxu1 %v10334_v33  ;;  %v16899_v30 = vld [vmem:[#allocation7_spill] sm:$0xff]  ;;  %v16900_v44 = vld [vmem:[#allocation16_spill] sm:$0xff] }
 0x2bc   :  { %9970 = vmatprep.subr.bf16.mxu0 %v16797_v23  ;;  %10336 = vmatprep.subr.bf16.mxu1 %v16797_v23  ;;  %v9974_v52 = vpack.c.bf16 %v16900_v44, %v16899_v30 }
 0x2bd   :  { %v14800_v2 = vadd.f32 %v8830_v3, %v14665_v57  ;;  %v8831_v49 = vpop.f32.mrb[82].mxu1  ;;  %7346 = vmatprep.mubr.f32.mxu1 %v16898_v39 }
 0x2be   :  { %5285 = vmatmul.mubr.f32.vlgmr.msra.gmra.mrb[96].mxu0 %v16885_v28  ;;  %v8832_v17 = vpop.f32.mrb[83].mxu1 }
 0x2bf   :  { %9972 = vmatpush1.bf16.msra.mxu0 %v9971_v43  ;;  %10338 = vmatpush1.bf16.msra.mxu1 %v10337_v47  ;;  %v8833_v33 = vadd.f32 %v8832_v17, %v8831_v49  ;;  %v9977_v43 = vpack.c.bf16 %v14398_v4, %v14393_v26  ;;  %v16901_v47 = vld [vmem:[#allocation102_spill] sm:$0xff] }
 0x2c0   :  { %9973 = vmatprep.subr.bf16.mxu0 %v16797_v23  ;;  %10339 = vmatprep.subr.bf16.mxu1 %v16797_v23  ;;  %v10343_v17 = vpack.c.bf16 %v14426_v56, %v16901_v47 }
 0x2c1   :  { %v14811_v57 = vadd.f32 %v8833_v33, %v14695_v45  ;;  %v8834_v3 = vpop.f32.mrb[84].mxu1  ;;  %5290 = vmatprep.mubr.f32.mxu0 %v16886_v48 }
 0x2c2   :  { %v8835_v38 = vpop.f32.mrb[85].mxu1  ;;  %5292 = vmatmul.mubr.f32.gmra.mrb[98].mxu0 %v16888_v21 }
 0x2c3   :  { %9975 = vmatpush1.bf16.msra.mxu0 %v9974_v52  ;;  %10341 = vmatpush1.bf16.msra.mxu1 %v10340_v9  ;;  %v8836_v49 = vadd.f32 %v8835_v38, %v8834_v3  ;;  %v9980_v52 = vpack.c.bf16 %v14434_v15, %v14431_v20  ;;  %v10346_v9 = vpack.c.bf16 %v14445_v51, %v14440_v8 }
 0x2c4   :  { %9976 = vmatprep.subr.bf16.mxu0 %v16797_v23  ;;  %10342 = vmatprep.subr.bf16.mxu1 %v16797_v23 }
 0x2c5   :  { %v14822_v45 = vadd.f32 %v8836_v49, %v14719_v22  ;;  %v8837_v33 = vpop.f32.mrb[86].mxu1  ;;  %5297 = vmatprep.mubr.f32.mxu0 %v16889_v7  ;;  %v16908_v7 = vld [vmem:[#allocation90_spill] sm:$0xff] }
 0x2c6   :  { %v8838_v21 = vpop.f32.mrb[87].mxu1  ;;  %5299 = vmatmul.mubr.f32.gmra.mrb[100].mxu0 %v16890_v27 }
 0x2c7   :  { %9978 = vmatpush1.bf16.msra.mxu0 %v9977_v43  ;;  %10344 = vmatpush1.bf16.msra.mxu1 %v10343_v17  ;;  %v8839_v38 = vadd.f32 %v8838_v21, %v8837_v33  ;;  %v9983_v43 = vpack.c.bf16 %v14473_v11, %v14449_v29  ;;  %v10349_v17 = vpack.c.bf16 %v14491_v34, %v14488_v35 }
 0x2c8   :  { %9979 = vmatprep.subr.bf16.mxu0 %v16797_v23  ;;  %10345 = vmatprep.subr.bf16.mxu1 %v16797_v23 }
 0x2c9   :  { %v14833_v22 = vadd.f32 %v8839_v38, %v14743_v6  ;;  %v8564_v3 = vpop.f32.mrb[56].mxu0  ;;  %5304 = vmatprep.mubr.f32.mxu0 %v16892_v58  ;;  %v16907_v58 = vld [vmem:[#allocation88_spill] sm:$0xff] }
 0x2ca   :  { %v8565_v49 = vpop.f32.mrb[57].mxu0  ;;  %5306 = vmatmul.mubr.f32.gmra.mrb[102].mxu0 %v16893_v13 }
 0x2cb   :  { %v8566_v21 = vadd.f32 %v8565_v49, %v8564_v3  ;;  %9981 = vmatpush1.bf16.msra.mxu0 %v9980_v52  ;;  %10347 = vmatpush1.bf16.msra.mxu1 %v10346_v9  ;;  %v9986_v52 = vpack.c.bf16 %v14506_v16, %v14504_v25 }
 0x2cc   :  { %9982 = vmatprep.subr.bf16.mxu0 %v16797_v23  ;;  %10348 = vmatprep.subr.bf16.mxu1 %v16797_v23 }
 0x2cd   :  { %v14844_v6 = vadd.f32 %v8566_v21, %v14753_v31  ;;  %v8567_v33 = vpop.f32.mrb[58].mxu0  ;;  %5413 = vmatprep.mubr.f32.mxu0 %v16898_v39  ;;  %v16902_v21 = vld [vmem:[#allocation6_spill] sm:$0xff]  ;;  %v16903_v39 = vld [vmem:[#allocation52_spill] sm:$0xff] }
 0x2ce   :  { %v8568_v38 = vpop.f32.mrb[59].mxu0 }
 0x2cf   :  { %v8569_v3 = vadd.f32 %v8568_v38, %v8567_v33  ;;  %9984 = vmatpush1.bf16.msra.mxu0 %v9983_v43  ;;  %10350 = vmatpush1.bf16.msra.mxu1 %v10349_v17  ;;  %v9989_v43 = vpack.c.bf16 %v14675_v54, %v14670_v19  ;;  %v16904_v33 = vld [vmem:[#allocation80_spill] sm:$0xff] }
 0x2d0   :  { %9985 = vmatprep.subr.bf16.mxu0 %v16797_v23  ;;  %10351 = vmatprep.subr.bf16.mxu1 %v16797_v23 }
 0x2d1   :  { %v14852_v9 = vadd.f32 %v8569_v3, %v14771_v12  ;;  %v8570_v49 = vpop.f32.mrb[60].mxu0  ;;  %v16905_v3 = vld [vmem:[#allocation81_spill] sm:$0xff] }
 0x2d2   :  { %v8571_v31 = vpop.f32.mrb[61].mxu0  ;;  %7349 = vmatmul.mubr.f32.vlgmr.msra.gmra.mrb[120].mxu1 %v16902_v21 }
 0x2d3   :  { %v8572_v13 = vadd.f32 %v8571_v31, %v8570_v49  ;;  %9987 = vmatpush1.bf16.msra.mxu0 %v9986_v52  ;;  %10353 = vmatpush1.bf16.msra.mxu1 %v16903_v39  ;;  %v16906_v52 = vld [vmem:[#allocation53_spill] sm:$0xff]  ;;  %v9992_v31 = vpack.c.bf16 %v14707_v36, %v14700_v5  ;;  %v7770_v36 = vld [vmem:[%s15204_s2] sm:$0xff]  ;;  %v16910_v5 = vld [vmem:[#allocation92_spill] sm:$0xff] }
 0x2d4   :  { %9988 = vmatprep.subr.bf16.mxu0 %v16797_v23  ;;  %10354 = vmatprep.subr.bf16.mxu1 %v16797_v23 }
 0x2d5   :  { %v14861_v17 = vadd.f32 %v8572_v13, %v14779_v63  ;;  %v8573_v12 = vpop.f32.mrb[62].mxu0  ;;  %7355 = vmatprep.mubr.f32.mxu1 %v16904_v33 }
 0x2d6   :  { %v8574_v38 = vpop.f32.mrb[63].mxu0  ;;  %7358 = vmatmul.mubr.f32.gmra.mrb[122].mxu1 %v16905_v3 }
 0x2d7   :  { %v8575_v49 = vadd.f32 %v8574_v38, %v8573_v12  ;;  %9990 = vmatpush1.bf16.msra.mxu0 %v9989_v43  ;;  %10356 = vmatpush1.bf16.msra.mxu1 %v16906_v52  ;;  %v16909_v43 = vld [vmem:[#allocation146_spill] sm:$0xff]  ;;  %v9995_v38 = vpack.c.bf16 %v14731_v40, %v14726_v24  ;;  %v16912_v24 = vld [vmem:[#allocation71_spill] sm:$0xff] }
 0x2d8   :  { %9991 = vmatprep.subr.bf16.mxu0 %v16797_v23  ;;  %10357 = vmatprep.subr.bf16.mxu1 %v16797_v23  ;;  %v16913_v52 = vld [vmem:[#allocation27_spill] sm:$0xff] }
 0x2d9   :  { %v14871_v63 = vadd.f32 %v8575_v49, %v14787_v42  ;;  %v8872_v13 = vpop.f32.mrb[88].mxu1  ;;  %7364 = vmatprep.mubr.f32.mxu1 %v16907_v58 }
 0x2da   :  { %v8873_v27 = vpop.f32.mrb[89].mxu1  ;;  %7367 = vmatmul.mubr.f32.gmra.mrb[124].mxu1 %v16908_v7 }
 0x2db   :  { %v8874_v12 = vadd.f32 %v8873_v27, %v8872_v13  ;;  %9993 = vmatpush1.bf16.msra.mxu0 %v9992_v31  ;;  %10359 = vmatpush1.bf16.msra.mxu1 %v16909_v43  ;;  %v10609_v27 = vmov 0   ;;  %v16911_v13 = vld [vmem:[#allocation95_spill] sm:$0xff]  ;;  %v7772_v43 = vld [vmem:[%s15204_s2 + $0x10] sm:$0xff] }
 0x2dc   :  { %9994 = vmatprep.subr.bf16.mxu0 %v16797_v23  ;;  %10360 = vmatprep.subr.bf16.mxu1 %v16797_v23 }
 0x2dd   :  { %v14884_v42 = vadd.f32 %v8874_v12, %v14800_v2  ;;  %v8875_v49 = vpop.f32.mrb[90].mxu1  ;;  %7373 = vmatprep.mubr.f32.mxu1 %v16910_v5  ;;  %10606 = vset.pattern.permute.xlu0 %v10609_v27 }
 0x2de   :  { %v8876_v31 = vpop.f32.mrb[91].mxu1  ;;  %7376 = vmatmul.mubr.f32.gmra.mrb[126].mxu1 %v16911_v13  ;;  %7776 = vperm.xlu0 %10606, %v7770_v36  }
 0x2df   :  { %v8877_v40 = vadd.f32 %v8876_v31, %v8875_v49  ;;  %9996 = vmatpush1.bf16.msra.mxu0 %v9995_v38  ;;  %10362 = vmatpush1.bf16.msra.mxu1 %v16912_v24  ;;  %v7771_v38 = vld [vmem:[%s15204_s2 + $0x8] sm:$0xff]  ;;  %v16914_v31 = vld [vmem:[#allocation8_spill] sm:$0xff] }
 0x2e0   :  { %9997 = vmatprep.subr.bf16.mxu0 %v16797_v23  ;;  %10363 = vmatprep.subr.bf16.mxu1 %v16797_v23  ;;  %v16915_v24 = vld [vmem:[#allocation72_spill] sm:$0xff] }
 0x2e1   :  { %v14895_v2 = vadd.f32 %v8877_v40, %v14811_v57  ;;  %v8878_v12 = vpop.f32.mrb[92].mxu1  ;;  %7466 = vmatprep.mubr.f32.mxu1 %v16913_v52  ;;  %10607 = vset.pattern.permute.xlu1 %v10609_v27  ;;  %v7773_v40 = vld [vmem:[%s15204_s2 + $0x18] sm:$0xff] }
 0x2e2   :  { %v8879_v36 = vpop.f32.mrb[93].mxu1  ;;  %5416 = vmatmul.mubr.f32.vlgmr.msra.gmra.mrb[96].mxu0 %v16902_v21  ;;  %7786 = vperm.xlu1 %10607, %v7772_v43  }
 0x2e3   :  { %v8880_v49 = vadd.f32 %v8879_v36, %v8878_v12  ;;  %9999 = vmatpush1.bf16.msra.mxu0 %v16914_v31  ;;  %10365 = vmatpush1.bf16.msra.mxu1 %v16915_v24  ;;  %v16916_v12 = vld [vmem:[#allocation75_spill] sm:$0xff]  ;;  %v16917_v36 = vld [vmem:[#allocation57_spill] sm:$0xff] }
 0x2e4   :  { %10000 = vmatprep.subr.bf16.mxu0 %v16797_v23  ;;  %10366 = vmatprep.subr.bf16.mxu1 %v16797_v23 }
 0x2e5   :  { %v14910_v57 = vadd.f32 %v8880_v49, %v14822_v45  ;;  %v8881_v21 = vpop.f32.mrb[94].mxu1  ;;  %5422 = vmatprep.mubr.f32.mxu0 %v16904_v33  ;;  %7781 = vperm.xlu0 %10606, %v7771_v38   ;;  %v16918_v38 = vld [vmem:[#allocation36_spill] sm:$0xff] }
 0x2e6   :  { %v8882_v43 = vpop.f32.mrb[95].mxu1  ;;  %5425 = vmatmul.mubr.f32.gmra.mrb[98].mxu0 %v16905_v3  ;;  %7791 = vperm.xlu1 %10607, %v7773_v40   ;;  %v16919_v40 = vld [vmem:[#allocation38_spill] sm:$0xff] }
 0x2e7   :  { %v8883_v27 = vadd.f32 %v8882_v43, %v8881_v21  ;;  %10002 = vmatpush1.bf16.msra.mxu0 %v16916_v12  ;;  %10368 = vmatpush1.bf16.msra.mxu1 %v16917_v36 }
 0x2e8   :  { %10003 = vmatprep.subr.bf16.mxu0 %v16797_v23  ;;  %10369 = vmatprep.subr.bf16.mxu1 %v16797_v23 }
 0x2e9   :  { %v14919_v45 = vadd.f32 %v8883_v27, %v14833_v22  ;;  %v8608_v49 = vpop.f32.mrb[64].mxu0  ;;  %5431 = vmatprep.mubr.f32.mxu0 %v16907_v58  ;;  %v16921_v27 = vld [vmem:[#allocation54_spill] sm:$0xff] }
 0x2ea   :  { %v8609_v33 = vpop.f32.mrb[65].mxu0  ;;  %5434 = vmatmul.mubr.f32.gmra.mrb[100].mxu0 %v16908_v7  ;;  %v16920_v7 = vld [vmem:[#allocation103_spill] sm:$0xff] }
 0x2eb   :  { %v8610_v3 = vadd.f32 %v8609_v33, %v8608_v49  ;;  %10005 = vmatpush1.bf16.msra.mxu0 %v16918_v38  ;;  %10371 = vmatpush1.bf16.msra.mxu1 %v16919_v40 }
 0x2ec   :  { %10006 = vmatprep.subr.bf16.mxu0 %v16797_v23  ;;  %10372 = vmatprep.subr.bf16.mxu1 %v16797_v23 }
 0x2ed   :  { %v14928_v21 = vadd.f32 %v8610_v3, %v14844_v6  ;;  %v8611_v22 = vpop.f32.mrb[66].mxu0  ;;  %5440 = vmatprep.mubr.f32.mxu0 %v16910_v5  ;;  %v16922_v3 = vld [vmem:[#allocation44_spill] sm:$0xff] }
 0x2ee   :  { %v8612_v43 = vpop.f32.mrb[67].mxu0  ;;  %5443 = vmatmul.mubr.f32.gmra.mrb[102].mxu0 %v16911_v13  ;;  %v16923_v13 = vld [vmem:[#allocation45_spill] sm:$0xff] }
 0x2ef   :  { %v8613_v58 = vadd.f32 %v8612_v43, %v8611_v22  ;;  %10008 = vmatpush1.bf16.msra.mxu0 %v16920_v7  ;;  %10374 = vmatpush1.bf16.msra.mxu1 %v16921_v27  ;;  %v16924_v22 = vand.u32 4294901760, %v14274_v60  ;;  %v16925_v43 = vand.u32 4294901760, %v14292_v1  ;;  %v16926_v7 = vld [vmem:[#allocation79_spill] sm:$0xff]  ;;  %v16928_v60 = vand.u32 4294901760, %v14297_v32 }
 0x2f0   :  { %10009 = vmatprep.subr.bf16.mxu0 %v16797_v23  ;;  %10375 = vmatprep.subr.bf16.mxu1 %v16797_v23  ;;  %v16929_v1 = vand.u32 4294901760, %v14302_v61  ;;  %v16933_v32 = vand.u32 4294901760, %v14304_v10  ;;  %v16934_v61 = vand.u32 4294901760, %v16887_v59  ;;  %v16938_v10 = vand.u32 4294901760, %v16891_v53 }
 0x2f1   :  { %v14937_v49 = vadd.f32 %v8613_v58, %v14852_v9  ;;  %v8614_v6 = vpop.f32.mrb[68].mxu0  ;;  %5533 = vmatprep.mubr.f32.mxu0 %v16913_v52  ;;  %v10379_v27 = vpack.c.bf16 %v16925_v43, %v16924_v22  ;;  %v16930_v43 = vld [vmem:[#allocation86_spill] sm:$0xff]  ;;  %v16939_v59 = vand.u32 4294901760, %v14338_v50  ;;  %v16942_v50 = vand.u32 4294901760, %v16894_v62 }
 0x2f2   :  { %v8615_v33 = vpop.f32.mrb[69].mxu0  ;;  %v10382_v22 = vpack.c.bf16 %v16929_v1, %v16928_v60  ;;  %v10385_v60 = vpack.c.bf16 %v16934_v61, %v16933_v32  ;;  %v16935_v1 = vld [vmem:[#allocation3_spill] sm:$0xff]  ;;  %v16940_v61 = vld [vmem:[#allocation17_spill] sm:$0xff]  ;;  %v16943_v53 = vand.u32 4294901760, %v16895_v0  ;;  %v16946_v0 = vand.u32 4294901760, %v16899_v30 }
 0x2f3   :  { %v8616_v5 = vadd.f32 %v8615_v33, %v8614_v6  ;;  %10011 = vmatpush1.bf16.msra.mxu0 %v16922_v3  ;;  %10377 = vmatpush1.bf16.msra.mxu1 %v16923_v13  ;;  %v16927_v33 = vld [vmem:[#allocation110_spill] sm:$0xff]  ;;  %v10388_v32 = vpack.c.bf16 %v16939_v59, %v16938_v10  ;;  %v16944_v10 = vand.u32 4294901760, %v16896_v37 }
 0x2f4   :  { %10012 = vmatprep.subr.bf16.mxu0 %v16797_v23  ;;  %10378 = vmatprep.subr.bf16.mxu1 %v16797_v23 }
 0x2f5   :  { %v14949_v9 = vadd.f32 %v8616_v5, %v14861_v17  ;;  %v8617_v58 = vpop.f32.mrb[70].mxu0 }
 0x2f6   :  { %v8618_v52 = vpop.f32.mrb[71].mxu0  ;;  %7470 = vmatmul.mubr.f32.vlgmr.msra.gmra.mrb[120].mxu1 %v16926_v7 }
 0x2f7   :  { %v8619_v6 = vadd.f32 %v8618_v52, %v8617_v58  ;;  %10014 = vmatpush1.bf16.msra.mxu0 %v16927_v33  ;;  %10380 = vmatpush1.bf16.msra.mxu1 %v10379_v27  ;;  %v16931_v58 = vld [vmem:[#allocation87_spill] sm:$0xff] }
 0x2f8   :  { %10015 = vmatprep.subr.bf16.mxu0 %v16797_v23  ;;  %10381 = vmatprep.subr.bf16.mxu1 %v16797_v23  ;;  %v16932_v27 = vld [vmem:[#allocation111_spill] sm:$0xff] }
 0x2f9   :  { %v14960_v17 = vadd.f32 %v8619_v6, %v14871_v63  ;;  %v8916_v5 = vpop.f32.mrb[96].mxu1  ;;  %7477 = vmatprep.mubr.f32.mxu1 %v16930_v43 }
 0x2fa   :  { %v8917_v13 = vpop.f32.mrb[97].mxu1  ;;  %7481 = vmatmul.mubr.f32.gmra.mrb[122].mxu1 %v16931_v58 }
 0x2fb   :  { %v8918_v52 = vadd.f32 %v8917_v13, %v8916_v5  ;;  %10017 = vmatpush1.bf16.msra.mxu0 %v16932_v27  ;;  %10383 = vmatpush1.bf16.msra.mxu1 %v10382_v22  ;;  %v16936_v13 = vld [vmem:[#allocation94_spill] sm:$0xff]  ;;  %v16937_v22 = vld [vmem:[#allocation120_spill] sm:$0xff] }
 0x2fc   :  { %10018 = vmatprep.subr.bf16.mxu0 %v16797_v23  ;;  %10384 = vmatprep.subr.bf16.mxu1 %v16797_v23 }
 0x2fd   :  { %v14972_v63 = vadd.f32 %v8918_v52, %v14884_v42  ;;  %v8919_v6 = vpop.f32.mrb[98].mxu1  ;;  %7488 = vmatprep.mubr.f32.mxu1 %v16935_v1 }
 0x2fe   :  { %v8920_v33 = vpop.f32.mrb[99].mxu1  ;;  %7492 = vmatmul.mubr.f32.gmra.mrb[124].mxu1 %v16936_v13 }
 0x2ff   :  { %v8921_v5 = vadd.f32 %v8920_v33, %v8919_v6  ;;  %10020 = vmatpush1.bf16.msra.mxu0 %v16937_v22  ;;  %10386 = vmatpush1.bf16.msra.mxu1 %v10385_v60  ;;  %v16941_v33 = vld [vmem:[#allocation97_spill] sm:$0xff]  ;;  %v10025_v60 = vpack.c.bf16 %v16943_v53, %v16942_v50  ;;  %v16949_v50 = vand.u32 4294901760, %v14389_v41  ;;  %v16951_v41 = vand.u32 4294901760, %v14398_v4 }
 0x300   :  { %10021 = vmatprep.subr.bf16.mxu0 %v16797_v23  ;;  %10387 = vmatprep.subr.bf16.mxu1 %v16797_v23 }
 0x301   :  { %v14984_v42 = vadd.f32 %v8921_v5, %v14895_v2  ;;  %v8922_v52 = vpop.f32.mrb[100].mxu1  ;;  %7499 = vmatprep.mubr.f32.mxu1 %v16940_v61  ;;  %v16945_v2 = vand.u32 4294901760, %v16897_v55  ;;  %v16947_v55 = vand.u32 4294901760, %v16900_v44 }
 0x302   :  { %v8923_v27 = vpop.f32.mrb[101].mxu1  ;;  %7503 = vmatmul.mubr.f32.gmra.mrb[126].mxu1 %v16941_v33 }
 0x303   :  { %v8924_v6 = vadd.f32 %v8923_v27, %v8922_v52  ;;  %10023 = vmatpush1.bf16.msra.mxu0 %v14575_v18  ;;  %10389 = vmatpush1.bf16.msra.mxu1 %v10388_v32  ;;  %v10391_v5 = vpack.c.bf16 %v16945_v2, %v16944_v10  ;;  %v10028_v37 = vpack.c.bf16 %v16947_v55, %v16946_v0  ;;  %v16948_v52 = vand.u32 4294901760, %v14386_v14 }
 0x304   :  { %10024 = vmatprep.subr.bf16.mxu0 %v16797_v23  ;;  %10390 = vmatprep.subr.bf16.mxu1 %v16797_v23  ;;  %v16950_v14 = vand.u32 4294901760, %v14393_v26  ;;  %v16953_v10 = vand.u32 4294901760, %v14426_v56  ;;  %v16954_v26 = vand.u32 4294901760, %v14431_v20  ;;  %v16955_v56 = vand.u32 4294901760, %v14434_v15 }
 0x305   :  { %v15000_v59 = vadd.f32 %v8924_v6, %v14910_v57  ;;  %v8925_v27 = vpop.f32.mrb[102].mxu1  ;;  %7627 = vmatprep.mubr.f32.mxu1 %v16871_v46  ;;  %v10394_v57 = vpack.c.bf16 %v16949_v50, %v16948_v52  ;;  %v16959_v15 = vand.u32 4294901760, %v14473_v11  ;;  %v16961_v0 = vand.u32 4294901760, %v14491_v34 }
 0x306   :  { %v8926_v32 = vpop.f32.mrb[103].mxu1  ;;  %5537 = vmatmul.mubr.f32.vlgmr.msra.gmra.mrb[96].mxu0 %v16926_v7  ;;  %v10031_v44 = vpack.c.bf16 %v16951_v41, %v16950_v14  ;;  %v16962_v11 = vand.u32 4294901760, %v14504_v25  ;;  %v16964_v25 = vand.u32 4294901760, %v14670_v19  ;;  %v16968_v19 = vld [vmem:[#allocation129_spill] sm:$0xff]  ;;  %v16970_v41 = vld [vmem:[#allocation131_spill] sm:$0xff] }
 0x307   :  { %v8927_v62 = vadd.f32 %v8926_v32, %v8925_v27  ;;  %10026 = vmatpush1.bf16.msra.mxu0 %v10025_v60  ;;  %10392 = vmatpush1.bf16.msra.mxu1 %v10391_v5  ;;  %v16952_v60 = vand.u32 4294901760, %v16901_v47  ;;  %v10034_v47 = vpack.c.bf16 %v16955_v56, %v16954_v26  ;;  %v16956_v5 = vand.u32 4294901760, %v14440_v8  ;;  %v16974_v26 = vld [vmem:[#allocation146_spill] sm:$0xff]  ;;  %v16975_v56 = vld [vmem:[#allocation133_spill] sm:$0xff] }
 0x308   :  { %10027 = vmatprep.subr.bf16.mxu0 %v16797_v23  ;;  %10393 = vmatprep.subr.bf16.mxu1 %v16797_v23  ;;  %v16957_v27 = vand.u32 4294901760, %v14445_v51  ;;  %v16958_v8 = vand.u32 4294901760, %v14449_v29 }
 0x309   :  { %v15015_v6 = vadd.f32 %v8927_v62, %v14919_v45  ;;  %v8652_v7 = vpop.f32.mrb[72].mxu0  ;;  %5544 = vmatprep.mubr.f32.mxu0 %v16930_v43  ;;  %v10397_v45 = vpack.c.bf16 %v16953_v10, %v16952_v60  ;;  %v16960_v62 = vand.u32 4294901760, %v14488_v35  ;;  %v16963_v35 = vand.u32 4294901760, %v14506_v16 }
 0x30a   :  { %v8653_v53 = vpop.f32.mrb[73].mxu0  ;;  %5548 = vmatmul.mubr.f32.gmra.mrb[98].mxu0 %v16931_v58  ;;  %v10037_v51 = vpack.c.bf16 %v16959_v15, %v16958_v8  ;;  %v16965_v16 = vand.u32 4294901760, %v14675_v54  ;;  %v16969_v54 = vand.u32 4294901760, %v16968_v19  ;;  %v16980_v8 = vld [vmem:[#allocation91_spill] sm:$0xff] }
 0x30b   :  { %v8654_v30 = vadd.f32 %v8653_v53, %v8652_v7  ;;  %10029 = vmatpush1.bf16.msra.mxu0 %v10028_v37  ;;  %10395 = vmatpush1.bf16.msra.mxu1 %v10394_v57  ;;  %v10040_v34 = vpack.c.bf16 %v16963_v35, %v16962_v11 }
 0x30c   :  { %10030 = vmatprep.subr.bf16.mxu0 %v16797_v23  ;;  %10396 = vmatprep.subr.bf16.mxu1 %v16797_v23  ;;  %v10043_v57 = vpack.c.bf16 %v16965_v16, %v16964_v25 }
 0x30d   :  { %v15030_v43 = vadd.f32 %v8654_v30, %v14928_v21  ;;  %v8655_v58 = vpop.f32.mrb[74].mxu0  ;;  %5555 = vmatprep.mubr.f32.mxu0 %v16935_v1  ;;  %v10400_v21 = vpack.c.bf16 %v16957_v27, %v16956_v5  ;;  %v16966_v30 = vld [vmem:[#allocation4_spill] sm:$0xff]  ;;  %v16977_v5 = vld [vmem:[#allocation135_spill] sm:$0xff] }
 0x30e   :  { %v8656_v2 = vpop.f32.mrb[75].mxu0  ;;  %5559 = vmatmul.mubr.f32.gmra.mrb[100].mxu0 %v16936_v13  ;;  %v16978_v27 = vand.u32 4294901760, %v16977_v5 }
 0x30f   :  { %v8657_v4 = vadd.f32 %v8656_v2, %v8655_v58  ;;  %10032 = vmatpush1.bf16.msra.mxu0 %v10031_v44  ;;  %10398 = vmatpush1.bf16.msra.mxu1 %v10397_v45  ;;  %v16971_v44 = vand.u32 4294901760, %v16970_v41  ;;  %v16972_v45 = vld [vmem:[#allocation83_spill] sm:$0xff]  ;;  %v16973_v2 = vld [vmem:[#allocation84_spill] sm:$0xff] }
 0x310   :  { %10033 = vmatprep.subr.bf16.mxu0 %v16797_v23  ;;  %10399 = vmatprep.subr.bf16.mxu1 %v16797_v23 }
 0x311   :  { %v15045_v1 = vadd.f32 %v8657_v4, %v14937_v49  ;;  %v8658_v13 = vpop.f32.mrb[76].mxu0  ;;  %5566 = vmatprep.mubr.f32.mxu0 %v16940_v61  ;;  %v10403_v49 = vpack.c.bf16 %v16961_v0, %v16960_v62  ;;  %v10046_v60 = vpack.c.bf16 %v16971_v44, %v16969_v54 }
 0x312   :  { %v8659_v32 = vpop.f32.mrb[77].mxu0  ;;  %5570 = vmatmul.mubr.f32.gmra.mrb[102].mxu0 %v16941_v33 }
 0x313   :  { %v8660_v20 = vadd.f32 %v8659_v32, %v8658_v13  ;;  %10035 = vmatpush1.bf16.msra.mxu0 %v10034_v47  ;;  %10401 = vmatpush1.bf16.msra.mxu1 %v10400_v21  ;;  %v16976_v47 = vand.u32 4294901760, %v16975_v56  ;;  %v16979_v32 = vld [vmem:[#allocation89_spill] sm:$0xff] }
 0x314   :  { %10036 = vmatprep.subr.bf16.mxu0 %v16797_v23  ;;  %10402 = vmatprep.subr.bf16.mxu1 %v16797_v23 }
 0x315   :  { %v15060_v61 = vadd.f32 %v8660_v20, %v14949_v9  ;;  %v8661_v33 = vpop.f32.mrb[78].mxu0  ;;  %5694 = vmatprep.mubr.f32.mxu0 %v16871_v46  ;;  %v10049_v21 = vpack.c.bf16 %v16978_v27, %v16976_v47 }
 0x316   :  { %v8662_v55 = vpop.f32.mrb[79].mxu0 }
 0x317   :  { %v8663_v29 = vadd.f32 %v8662_v55, %v8661_v33  ;;  %10038 = vmatpush1.bf16.msra.mxu0 %v10037_v51  ;;  %10404 = vmatpush1.bf16.msra.mxu1 %v10403_v49  ;;  %v16981_v51 = vld [vmem:[#allocation71_spill] sm:$0xff] }
 0x318   :  { %10039 = vmatprep.subr.bf16.mxu0 %v16797_v23  ;;  %10405 = vmatprep.subr.bf16.mxu1 %v16797_v23 }
 0x319   :  { %v15070_v37 = vadd.f32 %v8663_v29, %v14960_v17  ;;  %v8960_v9 = vpop.f32.mrb[104].mxu1 }
 0x31a   :  { %v8961_v52 = vpop.f32.mrb[105].mxu1  ;;  %7629 = vmatmul.mubr.f32.vlgmr.msra.gmra.mrb[120].mxu1 %v16885_v28 }
 0x31b   :  { %v8962_v50 = vadd.f32 %v8961_v52, %v8960_v9  ;;  %10041 = vmatpush1.bf16.msra.mxu0 %v10040_v34  ;;  %10407 = vmatpush1.bf16.msra.mxu1 %v16903_v39  ;;  %v16967_v39 = vld [vmem:[#allocation53_spill] sm:$0xff]  ;;  %v16982_v34 = vld [vmem:[#allocation103_spill] sm:$0xff]  ;;  %v16983_v9 = vld [vmem:[#allocation54_spill] sm:$0xff] }
 0x31c   :  { %10042 = vmatprep.subr.bf16.mxu0 %v16797_v23  ;;  %10408 = vmatprep.subr.bf16.mxu1 %v16797_v23 }
 0x31d   :  { %v15081_v17 = vadd.f32 %v8962_v50, %v14972_v63  ;;  %v8963_v7 = vpop.f32.mrb[106].mxu1  ;;  %7634 = vmatprep.mubr.f32.mxu1 %v16886_v48  ;;  %v16984_v50 = vld [vmem:[#allocation45_spill] sm:$0xff] }
 0x31e   :  { %v8964_v53 = vpop.f32.mrb[107].mxu1  ;;  %7636 = vmatmul.mubr.f32.gmra.mrb[122].mxu1 %v16966_v30 }
 0x31f   :  { %v8965_v14 = vadd.f32 %v8964_v53, %v8963_v7  ;;  %10044 = vmatpush1.bf16.msra.mxu0 %v10043_v57  ;;  %10410 = vmatpush1.bf16.msra.mxu1 %v16967_v39  ;;  %v16985_v53 = vld [vmem:[#allocation110_spill] sm:$0xff]  ;;  %v16986_v39 = vld [vmem:[#allocation111_spill] sm:$0xff] }
 0x320   :  { %10045 = vmatprep.subr.bf16.mxu0 %v16797_v23  ;;  %10411 = vmatprep.subr.bf16.mxu1 %v16797_v23 }
 0x321   :  { %v15093_v63 = vadd.f32 %v8965_v14, %v14984_v42  ;;  %v8966_v10 = vpop.f32.mrb[108].mxu1  ;;  %7641 = vmatprep.mubr.f32.mxu1 %v16972_v45 }
 0x322   :  { %v8967_v58 = vpop.f32.mrb[109].mxu1  ;;  %7643 = vmatmul.mubr.f32.gmra.mrb[124].mxu1 %v16973_v2 }
 0x323   :  { %v8968_v4 = vadd.f32 %v8967_v58, %v8966_v10  ;;  %10047 = vmatpush1.bf16.msra.mxu0 %v10046_v60  ;;  %10413 = vmatpush1.bf16.msra.mxu1 %v16974_v26 }
 0x324   :  { %10048 = vmatprep.subr.bf16.mxu0 %v16797_v23  ;;  %10414 = vmatprep.subr.bf16.mxu1 %v16797_v23 }
 0x325   :  { %v15105_v42 = vadd.f32 %v8968_v4, %v15000_v59  ;;  %v8969_v13 = vpop.f32.mrb[110].mxu1  ;;  %7648 = vmatprep.mubr.f32.mxu1 %v16979_v32 }
 0x326   :  { %v8970_v20 = vpop.f32.mrb[111].mxu1  ;;  %7650 = vmatmul.mubr.f32.gmra.mrb[126].mxu1 %v16980_v8 }
 0x327   :  { %v8971_v15 = vadd.f32 %v8970_v20, %v8969_v13  ;;  %10050 = vmatpush1.bf16.msra.mxu0 %v10049_v21  ;;  %10416 = vmatpush1.bf16.msra.mxu1 %v16981_v51 }
 0x328   :  { %10051 = vmatprep.subr.bf16.mxu0 %v16797_v23  ;;  %10417 = vmatprep.subr.bf16.mxu1 %v16797_v23 }
 0x329   :  { %v15113_v62 = vadd.f32 %v8971_v15, %v15015_v6  ;;  %v8696_v0 = vpop.f32.mrb[80].mxu0  ;;  %7738 = vmatprep.mubr.f32.mxu1 %v16871_v46 }
 0x32a   :  { %v8697_v59 = vpop.f32.mrb[81].mxu0  ;;  %5696 = vmatmul.mubr.f32.vlgmr.msra.gmra.mrb[96].mxu0 %v16885_v28 }
 0x32b   :  { %v8698_v49 = vadd.f32 %v8697_v59, %v8696_v0  ;;  %10053 = vmatpush1.bf16.msra.mxu0 %v16914_v31  ;;  %10419 = vmatpush1.bf16.msra.mxu1 %v16915_v24 }
 0x32c   :  { %10054 = vmatprep.subr.bf16.mxu0 %v16797_v23  ;;  %10420 = vmatprep.subr.bf16.mxu1 %v16797_v23 }
 0x32d   :  { %v15122_v33 = vadd.f32 %v8698_v49, %v15030_v43  ;;  %v8699_v6 = vpop.f32.mrb[82].mxu0  ;;  %5701 = vmatprep.mubr.f32.mxu0 %v16886_v48 }
 0x32e   :  { %v8700_v55 = vpop.f32.mrb[83].mxu0  ;;  %5703 = vmatmul.mubr.f32.gmra.mrb[98].mxu0 %v16966_v30 }
 0x32f   :  { %v8701_v29 = vadd.f32 %v8700_v55, %v8699_v6  ;;  %10056 = vmatpush1.bf16.msra.mxu0 %v16916_v12  ;;  %10422 = vmatpush1.bf16.msra.mxu1 %v16917_v36 }
 0x330   :  { %10057 = vmatprep.subr.bf16.mxu0 %v16797_v23  ;;  %10423 = vmatprep.subr.bf16.mxu1 %v16797_v23 }
 0x331   :  { %v15131_v24 = vadd.f32 %v8701_v29, %v15045_v1  ;;  %v8702_v31 = vpop.f32.mrb[84].mxu0  ;;  %5708 = vmatprep.mubr.f32.mxu0 %v16972_v45 }
 0x332   :  { %v8703_v43 = vpop.f32.mrb[85].mxu0  ;;  %5710 = vmatmul.mubr.f32.gmra.mrb[100].mxu0 %v16973_v2 }
 0x333   :  { %v8704_v11 = vadd.f32 %v8703_v43, %v8702_v31  ;;  %10059 = vmatpush1.bf16.msra.mxu0 %v16918_v38  ;;  %10425 = vmatpush1.bf16.msra.mxu1 %v16919_v40 }
 0x334   :  { %10060 = vmatprep.subr.bf16.mxu0 %v16797_v23  ;;  %10426 = vmatprep.subr.bf16.mxu1 %v16797_v23 }
 0x335   :  { %v4850_v12 = vadd.f32 %v8704_v11, %v15060_v61  ;;  %v8705_v36 = vpop.f32.mrb[86].mxu0  ;;  %5715 = vmatprep.mubr.f32.mxu0 %v16979_v32 }
 0x336   :  { %v8706_v1 = vpop.f32.mrb[87].mxu0  ;;  %5717 = vmatmul.mubr.f32.gmra.mrb[102].mxu0 %v16980_v8 }
 0x337   :  { %v8707_v35 = vadd.f32 %v8706_v1, %v8705_v36  ;;  %10062 = vmatpush1.bf16.msra.mxu0 %v16982_v34  ;;  %10428 = vmatpush1.bf16.msra.mxu1 %v16983_v9  ;;  %v16990_v1 = vld [vmem:[#allocation142_spill] sm:$0xff] }
 0x338   :  { %10063 = vmatprep.subr.bf16.mxu0 %v16797_v23  ;;  %10429 = vmatprep.subr.bf16.mxu1 %v16797_v23 }
 0x339   :  { %v4857_v38 = vadd.f32 %v8707_v35, %v15070_v37  ;;  %v9004_v40 = vpop.f32.mrb[112].mxu1  ;;  %5805 = vmatprep.mubr.f32.mxu0 %v16871_v46  ;;  %v16991_v35 = vld [vmem:[#allocation122_spill] sm:$0xff] }
 0x33a   :  { %v9005_v61 = vpop.f32.mrb[113].mxu1  ;;  %v16992_v34 = vmax.f32 %v16990_v1, %v16991_v35 }
 0x33b   :  { %v9006_v52 = vadd.f32 %v9005_v61, %v9004_v40  ;;  %10065 = vmatpush1.bf16.msra.mxu0 %v16922_v3  ;;  %10431 = vmatpush1.bf16.msra.mxu1 %v16984_v50 }
 0x33c   :  { %10066 = vmatprep.subr.bf16.mxu0 %v16797_v23 }
 0x33d   :  { %v9007_v25 = vpop.f32.mrb[114].mxu1  ;;  %v6894_v16 = vadd.f32 %v9006_v52, %v15081_v17 }
 0x33e   :  { %v9008_v57 = vpop.f32.mrb[115].mxu1  ;;  %7740 = vmatmul.mubr.f32.vlgmr.msra.gmra.mrb[120].mxu1 %v16885_v28 }
 0x33f   :  { %v9009_v7 = vadd.f32 %v9008_v57, %v9007_v25  ;;  %10068 = vmatpush1.bf16.msra.mxu0 %v16985_v53  ;;  %7745 = vmatprep.mubr.f32.mxu1 %v16886_v48  ;;  %v16993_v57 = vld [vmem:[#allocation28_spill] sm:$0xff] }
 0x340   :  { %10069 = vmatprep.subr.bf16.mxu0 %v16797_v23 }
 0x341   :  { %v9010_v46 = vpop.f32.mrb[116].mxu1  ;;  %v6901_v3 = vadd.f32 %v9009_v7, %v15093_v63  ;;  %v16994_v7 = vld [vmem:[#allocation123_spill] sm:$0xff] }
 0x342   :  { %v9011_v37 = vpop.f32.mrb[117].mxu1  ;;  %7747 = vmatmul.mubr.f32.gmra.mrb[122].mxu1 %v16966_v30  ;;  %v16995_v53 = vmax.f32 %v16993_v57, %v16994_v7 }
 0x343   :  { %v9012_v14 = vadd.f32 %v9011_v37, %v9010_v46  ;;  %10071 = vmatpush1.bf16.msra.mxu0 %v16986_v39  ;;  %7752 = vmatprep.mubr.f32.mxu1 %v16972_v45 }
 0x344   :  { %10072 = vmatprep.subr.bf16.mxu0 %v16797_v23 }
 0x345   :  { %v9013_v17 = vpop.f32.mrb[118].mxu1  ;;  %v6908_v19 = vadd.f32 %v9012_v14, %v15105_v42 }
 0x346   :  { %v9014_v54 = vpop.f32.mrb[119].mxu1  ;;  %7754 = vmatmul.mubr.f32.gmra.mrb[124].mxu1 %v16973_v2 }
 0x347   :  { %v9015_v41 = vadd.f32 %v9014_v54, %v9013_v17  ;;  %10074 = vmatpush1.bf16.msra.mxu0 %v16937_v22  ;;  %7759 = vmatprep.mubr.f32.mxu1 %v16979_v32 }
 0x348   :  { %10075 = vmatprep.subr.bf16.mxu0 %v16797_v23 }
 0x349   :  { %v8740_v44 = vpop.f32.mrb[88].mxu0  ;;  %v6915_v60 = vadd.f32 %v9015_v41, %v15113_v62 }
 0x34a   :  { %v8741_v63 = vpop.f32.mrb[89].mxu0  ;;  %7761 = vmatmul.mubr.f32.gmra.mrb[126].mxu1 %v16980_v8 }
 0x34b   :  { %v8742_v10 = vadd.f32 %v8741_v63, %v8740_v44  ;;  %10077 = vmatpush1.bf16.msra.mxu0 %v14575_v18  ;;  %v16996_v44 = vld [vmem:[#allocation62_spill] sm:$0xff] }
 0x34d   :  { %v8743_v58 = vpop.f32.mrb[90].mxu0  ;;  %v4961_v4 = vadd.f32 %v8742_v10, %v15122_v33 }
 0x34e   :  { %v8744_v26 = vpop.f32.mrb[91].mxu0  ;;  %5807 = vmatmul.mubr.f32.vlgmr.msra.gmra.mrb[96].mxu0 %v16885_v28 }
 0x34f   :  { %v8745_v22 = vadd.f32 %v8744_v26, %v8743_v58  ;;  %5812 = vmatprep.mubr.f32.mxu0 %v16886_v48 }
 0x351   :  { %v8746_v56 = vpop.f32.mrb[92].mxu0  ;;  %v4968_v23 = vadd.f32 %v8745_v22, %v15131_v24  ;;  %v16988_v24 = vld [vmem:[#allocation23_spill] sm:$0xff] }
 0x352   :  { %v8747_v47 = vpop.f32.mrb[93].mxu0  ;;  %5814 = vmatmul.mubr.f32.gmra.mrb[98].mxu0 %v16966_v30 }
 0x353   :  { %v8748_v5 = vadd.f32 %v8747_v47, %v8746_v56  ;;  %5819 = vmatprep.mubr.f32.mxu0 %v16972_v45 }
 0x355   :  { %v8749_v27 = vpop.f32.mrb[94].mxu0  ;;  %v4975_v18 = vadd.f32 %v8748_v5, %v4850_v12 }
 0x356   :  { %v8750_v21 = vpop.f32.mrb[95].mxu0  ;;  %5821 = vmatmul.mubr.f32.gmra.mrb[100].mxu0 %v16973_v2 }
 0x357   :  { %v8751_v42 = vadd.f32 %v8750_v21, %v8749_v27  ;;  %5826 = vmatprep.mubr.f32.mxu0 %v16979_v32  ;;  %v16987_v32 = vld [vmem:[#allocation154_spill] sm:$0xff] }
 0x358   :  { %v16989_v31 = vmax.f32 %v16987_v32, %v16988_v24 }
 0x359   :  { %v4982_v28 = vadd.f32 %v8751_v42, %v4857_v38 }
 0x35a   :  { %5828 = vmatmul.mubr.f32.gmra.mrb[102].mxu0 %v16980_v8 }
 0x35d   :  { %v7777_v29 = vpop.permute.xlu0 %7776 }
 0x361   :  { %v7787_v37 = vpop.permute.xlu1 %7786 }
 0x364   :  { %v7782_v61 = vpop.permute.xlu0 %7781 }
 0x365   :  { %v7792_v26 = vpop.permute.xlu1 %7791 }
 0x411   :  { %v7741_v48 = vpop.f32.mrb[120].mxu1 }
 0x412   :  { %v10448_v13 = vadd.f32 %v7741_v48, %v6894_v16  ;;  %v7743_v20 = vpop.f32.mrb[121].mxu1 }
 0x415   :  { %v7748_v15 = vpop.f32.mrb[122].mxu1 }
 0x416   :  { %v10449_v51 = vadd.f32 %v7748_v15, %v6901_v3  ;;  %v7750_v30 = vpop.f32.mrb[123].mxu1 }
 0x419   :  { %v7755_v62 = vpop.f32.mrb[124].mxu1 }
 0x41a   :  { %v10450_v0 = vadd.f32 %v7755_v62, %v6908_v19  ;;  %v7757_v45 = vpop.f32.mrb[125].mxu1 }
 0x41d   :  { %v7762_v59 = vpop.f32.mrb[126].mxu1 }
 0x41e   :  { %v10451_v49 = vadd.f32 %v7762_v59, %v6915_v60  ;;  %v7764_v33 = vpop.f32.mrb[127].mxu1  ;;  %v16997_v60 = vld [vmem:[#allocation124_spill] sm:$0xff] }
 0x41f   :  { %v16998_v63 = vmax.f32 %v16996_v44, %v16997_v60 }
 0x421   :  { %v5808_v6 = vpop.f32.mrb[96].mxu0 }
 0x422   :  { %v10444_v2 = vadd.f32 %v5808_v6, %v4961_v4  ;;  %v5810_v55 = vpop.f32.mrb[97].mxu0 }
 0x424   :  { %v5833_v8 = vmax.f32 %v16989_v31, %v10444_v2 }
 0x425   :  { %v5815_v43 = vpop.f32.mrb[98].mxu0 }
 0x426   :  { %v10445_v11 = vadd.f32 %v5815_v43, %v4968_v23  ;;  %v5817_v12 = vpop.f32.mrb[99].mxu0  ;;  %v7766_v36 = vmax.f32 %v5833_v8, %v10448_v13 }
 0x428   :  { %v5834_v9 = vmax.f32 %v16992_v34, %v10445_v11  ;;  %v7794_v38 = vadd.f32 %v7777_v29, %v7766_v36 }
 0x429   :  { %v5822_v40 = vpop.f32.mrb[100].mxu0 }
 0x42a   :  { %v7798_v52 = vmax.f32 %v7794_v38, 0.0  ;;  %v10446_v50 = vadd.f32 %v5822_v40, %v4975_v18  ;;  %v5824_v25 = vpop.f32.mrb[101].mxu0  ;;  %v7767_v16 = vmax.f32 %v5834_v9, %v10449_v51 }
 0x42c   :  { %7802 = vst [vmem:[%s15205_s3] sm:$0xff] %v7798_v52  ;;  %v5835_v46 = vmax.f32 %v16995_v53, %v10446_v50  ;;  %v7795_v3 = vadd.f32 %v7782_v61, %v7767_v16 }
 0x42d   :  { %v5829_v14 = vpop.f32.mrb[102].mxu0 }
 0x42e   :  { %v7768_v39 = vmax.f32 %v5835_v46, %v10450_v0  ;;  %v7799_v17 = vmax.f32 %v7795_v3, 0.0  ;;  %v10447_v19 = vadd.f32 %v5829_v14, %v4982_v28  ;;  %v5831_v54 = vpop.f32.mrb[103].mxu0 }
 0x430   :  { %v7796_v41 = vadd.f32 %v7787_v37, %v7768_v39  ;;  %7803 = vst [vmem:[%s15205_s3 + $0x8] sm:$0xff] %v7799_v17  ;;  %v5836_v10 = vmax.f32 %v16998_v63, %v10447_v19 }
 0x432   :  { %v7800_v58 = vmax.f32 %v7796_v41, 0.0  ;;  %v7769_v4 = vmax.f32 %v5836_v10, %v10451_v49 }
 0x434   :  { %7804 = vst [vmem:[%s15205_s3 + $0x10] sm:$0xff] %v7800_v58  ;;  %v7797_v22 = vadd.f32 %v7792_v26, %v7769_v4 }
 0x436   :  { %v7801_v56 = vmax.f32 %v7797_v22, 0.0 }
 0x438   :  { %7805 = vst [vmem:[%s15205_s3 + $0x18] sm:$0xff] %v7801_v56 }

</bundles_post_ra>
